<compile_context>
chip_gen: v6e
topology: v6e:2x2x1
jax: 0.10.0
libtpu: 0.0.40
codegen_flags: <defaults>
</compile_context>

<pallas_src>
import functools

import numpy as np
import jax
import jax.numpy as jnp
from jax.experimental import pallas as pl
from jax.experimental.pallas import tpu as pltpu


# ---------------------------------------------------------------------------
# small helpers
# ---------------------------------------------------------------------------
def _round_up(x, m):
    return (x + m - 1) // m * m


def _tree_max(vals):
    """Balanced-tree max reduction of a list of equal-shape arrays."""
    vals = list(vals)
    while len(vals) > 1:
        nxt = [jnp.maximum(vals[i], vals[i + 1]) for i in range(0, len(vals) - 1, 2)]
        if len(vals) % 2:
            nxt.append(vals[-1])
        vals = nxt
    return vals[0]


# ---------------------------------------------------------------------------
# Pallas kernels
# ---------------------------------------------------------------------------
def _matmul_bias_relu_kernel(a_ref, w_ref, b_ref, o_ref):
    acc = jnp.dot(a_ref[...], w_ref[...], preferred_element_type=jnp.float32)
    o_ref[...] = jnp.maximum(acc + b_ref[...], 0.0).astype(o_ref.dtype)


def matmul_bias_relu(a, w, b, tm=512):
    """relu(a @ w + b), row-tiled over M; handles M not divisible by the tile."""
    M, K = a.shape
    _, cout = w.shape
    tm = min(tm, _round_up(M, 8))          # tm is always a multiple of 8
    Mp = _round_up(M, tm)
    if Mp != M:
        a = jnp.pad(a, ((0, Mp - M), (0, 0)))
    out = pl.pallas_call(
        _matmul_bias_relu_kernel,
        out_shape=jax.ShapeDtypeStruct((Mp, cout), jnp.float32),
        grid=(Mp // tm,),
        in_specs=[
            pl.BlockSpec((tm, K), lambda i: (i, 0)),
            pl.BlockSpec((K, cout), lambda i: (0, 0)),
            pl.BlockSpec((1, cout), lambda i: (0, 0)),
        ],
        out_specs=pl.BlockSpec((tm, cout), lambda i: (i, 0)),
        compiler_params=pltpu.CompilerParams(dimension_semantics=("parallel",)),
    )(a, w, b.reshape(1, cout))
    return out[:M] if Mp != M else out


def _conv_implicit_gemm_kernel(x_ref, w_ref, b_ref, o_ref, acc_ref, *, k, Wp, HWp):
    """Implicit-GEMM conv: one padded depth plane x one depth-offset of the filter.

    x_ref : (Hp*Wp + k - 1, Cin)  flattened zero-padded input plane at depth d+kd
    w_ref : (k, k, Cin, Cout)     filter slab for depth offset kd
    b_ref : (1, Cout)
    o_ref : (H*Wp, Cout)          Wp-strided output rows (junk cols dropped outside)
    acc_ref: (H*Wp, Cout) f32     accumulator, live across the kd grid axis
    """
    kd = pl.program_id(2)

    @pl.when(kd == 0)
    def _init():
        acc_ref[...] = jnp.zeros_like(acc_ref)

    acc = acc_ref[...]
    for kh in range(k):
        for kw in range(k):
            off = kh * Wp + kw
            a = x_ref[off:off + HWp, :]          # contiguous row-shifted slice
            acc = acc + jnp.dot(a, w_ref[kh, kw],
                                preferred_element_type=jnp.float32)
    acc_ref[...] = acc

    @pl.when(kd == k - 1)
    def _finalize():                              # bias + ReLU folded in
        o_ref[...] = jnp.maximum(acc + b_ref[...], 0.0)


def _maxpool_conv1x1_kernel(x_ref, w_ref, b_ref, o_ref, acc_ref, *, Wp, HWp):
    """3x3x3 stride-1 maxpool (one depth offset per grid step) fused with the
    following 1x1 conv + ReLU (p4_2).

    x_ref : (Hp*Wp + 2, C)  flattened -inf-padded input plane at depth d+kd
    w_ref : (C, Cout)       p4_2 weight
    b_ref : (1, Cout)
    o_ref : (H*Wp, Cout)
    acc_ref: (H*Wp, C) f32  running max across the kd grid axis
    """
    kd = pl.program_id(2)

    @pl.when(kd == 0)
    def _init():
        acc_ref[...] = jnp.full_like(acc_ref, -jnp.inf)

    windows = [x_ref[kh * Wp + kw: kh * Wp + kw + HWp, :]
               for kh in range(3) for kw in range(3)]
    acc_ref[...] = jnp.maximum(acc_ref[...], _tree_max(windows))

    @pl.when(kd == 2)
    def _finalize():
        # junk (dropped) columns can hold -inf; clamp so the dot stays finite
        pooled = jnp.maximum(acc_ref[...], jnp.float32(-3e38))
        out = jnp.dot(pooled, w_ref[...], preferred_element_type=jnp.float32)
        o_ref[...] = jnp.maximum(out + b_ref[...], 0.0)


# ---------------------------------------------------------------------------
# Wrappers (channels-last, NDHWC)
# ---------------------------------------------------------------------------
def conv3d_relu_ndhwc(x, w, b):
    """relu(Conv3d(x) + b), stride 1, 'same' padding.

    x: (N, D, H, W, Cin)   w: (Cout, Cin, k, k, k) (PyTorch layout)   b: (Cout,)
    """
    N, D, H, W, Cin = x.shape
    Cout, _, k, _, _ = w.shape
    if k == 1:
        y = matmul_bias_relu(x.reshape(-1, Cin), w.reshape(Cout, Cin).T, b)
        return y.reshape(N, D, H, W, Cout)

    p = (k - 1) // 2
    Dp, Hp, Wp = D + 2 * p, H + 2 * p, W + 2 * p
    HWp = H * Wp
    L = Hp * Wp + (k - 1)

    xp = jnp.pad(x, ((0, 0), (p, p), (p, p), (p, p), (0, 0)))
    xf = jnp.pad(xp.reshape(N, Dp, Hp * Wp, Cin),
                 ((0, 0), (0, 0), (0, k - 1), (0, 0)))
    wt = jnp.transpose(w, (2, 3, 4, 1, 0))                  # (k, k, k, Cin, Cout)

    out = pl.pallas_call(
        functools.partial(_conv_implicit_gemm_kernel, k=k, Wp=Wp, HWp=HWp),
        out_shape=jax.ShapeDtypeStruct((N, D, HWp, Cout), jnp.float32),
        grid=(N, D, k),
        in_specs=[
            pl.BlockSpec((None, None, L, Cin), lambda n, d, kd: (n, d + kd, 0, 0)),
            pl.BlockSpec((None, k, k, Cin, Cout),
                         lambda n, d, kd: (kd, 0, 0, 0, 0)),
            pl.BlockSpec((1, Cout), lambda n, d, kd: (0, 0)),
        ],
        out_specs=pl.BlockSpec((None, None, HWp, Cout),
                               lambda n, d, kd: (n, d, 0, 0)),
        scratch_shapes=[pltpu.VMEM((HWp, Cout), jnp.float32)],
        compiler_params=pltpu.CompilerParams(
            dimension_semantics=("parallel", "parallel", "arbitrary")),
    )(xf, wt, b.reshape(1, Cout))
    # drop the Wp-strided junk columns (w >= W)
    return out.reshape(N, D, H, Wp, Cout)[:, :, :, :W, :]


def maxpool3_conv1x1_relu(x, w, b):
    """relu(Conv1x1(MaxPool3d(k=3, s=1, pad=1)(x)) + b), fused in one kernel.

    x: (N, D, H, W, C)   w: (Cout, C, 1, 1, 1)   b: (Cout,)
    """
    N, D, H, W, C = x.shape
    Cout = w.shape[0]
    Dp, Hp, Wp = D + 2, H + 2, W + 2
    HWp = H * Wp
    L = Hp * Wp + 2

    xp = jnp.pad(x, ((0, 0), (1, 1), (1, 1), (1, 1), (0, 0)),
                 constant_values=-jnp.inf)
    xf = jnp.pad(xp.reshape(N, Dp, Hp * Wp, C), ((0, 0), (0, 0), (0, 2), (0, 0)),
                 constant_values=-jnp.inf)
    wm = w.reshape(Cout, C).T                                # (C, Cout)

    out = pl.pallas_call(
        functools.partial(_maxpool_conv1x1_kernel, Wp=Wp, HWp=HWp),
        out_shape=jax.ShapeDtypeStruct((N, D, HWp, Cout), jnp.float32),
        grid=(N, D, 3),
        in_specs=[
            pl.BlockSpec((None, None, L, C), lambda n, d, kd: (n, d + kd, 0, 0)),
            pl.BlockSpec((C, Cout), lambda n, d, kd: (0, 0)),
            pl.BlockSpec((1, Cout), lambda n, d, kd: (0, 0)),
        ],
        out_specs=pl.BlockSpec((None, None, HWp, Cout),
                               lambda n, d, kd: (n, d, 0, 0)),
        scratch_shapes=[pltpu.VMEM((HWp, C), jnp.float32)],
        compiler_params=pltpu.CompilerParams(
            dimension_semantics=("parallel", "parallel", "arbitrary")),
    )(xf, wm, b.reshape(1, Cout))
    return out.reshape(N, D, H, Wp, Cout)[:, :, :, :W, :]


def fused_1x1_convs_relu(x, branch_params):
    """Several 1x1 conv+ReLU branches sharing one input -> ONE lane-dense matmul."""
    N, D, H, W, Cin = x.shape
    ws, bs, couts = [], [], []
    for w, b in branch_params:
        couts.append(w.shape[0])
        ws.append(w.reshape(w.shape[0], Cin))
        bs.append(b)
    w_cat = jnp.concatenate(ws, axis=0).T                    # (Cin, sum Cout)
    b_cat = jnp.concatenate(bs, axis=0)
    y = matmul_bias_relu(x.reshape(-1, Cin), w_cat, b_cat)
    y = y.reshape(N, D, H, W, -1)
    outs, off = [], 0
    for c in couts:
        outs.append(y[..., off:off + c])
        off += c
    return outs


# ---------------------------------------------------------------------------
# InceptionBlock forward
# ---------------------------------------------------------------------------
def inception_block(x, params):
    """x: (N, Cin, D, H, W) NCDHW (PyTorch layout) -> (N, Ctot, D, H, W)."""
    xl = jnp.transpose(x, (0, 2, 3, 4, 1))                   # -> NDHWC, once
    p1, p2_1, p3_1, p5_1 = fused_1x1_convs_relu(
        xl, [params['p1_1'], params['p2_1'], params['p3_1'], params['p5_1']])
    p2 = conv3d_relu_ndhwc(p2_1, *params['p2_2'])
    p3 = conv3d_relu_ndhwc(p3_1, *params['p3_2'])
    p4 = maxpool3_conv1x1_relu(xl, *params['p4_2'])
    p5 = conv3d_relu_ndhwc(p5_1, *params['p5_2'])
    out = jnp.concatenate([p1, p2, p3, p4, p5], axis=-1)     # channels-last concat
    return jnp.transpose(out, (0, 4, 1, 2, 3))               # back to NCDHW, once


def init_params(key, in_channels, c1, c2, c3, c4, c5):
    def conv_init(k, cout, cin, ks):
        kw, kb = jax.random.split(k)
        w = jax.random.normal(kw, (cout, cin, ks, ks, ks), jnp.float32) * 0.1
        b = jax.random.normal(kb, (cout,), jnp.float32) * 0.1
        return w, b

    keys = jax.random.split(key, 8)
    return {
        'p1_1': conv_init(keys[0], c1, in_channels, 1),
        'p2_1': conv_init(keys[1], c2[0], in_channels, 1),
        'p2_2': conv_init(keys[2], c2[1], c2[0], 3),
        'p3_1': conv_init(keys[3], c3[0], in_channels, 1),
        'p3_2': conv_init(keys[4], c3[1], c3[0], 5),
        'p4_2': conv_init(keys[5], c4, in_channels, 1),
        'p5_1': conv_init(keys[6], c5[0], in_channels, 1),
        'p5_2': conv_init(keys[7], c5[1], c5[0], 7),
    }


# ---------------------------------------------------------------------------
# Pure-JAX reference (correctness check only)
# ---------------------------------------------------------------------------
def _ref_conv_relu(x, w, b, pad):
    out = jax.lax.conv_general_dilated(
        x, w, window_strides=(1, 1, 1), padding=[(pad, pad)] * 3,
        dimension_numbers=('NCDHW', 'OIDHW', 'NCDHW'),
        precision=jax.lax.Precision.HIGHEST)
    return jax.nn.relu(out + b.reshape(1, -1, 1, 1, 1))


def _ref_maxpool(x):
    return jax.lax.reduce_window(
        x, -jnp.inf, jax.lax.max,
        window_dimensions=(1, 1, 3, 3, 3), window_strides=(1, 1, 1, 1, 1),
        padding=[(0, 0), (0, 0), (1, 1), (1, 1), (1, 1)])


def _ref_inception(x, params):
    p1 = _ref_conv_relu(x, *params['p1_1'], pad=0)
    p2 = _ref_conv_relu(_ref_conv_relu(x, *params['p2_1'], pad=0),
                        *params['p2_2'], pad=1)
    p3 = _ref_conv_relu(_ref_conv_relu(x, *params['p3_1'], pad=0),
                        *params['p3_2'], pad=2)
    p4 = _ref_conv_relu(_ref_maxpool(x), *params['p4_2'], pad=0)
    p5 = _ref_conv_relu(_ref_conv_relu(x, *params['p5_1'], pad=0),
                        *params['p5_2'], pad=3)
    return jnp.concatenate([p1, p2, p3, p4, p5], axis=1)


# ---------------------------------------------------------------------------
if __name__ == "__main__":
    key = jax.random.PRNGKey(0)
    kx, kp = jax.random.split(key)

    N, Cin, D, H, W = 2, 4, 8, 8, 8
    c1, c2, c3, c4, c5 = 4, (4, 8), (4, 4), 4, (4, 4)

    x = jax.random.normal(kx, (N, Cin, D, H, W), jnp.float32)
    params = init_params(kp, Cin, c1, c2, c3, c4, c5)

    out = jax.jit(inception_block)(x, params)
    out = jax.block_until_ready(out)

    assert out.shape == (N, c1 + c2[1] + c3[1] + c4 + c5[1], D, H, W)

    ref = jax.block_until_ready(_ref_inception(x, params))
    np.testing.assert_allclose(np.asarray(out), np.asarray(ref),
                               rtol=2e-3, atol=2e-3)

    print("KERNEL_OK")
</pallas_src>

<mosaic_0001>
module attributes {stable_mosaic.version = 11 : i64} {
  func.func @_matmul_bias_relu_kernel(%arg0: i32, %arg1: memref<512x4xf32, #tpu.memory_space<vmem>>, %arg2: memref<4x16xf32, #tpu.memory_space<vmem>>, %arg3: memref<1x16xf32, #tpu.memory_space<vmem>>, %arg4: memref<512x16xf32, #tpu.memory_space<vmem>>) attributes {dimension_semantics = [#tpu.dimension_semantics<parallel>], iteration_bounds = array<i64: 2>, scalar_prefetch = 0 : i64, scratch_operands = 0 : i64, tpu.core_type = #tpu.core_type<tc>, window_params = [{transform_indices = @transform_0, window_bounds = array<i64: 512, 4>}, {pipeline_mode = #tpu.pipeline_mode<synchronous>, transform_indices = @transform_1, window_bounds = array<i64: 4, 16>}, {pipeline_mode = #tpu.pipeline_mode<synchronous>, transform_indices = @transform_2, window_bounds = array<i64: 1, 16>}, {transform_indices = @transform_3, window_bounds = array<i64: 512, 16>}]} {
    %c0 = arith.constant 0 : index
    %c0_0 = arith.constant 0 : index
    %0 = vector.load %arg1[%c0, %c0_0] : memref<512x4xf32, #tpu.memory_space<vmem>>, vector<512x4xf32>
    %c0_1 = arith.constant 0 : index
    %c0_2 = arith.constant 0 : index
    %1 = vector.load %arg2[%c0_1, %c0_2] : memref<4x16xf32, #tpu.memory_space<vmem>>, vector<4x16xf32>
    %cst = arith.constant dense<0.000000e+00> : vector<512x16xf32>
    %2 = tpu.matmul %0, %1, %cst {dimension_numbers = #tpu.dot_dimension_numbers<[1], [0], [0], [1], [0, 0, 1, 1], [], []>} : vector<512x4xf32>, vector<4x16xf32>, vector<512x16xf32> -> vector<512x16xf32>
    %c0_3 = arith.constant 0 : index
    %c0_4 = arith.constant 0 : index
    %3 = vector.load %arg3[%c0_3, %c0_4] : memref<1x16xf32, #tpu.memory_space<vmem>>, vector<1x16xf32>
    %4 = vector.broadcast %3 : vector<1x16xf32> to vector<512x16xf32>
    %5 = arith.addf %2, %4 : vector<512x16xf32>
    %cst_5 = arith.constant 0.000000e+00 : f32
    %6 = vector.broadcast %cst_5 : f32 to vector<512x16xf32>
    %7 = arith.maximumf %5, %6 : vector<512x16xf32>
    %c0_6 = arith.constant 0 : index
    %c0_7 = arith.constant 0 : index
    %8 = vector.load %arg4[%c0_6, %c0_7] : memref<512x16xf32, #tpu.memory_space<vmem>>, vector<512x16xf32>
    tpu.vector_store %arg4[%c0_6, %c0_7], %7 {strides = array<i32>} : memref<512x16xf32, #tpu.memory_space<vmem>>, vector<512x16xf32>,
    return
  }
  func.func @transform_0(%arg0: i32) -> (i32, i32) {
    %c0_i32 = arith.constant 0 : i32
    %c0_i32_0 = arith.constant 0 : i32
    return %arg0, %c0_i32 : i32, i32
  }
  func.func @transform_1(%arg0: i32) -> (i32, i32) {
    %c0_i32 = arith.constant 0 : i32
    %c0_i32_0 = arith.constant 0 : i32
    %c0_i32_1 = arith.constant 0 : i32
    return %c0_i32, %c0_i32_0 : i32, i32
  }
  func.func @transform_2(%arg0: i32) -> (i32, i32) {
    %c0_i32 = arith.constant 0 : i32
    %c0_i32_0 = arith.constant 0 : i32
    %c0_i32_1 = arith.constant 0 : i32
    return %c0_i32, %c0_i32_0 : i32, i32
  }
  func.func @transform_3(%arg0: i32) -> (i32, i32) {
    %c0_i32 = arith.constant 0 : i32
    %c0_i32_0 = arith.constant 0 : i32
    return %arg0, %c0_i32 : i32, i32
  }
}

module attributes {stable_mosaic.version = 11 : i64} {
  func.func @_conv_implicit_gemm_kernel(%arg0: i32, %arg1: i32, %arg2: i32, %arg3: memref<1x1x202x4xf32, #tpu.memory_space<vmem>>, %arg4: memref<1x7x7x4x4xf32, #tpu.memory_space<vmem>>, %arg5: memref<1x4xf32, #tpu.memory_space<vmem>>, %arg6: memref<1x1x112x4xf32, #tpu.memory_space<vmem>>, %arg7: memref<112x4xf32, #tpu.memory_space<vmem>>) attributes {dimension_semantics = [#tpu.dimension_semantics<parallel>, #tpu.dimension_semantics<parallel>, #tpu.dimension_semantics<arbitrary>], iteration_bounds = array<i64: 2, 8, 7>, scalar_prefetch = 0 : i64, scratch_operands = 1 : i64, tpu.core_type = #tpu.core_type<tc>, window_params = [{transform_indices = @transform_0, window_bounds = array<i64: 1, 1, 202, 4>}, {transform_indices = @transform_1, window_bounds = array<i64: 1, 7, 7, 4, 4>}, {pipeline_mode = #tpu.pipeline_mode<synchronous>, transform_indices = @transform_2, window_bounds = array<i64: 1, 4>}, {transform_indices = @transform_3, window_bounds = array<i64: 1, 1, 112, 4>}]} {
    %c0_i32 = arith.constant 0 : i32
    %0 = arith.cmpi eq, %arg2, %c0_i32 : i32
    %1 = arith.extui %0 : i1 to i32
    %c0_i32_0 = arith.constant 0 : i32
    %2 = arith.cmpi ne, %1, %c0_i32_0 : i32
    scf.if %2 {
      %cst_446 = arith.constant 0.000000e+00 : f32
      %302 = vector.broadcast %cst_446 : f32 to vector<112x4xf32>
      %c0_447 = arith.constant 0 : index
      %c0_448 = arith.constant 0 : index
      %303 = vector.load %arg7[%c0_447, %c0_448] : memref<112x4xf32, #tpu.memory_space<vmem>>, vector<112x4xf32>
      tpu.vector_store %arg7[%c0_447, %c0_448], %302 {strides = array<i32>} : memref<112x4xf32, #tpu.memory_space<vmem>>, vector<112x4xf32>,
    } else {
    }
    %c0 = arith.constant 0 : index
    %c0_1 = arith.constant 0 : index
    %3 = vector.load %arg7[%c0, %c0_1] : memref<112x4xf32, #tpu.memory_space<vmem>>, vector<112x4xf32>
    %c0_2 = arith.constant 0 : index
    %c0_3 = arith.constant 0 : index
    %c0_4 = arith.constant 0 : index
    %c0_5 = arith.constant 0 : index
    %4 = vector.load %arg3[%c0_2, %c0_3, %c0_4, %c0_5] : memref<1x1x202x4xf32, #tpu.memory_space<vmem>>, vector<1x1x112x4xf32>
    %5 = vector.shape_cast %4 : vector<1x1x112x4xf32> to vector<112x4xf32>
    %c0_6 = arith.constant 0 : index
    %c0_7 = arith.constant 0 : index
    %c0_8 = arith.constant 0 : index
    %c0_9 = arith.constant 0 : index
    %c0_10 = arith.constant 0 : index
    %6 = vector.load %arg4[%c0_6, %c0_7, %c0_8, %c0_9, %c0_10] : memref<1x7x7x4x4xf32, #tpu.memory_space<vmem>>, vector<1x1x1x4x4xf32>
    %7 = vector.shape_cast %6 : vector<1x1x1x4x4xf32> to vector<4x4xf32>
    %cst = arith.constant dense<0.000000e+00> : vector<112x4xf32>
    %8 = tpu.matmul %5, %7, %cst {dimension_numbers = #tpu.dot_dimension_numbers<[1], [0], [0], [1], [0, 0, 1, 1], [], []>} : vector<112x4xf32>, vector<4x4xf32>, vector<112x4xf32> -> vector<112x4xf32>
    %9 = arith.addf %3, %8 : vector<112x4xf32>
    %c0_11 = arith.constant 0 : index
    %c0_12 = arith.constant 0 : index
    %c1 = arith.constant 1 : index
    %c0_13 = arith.constant 0 : index
    %10 = vector.load %arg3[%c0_11, %c0_12, %c1, %c0_13] : memref<1x1x202x4xf32, #tpu.memory_space<vmem>>, vector<1x1x112x4xf32>
    %11 = vector.shape_cast %10 : vector<1x1x112x4xf32> to vector<112x4xf32>
    %c0_14 = arith.constant 0 : index
    %c0_15 = arith.constant 0 : index
    %c1_16 = arith.constant 1 : index
    %c0_17 = arith.constant 0 : index
    %c0_18 = arith.constant 0 : index
    %12 = vector.load %arg4[%c0_14, %c0_15, %c1_16, %c0_17, %c0_18] : memref<1x7x7x4x4xf32, #tpu.memory_space<vmem>>, vector<1x1x1x4x4xf32>
    %13 = vector.shape_cast %12 : vector<1x1x1x4x4xf32> to vector<4x4xf32>
    %cst_19 = arith.constant dense<0.000000e+00> : vector<112x4xf32>
    %14 = tpu.matmul %11, %13, %cst_19 {dimension_numbers = #tpu.dot_dimension_numbers<[1], [0], [0], [1], [0, 0, 1, 1], [], []>} : vector<112x4xf32>, vector<4x4xf32>, vector<112x4xf32> -> vector<112x4xf32>
    %15 = arith.addf %9, %14 : vector<112x4xf32>
    %c0_20 = arith.constant 0 : index
    %c0_21 = arith.constant 0 : index
    %c2 = arith.constant 2 : index
    %c0_22 = arith.constant 0 : index
    %16 = vector.load %arg3[%c0_20, %c0_21, %c2, %c0_22] : memref<1x1x202x4xf32, #tpu.memory_space<vmem>>, vector<1x1x112x4xf32>
    %17 = vector.shape_cast %16 : vector<1x1x112x4xf32> to vector<112x4xf32>
    %c0_23 = arith.constant 0 : index
    %c0_24 = arith.constant 0 : index
    %c2_25 = arith.constant 2 : index
    %c0_26 = arith.constant 0 : index
    %c0_27 = arith.constant 0 : index
    %18 = vector.load %arg4[%c0_23, %c0_24, %c2_25, %c0_26, %c0_27] : memref<1x7x7x4x4xf32, #tpu.memory_space<vmem>>, vector<1x1x1x4x4xf32>
    %19 = vector.shape_cast %18 : vector<1x1x1x4x4xf32> to vector<4x4xf32>
    %cst_28 = arith.constant dense<0.000000e+00> : vector<112x4xf32>
    %20 = tpu.matmul %17, %19, %cst_28 {dimension_numbers = #tpu.dot_dimension_numbers<[1], [0], [0], [1], [0, 0, 1, 1], [], []>} : vector<112x4xf32>, vector<4x4xf32>, vector<112x4xf32> -> vector<112x4xf32>
    %21 = arith.addf %15, %20 : vector<112x4xf32>
    %c0_29 = arith.constant 0 : index
    %c0_30 = arith.constant 0 : index
    %c3 = arith.constant 3 : index
    %c0_31 = arith.constant 0 : index
    %22 = vector.load %arg3[%c0_29, %c0_30, %c3, %c0_31] : memref<1x1x202x4xf32, #tpu.memory_space<vmem>>, vector<1x1x112x4xf32>
    %23 = vector.shape_cast %22 : vector<1x1x112x4xf32> to vector<112x4xf32>
    %c0_32 = arith.constant 0 : index
    %c0_33 = arith.constant 0 : index
    %c3_34 = arith.constant 3 : index
    %c0_35 = arith.constant 0 : index
    %c0_36 = arith.constant 0 : index
    %24 = vector.load %arg4[%c0_32, %c0_33, %c3_34, %c0_35, %c0_36] : memref<1x7x7x4x4xf32, #tpu.memory_space<vmem>>, vector<1x1x1x4x4xf32>
    %25 = vector.shape_cast %24 : vector<1x1x1x4x4xf32> to vector<4x4xf32>
    %cst_37 = arith.constant dense<0.000000e+00> : vector<112x4xf32>
    %26 = tpu.matmul %23, %25, %cst_37 {dimension_numbers = #tpu.dot_dimension_numbers<[1], [0], [0], [1], [0, 0, 1, 1], [], []>} : vector<112x4xf32>, vector<4x4xf32>, vector<112x4xf32> -> vector<112x4xf32>
    %27 = arith.addf %21, %26 : vector<112x4xf32>
    %c0_38 = arith.constant 0 : index
    %c0_39 = arith.constant 0 : index
    %c4 = arith.constant 4 : index
    %c0_40 = arith.constant 0 : index
    %28 = vector.load %arg3[%c0_38, %c0_39, %c4, %c0_40] : memref<1x1x202x4xf32, #tpu.memory_space<vmem>>, vector<1x1x112x4xf32>
    %29 = vector.shape_cast %28 : vector<1x1x112x4xf32> to vector<112x4xf32>
    %c0_41 = arith.constant 0 : index
    %c0_42 = arith.constant 0 : index
    %c4_43 = arith.constant 4 : index
    %c0_44 = arith.constant 0 : index
    %c0_45 = arith.constant 0 : index
    %30 = vector.load %arg4[%c0_41, %c0_42, %c4_43, %c0_44, %c0_45] : memref<1x7x7x4x4xf32, #tpu.memory_space<vmem>>, vector<1x1x1x4x4xf32>
    %31 = vector.shape_cast %30 : vector<1x1x1x4x4xf32> to vector<4x4xf32>
    %cst_46 = arith.constant dense<0.000000e+00> : vector<112x4xf32>
    %32 = tpu.matmul %29, %31, %cst_46 {dimension_numbers = #tpu.dot_dimension_numbers<[1], [0], [0], [1], [0, 0, 1, 1], [], []>} : vector<112x4xf32>, vector<4x4xf32>, vector<112x4xf32> -> vector<112x4xf32>
    %33 = arith.addf %27, %32 : vector<112x4xf32>
    %c0_47 = arith.constant 0 : index
    %c0_48 = arith.constant 0 : index
    %c5 = arith.constant 5 : index
    %c0_49 = arith.constant 0 : index
    %34 = vector.load %arg3[%c0_47, %c0_48, %c5, %c0_49] : memref<1x1x202x4xf32, #tpu.memory_space<vmem>>, vector<1x1x112x4xf32>
    %35 = vector.shape_cast %34 : vector<1x1x112x4xf32> to vector<112x4xf32>
    %c0_50 = arith.constant 0 : index
    %c0_51 = arith.constant 0 : index
    %c5_52 = arith.constant 5 : index
    %c0_53 = arith.constant 0 : index
    %c0_54 = arith.constant 0 : index
    %36 = vector.load %arg4[%c0_50, %c0_51, %c5_52, %c0_53, %c0_54] : memref<1x7x7x4x4xf32, #tpu.memory_space<vmem>>, vector<1x1x1x4x4xf32>
    %37 = vector.shape_cast %36 : vector<1x1x1x4x4xf32> to vector<4x4xf32>
    %cst_55 = arith.constant dense<0.000000e+00> : vector<112x4xf32>
    %38 = tpu.matmul %35, %37, %cst_55 {dimension_numbers = #tpu.dot_dimension_numbers<[1], [0], [0], [1], [0, 0, 1, 1], [], []>} : vector<112x4xf32>, vector<4x4xf32>, vector<112x4xf32> -> vector<112x4xf32>
    %39 = arith.addf %33, %38 : vector<112x4xf32>
    %c0_56 = arith.constant 0 : index
    %c0_57 = arith.constant 0 : index
    %c6 = arith.constant 6 : index
    %c0_58 = arith.constant 0 : index
    %40 = vector.load %arg3[%c0_56, %c0_57, %c6, %c0_58] : memref<1x1x202x4xf32, #tpu.memory_space<vmem>>, vector<1x1x112x4xf32>
    %41 = vector.shape_cast %40 : vector<1x1x112x4xf32> to vector<112x4xf32>
    %c0_59 = arith.constant 0 : index
    %c0_60 = arith.constant 0 : index
    %c6_61 = arith.constant 6 : index
    %c0_62 = arith.constant 0 : index
    %c0_63 = arith.constant 0 : index
    %42 = vector.load %arg4[%c0_59, %c0_60, %c6_61, %c0_62, %c0_63] : memref<1x7x7x4x4xf32, #tpu.memory_space<vmem>>, vector<1x1x1x4x4xf32>
    %43 = vector.shape_cast %42 : vector<1x1x1x4x4xf32> to vector<4x4xf32>
    %cst_64 = arith.constant dense<0.000000e+00> : vector<112x4xf32>
    %44 = tpu.matmul %41, %43, %cst_64 {dimension_numbers = #tpu.dot_dimension_numbers<[1], [0], [0], [1], [0, 0, 1, 1], [], []>} : vector<112x4xf32>, vector<4x4xf32>, vector<112x4xf32> -> vector<112x4xf32>
    %45 = arith.addf %39, %44 : vector<112x4xf32>
    %c0_65 = arith.constant 0 : index
    %c0_66 = arith.constant 0 : index
    %c14 = arith.constant 14 : index
    %c0_67 = arith.constant 0 : index
    %46 = vector.load %arg3[%c0_65, %c0_66, %c14, %c0_67] : memref<1x1x202x4xf32, #tpu.memory_space<vmem>>, vector<1x1x112x4xf32>
    %47 = vector.shape_cast %46 : vector<1x1x112x4xf32> to vector<112x4xf32>
    %c0_68 = arith.constant 0 : index
    %c1_69 = arith.constant 1 : index
    %c0_70 = arith.constant 0 : index
    %c0_71 = arith.constant 0 : index
    %c0_72 = arith.constant 0 : index
    %48 = vector.load %arg4[%c0_68, %c1_69, %c0_70, %c0_71, %c0_72] : memref<1x7x7x4x4xf32, #tpu.memory_space<vmem>>, vector<1x1x1x4x4xf32>
    %49 = vector.shape_cast %48 : vector<1x1x1x4x4xf32> to vector<4x4xf32>
    %cst_73 = arith.constant dense<0.000000e+00> : vector<112x4xf32>
    %50 = tpu.matmul %47, %49, %cst_73 {dimension_numbers = #tpu.dot_dimension_numbers<[1], [0], [0], [1], [0, 0, 1, 1], [], []>} : vector<112x4xf32>, vector<4x4xf32>, vector<112x4xf32> -> vector<112x4xf32>
    %51 = arith.addf %45, %50 : vector<112x4xf32>
    %c0_74 = arith.constant 0 : index
    %c0_75 = arith.constant 0 : index
    %c15 = arith.constant 15 : index
    %c0_76 = arith.constant 0 : index
    %52 = vector.load %arg3[%c0_74, %c0_75, %c15, %c0_76] : memref<1x1x202x4xf32, #tpu.memory_space<vmem>>, vector<1x1x112x4xf32>
    %53 = vector.shape_cast %52 : vector<1x1x112x4xf32> to vector<112x4xf32>
    %c0_77 = arith.constant 0 : index
    %c1_78 = arith.constant 1 : index
    %c1_79 = arith.constant 1 : index
    %c0_80 = arith.constant 0 : index
    %c0_81 = arith.constant 0 : index
    %54 = vector.load %arg4[%c0_77, %c1_78, %c1_79, %c0_80, %c0_81] : memref<1x7x7x4x4xf32, #tpu.memory_space<vmem>>, vector<1x1x1x4x4xf32>
    %55 = vector.shape_cast %54 : vector<1x1x1x4x4xf32> to vector<4x4xf32>
    %cst_82 = arith.constant dense<0.000000e+00> : vector<112x4xf32>
    %56 = tpu.matmul %53, %55, %cst_82 {dimension_numbers = #tpu.dot_dimension_numbers<[1], [0], [0], [1], [0, 0, 1, 1], [], []>} : vector<112x4xf32>, vector<4x4xf32>, vector<112x4xf32> -> vector<112x4xf32>
    %57 = arith.addf %51, %56 : vector<112x4xf32>
    %c0_83 = arith.constant 0 : index
    %c0_84 = arith.constant 0 : index
    %c16 = arith.constant 16 : index
    %c0_85 = arith.constant 0 : index
    %58 = vector.load %arg3[%c0_83, %c0_84, %c16, %c0_85] : memref<1x1x202x4xf32, #tpu.memory_space<vmem>>, vector<1x1x112x4xf32>
    %59 = vector.shape_cast %58 : vector<1x1x112x4xf32> to vector<112x4xf32>
    %c0_86 = arith.constant 0 : index
    %c1_87 = arith.constant 1 : index
    %c2_88 = arith.constant 2 : index
    %c0_89 = arith.constant 0 : index
    %c0_90 = arith.constant 0 : index
    %60 = vector.load %arg4[%c0_86, %c1_87, %c2_88, %c0_89, %c0_90] : memref<1x7x7x4x4xf32, #tpu.memory_space<vmem>>, vector<1x1x1x4x4xf32>
    %61 = vector.shape_cast %60 : vector<1x1x1x4x4xf32> to vector<4x4xf32>
    %cst_91 = arith.constant dense<0.000000e+00> : vector<112x4xf32>
    %62 = tpu.matmul %59, %61, %cst_91 {dimension_numbers = #tpu.dot_dimension_numbers<[1], [0], [0], [1], [0, 0, 1, 1], [], []>} : vector<112x4xf32>, vector<4x4xf32>, vector<112x4xf32> -> vector<112x4xf32>
    %63 = arith.addf %57, %62 : vector<112x4xf32>
    %c0_92 = arith.constant 0 : index
    %c0_93 = arith.constant 0 : index
    %c17 = arith.constant 17 : index
    %c0_94 = arith.constant 0 : index
    %64 = vector.load %arg3[%c0_92, %c0_93, %c17, %c0_94] : memref<1x1x202x4xf32, #tpu.memory_space<vmem>>, vector<1x1x112x4xf32>
    %65 = vector.shape_cast %64 : vector<1x1x112x4xf32> to vector<112x4xf32>
    %c0_95 = arith.constant 0 : index
    %c1_96 = arith.constant 1 : index
    %c3_97 = arith.constant 3 : index
    %c0_98 = arith.constant 0 : index
    %c0_99 = arith.constant 0 : index
    %66 = vector.load %arg4[%c0_95, %c1_96, %c3_97, %c0_98, %c0_99] : memref<1x7x7x4x4xf32, #tpu.memory_space<vmem>>, vector<1x1x1x4x4xf32>
    %67 = vector.shape_cast %66 : vector<1x1x1x4x4xf32> to vector<4x4xf32>
    %cst_100 = arith.constant dense<0.000000e+00> : vector<112x4xf32>
    %68 = tpu.matmul %65, %67, %cst_100 {dimension_numbers = #tpu.dot_dimension_numbers<[1], [0], [0], [1], [0, 0, 1, 1], [], []>} : vector<112x4xf32>, vector<4x4xf32>, vector<112x4xf32> -> vector<112x4xf32>
    %69 = arith.addf %63, %68 : vector<112x4xf32>
    %c0_101 = arith.constant 0 : index
    %c0_102 = arith.constant 0 : index
    %c18 = arith.constant 18 : index
    %c0_103 = arith.constant 0 : index
    %70 = vector.load %arg3[%c0_101, %c0_102, %c18, %c0_103] : memref<1x1x202x4xf32, #tpu.memory_space<vmem>>, vector<1x1x112x4xf32>
    %71 = vector.shape_cast %70 : vector<1x1x112x4xf32> to vector<112x4xf32>
    %c0_104 = arith.constant 0 : index
    %c1_105 = arith.constant 1 : index
    %c4_106 = arith.constant 4 : index
    %c0_107 = arith.constant 0 : index
    %c0_108 = arith.constant 0 : index
    %72 = vector.load %arg4[%c0_104, %c1_105, %c4_106, %c0_107, %c0_108] : memref<1x7x7x4x4xf32, #tpu.memory_space<vmem>>, vector<1x1x1x4x4xf32>
    %73 = vector.shape_cast %72 : vector<1x1x1x4x4xf32> to vector<4x4xf32>
    %cst_109 = arith.constant dense<0.000000e+00> : vector<112x4xf32>
    %74 = tpu.matmul %71, %73, %cst_109 {dimension_numbers = #tpu.dot_dimension_numbers<[1], [0], [0], [1], [0, 0, 1, 1], [], []>} : vector<112x4xf32>, vector<4x4xf32>, vector<112x4xf32> -> vector<112x4xf32>
    %75 = arith.addf %69, %74 : vector<112x4xf32>
    %c0_110 = arith.constant 0 : index
    %c0_111 = arith.constant 0 : index
    %c19 = arith.constant 19 : index
    %c0_112 = arith.constant 0 : index
    %76 = vector.load %arg3[%c0_110, %c0_111, %c19, %c0_112] : memref<1x1x202x4xf32, #tpu.memory_space<vmem>>, vector<1x1x112x4xf32>
    %77 = vector.shape_cast %76 : vector<1x1x112x4xf32> to vector<112x4xf32>
    %c0_113 = arith.constant 0 : index
    %c1_114 = arith.constant 1 : index
    %c5_115 = arith.constant 5 : index
    %c0_116 = arith.constant 0 : index
    %c0_117 = arith.constant 0 : index
    %78 = vector.load %arg4[%c0_113, %c1_114, %c5_115, %c0_116, %c0_117] : memref<1x7x7x4x4xf32, #tpu.memory_space<vmem>>, vector<1x1x1x4x4xf32>
    %79 = vector.shape_cast %78 : vector<1x1x1x4x4xf32> to vector<4x4xf32>
    %cst_118 = arith.constant dense<0.000000e+00> : vector<112x4xf32>
    %80 = tpu.matmul %77, %79, %cst_118 {dimension_numbers = #tpu.dot_dimension_numbers<[1], [0], [0], [1], [0, 0, 1, 1], [], []>} : vector<112x4xf32>, vector<4x4xf32>, vector<112x4xf32> -> vector<112x4xf32>
    %81 = arith.addf %75, %80 : vector<112x4xf32>
    %c0_119 = arith.constant 0 : index
    %c0_120 = arith.constant 0 : index
    %c20 = arith.constant 20 : index
    %c0_121 = arith.constant 0 : index
    %82 = vector.load %arg3[%c0_119, %c0_120, %c20, %c0_121] : memref<1x1x202x4xf32, #tpu.memory_space<vmem>>, vector<1x1x112x4xf32>
    %83 = vector.shape_cast %82 : vector<1x1x112x4xf32> to vector<112x4xf32>
    %c0_122 = arith.constant 0 : index
    %c1_123 = arith.constant 1 : index
    %c6_124 = arith.constant 6 : index
    %c0_125 = arith.constant 0 : index
    %c0_126 = arith.constant 0 : index
    %84 = vector.load %arg4[%c0_122, %c1_123, %c6_124, %c0_125, %c0_126] : memref<1x7x7x4x4xf32, #tpu.memory_space<vmem>>, vector<1x1x1x4x4xf32>
    %85 = vector.shape_cast %84 : vector<1x1x1x4x4xf32> to vector<4x4xf32>
    %cst_127 = arith.constant dense<0.000000e+00> : vector<112x4xf32>
    %86 = tpu.matmul %83, %85, %cst_127 {dimension_numbers = #tpu.dot_dimension_numbers<[1], [0], [0], [1], [0, 0, 1, 1], [], []>} : vector<112x4xf32>, vector<4x4xf32>, vector<112x4xf32> -> vector<112x4xf32>
    %87 = arith.addf %81, %86 : vector<112x4xf32>
    %c0_128 = arith.constant 0 : index
    %c0_129 = arith.constant 0 : index
    %c28 = arith.constant 28 : index
    %c0_130 = arith.constant 0 : index
    %88 = vector.load %arg3[%c0_128, %c0_129, %c28, %c0_130] : memref<1x1x202x4xf32, #tpu.memory_space<vmem>>, vector<1x1x112x4xf32>
    %89 = vector.shape_cast %88 : vector<1x1x112x4xf32> to vector<112x4xf32>
    %c0_131 = arith.constant 0 : index
    %c2_132 = arith.constant 2 : index
    %c0_133 = arith.constant 0 : index
    %c0_134 = arith.constant 0 : index
    %c0_135 = arith.constant 0 : index
    %90 = vector.load %arg4[%c0_131, %c2_132, %c0_133, %c0_134, %c0_135] : memref<1x7x7x4x4xf32, #tpu.memory_space<vmem>>, vector<1x1x1x4x4xf32>
    %91 = vector.shape_cast %90 : vector<1x1x1x4x4xf32> to vector<4x4xf32>
    %cst_136 = arith.constant dense<0.000000e+00> : vector<112x4xf32>
    %92 = tpu.matmul %89, %91, %cst_136 {dimension_numbers = #tpu.dot_dimension_numbers<[1], [0], [0], [1], [0, 0, 1, 1], [], []>} : vector<112x4xf32>, vector<4x4xf32>, vector<112x4xf32> -> vector<112x4xf32>
    %93 = arith.addf %87, %92 : vector<112x4xf32>
    %c0_137 = arith.constant 0 : index
    %c0_138 = arith.constant 0 : index
    %c29 = arith.constant 29 : index
    %c0_139 = arith.constant 0 : index
    %94 = vector.load %arg3[%c0_137, %c0_138, %c29, %c0_139] : memref<1x1x202x4xf32, #tpu.memory_space<vmem>>, vector<1x1x112x4xf32>
    %95 = vector.shape_cast %94 : vector<1x1x112x4xf32> to vector<112x4xf32>
    %c0_140 = arith.constant 0 : index
    %c2_141 = arith.constant 2 : index
    %c1_142 = arith.constant 1 : index
    %c0_143 = arith.constant 0 : index
    %c0_144 = arith.constant 0 : index
    %96 = vector.load %arg4[%c0_140, %c2_141, %c1_142, %c0_143, %c0_144] : memref<1x7x7x4x4xf32, #tpu.memory_space<vmem>>, vector<1x1x1x4x4xf32>
    %97 = vector.shape_cast %96 : vector<1x1x1x4x4xf32> to vector<4x4xf32>
    %cst_145 = arith.constant dense<0.000000e+00> : vector<112x4xf32>
    %98 = tpu.matmul %95, %97, %cst_145 {dimension_numbers = #tpu.dot_dimension_numbers<[1], [0], [0], [1], [0, 0, 1, 1], [], []>} : vector<112x4xf32>, vector<4x4xf32>, vector<112x4xf32> -> vector<112x4xf32>
    %99 = arith.addf %93, %98 : vector<112x4xf32>
    %c0_146 = arith.constant 0 : index
    %c0_147 = arith.constant 0 : index
    %c30 = arith.constant 30 : index
    %c0_148 = arith.constant 0 : index
    %100 = vector.load %arg3[%c0_146, %c0_147, %c30, %c0_148] : memref<1x1x202x4xf32, #tpu.memory_space<vmem>>, vector<1x1x112x4xf32>
    %101 = vector.shape_cast %100 : vector<1x1x112x4xf32> to vector<112x4xf32>
    %c0_149 = arith.constant 0 : index
    %c2_150 = arith.constant 2 : index
    %c2_151 = arith.constant 2 : index
    %c0_152 = arith.constant 0 : index
    %c0_153 = arith.constant 0 : index
    %102 = vector.load %arg4[%c0_149, %c2_150, %c2_151, %c0_152, %c0_153] : memref<1x7x7x4x4xf32, #tpu.memory_space<vmem>>, vector<1x1x1x4x4xf32>
    %103 = vector.shape_cast %102 : vector<1x1x1x4x4xf32> to vector<4x4xf32>
    %cst_154 = arith.constant dense<0.000000e+00> : vector<112x4xf32>
    %104 = tpu.matmul %101, %103, %cst_154 {dimension_numbers = #tpu.dot_dimension_numbers<[1], [0], [0], [1], [0, 0, 1, 1], [], []>} : vector<112x4xf32>, vector<4x4xf32>, vector<112x4xf32> -> vector<112x4xf32>
    %105 = arith.addf %99, %104 : vector<112x4xf32>
    %c0_155 = arith.constant 0 : index
    %c0_156 = arith.constant 0 : index
    %c31 = arith.constant 31 : index
    %c0_157 = arith.constant 0 : index
    %106 = vector.load %arg3[%c0_155, %c0_156, %c31, %c0_157] : memref<1x1x202x4xf32, #tpu.memory_space<vmem>>, vector<1x1x112x4xf32>
    %107 = vector.shape_cast %106 : vector<1x1x112x4xf32> to vector<112x4xf32>
    %c0_158 = arith.constant 0 : index
    %c2_159 = arith.constant 2 : index
    %c3_160 = arith.constant 3 : index
    %c0_161 = arith.constant 0 : index
    %c0_162 = arith.constant 0 : index
    %108 = vector.load %arg4[%c0_158, %c2_159, %c3_160, %c0_161, %c0_162] : memref<1x7x7x4x4xf32, #tpu.memory_space<vmem>>, vector<1x1x1x4x4xf32>
    %109 = vector.shape_cast %108 : vector<1x1x1x4x4xf32> to vector<4x4xf32>
    %cst_163 = arith.constant dense<0.000000e+00> : vector<112x4xf32>
    %110 = tpu.matmul %107, %109, %cst_163 {dimension_numbers = #tpu.dot_dimension_numbers<[1], [0], [0], [1], [0, 0, 1, 1], [], []>} : vector<112x4xf32>, vector<4x4xf32>, vector<112x4xf32> -> vector<112x4xf32>
    %111 = arith.addf %105, %110 : vector<112x4xf32>
    %c0_164 = arith.constant 0 : index
    %c0_165 = arith.constant 0 : index
    %c32 = arith.constant 32 : index
    %c0_166 = arith.constant 0 : index
    %112 = vector.load %arg3[%c0_164, %c0_165, %c32, %c0_166] : memref<1x1x202x4xf32, #tpu.memory_space<vmem>>, vector<1x1x112x4xf32>
    %113 = vector.shape_cast %112 : vector<1x1x112x4xf32> to vector<112x4xf32>
    %c0_167 = arith.constant 0 : index
    %c2_168 = arith.constant 2 : index
    %c4_169 = arith.constant 4 : index
    %c0_170 = arith.constant 0 : index
    %c0_171 = arith.constant 0 : index
    %114 = vector.load %arg4[%c0_167, %c2_168, %c4_169, %c0_170, %c0_171] : memref<1x7x7x4x4xf32, #tpu.memory_space<vmem>>, vector<1x1x1x4x4xf32>
    %115 = vector.shape_cast %114 : vector<1x1x1x4x4xf32> to vector<4x4xf32>
    %cst_172 = arith.constant dense<0.000000e+00> : vector<112x4xf32>
    %116 = tpu.matmul %113, %115, %cst_172 {dimension_numbers = #tpu.dot_dimension_numbers<[1], [0], [0], [1], [0, 0, 1, 1], [], []>} : vector<112x4xf32>, vector<4x4xf32>, vector<112x4xf32> -> vector<112x4xf32>
    %117 = arith.addf %111, %116 : vector<112x4xf32>
    %c0_173 = arith.constant 0 : index
    %c0_174 = arith.constant 0 : index
    %c33 = arith.constant 33 : index
    %c0_175 = arith.constant 0 : index
    %118 = vector.load %arg3[%c0_173, %c0_174, %c33, %c0_175] : memref<1x1x202x4xf32, #tpu.memory_space<vmem>>, vector<1x1x112x4xf32>
    %119 = vector.shape_cast %118 : vector<1x1x112x4xf32> to vector<112x4xf32>
    %c0_176 = arith.constant 0 : index
    %c2_177 = arith.constant 2 : index
    %c5_178 = arith.constant 5 : index
    %c0_179 = arith.constant 0 : index
    %c0_180 = arith.constant 0 : index
    %120 = vector.load %arg4[%c0_176, %c2_177, %c5_178, %c0_179, %c0_180] : memref<1x7x7x4x4xf32, #tpu.memory_space<vmem>>, vector<1x1x1x4x4xf32>
    %121 = vector.shape_cast %120 : vector<1x1x1x4x4xf32> to vector<4x4xf32>
    %cst_181 = arith.constant dense<0.000000e+00> : vector<112x4xf32>
    %122 = tpu.matmul %119, %121, %cst_181 {dimension_numbers = #tpu.dot_dimension_numbers<[1], [0], [0], [1], [0, 0, 1, 1], [], []>} : vector<112x4xf32>, vector<4x4xf32>, vector<112x4xf32> -> vector<112x4xf32>
    %123 = arith.addf %117, %122 : vector<112x4xf32>
    %c0_182 = arith.constant 0 : index
    %c0_183 = arith.constant 0 : index
    %c34 = arith.constant 34 : index
    %c0_184 = arith.constant 0 : index
    %124 = vector.load %arg3[%c0_182, %c0_183, %c34, %c0_184] : memref<1x1x202x4xf32, #tpu.memory_space<vmem>>, vector<1x1x112x4xf32>
    %125 = vector.shape_cast %124 : vector<1x1x112x4xf32> to vector<112x4xf32>
    %c0_185 = arith.constant 0 : index
    %c2_186 = arith.constant 2 : index
    %c6_187 = arith.constant 6 : index
    %c0_188 = arith.constant 0 : index
    %c0_189 = arith.constant 0 : index
    %126 = vector.load %arg4[%c0_185, %c2_186, %c6_187, %c0_188, %c0_189] : memref<1x7x7x4x4xf32, #tpu.memory_space<vmem>>, vector<1x1x1x4x4xf32>
    %127 = vector.shape_cast %126 : vector<1x1x1x4x4xf32> to vector<4x4xf32>
    %cst_190 = arith.constant dense<0.000000e+00> : vector<112x4xf32>
    %128 = tpu.matmul %125, %127, %cst_190 {dimension_numbers = #tpu.dot_dimension_numbers<[1], [0], [0], [1], [0, 0, 1, 1], [], []>} : vector<112x4xf32>, vector<4x4xf32>, vector<112x4xf32> -> vector<112x4xf32>
    %129 = arith.addf %123, %128 : vector<112x4xf32>
    %c0_191 = arith.constant 0 : index
    %c0_192 = arith.constant 0 : index
    %c42 = arith.constant 42 : index
    %c0_193 = arith.constant 0 : index
    %130 = vector.load %arg3[%c0_191, %c0_192, %c42, %c0_193] : memref<1x1x202x4xf32, #tpu.memory_space<vmem>>, vector<1x1x112x4xf32>
    %131 = vector.shape_cast %130 : vector<1x1x112x4xf32> to vector<112x4xf32>
    %c0_194 = arith.constant 0 : index
    %c3_195 = arith.constant 3 : index
    %c0_196 = arith.constant 0 : index
    %c0_197 = arith.constant 0 : index
    %c0_198 = arith.constant 0 : index
    %132 = vector.load %arg4[%c0_194, %c3_195, %c0_196, %c0_197, %c0_198] : memref<1x7x7x4x4xf32, #tpu.memory_space<vmem>>, vector<1x1x1x4x4xf32>
    %133 = vector.shape_cast %132 : vector<1x1x1x4x4xf32> to vector<4x4xf32>
    %cst_199 = arith.constant dense<0.000000e+00> : vector<112x4xf32>
    %134 = tpu.matmul %131, %133, %cst_199 {dimension_numbers = #tpu.dot_dimension_numbers<[1], [0], [0], [1], [0, 0, 1, 1], [], []>} : vector<112x4xf32>, vector<4x4xf32>, vector<112x4xf32> -> vector<112x4xf32>
    %135 = arith.addf %129, %134 : vector<112x4xf32>
    %c0_200 = arith.constant 0 : index
    %c0_201 = arith.constant 0 : index
    %c43 = arith.constant 43 : index
    %c0_202 = arith.constant 0 : index
    %136 = vector.load %arg3[%c0_200, %c0_201, %c43, %c0_202] : memref<1x1x202x4xf32, #tpu.memory_space<vmem>>, vector<1x1x112x4xf32>
    %137 = vector.shape_cast %136 : vector<1x1x112x4xf32> to vector<112x4xf32>
    %c0_203 = arith.constant 0 : index
    %c3_204 = arith.constant 3 : index
    %c1_205 = arith.constant 1 : index
    %c0_206 = arith.constant 0 : index
    %c0_207 = arith.constant 0 : index
    %138 = vector.load %arg4[%c0_203, %c3_204, %c1_205, %c0_206, %c0_207] : memref<1x7x7x4x4xf32, #tpu.memory_space<vmem>>, vector<1x1x1x4x4xf32>
    %139 = vector.shape_cast %138 : vector<1x1x1x4x4xf32> to vector<4x4xf32>
    %cst_208 = arith.constant dense<0.000000e+00> : vector<112x4xf32>
    %140 = tpu.matmul %137, %139, %cst_208 {dimension_numbers = #tpu.dot_dimension_numbers<[1], [0], [0], [1], [0, 0, 1, 1], [], []>} : vector<112x4xf32>, vector<4x4xf32>, vector<112x4xf32> -> vector<112x4xf32>
    %141 = arith.addf %135, %140 : vector<112x4xf32>
    %c0_209 = arith.constant 0 : index
    %c0_210 = arith.constant 0 : index
    %c44 = arith.constant 44 : index
    %c0_211 = arith.constant 0 : index
    %142 = vector.load %arg3[%c0_209, %c0_210, %c44, %c0_211] : memref<1x1x202x4xf32, #tpu.memory_space<vmem>>, vector<1x1x112x4xf32>
    %143 = vector.shape_cast %142 : vector<1x1x112x4xf32> to vector<112x4xf32>
    %c0_212 = arith.constant 0 : index
    %c3_213 = arith.constant 3 : index
    %c2_214 = arith.constant 2 : index
    %c0_215 = arith.constant 0 : index
    %c0_216 = arith.constant 0 : index
    %144 = vector.load %arg4[%c0_212, %c3_213, %c2_214, %c0_215, %c0_216] : memref<1x7x7x4x4xf32, #tpu.memory_space<vmem>>, vector<1x1x1x4x4xf32>
    %145 = vector.shape_cast %144 : vector<1x1x1x4x4xf32> to vector<4x4xf32>
    %cst_217 = arith.constant dense<0.000000e+00> : vector<112x4xf32>
    %146 = tpu.matmul %143, %145, %cst_217 {dimension_numbers = #tpu.dot_dimension_numbers<[1], [0], [0], [1], [0, 0, 1, 1], [], []>} : vector<112x4xf32>, vector<4x4xf32>, vector<112x4xf32> -> vector<112x4xf32>
    %147 = arith.addf %141, %146 : vector<112x4xf32>
    %c0_218 = arith.constant 0 : index
    %c0_219 = arith.constant 0 : index
    %c45 = arith.constant 45 : index
    %c0_220 = arith.constant 0 : index
    %148 = vector.load %arg3[%c0_218, %c0_219, %c45, %c0_220] : memref<1x1x202x4xf32, #tpu.memory_space<vmem>>, vector<1x1x112x4xf32>
    %149 = vector.shape_cast %148 : vector<1x1x112x4xf32> to vector<112x4xf32>
    %c0_221 = arith.constant 0 : index
    %c3_222 = arith.constant 3 : index
    %c3_223 = arith.constant 3 : index
    %c0_224 = arith.constant 0 : index
    %c0_225 = arith.constant 0 : index
    %150 = vector.load %arg4[%c0_221, %c3_222, %c3_223, %c0_224, %c0_225] : memref<1x7x7x4x4xf32, #tpu.memory_space<vmem>>, vector<1x1x1x4x4xf32>
    %151 = vector.shape_cast %150 : vector<1x1x1x4x4xf32> to vector<4x4xf32>
    %cst_226 = arith.constant dense<0.000000e+00> : vector<112x4xf32>
    %152 = tpu.matmul %149, %151, %cst_226 {dimension_numbers = #tpu.dot_dimension_numbers<[1], [0], [0], [1], [0, 0, 1, 1], [], []>} : vector<112x4xf32>, vector<4x4xf32>, vector<112x4xf32> -> vector<112x4xf32>
    %153 = arith.addf %147, %152 : vector<112x4xf32>
    %c0_227 = arith.constant 0 : index
    %c0_228 = arith.constant 0 : index
    %c46 = arith.constant 46 : index
    %c0_229 = arith.constant 0 : index
    %154 = vector.load %arg3[%c0_227, %c0_228, %c46, %c0_229] : memref<1x1x202x4xf32, #tpu.memory_space<vmem>>, vector<1x1x112x4xf32>
    %155 = vector.shape_cast %154 : vector<1x1x112x4xf32> to vector<112x4xf32>
    %c0_230 = arith.constant 0 : index
    %c3_231 = arith.constant 3 : index
    %c4_232 = arith.constant 4 : index
    %c0_233 = arith.constant 0 : index
    %c0_234 = arith.constant 0 : index
    %156 = vector.load %arg4[%c0_230, %c3_231, %c4_232, %c0_233, %c0_234] : memref<1x7x7x4x4xf32, #tpu.memory_space<vmem>>, vector<1x1x1x4x4xf32>
    %157 = vector.shape_cast %156 : vector<1x1x1x4x4xf32> to vector<4x4xf32>
    %cst_235 = arith.constant dense<0.000000e+00> : vector<112x4xf32>
    %158 = tpu.matmul %155, %157, %cst_235 {dimension_numbers = #tpu.dot_dimension_numbers<[1], [0], [0], [1], [0, 0, 1, 1], [], []>} : vector<112x4xf32>, vector<4x4xf32>, vector<112x4xf32> -> vector<112x4xf32>
    %159 = arith.addf %153, %158 : vector<112x4xf32>
    %c0_236 = arith.constant 0 : index
    %c0_237 = arith.constant 0 : index
    %c47 = arith.constant 47 : index
    %c0_238 = arith.constant 0 : index
    %160 = vector.load %arg3[%c0_236, %c0_237, %c47, %c0_238] : memref<1x1x202x4xf32, #tpu.memory_space<vmem>>, vector<1x1x112x4xf32>
    %161 = vector.shape_cast %160 : vector<1x1x112x4xf32> to vector<112x4xf32>
    %c0_239 = arith.constant 0 : index
    %c3_240 = arith.constant 3 : index
    %c5_241 = arith.constant 5 : index
    %c0_242 = arith.constant 0 : index
    %c0_243 = arith.constant 0 : index
    %162 = vector.load %arg4[%c0_239, %c3_240, %c5_241, %c0_242, %c0_243] : memref<1x7x7x4x4xf32, #tpu.memory_space<vmem>>, vector<1x1x1x4x4xf32>
    %163 = vector.shape_cast %162 : vector<1x1x1x4x4xf32> to vector<4x4xf32>
    %cst_244 = arith.constant dense<0.000000e+00> : vector<112x4xf32>
    %164 = tpu.matmul %161, %163, %cst_244 {dimension_numbers = #tpu.dot_dimension_numbers<[1], [0], [0], [1], [0, 0, 1, 1], [], []>} : vector<112x4xf32>, vector<4x4xf32>, vector<112x4xf32> -> vector<112x4xf32>
    %165 = arith.addf %159, %164 : vector<112x4xf32>
    %c0_245 = arith.constant 0 : index
    %c0_246 = arith.constant 0 : index
    %c48 = arith.constant 48 : index
    %c0_247 = arith.constant 0 : index
    %166 = vector.load %arg3[%c0_245, %c0_246, %c48, %c0_247] : memref<1x1x202x4xf32, #tpu.memory_space<vmem>>, vector<1x1x112x4xf32>
    %167 = vector.shape_cast %166 : vector<1x1x112x4xf32> to vector<112x4xf32>
    %c0_248 = arith.constant 0 : index
    %c3_249 = arith.constant 3 : index
    %c6_250 = arith.constant 6 : index
    %c0_251 = arith.constant 0 : index
    %c0_252 = arith.constant 0 : index
    %168 = vector.load %arg4[%c0_248, %c3_249, %c6_250, %c0_251, %c0_252] : memref<1x7x7x4x4xf32, #tpu.memory_space<vmem>>, vector<1x1x1x4x4xf32>
    %169 = vector.shape_cast %168 : vector<1x1x1x4x4xf32> to vector<4x4xf32>
    %cst_253 = arith.constant dense<0.000000e+00> : vector<112x4xf32>
    %170 = tpu.matmul %167, %169, %cst_253 {dimension_numbers = #tpu.dot_dimension_numbers<[1], [0], [0], [1], [0, 0, 1, 1], [], []>} : vector<112x4xf32>, vector<4x4xf32>, vector<112x4xf32> -> vector<112x4xf32>
    %171 = arith.addf %165, %170 : vector<112x4xf32>
    %c0_254 = arith.constant 0 : index
    %c0_255 = arith.constant 0 : index
    %c56 = arith.constant 56 : index
    %c0_256 = arith.constant 0 : index
    %172 = vector.load %arg3[%c0_254, %c0_255, %c56, %c0_256] : memref<1x1x202x4xf32, #tpu.memory_space<vmem>>, vector<1x1x112x4xf32>
    %173 = vector.shape_cast %172 : vector<1x1x112x4xf32> to vector<112x4xf32>
    %c0_257 = arith.constant 0 : index
    %c4_258 = arith.constant 4 : index
    %c0_259 = arith.constant 0 : index
    %c0_260 = arith.constant 0 : index
    %c0_261 = arith.constant 0 : index
    %174 = vector.load %arg4[%c0_257, %c4_258, %c0_259, %c0_260, %c0_261] : memref<1x7x7x4x4xf32, #tpu.memory_space<vmem>>, vector<1x1x1x4x4xf32>
    %175 = vector.shape_cast %174 : vector<1x1x1x4x4xf32> to vector<4x4xf32>
    %cst_262 = arith.constant dense<0.000000e+00> : vector<112x4xf32>
    %176 = tpu.matmul %173, %175, %cst_262 {dimension_numbers = #tpu.dot_dimension_numbers<[1], [0], [0], [1], [0, 0, 1, 1], [], []>} : vector<112x4xf32>, vector<4x4xf32>, vector<112x4xf32> -> vector<112x4xf32>
    %177 = arith.addf %171, %176 : vector<112x4xf32>
    %c0_263 = arith.constant 0 : index
    %c0_264 = arith.constant 0 : index
    %c57 = arith.constant 57 : index
    %c0_265 = arith.constant 0 : index
    %178 = vector.load %arg3[%c0_263, %c0_264, %c57, %c0_265] : memref<1x1x202x4xf32, #tpu.memory_space<vmem>>, vector<1x1x112x4xf32>
    %179 = vector.shape_cast %178 : vector<1x1x112x4xf32> to vector<112x4xf32>
    %c0_266 = arith.constant 0 : index
    %c4_267 = arith.constant 4 : index
    %c1_268 = arith.constant 1 : index
    %c0_269 = arith.constant 0 : index
    %c0_270 = arith.constant 0 : index
    %180 = vector.load %arg4[%c0_266, %c4_267, %c1_268, %c0_269, %c0_270] : memref<1x7x7x4x4xf32, #tpu.memory_space<vmem>>, vector<1x1x1x4x4xf32>
    %181 = vector.shape_cast %180 : vector<1x1x1x4x4xf32> to vector<4x4xf32>
    %cst_271 = arith.constant dense<0.000000e+00> : vector<112x4xf32>
    %182 = tpu.matmul %179, %181, %cst_271 {dimension_numbers = #tpu.dot_dimension_numbers<[1], [0], [0], [1], [0, 0, 1, 1], [], []>} : vector<112x4xf32>, vector<4x4xf32>, vector<112x4xf32> -> vector<112x4xf32>
    %183 = arith.addf %177, %182 : vector<112x4xf32>
    %c0_272 = arith.constant 0 : index
    %c0_273 = arith.constant 0 : index
    %c58 = arith.constant 58 : index
    %c0_274 = arith.constant 0 : index
    %184 = vector.load %arg3[%c0_272, %c0_273, %c58, %c0_274] : memref<1x1x202x4xf32, #tpu.memory_space<vmem>>, vector<1x1x112x4xf32>
    %185 = vector.shape_cast %184 : vector<1x1x112x4xf32> to vector<112x4xf32>
    %c0_275 = arith.constant 0 : index
    %c4_276 = arith.constant 4 : index
    %c2_277 = arith.constant 2 : index
    %c0_278 = arith.constant 0 : index
    %c0_279 = arith.constant 0 : index
    %186 = vector.load %arg4[%c0_275, %c4_276, %c2_277, %c0_278, %c0_279] : memref<1x7x7x4x4xf32, #tpu.memory_space<vmem>>, vector<1x1x1x4x4xf32>
    %187 = vector.shape_cast %186 : vector<1x1x1x4x4xf32> to vector<4x4xf32>
    %cst_280 = arith.constant dense<0.000000e+00> : vector<112x4xf32>
    %188 = tpu.matmul %185, %187, %cst_280 {dimension_numbers = #tpu.dot_dimension_numbers<[1], [0], [0], [1], [0, 0, 1, 1], [], []>} : vector<112x4xf32>, vector<4x4xf32>, vector<112x4xf32> -> vector<112x4xf32>
    %189 = arith.addf %183, %188 : vector<112x4xf32>
    %c0_281 = arith.constant 0 : index
    %c0_282 = arith.constant 0 : index
    %c59 = arith.constant 59 : index
    %c0_283 = arith.constant 0 : index
    %190 = vector.load %arg3[%c0_281, %c0_282, %c59, %c0_283] : memref<1x1x202x4xf32, #tpu.memory_space<vmem>>, vector<1x1x112x4xf32>
    %191 = vector.shape_cast %190 : vector<1x1x112x4xf32> to vector<112x4xf32>
    %c0_284 = arith.constant 0 : index
    %c4_285 = arith.constant 4 : index
    %c3_286 = arith.constant 3 : index
    %c0_287 = arith.constant 0 : index
    %c0_288 = arith.constant 0 : index
    %192 = vector.load %arg4[%c0_284, %c4_285, %c3_286, %c0_287, %c0_288] : memref<1x7x7x4x4xf32, #tpu.memory_space<vmem>>, vector<1x1x1x4x4xf32>
    %193 = vector.shape_cast %192 : vector<1x1x1x4x4xf32> to vector<4x4xf32>
    %cst_289 = arith.constant dense<0.000000e+00> : vector<112x4xf32>
    %194 = tpu.matmul %191, %193, %cst_289 {dimension_numbers = #tpu.dot_dimension_numbers<[1], [0], [0], [1], [0, 0, 1, 1], [], []>} : vector<112x4xf32>, vector<4x4xf32>, vector<112x4xf32> -> vector<112x4xf32>
    %195 = arith.addf %189, %194 : vector<112x4xf32>
    %c0_290 = arith.constant 0 : index
    %c0_291 = arith.constant 0 : index
    %c60 = arith.constant 60 : index
    %c0_292 = arith.constant 0 : index
    %196 = vector.load %arg3[%c0_290, %c0_291, %c60, %c0_292] : memref<1x1x202x4xf32, #tpu.memory_space<vmem>>, vector<1x1x112x4xf32>
    %197 = vector.shape_cast %196 : vector<1x1x112x4xf32> to vector<112x4xf32>
    %c0_293 = arith.constant 0 : index
    %c4_294 = arith.constant 4 : index
    %c4_295 = arith.constant 4 : index
    %c0_296 = arith.constant 0 : index
    %c0_297 = arith.constant 0 : index
    %198 = vector.load %arg4[%c0_293, %c4_294, %c4_295, %c0_296, %c0_297] : memref<1x7x7x4x4xf32, #tpu.memory_space<vmem>>, vector<1x1x1x4x4xf32>
    %199 = vector.shape_cast %198 : vector<1x1x1x4x4xf32> to vector<4x4xf32>
    %cst_298 = arith.constant dense<0.000000e+00> : vector<112x4xf32>
    %200 = tpu.matmul %197, %199, %cst_298 {dimension_numbers = #tpu.dot_dimension_numbers<[1], [0], [0], [1], [0, 0, 1, 1], [], []>} : vector<112x4xf32>, vector<4x4xf32>, vector<112x4xf32> -> vector<112x4xf32>
    %201 = arith.addf %195, %200 : vector<112x4xf32>
    %c0_299 = arith.constant 0 : index
    %c0_300 = arith.constant 0 : index
    %c61 = arith.constant 61 : index
    %c0_301 = arith.constant 0 : index
    %202 = vector.load %arg3[%c0_299, %c0_300, %c61, %c0_301] : memref<1x1x202x4xf32, #tpu.memory_space<vmem>>, vector<1x1x112x4xf32>
    %203 = vector.shape_cast %202 : vector<1x1x112x4xf32> to vector<112x4xf32>
    %c0_302 = arith.constant 0 : index
    %c4_303 = arith.constant 4 : index
    %c5_304 = arith.constant 5 : index
    %c0_305 = arith.constant 0 : index
    %c0_306 = arith.constant 0 : index
    %204 = vector.load %arg4[%c0_302, %c4_303, %c5_304, %c0_305, %c0_306] : memref<1x7x7x4x4xf32, #tpu.memory_space<vmem>>, vector<1x1x1x4x4xf32>
    %205 = vector.shape_cast %204 : vector<1x1x1x4x4xf32> to vector<4x4xf32>
    %cst_307 = arith.constant dense<0.000000e+00> : vector<112x4xf32>
    %206 = tpu.matmul %203, %205, %cst_307 {dimension_numbers = #tpu.dot_dimension_numbers<[1], [0], [0], [1], [0, 0, 1, 1], [], []>} : vector<112x4xf32>, vector<4x4xf32>, vector<112x4xf32> -> vector<112x4xf32>
    %207 = arith.addf %201, %206 : vector<112x4xf32>
    %c0_308 = arith.constant 0 : index
    %c0_309 = arith.constant 0 : index
    %c62 = arith.constant 62 : index
    %c0_310 = arith.constant 0 : index
    %208 = vector.load %arg3[%c0_308, %c0_309, %c62, %c0_310] : memref<1x1x202x4xf32, #tpu.memory_space<vmem>>, vector<1x1x112x4xf32>
    %209 = vector.shape_cast %208 : vector<1x1x112x4xf32> to vector<112x4xf32>
    %c0_311 = arith.constant 0 : index
    %c4_312 = arith.constant 4 : index
    %c6_313 = arith.constant 6 : index
    %c0_314 = arith.constant 0 : index
    %c0_315 = arith.constant 0 : index
    %210 = vector.load %arg4[%c0_311, %c4_312, %c6_313, %c0_314, %c0_315] : memref<1x7x7x4x4xf32, #tpu.memory_space<vmem>>, vector<1x1x1x4x4xf32>
    %211 = vector.shape_cast %210 : vector<1x1x1x4x4xf32> to vector<4x4xf32>
    %cst_316 = arith.constant dense<0.000000e+00> : vector<112x4xf32>
    %212 = tpu.matmul %209, %211, %cst_316 {dimension_numbers = #tpu.dot_dimension_numbers<[1], [0], [0], [1], [0, 0, 1, 1], [], []>} : vector<112x4xf32>, vector<4x4xf32>, vector<112x4xf32> -> vector<112x4xf32>
    %213 = arith.addf %207, %212 : vector<112x4xf32>
    %c0_317 = arith.constant 0 : index
    %c0_318 = arith.constant 0 : index
    %c70 = arith.constant 70 : index
    %c0_319 = arith.constant 0 : index
    %214 = vector.load %arg3[%c0_317, %c0_318, %c70, %c0_319] : memref<1x1x202x4xf32, #tpu.memory_space<vmem>>, vector<1x1x112x4xf32>
    %215 = vector.shape_cast %214 : vector<1x1x112x4xf32> to vector<112x4xf32>
    %c0_320 = arith.constant 0 : index
    %c5_321 = arith.constant 5 : index
    %c0_322 = arith.constant 0 : index
    %c0_323 = arith.constant 0 : index
    %c0_324 = arith.constant 0 : index
    %216 = vector.load %arg4[%c0_320, %c5_321, %c0_322, %c0_323, %c0_324] : memref<1x7x7x4x4xf32, #tpu.memory_space<vmem>>, vector<1x1x1x4x4xf32>
    %217 = vector.shape_cast %216 : vector<1x1x1x4x4xf32> to vector<4x4xf32>
    %cst_325 = arith.constant dense<0.000000e+00> : vector<112x4xf32>
    %218 = tpu.matmul %215, %217, %cst_325 {dimension_numbers = #tpu.dot_dimension_numbers<[1], [0], [0], [1], [0, 0, 1, 1], [], []>} : vector<112x4xf32>, vector<4x4xf32>, vector<112x4xf32> -> vector<112x4xf32>
    %219 = arith.addf %213, %218 : vector<112x4xf32>
    %c0_326 = arith.constant 0 : index
    %c0_327 = arith.constant 0 : index
    %c71 = arith.constant 71 : index
    %c0_328 = arith.constant 0 : index
    %220 = vector.load %arg3[%c0_326, %c0_327, %c71, %c0_328] : memref<1x1x202x4xf32, #tpu.memory_space<vmem>>, vector<1x1x112x4xf32>
    %221 = vector.shape_cast %220 : vector<1x1x112x4xf32> to vector<112x4xf32>
    %c0_329 = arith.constant 0 : index
    %c5_330 = arith.constant 5 : index
    %c1_331 = arith.constant 1 : index
    %c0_332 = arith.constant 0 : index
    %c0_333 = arith.constant 0 : index
    %222 = vector.load %arg4[%c0_329, %c5_330, %c1_331, %c0_332, %c0_333] : memref<1x7x7x4x4xf32, #tpu.memory_space<vmem>>, vector<1x1x1x4x4xf32>
    %223 = vector.shape_cast %222 : vector<1x1x1x4x4xf32> to vector<4x4xf32>
    %cst_334 = arith.constant dense<0.000000e+00> : vector<112x4xf32>
    %224 = tpu.matmul %221, %223, %cst_334 {dimension_numbers = #tpu.dot_dimension_numbers<[1], [0], [0], [1], [0, 0, 1, 1], [], []>} : vector<112x4xf32>, vector<4x4xf32>, vector<112x4xf32> -> vector<112x4xf32>
    %225 = arith.addf %219, %224 : vector<112x4xf32>
    %c0_335 = arith.constant 0 : index
    %c0_336 = arith.constant 0 : index
    %c72 = arith.constant 72 : index
    %c0_337 = arith.constant 0 : index
    %226 = vector.load %arg3[%c0_335, %c0_336, %c72, %c0_337] : memref<1x1x202x4xf32, #tpu.memory_space<vmem>>, vector<1x1x112x4xf32>
    %227 = vector.shape_cast %226 : vector<1x1x112x4xf32> to vector<112x4xf32>
    %c0_338 = arith.constant 0 : index
    %c5_339 = arith.constant 5 : index
    %c2_340 = arith.constant 2 : index
    %c0_341 = arith.constant 0 : index
    %c0_342 = arith.constant 0 : index
    %228 = vector.load %arg4[%c0_338, %c5_339, %c2_340, %c0_341, %c0_342] : memref<1x7x7x4x4xf32, #tpu.memory_space<vmem>>, vector<1x1x1x4x4xf32>
    %229 = vector.shape_cast %228 : vector<1x1x1x4x4xf32> to vector<4x4xf32>
    %cst_343 = arith.constant dense<0.000000e+00> : vector<112x4xf32>
    %230 = tpu.matmul %227, %229, %cst_343 {dimension_numbers = #tpu.dot_dimension_numbers<[1], [0], [0], [1], [0, 0, 1, 1], [], []>} : vector<112x4xf32>, vector<4x4xf32>, vector<112x4xf32> -> vector<112x4xf32>
    %231 = arith.addf %225, %230 : vector<112x4xf32>
    %c0_344 = arith.constant 0 : index
    %c0_345 = arith.constant 0 : index
    %c73 = arith.constant 73 : index
    %c0_346 = arith.constant 0 : index
    %232 = vector.load %arg3[%c0_344, %c0_345, %c73, %c0_346] : memref<1x1x202x4xf32, #tpu.memory_space<vmem>>, vector<1x1x112x4xf32>
    %233 = vector.shape_cast %232 : vector<1x1x112x4xf32> to vector<112x4xf32>
    %c0_347 = arith.constant 0 : index
    %c5_348 = arith.constant 5 : index
    %c3_349 = arith.constant 3 : index
    %c0_350 = arith.constant 0 : index
    %c0_351 = arith.constant 0 : index
    %234 = vector.load %arg4[%c0_347, %c5_348, %c3_349, %c0_350, %c0_351] : memref<1x7x7x4x4xf32, #tpu.memory_space<vmem>>, vector<1x1x1x4x4xf32>
    %235 = vector.shape_cast %234 : vector<1x1x1x4x4xf32> to vector<4x4xf32>
    %cst_352 = arith.constant dense<0.000000e+00> : vector<112x4xf32>
    %236 = tpu.matmul %233, %235, %cst_352 {dimension_numbers = #tpu.dot_dimension_numbers<[1], [0], [0], [1], [0, 0, 1, 1], [], []>} : vector<112x4xf32>, vector<4x4xf32>, vector<112x4xf32> -> vector<112x4xf32>
    %237 = arith.addf %231, %236 : vector<112x4xf32>
    %c0_353 = arith.constant 0 : index
    %c0_354 = arith.constant 0 : index
    %c74 = arith.constant 74 : index
    %c0_355 = arith.constant 0 : index
    %238 = vector.load %arg3[%c0_353, %c0_354, %c74, %c0_355] : memref<1x1x202x4xf32, #tpu.memory_space<vmem>>, vector<1x1x112x4xf32>
    %239 = vector.shape_cast %238 : vector<1x1x112x4xf32> to vector<112x4xf32>
    %c0_356 = arith.constant 0 : index
    %c5_357 = arith.constant 5 : index
    %c4_358 = arith.constant 4 : index
    %c0_359 = arith.constant 0 : index
    %c0_360 = arith.constant 0 : index
    %240 = vector.load %arg4[%c0_356, %c5_357, %c4_358, %c0_359, %c0_360] : memref<1x7x7x4x4xf32, #tpu.memory_space<vmem>>, vector<1x1x1x4x4xf32>
    %241 = vector.shape_cast %240 : vector<1x1x1x4x4xf32> to vector<4x4xf32>
    %cst_361 = arith.constant dense<0.000000e+00> : vector<112x4xf32>
    %242 = tpu.matmul %239, %241, %cst_361 {dimension_numbers = #tpu.dot_dimension_numbers<[1], [0], [0], [1], [0, 0, 1, 1], [], []>} : vector<112x4xf32>, vector<4x4xf32>, vector<112x4xf32> -> vector<112x4xf32>
    %243 = arith.addf %237, %242 : vector<112x4xf32>
    %c0_362 = arith.constant 0 : index
    %c0_363 = arith.constant 0 : index
    %c75 = arith.constant 75 : index
    %c0_364 = arith.constant 0 : index
    %244 = vector.load %arg3[%c0_362, %c0_363, %c75, %c0_364] : memref<1x1x202x4xf32, #tpu.memory_space<vmem>>, vector<1x1x112x4xf32>
    %245 = vector.shape_cast %244 : vector<1x1x112x4xf32> to vector<112x4xf32>
    %c0_365 = arith.constant 0 : index
    %c5_366 = arith.constant 5 : index
    %c5_367 = arith.constant 5 : index
    %c0_368 = arith.constant 0 : index
    %c0_369 = arith.constant 0 : index
    %246 = vector.load %arg4[%c0_365, %c5_366, %c5_367, %c0_368, %c0_369] : memref<1x7x7x4x4xf32, #tpu.memory_space<vmem>>, vector<1x1x1x4x4xf32>
    %247 = vector.shape_cast %246 : vector<1x1x1x4x4xf32> to vector<4x4xf32>
    %cst_370 = arith.constant dense<0.000000e+00> : vector<112x4xf32>
    %248 = tpu.matmul %245, %247, %cst_370 {dimension_numbers = #tpu.dot_dimension_numbers<[1], [0], [0], [1], [0, 0, 1, 1], [], []>} : vector<112x4xf32>, vector<4x4xf32>, vector<112x4xf32> -> vector<112x4xf32>
    %249 = arith.addf %243, %248 : vector<112x4xf32>
    %c0_371 = arith.constant 0 : index
    %c0_372 = arith.constant 0 : index
    %c76 = arith.constant 76 : index
    %c0_373 = arith.constant 0 : index
    %250 = vector.load %arg3[%c0_371, %c0_372, %c76, %c0_373] : memref<1x1x202x4xf32, #tpu.memory_space<vmem>>, vector<1x1x112x4xf32>
    %251 = vector.shape_cast %250 : vector<1x1x112x4xf32> to vector<112x4xf32>
    %c0_374 = arith.constant 0 : index
    %c5_375 = arith.constant 5 : index
    %c6_376 = arith.constant 6 : index
    %c0_377 = arith.constant 0 : index
    %c0_378 = arith.constant 0 : index
    %252 = vector.load %arg4[%c0_374, %c5_375, %c6_376, %c0_377, %c0_378] : memref<1x7x7x4x4xf32, #tpu.memory_space<vmem>>, vector<1x1x1x4x4xf32>
    %253 = vector.shape_cast %252 : vector<1x1x1x4x4xf32> to vector<4x4xf32>
    %cst_379 = arith.constant dense<0.000000e+00> : vector<112x4xf32>
    %254 = tpu.matmul %251, %253, %cst_379 {dimension_numbers = #tpu.dot_dimension_numbers<[1], [0], [0], [1], [0, 0, 1, 1], [], []>} : vector<112x4xf32>, vector<4x4xf32>, vector<112x4xf32> -> vector<112x4xf32>
    %255 = arith.addf %249, %254 : vector<112x4xf32>
    %c0_380 = arith.constant 0 : index
    %c0_381 = arith.constant 0 : index
    %c84 = arith.constant 84 : index
    %c0_382 = arith.constant 0 : index
    %256 = vector.load %arg3[%c0_380, %c0_381, %c84, %c0_382] : memref<1x1x202x4xf32, #tpu.memory_space<vmem>>, vector<1x1x112x4xf32>
    %257 = vector.shape_cast %256 : vector<1x1x112x4xf32> to vector<112x4xf32>
    %c0_383 = arith.constant 0 : index
    %c6_384 = arith.constant 6 : index
    %c0_385 = arith.constant 0 : index
    %c0_386 = arith.constant 0 : index
    %c0_387 = arith.constant 0 : index
    %258 = vector.load %arg4[%c0_383, %c6_384, %c0_385, %c0_386, %c0_387] : memref<1x7x7x4x4xf32, #tpu.memory_space<vmem>>, vector<1x1x1x4x4xf32>
    %259 = vector.shape_cast %258 : vector<1x1x1x4x4xf32> to vector<4x4xf32>
    %cst_388 = arith.constant dense<0.000000e+00> : vector<112x4xf32>
    %260 = tpu.matmul %257, %259, %cst_388 {dimension_numbers = #tpu.dot_dimension_numbers<[1], [0], [0], [1], [0, 0, 1, 1], [], []>} : vector<112x4xf32>, vector<4x4xf32>, vector<112x4xf32> -> vector<112x4xf32>
    %261 = arith.addf %255, %260 : vector<112x4xf32>
    %c0_389 = arith.constant 0 : index
    %c0_390 = arith.constant 0 : index
    %c85 = arith.constant 85 : index
    %c0_391 = arith.constant 0 : index
    %262 = vector.load %arg3[%c0_389, %c0_390, %c85, %c0_391] : memref<1x1x202x4xf32, #tpu.memory_space<vmem>>, vector<1x1x112x4xf32>
    %263 = vector.shape_cast %262 : vector<1x1x112x4xf32> to vector<112x4xf32>
    %c0_392 = arith.constant 0 : index
    %c6_393 = arith.constant 6 : index
    %c1_394 = arith.constant 1 : index
    %c0_395 = arith.constant 0 : index
    %c0_396 = arith.constant 0 : index
    %264 = vector.load %arg4[%c0_392, %c6_393, %c1_394, %c0_395, %c0_396] : memref<1x7x7x4x4xf32, #tpu.memory_space<vmem>>, vector<1x1x1x4x4xf32>
    %265 = vector.shape_cast %264 : vector<1x1x1x4x4xf32> to vector<4x4xf32>
    %cst_397 = arith.constant dense<0.000000e+00> : vector<112x4xf32>
    %266 = tpu.matmul %263, %265, %cst_397 {dimension_numbers = #tpu.dot_dimension_numbers<[1], [0], [0], [1], [0, 0, 1, 1], [], []>} : vector<112x4xf32>, vector<4x4xf32>, vector<112x4xf32> -> vector<112x4xf32>
    %267 = arith.addf %261, %266 : vector<112x4xf32>
    %c0_398 = arith.constant 0 : index
    %c0_399 = arith.constant 0 : index
    %c86 = arith.constant 86 : index
    %c0_400 = arith.constant 0 : index
    %268 = vector.load %arg3[%c0_398, %c0_399, %c86, %c0_400] : memref<1x1x202x4xf32, #tpu.memory_space<vmem>>, vector<1x1x112x4xf32>
    %269 = vector.shape_cast %268 : vector<1x1x112x4xf32> to vector<112x4xf32>
    %c0_401 = arith.constant 0 : index
    %c6_402 = arith.constant 6 : index
    %c2_403 = arith.constant 2 : index
    %c0_404 = arith.constant 0 : index
    %c0_405 = arith.constant 0 : index
    %270 = vector.load %arg4[%c0_401, %c6_402, %c2_403, %c0_404, %c0_405] : memref<1x7x7x4x4xf32, #tpu.memory_space<vmem>>, vector<1x1x1x4x4xf32>
    %271 = vector.shape_cast %270 : vector<1x1x1x4x4xf32> to vector<4x4xf32>
    %cst_406 = arith.constant dense<0.000000e+00> : vector<112x4xf32>
    %272 = tpu.matmul %269, %271, %cst_406 {dimension_numbers = #tpu.dot_dimension_numbers<[1], [0], [0], [1], [0, 0, 1, 1], [], []>} : vector<112x4xf32>, vector<4x4xf32>, vector<112x4xf32> -> vector<112x4xf32>
    %273 = arith.addf %267, %272 : vector<112x4xf32>
    %c0_407 = arith.constant 0 : index
    %c0_408 = arith.constant 0 : index
    %c87 = arith.constant 87 : index
    %c0_409 = arith.constant 0 : index
    %274 = vector.load %arg3[%c0_407, %c0_408, %c87, %c0_409] : memref<1x1x202x4xf32, #tpu.memory_space<vmem>>, vector<1x1x112x4xf32>
    %275 = vector.shape_cast %274 : vector<1x1x112x4xf32> to vector<112x4xf32>
    %c0_410 = arith.constant 0 : index
    %c6_411 = arith.constant 6 : index
    %c3_412 = arith.constant 3 : index
    %c0_413 = arith.constant 0 : index
    %c0_414 = arith.constant 0 : index
    %276 = vector.load %arg4[%c0_410, %c6_411, %c3_412, %c0_413, %c0_414] : memref<1x7x7x4x4xf32, #tpu.memory_space<vmem>>, vector<1x1x1x4x4xf32>
    %277 = vector.shape_cast %276 : vector<1x1x1x4x4xf32> to vector<4x4xf32>
    %cst_415 = arith.constant dense<0.000000e+00> : vector<112x4xf32>
    %278 = tpu.matmul %275, %277, %cst_415 {dimension_numbers = #tpu.dot_dimension_numbers<[1], [0], [0], [1], [0, 0, 1, 1], [], []>} : vector<112x4xf32>, vector<4x4xf32>, vector<112x4xf32> -> vector<112x4xf32>
    %279 = arith.addf %273, %278 : vector<112x4xf32>
    %c0_416 = arith.constant 0 : index
    %c0_417 = arith.constant 0 : index
    %c88 = arith.constant 88 : index
    %c0_418 = arith.constant 0 : index
    %280 = vector.load %arg3[%c0_416, %c0_417, %c88, %c0_418] : memref<1x1x202x4xf32, #tpu.memory_space<vmem>>, vector<1x1x112x4xf32>
    %281 = vector.shape_cast %280 : vector<1x1x112x4xf32> to vector<112x4xf32>
    %c0_419 = arith.constant 0 : index
    %c6_420 = arith.constant 6 : index
    %c4_421 = arith.constant 4 : index
    %c0_422 = arith.constant 0 : index
    %c0_423 = arith.constant 0 : index
    %282 = vector.load %arg4[%c0_419, %c6_420, %c4_421, %c0_422, %c0_423] : memref<1x7x7x4x4xf32, #tpu.memory_space<vmem>>, vector<1x1x1x4x4xf32>
    %283 = vector.shape_cast %282 : vector<1x1x1x4x4xf32> to vector<4x4xf32>
    %cst_424 = arith.constant dense<0.000000e+00> : vector<112x4xf32>
    %284 = tpu.matmul %281, %283, %cst_424 {dimension_numbers = #tpu.dot_dimension_numbers<[1], [0], [0], [1], [0, 0, 1, 1], [], []>} : vector<112x4xf32>, vector<4x4xf32>, vector<112x4xf32> -> vector<112x4xf32>
    %285 = arith.addf %279, %284 : vector<112x4xf32>
    %c0_425 = arith.constant 0 : index
    %c0_426 = arith.constant 0 : index
    %c89 = arith.constant 89 : index
    %c0_427 = arith.constant 0 : index
    %286 = vector.load %arg3[%c0_425, %c0_426, %c89, %c0_427] : memref<1x1x202x4xf32, #tpu.memory_space<vmem>>, vector<1x1x112x4xf32>
    %287 = vector.shape_cast %286 : vector<1x1x112x4xf32> to vector<112x4xf32>
    %c0_428 = arith.constant 0 : index
    %c6_429 = arith.constant 6 : index
    %c5_430 = arith.constant 5 : index
    %c0_431 = arith.constant 0 : index
    %c0_432 = arith.constant 0 : index
    %288 = vector.load %arg4[%c0_428, %c6_429, %c5_430, %c0_431, %c0_432] : memref<1x7x7x4x4xf32, #tpu.memory_space<vmem>>, vector<1x1x1x4x4xf32>
    %289 = vector.shape_cast %288 : vector<1x1x1x4x4xf32> to vector<4x4xf32>
    %cst_433 = arith.constant dense<0.000000e+00> : vector<112x4xf32>
    %290 = tpu.matmul %287, %289, %cst_433 {dimension_numbers = #tpu.dot_dimension_numbers<[1], [0], [0], [1], [0, 0, 1, 1], [], []>} : vector<112x4xf32>, vector<4x4xf32>, vector<112x4xf32> -> vector<112x4xf32>
    %291 = arith.addf %285, %290 : vector<112x4xf32>
    %c0_434 = arith.constant 0 : index
    %c0_435 = arith.constant 0 : index
    %c90 = arith.constant 90 : index
    %c0_436 = arith.constant 0 : index
    %292 = vector.load %arg3[%c0_434, %c0_435, %c90, %c0_436] : memref<1x1x202x4xf32, #tpu.memory_space<vmem>>, vector<1x1x112x4xf32>
    %293 = vector.shape_cast %292 : vector<1x1x112x4xf32> to vector<112x4xf32>
    %c0_437 = arith.constant 0 : index
    %c6_438 = arith.constant 6 : index
    %c6_439 = arith.constant 6 : index
    %c0_440 = arith.constant 0 : index
    %c0_441 = arith.constant 0 : index
    %294 = vector.load %arg4[%c0_437, %c6_438, %c6_439, %c0_440, %c0_441] : memref<1x7x7x4x4xf32, #tpu.memory_space<vmem>>, vector<1x1x1x4x4xf32>
    %295 = vector.shape_cast %294 : vector<1x1x1x4x4xf32> to vector<4x4xf32>
    %cst_442 = arith.constant dense<0.000000e+00> : vector<112x4xf32>
    %296 = tpu.matmul %293, %295, %cst_442 {dimension_numbers = #tpu.dot_dimension_numbers<[1], [0], [0], [1], [0, 0, 1, 1], [], []>} : vector<112x4xf32>, vector<4x4xf32>, vector<112x4xf32> -> vector<112x4xf32>
    %297 = arith.addf %291, %296 : vector<112x4xf32>
    %c0_443 = arith.constant 0 : index
    %c0_444 = arith.constant 0 : index
    %298 = vector.load %arg7[%c0_443, %c0_444] : memref<112x4xf32, #tpu.memory_space<vmem>>, vector<112x4xf32>
    tpu.vector_store %arg7[%c0_443, %c0_444], %297 {strides = array<i32>} : memref<112x4xf32, #tpu.memory_space<vmem>>, vector<112x4xf32>,
    %c6_i32 = arith.constant 6 : i32
    %299 = arith.cmpi eq, %arg2, %c6_i32 : i32
    %300 = arith.extui %299 : i1 to i32
    %c0_i32_445 = arith.constant 0 : i32
    %301 = arith.cmpi ne, %300, %c0_i32_445 : i32
    scf.if %301 {
      %c0_446 = arith.constant 0 : index
      %c0_447 = arith.constant 0 : index
      %302 = vector.load %arg5[%c0_446, %c0_447] : memref<1x4xf32, #tpu.memory_space<vmem>>, vector<1x4xf32>
      %303 = vector.broadcast %302 : vector<1x4xf32> to vector<112x4xf32>
      %304 = arith.addf %297, %303 : vector<112x4xf32>
      %cst_448 = arith.constant 0.000000e+00 : f32
      %305 = vector.broadcast %cst_448 : f32 to vector<112x4xf32>
      %306 = arith.maximumf %304, %305 : vector<112x4xf32>
      %c0_449 = arith.constant 0 : index
      %c0_450 = arith.constant 0 : index
      %c0_451 = arith.constant 0 : index
      %c0_452 = arith.constant 0 : index
      %307 = vector.load %arg6[%c0_449, %c0_450, %c0_451, %c0_452] : memref<1x1x112x4xf32, #tpu.memory_space<vmem>>, vector<1x1x112x4xf32>
      %308 = vector.shape_cast %307 : vector<1x1x112x4xf32> to vector<112x4xf32>
      %309 = vector.shape_cast %306 : vector<112x4xf32> to vector<1x1x112x4xf32>
      tpu.vector_store %arg6[%c0_449, %c0_450, %c0_451, %c0_452], %309 {strides = array<i32>} : memref<1x1x112x4xf32, #tpu.memory_space<vmem>>, vector<1x1x112x4xf32>,
    } else {
    }
    return
  }
  func.func @transform_0(%arg0: i32, %arg1: i32, %arg2: i32) -> (i32, i32, i32, i32) {
    %0 = arith.addi %arg1, %arg2 : i32
    %c0_i32 = arith.constant 0 : i32
    %c0_i32_0 = arith.constant 0 : i32
    %c0_i32_1 = arith.constant 0 : i32
    return %arg0, %0, %c0_i32, %c0_i32_0 : i32, i32, i32, i32
  }
  func.func @transform_1(%arg0: i32, %arg1: i32, %arg2: i32) -> (i32, i32, i32, i32, i32) {
    %c0_i32 = arith.constant 0 : i32
    %c0_i32_0 = arith.constant 0 : i32
    %c0_i32_1 = arith.constant 0 : i32
    %c0_i32_2 = arith.constant 0 : i32
    %c0_i32_3 = arith.constant 0 : i32
    return %arg2, %c0_i32, %c0_i32_0, %c0_i32_1, %c0_i32_2 : i32, i32, i32, i32, i32
  }
  func.func @transform_2(%arg0: i32, %arg1: i32, %arg2: i32) -> (i32, i32) {
    %c0_i32 = arith.constant 0 : i32
    %c0_i32_0 = arith.constant 0 : i32
    %c0_i32_1 = arith.constant 0 : i32
    return %c0_i32, %c0_i32_0 : i32, i32
  }
  func.func @transform_3(%arg0: i32, %arg1: i32, %arg2: i32) -> (i32, i32, i32, i32) {
    %c0_i32 = arith.constant 0 : i32
    %c0_i32_0 = arith.constant 0 : i32
    %c0_i32_1 = arith.constant 0 : i32
    return %arg0, %arg1, %c0_i32, %c0_i32_0 : i32, i32, i32, i32
  }
}

module attributes {stable_mosaic.version = 11 : i64} {
  func.func @_conv_implicit_gemm_kernel(%arg0: i32, %arg1: i32, %arg2: i32, %arg3: memref<1x1x148x4xf32, #tpu.memory_space<vmem>>, %arg4: memref<1x5x5x4x4xf32, #tpu.memory_space<vmem>>, %arg5: memref<1x4xf32, #tpu.memory_space<vmem>>, %arg6: memref<1x1x96x4xf32, #tpu.memory_space<vmem>>, %arg7: memref<96x4xf32, #tpu.memory_space<vmem>>) attributes {dimension_semantics = [#tpu.dimension_semantics<parallel>, #tpu.dimension_semantics<parallel>, #tpu.dimension_semantics<arbitrary>], iteration_bounds = array<i64: 2, 8, 5>, scalar_prefetch = 0 : i64, scratch_operands = 1 : i64, tpu.core_type = #tpu.core_type<tc>, window_params = [{transform_indices = @transform_0, window_bounds = array<i64: 1, 1, 148, 4>}, {transform_indices = @transform_1, window_bounds = array<i64: 1, 5, 5, 4, 4>}, {pipeline_mode = #tpu.pipeline_mode<synchronous>, transform_indices = @transform_2, window_bounds = array<i64: 1, 4>}, {transform_indices = @transform_3, window_bounds = array<i64: 1, 1, 96, 4>}]} {
    %c0_i32 = arith.constant 0 : i32
    %0 = arith.cmpi eq, %arg2, %c0_i32 : i32
    %1 = arith.extui %0 : i1 to i32
    %c0_i32_0 = arith.constant 0 : i32
    %2 = arith.cmpi ne, %1, %c0_i32_0 : i32
    scf.if %2 {
      %cst_230 = arith.constant 0.000000e+00 : f32
      %158 = vector.broadcast %cst_230 : f32 to vector<96x4xf32>
      %c0_231 = arith.constant 0 : index
      %c0_232 = arith.constant 0 : index
      %159 = vector.load %arg7[%c0_231, %c0_232] : memref<96x4xf32, #tpu.memory_space<vmem>>, vector<96x4xf32>
      tpu.vector_store %arg7[%c0_231, %c0_232], %158 {strides = array<i32>} : memref<96x4xf32, #tpu.memory_space<vmem>>, vector<96x4xf32>,
    } else {
    }
    %c0 = arith.constant 0 : index
    %c0_1 = arith.constant 0 : index
    %3 = vector.load %arg7[%c0, %c0_1] : memref<96x4xf32, #tpu.memory_space<vmem>>, vector<96x4xf32>
    %c0_2 = arith.constant 0 : index
    %c0_3 = arith.constant 0 : index
    %c0_4 = arith.constant 0 : index
    %c0_5 = arith.constant 0 : index
    %4 = vector.load %arg3[%c0_2, %c0_3, %c0_4, %c0_5] : memref<1x1x148x4xf32, #tpu.memory_space<vmem>>, vector<1x1x96x4xf32>
    %5 = vector.shape_cast %4 : vector<1x1x96x4xf32> to vector<96x4xf32>
    %c0_6 = arith.constant 0 : index
    %c0_7 = arith.constant 0 : index
    %c0_8 = arith.constant 0 : index
    %c0_9 = arith.constant 0 : index
    %c0_10 = arith.constant 0 : index
    %6 = vector.load %arg4[%c0_6, %c0_7, %c0_8, %c0_9, %c0_10] : memref<1x5x5x4x4xf32, #tpu.memory_space<vmem>>, vector<1x1x1x4x4xf32>
    %7 = vector.shape_cast %6 : vector<1x1x1x4x4xf32> to vector<4x4xf32>
    %cst = arith.constant dense<0.000000e+00> : vector<96x4xf32>
    %8 = tpu.matmul %5, %7, %cst {dimension_numbers = #tpu.dot_dimension_numbers<[1], [0], [0], [1], [0, 0, 1, 1], [], []>} : vector<96x4xf32>, vector<4x4xf32>, vector<96x4xf32> -> vector<96x4xf32>
    %9 = arith.addf %3, %8 : vector<96x4xf32>
    %c0_11 = arith.constant 0 : index
    %c0_12 = arith.constant 0 : index
    %c1 = arith.constant 1 : index
    %c0_13 = arith.constant 0 : index
    %10 = vector.load %arg3[%c0_11, %c0_12, %c1, %c0_13] : memref<1x1x148x4xf32, #tpu.memory_space<vmem>>, vector<1x1x96x4xf32>
    %11 = vector.shape_cast %10 : vector<1x1x96x4xf32> to vector<96x4xf32>
    %c0_14 = arith.constant 0 : index
    %c0_15 = arith.constant 0 : index
    %c1_16 = arith.constant 1 : index
    %c0_17 = arith.constant 0 : index
    %c0_18 = arith.constant 0 : index
    %12 = vector.load %arg4[%c0_14, %c0_15, %c1_16, %c0_17, %c0_18] : memref<1x5x5x4x4xf32, #tpu.memory_space<vmem>>, vector<1x1x1x4x4xf32>
    %13 = vector.shape_cast %12 : vector<1x1x1x4x4xf32> to vector<4x4xf32>
    %cst_19 = arith.constant dense<0.000000e+00> : vector<96x4xf32>
    %14 = tpu.matmul %11, %13, %cst_19 {dimension_numbers = #tpu.dot_dimension_numbers<[1], [0], [0], [1], [0, 0, 1, 1], [], []>} : vector<96x4xf32>, vector<4x4xf32>, vector<96x4xf32> -> vector<96x4xf32>
    %15 = arith.addf %9, %14 : vector<96x4xf32>
    %c0_20 = arith.constant 0 : index
    %c0_21 = arith.constant 0 : index
    %c2 = arith.constant 2 : index
    %c0_22 = arith.constant 0 : index
    %16 = vector.load %arg3[%c0_20, %c0_21, %c2, %c0_22] : memref<1x1x148x4xf32, #tpu.memory_space<vmem>>, vector<1x1x96x4xf32>
    %17 = vector.shape_cast %16 : vector<1x1x96x4xf32> to vector<96x4xf32>
    %c0_23 = arith.constant 0 : index
    %c0_24 = arith.constant 0 : index
    %c2_25 = arith.constant 2 : index
    %c0_26 = arith.constant 0 : index
    %c0_27 = arith.constant 0 : index
    %18 = vector.load %arg4[%c0_23, %c0_24, %c2_25, %c0_26, %c0_27] : memref<1x5x5x4x4xf32, #tpu.memory_space<vmem>>, vector<1x1x1x4x4xf32>
    %19 = vector.shape_cast %18 : vector<1x1x1x4x4xf32> to vector<4x4xf32>
    %cst_28 = arith.constant dense<0.000000e+00> : vector<96x4xf32>
    %20 = tpu.matmul %17, %19, %cst_28 {dimension_numbers = #tpu.dot_dimension_numbers<[1], [0], [0], [1], [0, 0, 1, 1], [], []>} : vector<96x4xf32>, vector<4x4xf32>, vector<96x4xf32> -> vector<96x4xf32>
    %21 = arith.addf %15, %20 : vector<96x4xf32>
    %c0_29 = arith.constant 0 : index
    %c0_30 = arith.constant 0 : index
    %c3 = arith.constant 3 : index
    %c0_31 = arith.constant 0 : index
    %22 = vector.load %arg3[%c0_29, %c0_30, %c3, %c0_31] : memref<1x1x148x4xf32, #tpu.memory_space<vmem>>, vector<1x1x96x4xf32>
    %23 = vector.shape_cast %22 : vector<1x1x96x4xf32> to vector<96x4xf32>
    %c0_32 = arith.constant 0 : index
    %c0_33 = arith.constant 0 : index
    %c3_34 = arith.constant 3 : index
    %c0_35 = arith.constant 0 : index
    %c0_36 = arith.constant 0 : index
    %24 = vector.load %arg4[%c0_32, %c0_33, %c3_34, %c0_35, %c0_36] : memref<1x5x5x4x4xf32, #tpu.memory_space<vmem>>, vector<1x1x1x4x4xf32>
    %25 = vector.shape_cast %24 : vector<1x1x1x4x4xf32> to vector<4x4xf32>
    %cst_37 = arith.constant dense<0.000000e+00> : vector<96x4xf32>
    %26 = tpu.matmul %23, %25, %cst_37 {dimension_numbers = #tpu.dot_dimension_numbers<[1], [0], [0], [1], [0, 0, 1, 1], [], []>} : vector<96x4xf32>, vector<4x4xf32>, vector<96x4xf32> -> vector<96x4xf32>
    %27 = arith.addf %21, %26 : vector<96x4xf32>
    %c0_38 = arith.constant 0 : index
    %c0_39 = arith.constant 0 : index
    %c4 = arith.constant 4 : index
    %c0_40 = arith.constant 0 : index
    %28 = vector.load %arg3[%c0_38, %c0_39, %c4, %c0_40] : memref<1x1x148x4xf32, #tpu.memory_space<vmem>>, vector<1x1x96x4xf32>
    %29 = vector.shape_cast %28 : vector<1x1x96x4xf32> to vector<96x4xf32>
    %c0_41 = arith.constant 0 : index
    %c0_42 = arith.constant 0 : index
    %c4_43 = arith.constant 4 : index
    %c0_44 = arith.constant 0 : index
    %c0_45 = arith.constant 0 : index
    %30 = vector.load %arg4[%c0_41, %c0_42, %c4_43, %c0_44, %c0_45] : memref<1x5x5x4x4xf32, #tpu.memory_space<vmem>>, vector<1x1x1x4x4xf32>
    %31 = vector.shape_cast %30 : vector<1x1x1x4x4xf32> to vector<4x4xf32>
    %cst_46 = arith.constant dense<0.000000e+00> : vector<96x4xf32>
    %32 = tpu.matmul %29, %31, %cst_46 {dimension_numbers = #tpu.dot_dimension_numbers<[1], [0], [0], [1], [0, 0, 1, 1], [], []>} : vector<96x4xf32>, vector<4x4xf32>, vector<96x4xf32> -> vector<96x4xf32>
    %33 = arith.addf %27, %32 : vector<96x4xf32>
    %c0_47 = arith.constant 0 : index
    %c0_48 = arith.constant 0 : index
    %c12 = arith.constant 12 : index
    %c0_49 = arith.constant 0 : index
    %34 = vector.load %arg3[%c0_47, %c0_48, %c12, %c0_49] : memref<1x1x148x4xf32, #tpu.memory_space<vmem>>, vector<1x1x96x4xf32>
    %35 = vector.shape_cast %34 : vector<1x1x96x4xf32> to vector<96x4xf32>
    %c0_50 = arith.constant 0 : index
    %c1_51 = arith.constant 1 : index
    %c0_52 = arith.constant 0 : index
    %c0_53 = arith.constant 0 : index
    %c0_54 = arith.constant 0 : index
    %36 = vector.load %arg4[%c0_50, %c1_51, %c0_52, %c0_53, %c0_54] : memref<1x5x5x4x4xf32, #tpu.memory_space<vmem>>, vector<1x1x1x4x4xf32>
    %37 = vector.shape_cast %36 : vector<1x1x1x4x4xf32> to vector<4x4xf32>
    %cst_55 = arith.constant dense<0.000000e+00> : vector<96x4xf32>
    %38 = tpu.matmul %35, %37, %cst_55 {dimension_numbers = #tpu.dot_dimension_numbers<[1], [0], [0], [1], [0, 0, 1, 1], [], []>} : vector<96x4xf32>, vector<4x4xf32>, vector<96x4xf32> -> vector<96x4xf32>
    %39 = arith.addf %33, %38 : vector<96x4xf32>
    %c0_56 = arith.constant 0 : index
    %c0_57 = arith.constant 0 : index
    %c13 = arith.constant 13 : index
    %c0_58 = arith.constant 0 : index
    %40 = vector.load %arg3[%c0_56, %c0_57, %c13, %c0_58] : memref<1x1x148x4xf32, #tpu.memory_space<vmem>>, vector<1x1x96x4xf32>
    %41 = vector.shape_cast %40 : vector<1x1x96x4xf32> to vector<96x4xf32>
    %c0_59 = arith.constant 0 : index
    %c1_60 = arith.constant 1 : index
    %c1_61 = arith.constant 1 : index
    %c0_62 = arith.constant 0 : index
    %c0_63 = arith.constant 0 : index
    %42 = vector.load %arg4[%c0_59, %c1_60, %c1_61, %c0_62, %c0_63] : memref<1x5x5x4x4xf32, #tpu.memory_space<vmem>>, vector<1x1x1x4x4xf32>
    %43 = vector.shape_cast %42 : vector<1x1x1x4x4xf32> to vector<4x4xf32>
    %cst_64 = arith.constant dense<0.000000e+00> : vector<96x4xf32>
    %44 = tpu.matmul %41, %43, %cst_64 {dimension_numbers = #tpu.dot_dimension_numbers<[1], [0], [0], [1], [0, 0, 1, 1], [], []>} : vector<96x4xf32>, vector<4x4xf32>, vector<96x4xf32> -> vector<96x4xf32>
    %45 = arith.addf %39, %44 : vector<96x4xf32>
    %c0_65 = arith.constant 0 : index
    %c0_66 = arith.constant 0 : index
    %c14 = arith.constant 14 : index
    %c0_67 = arith.constant 0 : index
    %46 = vector.load %arg3[%c0_65, %c0_66, %c14, %c0_67] : memref<1x1x148x4xf32, #tpu.memory_space<vmem>>, vector<1x1x96x4xf32>
    %47 = vector.shape_cast %46 : vector<1x1x96x4xf32> to vector<96x4xf32>
    %c0_68 = arith.constant 0 : index
    %c1_69 = arith.constant 1 : index
    %c2_70 = arith.constant 2 : index
    %c0_71 = arith.constant 0 : index
    %c0_72 = arith.constant 0 : index
    %48 = vector.load %arg4[%c0_68, %c1_69, %c2_70, %c0_71, %c0_72] : memref<1x5x5x4x4xf32, #tpu.memory_space<vmem>>, vector<1x1x1x4x4xf32>
    %49 = vector.shape_cast %48 : vector<1x1x1x4x4xf32> to vector<4x4xf32>
    %cst_73 = arith.constant dense<0.000000e+00> : vector<96x4xf32>
    %50 = tpu.matmul %47, %49, %cst_73 {dimension_numbers = #tpu.dot_dimension_numbers<[1], [0], [0], [1], [0, 0, 1, 1], [], []>} : vector<96x4xf32>, vector<4x4xf32>, vector<96x4xf32> -> vector<96x4xf32>
    %51 = arith.addf %45, %50 : vector<96x4xf32>
    %c0_74 = arith.constant 0 : index
    %c0_75 = arith.constant 0 : index
    %c15 = arith.constant 15 : index
    %c0_76 = arith.constant 0 : index
    %52 = vector.load %arg3[%c0_74, %c0_75, %c15, %c0_76] : memref<1x1x148x4xf32, #tpu.memory_space<vmem>>, vector<1x1x96x4xf32>
    %53 = vector.shape_cast %52 : vector<1x1x96x4xf32> to vector<96x4xf32>
    %c0_77 = arith.constant 0 : index
    %c1_78 = arith.constant 1 : index
    %c3_79 = arith.constant 3 : index
    %c0_80 = arith.constant 0 : index
    %c0_81 = arith.constant 0 : index
    %54 = vector.load %arg4[%c0_77, %c1_78, %c3_79, %c0_80, %c0_81] : memref<1x5x5x4x4xf32, #tpu.memory_space<vmem>>, vector<1x1x1x4x4xf32>
    %55 = vector.shape_cast %54 : vector<1x1x1x4x4xf32> to vector<4x4xf32>
    %cst_82 = arith.constant dense<0.000000e+00> : vector<96x4xf32>
    %56 = tpu.matmul %53, %55, %cst_82 {dimension_numbers = #tpu.dot_dimension_numbers<[1], [0], [0], [1], [0, 0, 1, 1], [], []>} : vector<96x4xf32>, vector<4x4xf32>, vector<96x4xf32> -> vector<96x4xf32>
    %57 = arith.addf %51, %56 : vector<96x4xf32>
    %c0_83 = arith.constant 0 : index
    %c0_84 = arith.constant 0 : index
    %c16 = arith.constant 16 : index
    %c0_85 = arith.constant 0 : index
    %58 = vector.load %arg3[%c0_83, %c0_84, %c16, %c0_85] : memref<1x1x148x4xf32, #tpu.memory_space<vmem>>, vector<1x1x96x4xf32>
    %59 = vector.shape_cast %58 : vector<1x1x96x4xf32> to vector<96x4xf32>
    %c0_86 = arith.constant 0 : index
    %c1_87 = arith.constant 1 : index
    %c4_88 = arith.constant 4 : index
    %c0_89 = arith.constant 0 : index
    %c0_90 = arith.constant 0 : index
    %60 = vector.load %arg4[%c0_86, %c1_87, %c4_88, %c0_89, %c0_90] : memref<1x5x5x4x4xf32, #tpu.memory_space<vmem>>, vector<1x1x1x4x4xf32>
    %61 = vector.shape_cast %60 : vector<1x1x1x4x4xf32> to vector<4x4xf32>
    %cst_91 = arith.constant dense<0.000000e+00> : vector<96x4xf32>
    %62 = tpu.matmul %59, %61, %cst_91 {dimension_numbers = #tpu.dot_dimension_numbers<[1], [0], [0], [1], [0, 0, 1, 1], [], []>} : vector<96x4xf32>, vector<4x4xf32>, vector<96x4xf32> -> vector<96x4xf32>
    %63 = arith.addf %57, %62 : vector<96x4xf32>
    %c0_92 = arith.constant 0 : index
    %c0_93 = arith.constant 0 : index
    %c24 = arith.constant 24 : index
    %c0_94 = arith.constant 0 : index
    %64 = vector.load %arg3[%c0_92, %c0_93, %c24, %c0_94] : memref<1x1x148x4xf32, #tpu.memory_space<vmem>>, vector<1x1x96x4xf32>
    %65 = vector.shape_cast %64 : vector<1x1x96x4xf32> to vector<96x4xf32>
    %c0_95 = arith.constant 0 : index
    %c2_96 = arith.constant 2 : index
    %c0_97 = arith.constant 0 : index
    %c0_98 = arith.constant 0 : index
    %c0_99 = arith.constant 0 : index
    %66 = vector.load %arg4[%c0_95, %c2_96, %c0_97, %c0_98, %c0_99] : memref<1x5x5x4x4xf32, #tpu.memory_space<vmem>>, vector<1x1x1x4x4xf32>
    %67 = vector.shape_cast %66 : vector<1x1x1x4x4xf32> to vector<4x4xf32>
    %cst_100 = arith.constant dense<0.000000e+00> : vector<96x4xf32>
    %68 = tpu.matmul %65, %67, %cst_100 {dimension_numbers = #tpu.dot_dimension_numbers<[1], [0], [0], [1], [0, 0, 1, 1], [], []>} : vector<96x4xf32>, vector<4x4xf32>, vector<96x4xf32> -> vector<96x4xf32>
    %69 = arith.addf %63, %68 : vector<96x4xf32>
    %c0_101 = arith.constant 0 : index
    %c0_102 = arith.constant 0 : index
    %c25 = arith.constant 25 : index
    %c0_103 = arith.constant 0 : index
    %70 = vector.load %arg3[%c0_101, %c0_102, %c25, %c0_103] : memref<1x1x148x4xf32, #tpu.memory_space<vmem>>, vector<1x1x96x4xf32>
    %71 = vector.shape_cast %70 : vector<1x1x96x4xf32> to vector<96x4xf32>
    %c0_104 = arith.constant 0 : index
    %c2_105 = arith.constant 2 : index
    %c1_106 = arith.constant 1 : index
    %c0_107 = arith.constant 0 : index
    %c0_108 = arith.constant 0 : index
    %72 = vector.load %arg4[%c0_104, %c2_105, %c1_106, %c0_107, %c0_108] : memref<1x5x5x4x4xf32, #tpu.memory_space<vmem>>, vector<1x1x1x4x4xf32>
    %73 = vector.shape_cast %72 : vector<1x1x1x4x4xf32> to vector<4x4xf32>
    %cst_109 = arith.constant dense<0.000000e+00> : vector<96x4xf32>
    %74 = tpu.matmul %71, %73, %cst_109 {dimension_numbers = #tpu.dot_dimension_numbers<[1], [0], [0], [1], [0, 0, 1, 1], [], []>} : vector<96x4xf32>, vector<4x4xf32>, vector<96x4xf32> -> vector<96x4xf32>
    %75 = arith.addf %69, %74 : vector<96x4xf32>
    %c0_110 = arith.constant 0 : index
    %c0_111 = arith.constant 0 : index
    %c26 = arith.constant 26 : index
    %c0_112 = arith.constant 0 : index
    %76 = vector.load %arg3[%c0_110, %c0_111, %c26, %c0_112] : memref<1x1x148x4xf32, #tpu.memory_space<vmem>>, vector<1x1x96x4xf32>
    %77 = vector.shape_cast %76 : vector<1x1x96x4xf32> to vector<96x4xf32>
    %c0_113 = arith.constant 0 : index
    %c2_114 = arith.constant 2 : index
    %c2_115 = arith.constant 2 : index
    %c0_116 = arith.constant 0 : index
    %c0_117 = arith.constant 0 : index
    %78 = vector.load %arg4[%c0_113, %c2_114, %c2_115, %c0_116, %c0_117] : memref<1x5x5x4x4xf32, #tpu.memory_space<vmem>>, vector<1x1x1x4x4xf32>
    %79 = vector.shape_cast %78 : vector<1x1x1x4x4xf32> to vector<4x4xf32>
    %cst_118 = arith.constant dense<0.000000e+00> : vector<96x4xf32>
    %80 = tpu.matmul %77, %79, %cst_118 {dimension_numbers = #tpu.dot_dimension_numbers<[1], [0], [0], [1], [0, 0, 1, 1], [], []>} : vector<96x4xf32>, vector<4x4xf32>, vector<96x4xf32> -> vector<96x4xf32>
    %81 = arith.addf %75, %80 : vector<96x4xf32>
    %c0_119 = arith.constant 0 : index
    %c0_120 = arith.constant 0 : index
    %c27 = arith.constant 27 : index
    %c0_121 = arith.constant 0 : index
    %82 = vector.load %arg3[%c0_119, %c0_120, %c27, %c0_121] : memref<1x1x148x4xf32, #tpu.memory_space<vmem>>, vector<1x1x96x4xf32>
    %83 = vector.shape_cast %82 : vector<1x1x96x4xf32> to vector<96x4xf32>
    %c0_122 = arith.constant 0 : index
    %c2_123 = arith.constant 2 : index
    %c3_124 = arith.constant 3 : index
    %c0_125 = arith.constant 0 : index
    %c0_126 = arith.constant 0 : index
    %84 = vector.load %arg4[%c0_122, %c2_123, %c3_124, %c0_125, %c0_126] : memref<1x5x5x4x4xf32, #tpu.memory_space<vmem>>, vector<1x1x1x4x4xf32>
    %85 = vector.shape_cast %84 : vector<1x1x1x4x4xf32> to vector<4x4xf32>
    %cst_127 = arith.constant dense<0.000000e+00> : vector<96x4xf32>
    %86 = tpu.matmul %83, %85, %cst_127 {dimension_numbers = #tpu.dot_dimension_numbers<[1], [0], [0], [1], [0, 0, 1, 1], [], []>} : vector<96x4xf32>, vector<4x4xf32>, vector<96x4xf32> -> vector<96x4xf32>
    %87 = arith.addf %81, %86 : vector<96x4xf32>
    %c0_128 = arith.constant 0 : index
    %c0_129 = arith.constant 0 : index
    %c28 = arith.constant 28 : index
    %c0_130 = arith.constant 0 : index
    %88 = vector.load %arg3[%c0_128, %c0_129, %c28, %c0_130] : memref<1x1x148x4xf32, #tpu.memory_space<vmem>>, vector<1x1x96x4xf32>
    %89 = vector.shape_cast %88 : vector<1x1x96x4xf32> to vector<96x4xf32>
    %c0_131 = arith.constant 0 : index
    %c2_132 = arith.constant 2 : index
    %c4_133 = arith.constant 4 : index
    %c0_134 = arith.constant 0 : index
    %c0_135 = arith.constant 0 : index
    %90 = vector.load %arg4[%c0_131, %c2_132, %c4_133, %c0_134, %c0_135] : memref<1x5x5x4x4xf32, #tpu.memory_space<vmem>>, vector<1x1x1x4x4xf32>
    %91 = vector.shape_cast %90 : vector<1x1x1x4x4xf32> to vector<4x4xf32>
    %cst_136 = arith.constant dense<0.000000e+00> : vector<96x4xf32>
    %92 = tpu.matmul %89, %91, %cst_136 {dimension_numbers = #tpu.dot_dimension_numbers<[1], [0], [0], [1], [0, 0, 1, 1], [], []>} : vector<96x4xf32>, vector<4x4xf32>, vector<96x4xf32> -> vector<96x4xf32>
    %93 = arith.addf %87, %92 : vector<96x4xf32>
    %c0_137 = arith.constant 0 : index
    %c0_138 = arith.constant 0 : index
    %c36 = arith.constant 36 : index
    %c0_139 = arith.constant 0 : index
    %94 = vector.load %arg3[%c0_137, %c0_138, %c36, %c0_139] : memref<1x1x148x4xf32, #tpu.memory_space<vmem>>, vector<1x1x96x4xf32>
    %95 = vector.shape_cast %94 : vector<1x1x96x4xf32> to vector<96x4xf32>
    %c0_140 = arith.constant 0 : index
    %c3_141 = arith.constant 3 : index
    %c0_142 = arith.constant 0 : index
    %c0_143 = arith.constant 0 : index
    %c0_144 = arith.constant 0 : index
    %96 = vector.load %arg4[%c0_140, %c3_141, %c0_142, %c0_143, %c0_144] : memref<1x5x5x4x4xf32, #tpu.memory_space<vmem>>, vector<1x1x1x4x4xf32>
    %97 = vector.shape_cast %96 : vector<1x1x1x4x4xf32> to vector<4x4xf32>
    %cst_145 = arith.constant dense<0.000000e+00> : vector<96x4xf32>
    %98 = tpu.matmul %95, %97, %cst_145 {dimension_numbers = #tpu.dot_dimension_numbers<[1], [0], [0], [1], [0, 0, 1, 1], [], []>} : vector<96x4xf32>, vector<4x4xf32>, vector<96x4xf32> -> vector<96x4xf32>
    %99 = arith.addf %93, %98 : vector<96x4xf32>
    %c0_146 = arith.constant 0 : index
    %c0_147 = arith.constant 0 : index
    %c37 = arith.constant 37 : index
    %c0_148 = arith.constant 0 : index
    %100 = vector.load %arg3[%c0_146, %c0_147, %c37, %c0_148] : memref<1x1x148x4xf32, #tpu.memory_space<vmem>>, vector<1x1x96x4xf32>
    %101 = vector.shape_cast %100 : vector<1x1x96x4xf32> to vector<96x4xf32>
    %c0_149 = arith.constant 0 : index
    %c3_150 = arith.constant 3 : index
    %c1_151 = arith.constant 1 : index
    %c0_152 = arith.constant 0 : index
    %c0_153 = arith.constant 0 : index
    %102 = vector.load %arg4[%c0_149, %c3_150, %c1_151, %c0_152, %c0_153] : memref<1x5x5x4x4xf32, #tpu.memory_space<vmem>>, vector<1x1x1x4x4xf32>
    %103 = vector.shape_cast %102 : vector<1x1x1x4x4xf32> to vector<4x4xf32>
    %cst_154 = arith.constant dense<0.000000e+00> : vector<96x4xf32>
    %104 = tpu.matmul %101, %103, %cst_154 {dimension_numbers = #tpu.dot_dimension_numbers<[1], [0], [0], [1], [0, 0, 1, 1], [], []>} : vector<96x4xf32>, vector<4x4xf32>, vector<96x4xf32> -> vector<96x4xf32>
    %105 = arith.addf %99, %104 : vector<96x4xf32>
    %c0_155 = arith.constant 0 : index
    %c0_156 = arith.constant 0 : index
    %c38 = arith.constant 38 : index
    %c0_157 = arith.constant 0 : index
    %106 = vector.load %arg3[%c0_155, %c0_156, %c38, %c0_157] : memref<1x1x148x4xf32, #tpu.memory_space<vmem>>, vector<1x1x96x4xf32>
    %107 = vector.shape_cast %106 : vector<1x1x96x4xf32> to vector<96x4xf32>
    %c0_158 = arith.constant 0 : index
    %c3_159 = arith.constant 3 : index
    %c2_160 = arith.constant 2 : index
    %c0_161 = arith.constant 0 : index
    %c0_162 = arith.constant 0 : index
    %108 = vector.load %arg4[%c0_158, %c3_159, %c2_160, %c0_161, %c0_162] : memref<1x5x5x4x4xf32, #tpu.memory_space<vmem>>, vector<1x1x1x4x4xf32>
    %109 = vector.shape_cast %108 : vector<1x1x1x4x4xf32> to vector<4x4xf32>
    %cst_163 = arith.constant dense<0.000000e+00> : vector<96x4xf32>
    %110 = tpu.matmul %107, %109, %cst_163 {dimension_numbers = #tpu.dot_dimension_numbers<[1], [0], [0], [1], [0, 0, 1, 1], [], []>} : vector<96x4xf32>, vector<4x4xf32>, vector<96x4xf32> -> vector<96x4xf32>
    %111 = arith.addf %105, %110 : vector<96x4xf32>
    %c0_164 = arith.constant 0 : index
    %c0_165 = arith.constant 0 : index
    %c39 = arith.constant 39 : index
    %c0_166 = arith.constant 0 : index
    %112 = vector.load %arg3[%c0_164, %c0_165, %c39, %c0_166] : memref<1x1x148x4xf32, #tpu.memory_space<vmem>>, vector<1x1x96x4xf32>
    %113 = vector.shape_cast %112 : vector<1x1x96x4xf32> to vector<96x4xf32>
    %c0_167 = arith.constant 0 : index
    %c3_168 = arith.constant 3 : index
    %c3_169 = arith.constant 3 : index
    %c0_170 = arith.constant 0 : index
    %c0_171 = arith.constant 0 : index
    %114 = vector.load %arg4[%c0_167, %c3_168, %c3_169, %c0_170, %c0_171] : memref<1x5x5x4x4xf32, #tpu.memory_space<vmem>>, vector<1x1x1x4x4xf32>
    %115 = vector.shape_cast %114 : vector<1x1x1x4x4xf32> to vector<4x4xf32>
    %cst_172 = arith.constant dense<0.000000e+00> : vector<96x4xf32>
    %116 = tpu.matmul %113, %115, %cst_172 {dimension_numbers = #tpu.dot_dimension_numbers<[1], [0], [0], [1], [0, 0, 1, 1], [], []>} : vector<96x4xf32>, vector<4x4xf32>, vector<96x4xf32> -> vector<96x4xf32>
    %117 = arith.addf %111, %116 : vector<96x4xf32>
    %c0_173 = arith.constant 0 : index
    %c0_174 = arith.constant 0 : index
    %c40 = arith.constant 40 : index
    %c0_175 = arith.constant 0 : index
    %118 = vector.load %arg3[%c0_173, %c0_174, %c40, %c0_175] : memref<1x1x148x4xf32, #tpu.memory_space<vmem>>, vector<1x1x96x4xf32>
    %119 = vector.shape_cast %118 : vector<1x1x96x4xf32> to vector<96x4xf32>
    %c0_176 = arith.constant 0 : index
    %c3_177 = arith.constant 3 : index
    %c4_178 = arith.constant 4 : index
    %c0_179 = arith.constant 0 : index
    %c0_180 = arith.constant 0 : index
    %120 = vector.load %arg4[%c0_176, %c3_177, %c4_178, %c0_179, %c0_180] : memref<1x5x5x4x4xf32, #tpu.memory_space<vmem>>, vector<1x1x1x4x4xf32>
    %121 = vector.shape_cast %120 : vector<1x1x1x4x4xf32> to vector<4x4xf32>
    %cst_181 = arith.constant dense<0.000000e+00> : vector<96x4xf32>
    %122 = tpu.matmul %119, %121, %cst_181 {dimension_numbers = #tpu.dot_dimension_numbers<[1], [0], [0], [1], [0, 0, 1, 1], [], []>} : vector<96x4xf32>, vector<4x4xf32>, vector<96x4xf32> -> vector<96x4xf32>
    %123 = arith.addf %117, %122 : vector<96x4xf32>
    %c0_182 = arith.constant 0 : index
    %c0_183 = arith.constant 0 : index
    %c48 = arith.constant 48 : index
    %c0_184 = arith.constant 0 : index
    %124 = vector.load %arg3[%c0_182, %c0_183, %c48, %c0_184] : memref<1x1x148x4xf32, #tpu.memory_space<vmem>>, vector<1x1x96x4xf32>
    %125 = vector.shape_cast %124 : vector<1x1x96x4xf32> to vector<96x4xf32>
    %c0_185 = arith.constant 0 : index
    %c4_186 = arith.constant 4 : index
    %c0_187 = arith.constant 0 : index
    %c0_188 = arith.constant 0 : index
    %c0_189 = arith.constant 0 : index
    %126 = vector.load %arg4[%c0_185, %c4_186, %c0_187, %c0_188, %c0_189] : memref<1x5x5x4x4xf32, #tpu.memory_space<vmem>>, vector<1x1x1x4x4xf32>
    %127 = vector.shape_cast %126 : vector<1x1x1x4x4xf32> to vector<4x4xf32>
    %cst_190 = arith.constant dense<0.000000e+00> : vector<96x4xf32>
    %128 = tpu.matmul %125, %127, %cst_190 {dimension_numbers = #tpu.dot_dimension_numbers<[1], [0], [0], [1], [0, 0, 1, 1], [], []>} : vector<96x4xf32>, vector<4x4xf32>, vector<96x4xf32> -> vector<96x4xf32>
    %129 = arith.addf %123, %128 : vector<96x4xf32>
    %c0_191 = arith.constant 0 : index
    %c0_192 = arith.constant 0 : index
    %c49 = arith.constant 49 : index
    %c0_193 = arith.constant 0 : index
    %130 = vector.load %arg3[%c0_191, %c0_192, %c49, %c0_193] : memref<1x1x148x4xf32, #tpu.memory_space<vmem>>, vector<1x1x96x4xf32>
    %131 = vector.shape_cast %130 : vector<1x1x96x4xf32> to vector<96x4xf32>
    %c0_194 = arith.constant 0 : index
    %c4_195 = arith.constant 4 : index
    %c1_196 = arith.constant 1 : index
    %c0_197 = arith.constant 0 : index
    %c0_198 = arith.constant 0 : index
    %132 = vector.load %arg4[%c0_194, %c4_195, %c1_196, %c0_197, %c0_198] : memref<1x5x5x4x4xf32, #tpu.memory_space<vmem>>, vector<1x1x1x4x4xf32>
    %133 = vector.shape_cast %132 : vector<1x1x1x4x4xf32> to vector<4x4xf32>
    %cst_199 = arith.constant dense<0.000000e+00> : vector<96x4xf32>
    %134 = tpu.matmul %131, %133, %cst_199 {dimension_numbers = #tpu.dot_dimension_numbers<[1], [0], [0], [1], [0, 0, 1, 1], [], []>} : vector<96x4xf32>, vector<4x4xf32>, vector<96x4xf32> -> vector<96x4xf32>
    %135 = arith.addf %129, %134 : vector<96x4xf32>
    %c0_200 = arith.constant 0 : index
    %c0_201 = arith.constant 0 : index
    %c50 = arith.constant 50 : index
    %c0_202 = arith.constant 0 : index
    %136 = vector.load %arg3[%c0_200, %c0_201, %c50, %c0_202] : memref<1x1x148x4xf32, #tpu.memory_space<vmem>>, vector<1x1x96x4xf32>
    %137 = vector.shape_cast %136 : vector<1x1x96x4xf32> to vector<96x4xf32>
    %c0_203 = arith.constant 0 : index
    %c4_204 = arith.constant 4 : index
    %c2_205 = arith.constant 2 : index
    %c0_206 = arith.constant 0 : index
    %c0_207 = arith.constant 0 : index
    %138 = vector.load %arg4[%c0_203, %c4_204, %c2_205, %c0_206, %c0_207] : memref<1x5x5x4x4xf32, #tpu.memory_space<vmem>>, vector<1x1x1x4x4xf32>
    %139 = vector.shape_cast %138 : vector<1x1x1x4x4xf32> to vector<4x4xf32>
    %cst_208 = arith.constant dense<0.000000e+00> : vector<96x4xf32>
    %140 = tpu.matmul %137, %139, %cst_208 {dimension_numbers = #tpu.dot_dimension_numbers<[1], [0], [0], [1], [0, 0, 1, 1], [], []>} : vector<96x4xf32>, vector<4x4xf32>, vector<96x4xf32> -> vector<96x4xf32>
    %141 = arith.addf %135, %140 : vector<96x4xf32>
    %c0_209 = arith.constant 0 : index
    %c0_210 = arith.constant 0 : index
    %c51 = arith.constant 51 : index
    %c0_211 = arith.constant 0 : index
    %142 = vector.load %arg3[%c0_209, %c0_210, %c51, %c0_211] : memref<1x1x148x4xf32, #tpu.memory_space<vmem>>, vector<1x1x96x4xf32>
    %143 = vector.shape_cast %142 : vector<1x1x96x4xf32> to vector<96x4xf32>
    %c0_212 = arith.constant 0 : index
    %c4_213 = arith.constant 4 : index
    %c3_214 = arith.constant 3 : index
    %c0_215 = arith.constant 0 : index
    %c0_216 = arith.constant 0 : index
    %144 = vector.load %arg4[%c0_212, %c4_213, %c3_214, %c0_215, %c0_216] : memref<1x5x5x4x4xf32, #tpu.memory_space<vmem>>, vector<1x1x1x4x4xf32>
    %145 = vector.shape_cast %144 : vector<1x1x1x4x4xf32> to vector<4x4xf32>
    %cst_217 = arith.constant dense<0.000000e+00> : vector<96x4xf32>
    %146 = tpu.matmul %143, %145, %cst_217 {dimension_numbers = #tpu.dot_dimension_numbers<[1], [0], [0], [1], [0, 0, 1, 1], [], []>} : vector<96x4xf32>, vector<4x4xf32>, vector<96x4xf32> -> vector<96x4xf32>
    %147 = arith.addf %141, %146 : vector<96x4xf32>
    %c0_218 = arith.constant 0 : index
    %c0_219 = arith.constant 0 : index
    %c52 = arith.constant 52 : index
    %c0_220 = arith.constant 0 : index
    %148 = vector.load %arg3[%c0_218, %c0_219, %c52, %c0_220] : memref<1x1x148x4xf32, #tpu.memory_space<vmem>>, vector<1x1x96x4xf32>
    %149 = vector.shape_cast %148 : vector<1x1x96x4xf32> to vector<96x4xf32>
    %c0_221 = arith.constant 0 : index
    %c4_222 = arith.constant 4 : index
    %c4_223 = arith.constant 4 : index
    %c0_224 = arith.constant 0 : index
    %c0_225 = arith.constant 0 : index
    %150 = vector.load %arg4[%c0_221, %c4_222, %c4_223, %c0_224, %c0_225] : memref<1x5x5x4x4xf32, #tpu.memory_space<vmem>>, vector<1x1x1x4x4xf32>
    %151 = vector.shape_cast %150 : vector<1x1x1x4x4xf32> to vector<4x4xf32>
    %cst_226 = arith.constant dense<0.000000e+00> : vector<96x4xf32>
    %152 = tpu.matmul %149, %151, %cst_226 {dimension_numbers = #tpu.dot_dimension_numbers<[1], [0], [0], [1], [0, 0, 1, 1], [], []>} : vector<96x4xf32>, vector<4x4xf32>, vector<96x4xf32> -> vector<96x4xf32>
    %153 = arith.addf %147, %152 : vector<96x4xf32>
    %c0_227 = arith.constant 0 : index
    %c0_228 = arith.constant 0 : index
    %154 = vector.load %arg7[%c0_227, %c0_228] : memref<96x4xf32, #tpu.memory_space<vmem>>, vector<96x4xf32>
    tpu.vector_store %arg7[%c0_227, %c0_228], %153 {strides = array<i32>} : memref<96x4xf32, #tpu.memory_space<vmem>>, vector<96x4xf32>,
    %c4_i32 = arith.constant 4 : i32
    %155 = arith.cmpi eq, %arg2, %c4_i32 : i32
    %156 = arith.extui %155 : i1 to i32
    %c0_i32_229 = arith.constant 0 : i32
    %157 = arith.cmpi ne, %156, %c0_i32_229 : i32
    scf.if %157 {
      %c0_230 = arith.constant 0 : index
      %c0_231 = arith.constant 0 : index
      %158 = vector.load %arg5[%c0_230, %c0_231] : memref<1x4xf32, #tpu.memory_space<vmem>>, vector<1x4xf32>
      %159 = vector.broadcast %158 : vector<1x4xf32> to vector<96x4xf32>
      %160 = arith.addf %153, %159 : vector<96x4xf32>
      %cst_232 = arith.constant 0.000000e+00 : f32
      %161 = vector.broadcast %cst_232 : f32 to vector<96x4xf32>
      %162 = arith.maximumf %160, %161 : vector<96x4xf32>
      %c0_233 = arith.constant 0 : index
      %c0_234 = arith.constant 0 : index
      %c0_235 = arith.constant 0 : index
      %c0_236 = arith.constant 0 : index
      %163 = vector.load %arg6[%c0_233, %c0_234, %c0_235, %c0_236] : memref<1x1x96x4xf32, #tpu.memory_space<vmem>>, vector<1x1x96x4xf32>
      %164 = vector.shape_cast %163 : vector<1x1x96x4xf32> to vector<96x4xf32>
      %165 = vector.shape_cast %162 : vector<96x4xf32> to vector<1x1x96x4xf32>
      tpu.vector_store %arg6[%c0_233, %c0_234, %c0_235, %c0_236], %165 {strides = array<i32>} : memref<1x1x96x4xf32, #tpu.memory_space<vmem>>, vector<1x1x96x4xf32>,
    } else {
    }
    return
  }
  func.func @transform_0(%arg0: i32, %arg1: i32, %arg2: i32) -> (i32, i32, i32, i32) {
    %0 = arith.addi %arg1, %arg2 : i32
    %c0_i32 = arith.constant 0 : i32
    %c0_i32_0 = arith.constant 0 : i32
    %c0_i32_1 = arith.constant 0 : i32
    return %arg0, %0, %c0_i32, %c0_i32_0 : i32, i32, i32, i32
  }
  func.func @transform_1(%arg0: i32, %arg1: i32, %arg2: i32) -> (i32, i32, i32, i32, i32) {
    %c0_i32 = arith.constant 0 : i32
    %c0_i32_0 = arith.constant 0 : i32
    %c0_i32_1 = arith.constant 0 : i32
    %c0_i32_2 = arith.constant 0 : i32
    %c0_i32_3 = arith.constant 0 : i32
    return %arg2, %c0_i32, %c0_i32_0, %c0_i32_1, %c0_i32_2 : i32, i32, i32, i32, i32
  }
  func.func @transform_2(%arg0: i32, %arg1: i32, %arg2: i32) -> (i32, i32) {
    %c0_i32 = arith.constant 0 : i32
    %c0_i32_0 = arith.constant 0 : i32
    %c0_i32_1 = arith.constant 0 : i32
    return %c0_i32, %c0_i32_0 : i32, i32
  }
  func.func @transform_3(%arg0: i32, %arg1: i32, %arg2: i32) -> (i32, i32, i32, i32) {
    %c0_i32 = arith.constant 0 : i32
    %c0_i32_0 = arith.constant 0 : i32
    %c0_i32_1 = arith.constant 0 : i32
    return %arg0, %arg1, %c0_i32, %c0_i32_0 : i32, i32, i32, i32
  }
}

module attributes {stable_mosaic.version = 11 : i64} {
  func.func @_conv_implicit_gemm_kernel(%arg0: i32, %arg1: i32, %arg2: i32, %arg3: memref<1x1x102x4xf32, #tpu.memory_space<vmem>>, %arg4: memref<1x3x3x4x8xf32, #tpu.memory_space<vmem>>, %arg5: memref<1x8xf32, #tpu.memory_space<vmem>>, %arg6: memref<1x1x80x8xf32, #tpu.memory_space<vmem>>, %arg7: memref<80x8xf32, #tpu.memory_space<vmem>>) attributes {dimension_semantics = [#tpu.dimension_semantics<parallel>, #tpu.dimension_semantics<parallel>, #tpu.dimension_semantics<arbitrary>], iteration_bounds = array<i64: 2, 8, 3>, scalar_prefetch = 0 : i64, scratch_operands = 1 : i64, tpu.core_type = #tpu.core_type<tc>, window_params = [{transform_indices = @transform_0, window_bounds = array<i64: 1, 1, 102, 4>}, {transform_indices = @transform_1, window_bounds = array<i64: 1, 3, 3, 4, 8>}, {pipeline_mode = #tpu.pipeline_mode<synchronous>, transform_indices = @transform_2, window_bounds = array<i64: 1, 8>}, {transform_indices = @transform_3, window_bounds = array<i64: 1, 1, 80, 8>}]} {
    %c0_i32 = arith.constant 0 : i32
    %0 = arith.cmpi eq, %arg2, %c0_i32 : i32
    %1 = arith.extui %0 : i1 to i32
    %c0_i32_0 = arith.constant 0 : i32
    %2 = arith.cmpi ne, %1, %c0_i32_0 : i32
    scf.if %2 {
      %cst_86 = arith.constant 0.000000e+00 : f32
      %62 = vector.broadcast %cst_86 : f32 to vector<80x8xf32>
      %c0_87 = arith.constant 0 : index
      %c0_88 = arith.constant 0 : index
      %63 = vector.load %arg7[%c0_87, %c0_88] : memref<80x8xf32, #tpu.memory_space<vmem>>, vector<80x8xf32>
      tpu.vector_store %arg7[%c0_87, %c0_88], %62 {strides = array<i32>} : memref<80x8xf32, #tpu.memory_space<vmem>>, vector<80x8xf32>,
    } else {
    }
    %c0 = arith.constant 0 : index
    %c0_1 = arith.constant 0 : index
    %3 = vector.load %arg7[%c0, %c0_1] : memref<80x8xf32, #tpu.memory_space<vmem>>, vector<80x8xf32>
    %c0_2 = arith.constant 0 : index
    %c0_3 = arith.constant 0 : index
    %c0_4 = arith.constant 0 : index
    %c0_5 = arith.constant 0 : index
    %4 = vector.load %arg3[%c0_2, %c0_3, %c0_4, %c0_5] : memref<1x1x102x4xf32, #tpu.memory_space<vmem>>, vector<1x1x80x4xf32>
    %5 = vector.shape_cast %4 : vector<1x1x80x4xf32> to vector<80x4xf32>
    %c0_6 = arith.constant 0 : index
    %c0_7 = arith.constant 0 : index
    %c0_8 = arith.constant 0 : index
    %c0_9 = arith.constant 0 : index
    %c0_10 = arith.constant 0 : index
    %6 = vector.load %arg4[%c0_6, %c0_7, %c0_8, %c0_9, %c0_10] : memref<1x3x3x4x8xf32, #tpu.memory_space<vmem>>, vector<1x1x1x4x8xf32>
    %7 = vector.shape_cast %6 : vector<1x1x1x4x8xf32> to vector<4x8xf32>
    %cst = arith.constant dense<0.000000e+00> : vector<80x8xf32>
    %8 = tpu.matmul %5, %7, %cst {dimension_numbers = #tpu.dot_dimension_numbers<[1], [0], [0], [1], [0, 0, 1, 1], [], []>} : vector<80x4xf32>, vector<4x8xf32>, vector<80x8xf32> -> vector<80x8xf32>
    %9 = arith.addf %3, %8 : vector<80x8xf32>
    %c0_11 = arith.constant 0 : index
    %c0_12 = arith.constant 0 : index
    %c1 = arith.constant 1 : index
    %c0_13 = arith.constant 0 : index
    %10 = vector.load %arg3[%c0_11, %c0_12, %c1, %c0_13] : memref<1x1x102x4xf32, #tpu.memory_space<vmem>>, vector<1x1x80x4xf32>
    %11 = vector.shape_cast %10 : vector<1x1x80x4xf32> to vector<80x4xf32>
    %c0_14 = arith.constant 0 : index
    %c0_15 = arith.constant 0 : index
    %c1_16 = arith.constant 1 : index
    %c0_17 = arith.constant 0 : index
    %c0_18 = arith.constant 0 : index
    %12 = vector.load %arg4[%c0_14, %c0_15, %c1_16, %c0_17, %c0_18] : memref<1x3x3x4x8xf32, #tpu.memory_space<vmem>>, vector<1x1x1x4x8xf32>
    %13 = vector.shape_cast %12 : vector<1x1x1x4x8xf32> to vector<4x8xf32>
    %cst_19 = arith.constant dense<0.000000e+00> : vector<80x8xf32>
    %14 = tpu.matmul %11, %13, %cst_19 {dimension_numbers = #tpu.dot_dimension_numbers<[1], [0], [0], [1], [0, 0, 1, 1], [], []>} : vector<80x4xf32>, vector<4x8xf32>, vector<80x8xf32> -> vector<80x8xf32>
    %15 = arith.addf %9, %14 : vector<80x8xf32>
    %c0_20 = arith.constant 0 : index
    %c0_21 = arith.constant 0 : index
    %c2 = arith.constant 2 : index
    %c0_22 = arith.constant 0 : index
    %16 = vector.load %arg3[%c0_20, %c0_21, %c2, %c0_22] : memref<1x1x102x4xf32, #tpu.memory_space<vmem>>, vector<1x1x80x4xf32>
    %17 = vector.shape_cast %16 : vector<1x1x80x4xf32> to vector<80x4xf32>
    %c0_23 = arith.constant 0 : index
    %c0_24 = arith.constant 0 : index
    %c2_25 = arith.constant 2 : index
    %c0_26 = arith.constant 0 : index
    %c0_27 = arith.constant 0 : index
    %18 = vector.load %arg4[%c0_23, %c0_24, %c2_25, %c0_26, %c0_27] : memref<1x3x3x4x8xf32, #tpu.memory_space<vmem>>, vector<1x1x1x4x8xf32>
    %19 = vector.shape_cast %18 : vector<1x1x1x4x8xf32> to vector<4x8xf32>
    %cst_28 = arith.constant dense<0.000000e+00> : vector<80x8xf32>
    %20 = tpu.matmul %17, %19, %cst_28 {dimension_numbers = #tpu.dot_dimension_numbers<[1], [0], [0], [1], [0, 0, 1, 1], [], []>} : vector<80x4xf32>, vector<4x8xf32>, vector<80x8xf32> -> vector<80x8xf32>
    %21 = arith.addf %15, %20 : vector<80x8xf32>
    %c0_29 = arith.constant 0 : index
    %c0_30 = arith.constant 0 : index
    %c10 = arith.constant 10 : index
    %c0_31 = arith.constant 0 : index
    %22 = vector.load %arg3[%c0_29, %c0_30, %c10, %c0_31] : memref<1x1x102x4xf32, #tpu.memory_space<vmem>>, vector<1x1x80x4xf32>
    %23 = vector.shape_cast %22 : vector<1x1x80x4xf32> to vector<80x4xf32>
    %c0_32 = arith.constant 0 : index
    %c1_33 = arith.constant 1 : index
    %c0_34 = arith.constant 0 : index
    %c0_35 = arith.constant 0 : index
    %c0_36 = arith.constant 0 : index
    %24 = vector.load %arg4[%c0_32, %c1_33, %c0_34, %c0_35, %c0_36] : memref<1x3x3x4x8xf32, #tpu.memory_space<vmem>>, vector<1x1x1x4x8xf32>
    %25 = vector.shape_cast %24 : vector<1x1x1x4x8xf32> to vector<4x8xf32>
    %cst_37 = arith.constant dense<0.000000e+00> : vector<80x8xf32>
    %26 = tpu.matmul %23, %25, %cst_37 {dimension_numbers = #tpu.dot_dimension_numbers<[1], [0], [0], [1], [0, 0, 1, 1], [], []>} : vector<80x4xf32>, vector<4x8xf32>, vector<80x8xf32> -> vector<80x8xf32>
    %27 = arith.addf %21, %26 : vector<80x8xf32>
    %c0_38 = arith.constant 0 : index
    %c0_39 = arith.constant 0 : index
    %c11 = arith.constant 11 : index
    %c0_40 = arith.constant 0 : index
    %28 = vector.load %arg3[%c0_38, %c0_39, %c11, %c0_40] : memref<1x1x102x4xf32, #tpu.memory_space<vmem>>, vector<1x1x80x4xf32>
    %29 = vector.shape_cast %28 : vector<1x1x80x4xf32> to vector<80x4xf32>
    %c0_41 = arith.constant 0 : index
    %c1_42 = arith.constant 1 : index
    %c1_43 = arith.constant 1 : index
    %c0_44 = arith.constant 0 : index
    %c0_45 = arith.constant 0 : index
    %30 = vector.load %arg4[%c0_41, %c1_42, %c1_43, %c0_44, %c0_45] : memref<1x3x3x4x8xf32, #tpu.memory_space<vmem>>, vector<1x1x1x4x8xf32>
    %31 = vector.shape_cast %30 : vector<1x1x1x4x8xf32> to vector<4x8xf32>
    %cst_46 = arith.constant dense<0.000000e+00> : vector<80x8xf32>
    %32 = tpu.matmul %29, %31, %cst_46 {dimension_numbers = #tpu.dot_dimension_numbers<[1], [0], [0], [1], [0, 0, 1, 1], [], []>} : vector<80x4xf32>, vector<4x8xf32>, vector<80x8xf32> -> vector<80x8xf32>
    %33 = arith.addf %27, %32 : vector<80x8xf32>
    %c0_47 = arith.constant 0 : index
    %c0_48 = arith.constant 0 : index
    %c12 = arith.constant 12 : index
    %c0_49 = arith.constant 0 : index
    %34 = vector.load %arg3[%c0_47, %c0_48, %c12, %c0_49] : memref<1x1x102x4xf32, #tpu.memory_space<vmem>>, vector<1x1x80x4xf32>
    %35 = vector.shape_cast %34 : vector<1x1x80x4xf32> to vector<80x4xf32>
    %c0_50 = arith.constant 0 : index
    %c1_51 = arith.constant 1 : index
    %c2_52 = arith.constant 2 : index
    %c0_53 = arith.constant 0 : index
    %c0_54 = arith.constant 0 : index
    %36 = vector.load %arg4[%c0_50, %c1_51, %c2_52, %c0_53, %c0_54] : memref<1x3x3x4x8xf32, #tpu.memory_space<vmem>>, vector<1x1x1x4x8xf32>
    %37 = vector.shape_cast %36 : vector<1x1x1x4x8xf32> to vector<4x8xf32>
    %cst_55 = arith.constant dense<0.000000e+00> : vector<80x8xf32>
    %38 = tpu.matmul %35, %37, %cst_55 {dimension_numbers = #tpu.dot_dimension_numbers<[1], [0], [0], [1], [0, 0, 1, 1], [], []>} : vector<80x4xf32>, vector<4x8xf32>, vector<80x8xf32> -> vector<80x8xf32>
    %39 = arith.addf %33, %38 : vector<80x8xf32>
    %c0_56 = arith.constant 0 : index
    %c0_57 = arith.constant 0 : index
    %c20 = arith.constant 20 : index
    %c0_58 = arith.constant 0 : index
    %40 = vector.load %arg3[%c0_56, %c0_57, %c20, %c0_58] : memref<1x1x102x4xf32, #tpu.memory_space<vmem>>, vector<1x1x80x4xf32>
    %41 = vector.shape_cast %40 : vector<1x1x80x4xf32> to vector<80x4xf32>
    %c0_59 = arith.constant 0 : index
    %c2_60 = arith.constant 2 : index
    %c0_61 = arith.constant 0 : index
    %c0_62 = arith.constant 0 : index
    %c0_63 = arith.constant 0 : index
    %42 = vector.load %arg4[%c0_59, %c2_60, %c0_61, %c0_62, %c0_63] : memref<1x3x3x4x8xf32, #tpu.memory_space<vmem>>, vector<1x1x1x4x8xf32>
    %43 = vector.shape_cast %42 : vector<1x1x1x4x8xf32> to vector<4x8xf32>
    %cst_64 = arith.constant dense<0.000000e+00> : vector<80x8xf32>
    %44 = tpu.matmul %41, %43, %cst_64 {dimension_numbers = #tpu.dot_dimension_numbers<[1], [0], [0], [1], [0, 0, 1, 1], [], []>} : vector<80x4xf32>, vector<4x8xf32>, vector<80x8xf32> -> vector<80x8xf32>
    %45 = arith.addf %39, %44 : vector<80x8xf32>
    %c0_65 = arith.constant 0 : index
    %c0_66 = arith.constant 0 : index
    %c21 = arith.constant 21 : index
    %c0_67 = arith.constant 0 : index
    %46 = vector.load %arg3[%c0_65, %c0_66, %c21, %c0_67] : memref<1x1x102x4xf32, #tpu.memory_space<vmem>>, vector<1x1x80x4xf32>
    %47 = vector.shape_cast %46 : vector<1x1x80x4xf32> to vector<80x4xf32>
    %c0_68 = arith.constant 0 : index
    %c2_69 = arith.constant 2 : index
    %c1_70 = arith.constant 1 : index
    %c0_71 = arith.constant 0 : index
    %c0_72 = arith.constant 0 : index
    %48 = vector.load %arg4[%c0_68, %c2_69, %c1_70, %c0_71, %c0_72] : memref<1x3x3x4x8xf32, #tpu.memory_space<vmem>>, vector<1x1x1x4x8xf32>
    %49 = vector.shape_cast %48 : vector<1x1x1x4x8xf32> to vector<4x8xf32>
    %cst_73 = arith.constant dense<0.000000e+00> : vector<80x8xf32>
    %50 = tpu.matmul %47, %49, %cst_73 {dimension_numbers = #tpu.dot_dimension_numbers<[1], [0], [0], [1], [0, 0, 1, 1], [], []>} : vector<80x4xf32>, vector<4x8xf32>, vector<80x8xf32> -> vector<80x8xf32>
    %51 = arith.addf %45, %50 : vector<80x8xf32>
    %c0_74 = arith.constant 0 : index
    %c0_75 = arith.constant 0 : index
    %c22 = arith.constant 22 : index
    %c0_76 = arith.constant 0 : index
    %52 = vector.load %arg3[%c0_74, %c0_75, %c22, %c0_76] : memref<1x1x102x4xf32, #tpu.memory_space<vmem>>, vector<1x1x80x4xf32>
    %53 = vector.shape_cast %52 : vector<1x1x80x4xf32> to vector<80x4xf32>
    %c0_77 = arith.constant 0 : index
    %c2_78 = arith.constant 2 : index
    %c2_79 = arith.constant 2 : index
    %c0_80 = arith.constant 0 : index
    %c0_81 = arith.constant 0 : index
    %54 = vector.load %arg4[%c0_77, %c2_78, %c2_79, %c0_80, %c0_81] : memref<1x3x3x4x8xf32, #tpu.memory_space<vmem>>, vector<1x1x1x4x8xf32>
    %55 = vector.shape_cast %54 : vector<1x1x1x4x8xf32> to vector<4x8xf32>
    %cst_82 = arith.constant dense<0.000000e+00> : vector<80x8xf32>
    %56 = tpu.matmul %53, %55, %cst_82 {dimension_numbers = #tpu.dot_dimension_numbers<[1], [0], [0], [1], [0, 0, 1, 1], [], []>} : vector<80x4xf32>, vector<4x8xf32>, vector<80x8xf32> -> vector<80x8xf32>
    %57 = arith.addf %51, %56 : vector<80x8xf32>
    %c0_83 = arith.constant 0 : index
    %c0_84 = arith.constant 0 : index
    %58 = vector.load %arg7[%c0_83, %c0_84] : memref<80x8xf32, #tpu.memory_space<vmem>>, vector<80x8xf32>
    tpu.vector_store %arg7[%c0_83, %c0_84], %57 {strides = array<i32>} : memref<80x8xf32, #tpu.memory_space<vmem>>, vector<80x8xf32>,
    %c2_i32 = arith.constant 2 : i32
    %59 = arith.cmpi eq, %arg2, %c2_i32 : i32
    %60 = arith.extui %59 : i1 to i32
    %c0_i32_85 = arith.constant 0 : i32
    %61 = arith.cmpi ne, %60, %c0_i32_85 : i32
    scf.if %61 {
      %c0_86 = arith.constant 0 : index
      %c0_87 = arith.constant 0 : index
      %62 = vector.load %arg5[%c0_86, %c0_87] : memref<1x8xf32, #tpu.memory_space<vmem>>, vector<1x8xf32>
      %63 = vector.broadcast %62 : vector<1x8xf32> to vector<80x8xf32>
      %64 = arith.addf %57, %63 : vector<80x8xf32>
      %cst_88 = arith.constant 0.000000e+00 : f32
      %65 = vector.broadcast %cst_88 : f32 to vector<80x8xf32>
      %66 = arith.maximumf %64, %65 : vector<80x8xf32>
      %c0_89 = arith.constant 0 : index
      %c0_90 = arith.constant 0 : index
      %c0_91 = arith.constant 0 : index
      %c0_92 = arith.constant 0 : index
      %67 = vector.load %arg6[%c0_89, %c0_90, %c0_91, %c0_92] : memref<1x1x80x8xf32, #tpu.memory_space<vmem>>, vector<1x1x80x8xf32>
      %68 = vector.shape_cast %67 : vector<1x1x80x8xf32> to vector<80x8xf32>
      %69 = vector.shape_cast %66 : vector<80x8xf32> to vector<1x1x80x8xf32>
      tpu.vector_store %arg6[%c0_89, %c0_90, %c0_91, %c0_92], %69 {strides = array<i32>} : memref<1x1x80x8xf32, #tpu.memory_space<vmem>>, vector<1x1x80x8xf32>,
    } else {
    }
    return
  }
  func.func @transform_0(%arg0: i32, %arg1: i32, %arg2: i32) -> (i32, i32, i32, i32) {
    %0 = arith.addi %arg1, %arg2 : i32
    %c0_i32 = arith.constant 0 : i32
    %c0_i32_0 = arith.constant 0 : i32
    %c0_i32_1 = arith.constant 0 : i32
    return %arg0, %0, %c0_i32, %c0_i32_0 : i32, i32, i32, i32
  }
  func.func @transform_1(%arg0: i32, %arg1: i32, %arg2: i32) -> (i32, i32, i32, i32, i32) {
    %c0_i32 = arith.constant 0 : i32
    %c0_i32_0 = arith.constant 0 : i32
    %c0_i32_1 = arith.constant 0 : i32
    %c0_i32_2 = arith.constant 0 : i32
    %c0_i32_3 = arith.constant 0 : i32
    return %arg2, %c0_i32, %c0_i32_0, %c0_i32_1, %c0_i32_2 : i32, i32, i32, i32, i32
  }
  func.func @transform_2(%arg0: i32, %arg1: i32, %arg2: i32) -> (i32, i32) {
    %c0_i32 = arith.constant 0 : i32
    %c0_i32_0 = arith.constant 0 : i32
    %c0_i32_1 = arith.constant 0 : i32
    return %c0_i32, %c0_i32_0 : i32, i32
  }
  func.func @transform_3(%arg0: i32, %arg1: i32, %arg2: i32) -> (i32, i32, i32, i32) {
    %c0_i32 = arith.constant 0 : i32
    %c0_i32_0 = arith.constant 0 : i32
    %c0_i32_1 = arith.constant 0 : i32
    return %arg0, %arg1, %c0_i32, %c0_i32_0 : i32, i32, i32, i32
  }
}

module attributes {stable_mosaic.version = 11 : i64} {
  func.func @_maxpool_conv1x1_kernel(%arg0: i32, %arg1: i32, %arg2: i32, %arg3: memref<1x1x102x4xf32, #tpu.memory_space<vmem>>, %arg4: memref<4x4xf32, #tpu.memory_space<vmem>>, %arg5: memref<1x4xf32, #tpu.memory_space<vmem>>, %arg6: memref<1x1x80x4xf32, #tpu.memory_space<vmem>>, %arg7: memref<80x4xf32, #tpu.memory_space<vmem>>) attributes {dimension_semantics = [#tpu.dimension_semantics<parallel>, #tpu.dimension_semantics<parallel>, #tpu.dimension_semantics<arbitrary>], iteration_bounds = array<i64: 2, 8, 3>, scalar_prefetch = 0 : i64, scratch_operands = 1 : i64, tpu.core_type = #tpu.core_type<tc>, window_params = [{transform_indices = @transform_0, window_bounds = array<i64: 1, 1, 102, 4>}, {pipeline_mode = #tpu.pipeline_mode<synchronous>, transform_indices = @transform_1, window_bounds = array<i64: 4, 4>}, {pipeline_mode = #tpu.pipeline_mode<synchronous>, transform_indices = @transform_2, window_bounds = array<i64: 1, 4>}, {transform_indices = @transform_3, window_bounds = array<i64: 1, 1, 80, 4>}]} {
    %c0_i32 = arith.constant 0 : i32
    %0 = arith.cmpi eq, %arg2, %c0_i32 : i32
    %1 = arith.extui %0 : i1 to i32
    %c0_i32_0 = arith.constant 0 : i32
    %2 = arith.cmpi ne, %1, %c0_i32_0 : i32
    scf.if %2 {
      %cst = arith.constant 0xFF800000 : f32
      %35 = vector.broadcast %cst : f32 to vector<80x4xf32>
      %c0_33 = arith.constant 0 : index
      %c0_34 = arith.constant 0 : index
      %36 = vector.load %arg7[%c0_33, %c0_34] : memref<80x4xf32, #tpu.memory_space<vmem>>, vector<80x4xf32>
      tpu.vector_store %arg7[%c0_33, %c0_34], %35 {strides = array<i32>} : memref<80x4xf32, #tpu.memory_space<vmem>>, vector<80x4xf32>,
    } else {
    }
    %c0 = arith.constant 0 : index
    %c0_1 = arith.constant 0 : index
    %c0_2 = arith.constant 0 : index
    %c0_3 = arith.constant 0 : index
    %3 = vector.load %arg3[%c0, %c0_1, %c0_2, %c0_3] : memref<1x1x102x4xf32, #tpu.memory_space<vmem>>, vector<1x1x80x4xf32>
    %4 = vector.shape_cast %3 : vector<1x1x80x4xf32> to vector<80x4xf32>
    %c0_4 = arith.constant 0 : index
    %c0_5 = arith.constant 0 : index
    %c1 = arith.constant 1 : index
    %c0_6 = arith.constant 0 : index
    %5 = vector.load %arg3[%c0_4, %c0_5, %c1, %c0_6] : memref<1x1x102x4xf32, #tpu.memory_space<vmem>>, vector<1x1x80x4xf32>
    %6 = vector.shape_cast %5 : vector<1x1x80x4xf32> to vector<80x4xf32>
    %c0_7 = arith.constant 0 : index
    %c0_8 = arith.constant 0 : index
    %c2 = arith.constant 2 : index
    %c0_9 = arith.constant 0 : index
    %7 = vector.load %arg3[%c0_7, %c0_8, %c2, %c0_9] : memref<1x1x102x4xf32, #tpu.memory_space<vmem>>, vector<1x1x80x4xf32>
    %8 = vector.shape_cast %7 : vector<1x1x80x4xf32> to vector<80x4xf32>
    %c0_10 = arith.constant 0 : index
    %c0_11 = arith.constant 0 : index
    %c10 = arith.constant 10 : index
    %c0_12 = arith.constant 0 : index
    %9 = vector.load %arg3[%c0_10, %c0_11, %c10, %c0_12] : memref<1x1x102x4xf32, #tpu.memory_space<vmem>>, vector<1x1x80x4xf32>
    %10 = vector.shape_cast %9 : vector<1x1x80x4xf32> to vector<80x4xf32>
    %c0_13 = arith.constant 0 : index
    %c0_14 = arith.constant 0 : index
    %c11 = arith.constant 11 : index
    %c0_15 = arith.constant 0 : index
    %11 = vector.load %arg3[%c0_13, %c0_14, %c11, %c0_15] : memref<1x1x102x4xf32, #tpu.memory_space<vmem>>, vector<1x1x80x4xf32>
    %12 = vector.shape_cast %11 : vector<1x1x80x4xf32> to vector<80x4xf32>
    %c0_16 = arith.constant 0 : index
    %c0_17 = arith.constant 0 : index
    %c12 = arith.constant 12 : index
    %c0_18 = arith.constant 0 : index
    %13 = vector.load %arg3[%c0_16, %c0_17, %c12, %c0_18] : memref<1x1x102x4xf32, #tpu.memory_space<vmem>>, vector<1x1x80x4xf32>
    %14 = vector.shape_cast %13 : vector<1x1x80x4xf32> to vector<80x4xf32>
    %c0_19 = arith.constant 0 : index
    %c0_20 = arith.constant 0 : index
    %c20 = arith.constant 20 : index
    %c0_21 = arith.constant 0 : index
    %15 = vector.load %arg3[%c0_19, %c0_20, %c20, %c0_21] : memref<1x1x102x4xf32, #tpu.memory_space<vmem>>, vector<1x1x80x4xf32>
    %16 = vector.shape_cast %15 : vector<1x1x80x4xf32> to vector<80x4xf32>
    %c0_22 = arith.constant 0 : index
    %c0_23 = arith.constant 0 : index
    %c21 = arith.constant 21 : index
    %c0_24 = arith.constant 0 : index
    %17 = vector.load %arg3[%c0_22, %c0_23, %c21, %c0_24] : memref<1x1x102x4xf32, #tpu.memory_space<vmem>>, vector<1x1x80x4xf32>
    %18 = vector.shape_cast %17 : vector<1x1x80x4xf32> to vector<80x4xf32>
    %c0_25 = arith.constant 0 : index
    %c0_26 = arith.constant 0 : index
    %c22 = arith.constant 22 : index
    %c0_27 = arith.constant 0 : index
    %19 = vector.load %arg3[%c0_25, %c0_26, %c22, %c0_27] : memref<1x1x102x4xf32, #tpu.memory_space<vmem>>, vector<1x1x80x4xf32>
    %20 = vector.shape_cast %19 : vector<1x1x80x4xf32> to vector<80x4xf32>
    %c0_28 = arith.constant 0 : index
    %c0_29 = arith.constant 0 : index
    %21 = vector.load %arg7[%c0_28, %c0_29] : memref<80x4xf32, #tpu.memory_space<vmem>>, vector<80x4xf32>
    %22 = arith.maximumf %4, %6 : vector<80x4xf32>
    %23 = arith.maximumf %8, %10 : vector<80x4xf32>
    %24 = arith.maximumf %12, %14 : vector<80x4xf32>
    %25 = arith.maximumf %16, %18 : vector<80x4xf32>
    %26 = arith.maximumf %22, %23 : vector<80x4xf32>
    %27 = arith.maximumf %24, %25 : vector<80x4xf32>
    %28 = arith.maximumf %26, %27 : vector<80x4xf32>
    %29 = arith.maximumf %28, %20 : vector<80x4xf32>
    %30 = arith.maximumf %21, %29 : vector<80x4xf32>
    %c0_30 = arith.constant 0 : index
    %c0_31 = arith.constant 0 : index
    %31 = vector.load %arg7[%c0_30, %c0_31] : memref<80x4xf32, #tpu.memory_space<vmem>>, vector<80x4xf32>
    tpu.vector_store %arg7[%c0_30, %c0_31], %30 {strides = array<i32>} : memref<80x4xf32, #tpu.memory_space<vmem>>, vector<80x4xf32>,
    %c2_i32 = arith.constant 2 : i32
    %32 = arith.cmpi eq, %arg2, %c2_i32 : i32
    %33 = arith.extui %32 : i1 to i32
    %c0_i32_32 = arith.constant 0 : i32
    %34 = arith.cmpi ne, %33, %c0_i32_32 : i32
    scf.if %34 {
      %c0_33 = arith.constant 0 : index
      %c0_34 = arith.constant 0 : index
      %35 = vector.load %arg7[%c0_33, %c0_34] : memref<80x4xf32, #tpu.memory_space<vmem>>, vector<80x4xf32>
      %cst = arith.constant -3.000000e+38 : f32
      %36 = vector.broadcast %cst : f32 to vector<80x4xf32>
      %37 = arith.maximumf %35, %36 : vector<80x4xf32>
      %c0_35 = arith.constant 0 : index
      %c0_36 = arith.constant 0 : index
      %38 = vector.load %arg4[%c0_35, %c0_36] : memref<4x4xf32, #tpu.memory_space<vmem>>, vector<4x4xf32>
      %cst_37 = arith.constant dense<0.000000e+00> : vector<80x4xf32>
      %39 = tpu.matmul %37, %38, %cst_37 {dimension_numbers = #tpu.dot_dimension_numbers<[1], [0], [0], [1], [0, 0, 1, 1], [], []>} : vector<80x4xf32>, vector<4x4xf32>, vector<80x4xf32> -> vector<80x4xf32>
      %c0_38 = arith.constant 0 : index
      %c0_39 = arith.constant 0 : index
      %40 = vector.load %arg5[%c0_38, %c0_39] : memref<1x4xf32, #tpu.memory_space<vmem>>, vector<1x4xf32>
      %41 = vector.broadcast %40 : vector<1x4xf32> to vector<80x4xf32>
      %42 = arith.addf %39, %41 : vector<80x4xf32>
      %cst_40 = arith.constant 0.000000e+00 : f32
      %43 = vector.broadcast %cst_40 : f32 to vector<80x4xf32>
      %44 = arith.maximumf %42, %43 : vector<80x4xf32>
      %c0_41 = arith.constant 0 : index
      %c0_42 = arith.constant 0 : index
      %c0_43 = arith.constant 0 : index
      %c0_44 = arith.constant 0 : index
      %45 = vector.load %arg6[%c0_41, %c0_42, %c0_43, %c0_44] : memref<1x1x80x4xf32, #tpu.memory_space<vmem>>, vector<1x1x80x4xf32>
      %46 = vector.shape_cast %45 : vector<1x1x80x4xf32> to vector<80x4xf32>
      %47 = vector.shape_cast %44 : vector<80x4xf32> to vector<1x1x80x4xf32>
      tpu.vector_store %arg6[%c0_41, %c0_42, %c0_43, %c0_44], %47 {strides = array<i32>} : memref<1x1x80x4xf32, #tpu.memory_space<vmem>>, vector<1x1x80x4xf32>,
    } else {
    }
    return
  }
  func.func @transform_0(%arg0: i32, %arg1: i32, %arg2: i32) -> (i32, i32, i32, i32) {
    %0 = arith.addi %arg1, %arg2 : i32
    %c0_i32 = arith.constant 0 : i32
    %c0_i32_0 = arith.constant 0 : i32
    %c0_i32_1 = arith.constant 0 : i32
    return %arg0, %0, %c0_i32, %c0_i32_0 : i32, i32, i32, i32
  }
  func.func @transform_1(%arg0: i32, %arg1: i32, %arg2: i32) -> (i32, i32) {
    %c0_i32 = arith.constant 0 : i32
    %c0_i32_0 = arith.constant 0 : i32
    %c0_i32_1 = arith.constant 0 : i32
    return %c0_i32, %c0_i32_0 : i32, i32
  }
  func.func @transform_2(%arg0: i32, %arg1: i32, %arg2: i32) -> (i32, i32) {
    %c0_i32 = arith.constant 0 : i32
    %c0_i32_0 = arith.constant 0 : i32
    %c0_i32_1 = arith.constant 0 : i32
    return %c0_i32, %c0_i32_0 : i32, i32
  }
  func.func @transform_3(%arg0: i32, %arg1: i32, %arg2: i32) -> (i32, i32, i32, i32) {
    %c0_i32 = arith.constant 0 : i32
    %c0_i32_0 = arith.constant 0 : i32
    %c0_i32_1 = arith.constant 0 : i32
    return %arg0, %arg1, %c0_i32, %c0_i32_0 : i32, i32, i32, i32
  }
}

</mosaic_0001>

<bundles_post_ra>
// kernel: inception_block.5
= control target key start
LH: loop header
LB: loop body
LE: loop exit
PB: predicated region body
PF: predicated region fallthrough
CT: control target
= control target key end

     0   :  { %s1291_s12 = smov 0   ;;  %s1647_s0 = inlined_call_operand.vmem [shape: f32[1024,4], index: 0, kind: input, shape index: {}]   ;;  %s1648_s1 = inlined_call_operand.vmem [shape: f32[4,16], index: 1, kind: input, shape index: {}]   ;;  %s1649_s2 = inlined_call_operand.vmem [shape: f32[1,16], index: 2, kind: input, shape index: {}]   ;;  %s1650_s3 = inlined_call_operand.vmem [shape: f32[1024,16], index: 3, kind: output, shape index: {}]  }
   0x1 LB: > { %s1013_s13 = sadd.s32 4294967295, %s1269_s12   ;;  %p1017_p0 = scmp.ge.s32.totalorder %s1269_s12, 1  ;;  %s1269_s12 = sphi %s1291_s12, %s13_s12  }
   0x2   : > { %p138_p1 = scmp.lt.s32.totalorder %s1269_s12, 3 }
   0x4   : > { %p139_p2 = pnand %p1017_p0, %p138_p1 }
   0x5   : > { %s1018_s16 = sshll.u32 (!%p139_p2), %s1013_s13, 6 }
   0x6   : > { %142 = sbr.rel (%p139_p2) target bundleno = 277 (0x115), region = 32  ;;  %p163_p3 = scmp.lt.s32.totalorder (!%p139_p2), %s1018_s16, 127 }
   0xb   : > { %v238_v0 = vld [vmem:[%s1648_s1] sm:$0xf]  ;;  %vm439_vm0 = vcmask 1043456   ;;  %s1652_s16 = smov (!%p163_p3, %s1018_s16), 127  ;;  %vm246_vm1 = vcmask 31744   ;;  %vm892_vm2 = vcmask 130048  }
   0xc   : > { %1155 = vmatprep.subr.msk.mxu0 %vm439_vm0, %v238_v0  ;;  %1253 = vmatprep.subr.msk.mxu1 %vm439_vm0, %v238_v0  ;;  %s1019_s17 = sshll.u32 %s1652_s16, 3 }
   0xd   : > { %1156 = vmatpush3.msk.msra.mxu0 %vm439_vm0, %v238_v0  ;;  %1254 = vmatpush3.msk.msra.mxu1 %vm439_vm0, %v238_v0  ;;  %s1310_s20 = scalar_lea.vmem %s1647_s0, %s1019_s17  ;;  %s1452_s25 = scalar_lea.vmem %s1650_s3, %s1019_s17 }
   0xe   : > { %v174_v1 = vld [vmem:[%s1310_s20] sm:$0xff]  ;;  %v175_v3 = vld [vmem:[%s1310_s20 + $0x8] sm:$0xff]  ;;  %v176_v5 = vld [vmem:[%s1310_s20 + $0x10] sm:$0xff] }
   0xf   : > { %v206_v2 = vld [vmem:[%s1310_s20 + $0x100] sm:$0xff]  ;;  %1157 = vmatprep.mubr.msk.f32.mxu0 %vm246_vm1, %v174_v1  ;;  %v207_v4 = vld [vmem:[%s1310_s20 + $0x108] sm:$0xff]  ;;  %v208_v6 = vld [vmem:[%s1310_s20 + $0x110] sm:$0xff] }
  0x10   : > { %1205 = vmatprep.mubr.msk.f32.mxu1 %vm246_vm1, %v206_v2  ;;  %1158 = vmatmul.mubr.msk.f32.vlgmr.msra.gmra.mxu0 %vm246_vm1, %v175_v3  ;;  %v177_v7 = vld [vmem:[%s1310_s20 + $0x18] sm:$0xff]  ;;  %v178_v9 = vld [vmem:[%s1310_s20 + $0x20] sm:$0xff]  ;;  %v179_v11 = vld [vmem:[%s1310_s20 + $0x28] sm:$0xff] }
  0x11   : > { %1206 = vmatmul.mubr.msk.f32.vlgmr.msra.gmra.mxu1 %vm246_vm1, %v207_v4  ;;  %1160 = vmatprep.mubr.msk.f32.mxu0 %vm246_vm1, %v176_v5  ;;  %v209_v8 = vld [vmem:[%s1310_s20 + $0x118] sm:$0xff]  ;;  %v210_v10 = vld [vmem:[%s1310_s20 + $0x120] sm:$0xff]  ;;  %v211_v12 = vld [vmem:[%s1310_s20 + $0x128] sm:$0xff] }
  0x12   : > { %1208 = vmatprep.mubr.msk.f32.mxu1 %vm246_vm1, %v208_v6  ;;  %v180_v13 = vld [vmem:[%s1310_s20 + $0x30] sm:$0xff]  ;;  %v181_v15 = vld [vmem:[%s1310_s20 + $0x38] sm:$0xff]  ;;  %v182_v17 = vld [vmem:[%s1310_s20 + $0x40] sm:$0xff] }
  0x13   : > { %v212_v14 = vld [vmem:[%s1310_s20 + $0x130] sm:$0xff]  ;;  %v213_v16 = vld [vmem:[%s1310_s20 + $0x138] sm:$0xff]  ;;  %v214_v18 = vld [vmem:[%s1310_s20 + $0x140] sm:$0xff] }
  0x14   : > { %1161 = vmatmul.mubr.msk.f32.gmra.mxu0 %vm246_vm1, %v177_v7  ;;  %v183_v19 = vld [vmem:[%s1310_s20 + $0x48] sm:$0xff]  ;;  %v184_v21 = vld [vmem:[%s1310_s20 + $0x50] sm:$0xff]  ;;  %v185_v23 = vld [vmem:[%s1310_s20 + $0x58] sm:$0xff] }
  0x15   : > { %1209 = vmatmul.mubr.msk.f32.gmra.mxu1 %vm246_vm1, %v209_v8  ;;  %1163 = vmatprep.mubr.msk.f32.mxu0 %vm246_vm1, %v178_v9  ;;  %v215_v20 = vld [vmem:[%s1310_s20 + $0x148] sm:$0xff]  ;;  %v216_v22 = vld [vmem:[%s1310_s20 + $0x150] sm:$0xff]  ;;  %v217_v24 = vld [vmem:[%s1310_s20 + $0x158] sm:$0xff] }
  0x16   : > { %1211 = vmatprep.mubr.msk.f32.mxu1 %vm246_vm1, %v210_v10  ;;  %v186_v25 = vld [vmem:[%s1310_s20 + $0x60] sm:$0xff]  ;;  %v187_v27 = vld [vmem:[%s1310_s20 + $0x68] sm:$0xff]  ;;  %v188_v29 = vld [vmem:[%s1310_s20 + $0x70] sm:$0xff] }
  0x17   : > { %v218_v26 = vld [vmem:[%s1310_s20 + $0x160] sm:$0xff]  ;;  %v219_v28 = vld [vmem:[%s1310_s20 + $0x168] sm:$0xff]  ;;  %v220_v30 = vld [vmem:[%s1310_s20 + $0x170] sm:$0xff] }
  0x18   : > { %1164 = vmatmul.mubr.msk.f32.gmra.mxu0 %vm246_vm1, %v179_v11  ;;  %v189_v31 = vld [vmem:[%s1310_s20 + $0x78] sm:$0xff]  ;;  %v190_v33 = vld [vmem:[%s1310_s20 + $0x80] sm:$0xff]  ;;  %v191_v35 = vld [vmem:[%s1310_s20 + $0x88] sm:$0xff] }
  0x19   : > { %1212 = vmatmul.mubr.msk.f32.gmra.mxu1 %vm246_vm1, %v211_v12  ;;  %1166 = vmatprep.mubr.msk.f32.mxu0 %vm246_vm1, %v180_v13  ;;  %v221_v32 = vld [vmem:[%s1310_s20 + $0x178] sm:$0xff]  ;;  %v222_v34 = vld [vmem:[%s1310_s20 + $0x180] sm:$0xff]  ;;  %v223_v36 = vld [vmem:[%s1310_s20 + $0x188] sm:$0xff] }
  0x1a   : > { %1214 = vmatprep.mubr.msk.f32.mxu1 %vm246_vm1, %v212_v14  ;;  %v192_v37 = vld [vmem:[%s1310_s20 + $0x90] sm:$0xff]  ;;  %v193_v39 = vld [vmem:[%s1310_s20 + $0x98] sm:$0xff]  ;;  %v194_v41 = vld [vmem:[%s1310_s20 + $0xa0] sm:$0xff] }
  0x1b   : > { %v224_v38 = vld [vmem:[%s1310_s20 + $0x190] sm:$0xff]  ;;  %v225_v40 = vld [vmem:[%s1310_s20 + $0x198] sm:$0xff]  ;;  %v226_v42 = vld [vmem:[%s1310_s20 + $0x1a0] sm:$0xff] }
  0x1c   : > { %1167 = vmatmul.mubr.msk.f32.gmra.mxu0 %vm246_vm1, %v181_v15  ;;  %v195_v43 = vld [vmem:[%s1310_s20 + $0xa8] sm:$0xff]  ;;  %v196_v45 = vld [vmem:[%s1310_s20 + $0xb0] sm:$0xff]  ;;  %v197_v47 = vld [vmem:[%s1310_s20 + $0xb8] sm:$0xff] }
  0x1d   : > { %1215 = vmatmul.mubr.msk.f32.gmra.mxu1 %vm246_vm1, %v213_v16  ;;  %1169 = vmatprep.mubr.msk.f32.mxu0 %vm246_vm1, %v182_v17  ;;  %v227_v44 = vld [vmem:[%s1310_s20 + $0x1a8] sm:$0xff]  ;;  %v228_v46 = vld [vmem:[%s1310_s20 + $0x1b0] sm:$0xff]  ;;  %v229_v48 = vld [vmem:[%s1310_s20 + $0x1b8] sm:$0xff] }
  0x1e   : > { %1217 = vmatprep.mubr.msk.f32.mxu1 %vm246_vm1, %v214_v18  ;;  %v198_v49 = vld [vmem:[%s1310_s20 + $0xc0] sm:$0xff]  ;;  %v199_v51 = vld [vmem:[%s1310_s20 + $0xc8] sm:$0xff]  ;;  %v200_v53 = vld [vmem:[%s1310_s20 + $0xd0] sm:$0xff] }
  0x1f   : > { %v230_v50 = vld [vmem:[%s1310_s20 + $0x1c0] sm:$0xff]  ;;  %v231_v52 = vld [vmem:[%s1310_s20 + $0x1c8] sm:$0xff]  ;;  %v232_v54 = vld [vmem:[%s1310_s20 + $0x1d0] sm:$0xff] }
  0x20   : > { %1170 = vmatmul.mubr.msk.f32.gmra.mxu0 %vm246_vm1, %v183_v19  ;;  %v201_v55 = vld [vmem:[%s1310_s20 + $0xd8] sm:$0xff]  ;;  %v202_v57 = vld [vmem:[%s1310_s20 + $0xe0] sm:$0xff]  ;;  %v203_v59 = vld [vmem:[%s1310_s20 + $0xe8] sm:$0xff] }
  0x21   : > { %1218 = vmatmul.mubr.msk.f32.gmra.mxu1 %vm246_vm1, %v215_v20  ;;  %1172 = vmatprep.mubr.msk.f32.mxu0 %vm246_vm1, %v184_v21  ;;  %v233_v56 = vld [vmem:[%s1310_s20 + $0x1d8] sm:$0xff]  ;;  %v234_v58 = vld [vmem:[%s1310_s20 + $0x1e0] sm:$0xff]  ;;  %v235_v60 = vld [vmem:[%s1310_s20 + $0x1e8] sm:$0xff] }
  0x22   : > { %1220 = vmatprep.mubr.msk.f32.mxu1 %vm246_vm1, %v216_v22  ;;  %v204_v61 = vld [vmem:[%s1310_s20 + $0xf0] sm:$0xff]  ;;  %v205_v63 = vld [vmem:[%s1310_s20 + $0xf8] sm:$0xff]  ;;  %v1443_v1 = vld [vmem:[%s1649_s2] ss:$0 sm:$0xff] }
  0x23   : > { %v236_v62 = vld [vmem:[%s1310_s20 + $0x1f0] sm:$0xff]  ;;  %v237_v0 = vld [vmem:[%s1310_s20 + $0x1f8] sm:$0xff] }
  0x24   : > { %1173 = vmatmul.mubr.msk.f32.gmra.mxu0 %vm246_vm1, %v185_v23 }
  0x25   : > { %1221 = vmatmul.mubr.msk.f32.gmra.mxu1 %vm246_vm1, %v217_v24  ;;  %1175 = vmatprep.mubr.msk.f32.mxu0 %vm246_vm1, %v186_v25 }
  0x26   : > { %1223 = vmatprep.mubr.msk.f32.mxu1 %vm246_vm1, %v218_v26 }
  0x28   : > { %1176 = vmatmul.mubr.msk.f32.gmra.mxu0 %vm246_vm1, %v187_v27 }
  0x29   : > { %1224 = vmatmul.mubr.msk.f32.gmra.mxu1 %vm246_vm1, %v219_v28  ;;  %1178 = vmatprep.mubr.msk.f32.mxu0 %vm246_vm1, %v188_v29 }
  0x2a   : > { %1226 = vmatprep.mubr.msk.f32.mxu1 %vm246_vm1, %v220_v30 }
  0x2c   : > { %1179 = vmatmul.mubr.msk.f32.gmra.mxu0 %vm246_vm1, %v189_v31 }
  0x2d   : > { %1227 = vmatmul.mubr.msk.f32.gmra.mxu1 %vm246_vm1, %v221_v32  ;;  %1181 = vmatprep.mubr.msk.f32.mxu0 %vm246_vm1, %v190_v33 }
  0x2e   : > { %1229 = vmatprep.mubr.msk.f32.mxu1 %vm246_vm1, %v222_v34 }
  0x30   : > { %1182 = vmatmul.mubr.msk.f32.gmra.mxu0 %vm246_vm1, %v191_v35 }
  0x31   : > { %1230 = vmatmul.mubr.msk.f32.gmra.mxu1 %vm246_vm1, %v223_v36  ;;  %1184 = vmatprep.mubr.msk.f32.mxu0 %vm246_vm1, %v192_v37 }
  0x32   : > { %1232 = vmatprep.mubr.msk.f32.mxu1 %vm246_vm1, %v224_v38 }
  0x34   : > { %1185 = vmatmul.mubr.msk.f32.gmra.mxu0 %vm246_vm1, %v193_v39 }
  0x35   : > { %1233 = vmatmul.mubr.msk.f32.gmra.mxu1 %vm246_vm1, %v225_v40  ;;  %1187 = vmatprep.mubr.msk.f32.mxu0 %vm246_vm1, %v194_v41 }
  0x36   : > { %1235 = vmatprep.mubr.msk.f32.mxu1 %vm246_vm1, %v226_v42 }
  0x38   : > { %1188 = vmatmul.mubr.msk.f32.gmra.mxu0 %vm246_vm1, %v195_v43 }
  0x39   : > { %1236 = vmatmul.mubr.msk.f32.gmra.mxu1 %vm246_vm1, %v227_v44  ;;  %1190 = vmatprep.mubr.msk.f32.mxu0 %vm246_vm1, %v196_v45 }
  0x3a   : > { %1238 = vmatprep.mubr.msk.f32.mxu1 %vm246_vm1, %v228_v46 }
  0x3c   : > { %1191 = vmatmul.mubr.msk.f32.gmra.mxu0 %vm246_vm1, %v197_v47 }
  0x3d   : > { %1239 = vmatmul.mubr.msk.f32.gmra.mxu1 %vm246_vm1, %v229_v48  ;;  %1193 = vmatprep.mubr.msk.f32.mxu0 %vm246_vm1, %v198_v49 }
  0x3e   : > { %1241 = vmatprep.mubr.msk.f32.mxu1 %vm246_vm1, %v230_v50 }
  0x40   : > { %1194 = vmatmul.mubr.msk.f32.gmra.mxu0 %vm246_vm1, %v199_v51 }
  0x41   : > { %1242 = vmatmul.mubr.msk.f32.gmra.mxu1 %vm246_vm1, %v231_v52  ;;  %1196 = vmatprep.mubr.msk.f32.mxu0 %vm246_vm1, %v200_v53 }
  0x42   : > { %1244 = vmatprep.mubr.msk.f32.mxu1 %vm246_vm1, %v232_v54 }
  0x44   : > { %1197 = vmatmul.mubr.msk.f32.gmra.mxu0 %vm246_vm1, %v201_v55 }
  0x45   : > { %1245 = vmatmul.mubr.msk.f32.gmra.mxu1 %vm246_vm1, %v233_v56  ;;  %1199 = vmatprep.mubr.msk.f32.mxu0 %vm246_vm1, %v202_v57 }
  0x46   : > { %1247 = vmatprep.mubr.msk.f32.mxu1 %vm246_vm1, %v234_v58 }
  0x48   : > { %1200 = vmatmul.mubr.msk.f32.gmra.mxu0 %vm246_vm1, %v203_v59 }
  0x49   : > { %1248 = vmatmul.mubr.msk.f32.gmra.mxu1 %vm246_vm1, %v235_v60  ;;  %1202 = vmatprep.mubr.msk.f32.mxu0 %vm246_vm1, %v204_v61 }
  0x4a   : > { %1250 = vmatprep.mubr.msk.f32.mxu1 %vm246_vm1, %v236_v62 }
  0x4c   : > { %1203 = vmatmul.mubr.msk.f32.gmra.mxu0 %vm246_vm1, %v205_v63 }
  0x4d   : > { %1251 = vmatmul.mubr.msk.f32.gmra.mxu1 %vm246_vm1, %v237_v0 }
  0xd0   : > { %v1159_v2 = vpop.f32.mrf.mxu0 }
  0xd1   : > { %v1207_v3 = vpop.f32.mrf.mxu1  ;;  %v515_v4 = vadd.f32 %v1159_v2, %v1443_v1 }
  0xd2   : > { %v675_v5 = vadd.f32 %v1207_v3, %v1443_v1  ;;  %v509_v6 = vpop.f32.mrf.mxu0 }
  0xd3   : > { %v669_v7 = vpop.f32.mrf.mxu1  ;;  %v829_v8 = vmax.f32 %v515_v4, 0.0  ;;  %v510_v10 = vadd.f32 %v1443_v1, %v509_v6 }
  0xd4   : > { %v861_v9 = vmax.f32 %v675_v5, 0.0  ;;  %v670_v11 = vadd.f32 %v1443_v1, %v669_v7  ;;  %v1162_v12 = vpop.f32.mrf.mxu0 }
  0xd5   : > { %v1210_v13 = vpop.f32.mrf.mxu1  ;;  %894 = vst.msk [vmem:[%s1452_s25 + $0x8] sm:$0xff] %vm892_vm2, %v829_v8  ;;  %v828_v14 = vmax.f32 %v510_v10, 0.0  ;;  %v525_v16 = vadd.f32 %v1162_v12, %v1443_v1 }
  0xd6   : > { %926 = vst.msk [vmem:[%s1452_s25 + $0x108] sm:$0xff] %vm892_vm2, %v861_v9  ;;  %v860_v15 = vmax.f32 %v670_v11, 0.0  ;;  %v685_v17 = vadd.f32 %v1210_v13, %v1443_v1  ;;  %v519_v18 = vpop.f32.mrf.mxu0 }
  0xd7   : > { %v679_v19 = vpop.f32.mrf.mxu1  ;;  %893 = vst.msk [vmem:[%s1452_s25] sm:$0xff] %vm892_vm2, %v828_v14  ;;  %v831_v20 = vmax.f32 %v525_v16, 0.0  ;;  %v520_v22 = vadd.f32 %v1443_v1, %v519_v18 }
  0xd8   : > { %925 = vst.msk [vmem:[%s1452_s25 + $0x100] sm:$0xff] %vm892_vm2, %v860_v15  ;;  %v863_v21 = vmax.f32 %v685_v17, 0.0  ;;  %v680_v23 = vadd.f32 %v1443_v1, %v679_v19  ;;  %v1165_v24 = vpop.f32.mrf.mxu0 }
  0xd9   : > { %v1213_v25 = vpop.f32.mrf.mxu1  ;;  %896 = vst.msk [vmem:[%s1452_s25 + $0x18] sm:$0xff] %vm892_vm2, %v831_v20  ;;  %v830_v26 = vmax.f32 %v520_v22, 0.0  ;;  %v535_v28 = vadd.f32 %v1165_v24, %v1443_v1 }
  0xda   : > { %928 = vst.msk [vmem:[%s1452_s25 + $0x118] sm:$0xff] %vm892_vm2, %v863_v21  ;;  %v862_v27 = vmax.f32 %v680_v23, 0.0  ;;  %v695_v29 = vadd.f32 %v1213_v25, %v1443_v1  ;;  %v529_v30 = vpop.f32.mrf.mxu0 }
  0xdb   : > { %v689_v31 = vpop.f32.mrf.mxu1  ;;  %895 = vst.msk [vmem:[%s1452_s25 + $0x10] sm:$0xff] %vm892_vm2, %v830_v26  ;;  %v833_v32 = vmax.f32 %v535_v28, 0.0  ;;  %v530_v34 = vadd.f32 %v1443_v1, %v529_v30 }
  0xdc   : > { %927 = vst.msk [vmem:[%s1452_s25 + $0x110] sm:$0xff] %vm892_vm2, %v862_v27  ;;  %v865_v33 = vmax.f32 %v695_v29, 0.0  ;;  %v690_v35 = vadd.f32 %v1443_v1, %v689_v31  ;;  %v1168_v36 = vpop.f32.mrf.mxu0 }
  0xdd   : > { %v1216_v37 = vpop.f32.mrf.mxu1  ;;  %898 = vst.msk [vmem:[%s1452_s25 + $0x28] sm:$0xff] %vm892_vm2, %v833_v32  ;;  %v832_v38 = vmax.f32 %v530_v34, 0.0  ;;  %v545_v40 = vadd.f32 %v1168_v36, %v1443_v1 }
  0xde   : > { %930 = vst.msk [vmem:[%s1452_s25 + $0x128] sm:$0xff] %vm892_vm2, %v865_v33  ;;  %v864_v39 = vmax.f32 %v690_v35, 0.0  ;;  %v705_v41 = vadd.f32 %v1216_v37, %v1443_v1  ;;  %v539_v42 = vpop.f32.mrf.mxu0 }
  0xdf   : > { %v699_v43 = vpop.f32.mrf.mxu1  ;;  %897 = vst.msk [vmem:[%s1452_s25 + $0x20] sm:$0xff] %vm892_vm2, %v832_v38  ;;  %v835_v44 = vmax.f32 %v545_v40, 0.0  ;;  %v540_v46 = vadd.f32 %v1443_v1, %v539_v42 }
  0xe0   : > { %929 = vst.msk [vmem:[%s1452_s25 + $0x120] sm:$0xff] %vm892_vm2, %v864_v39  ;;  %v867_v45 = vmax.f32 %v705_v41, 0.0  ;;  %v700_v47 = vadd.f32 %v1443_v1, %v699_v43  ;;  %v1171_v48 = vpop.f32.mrf.mxu0 }
  0xe1   : > { %v1219_v49 = vpop.f32.mrf.mxu1  ;;  %900 = vst.msk [vmem:[%s1452_s25 + $0x38] sm:$0xff] %vm892_vm2, %v835_v44  ;;  %v834_v50 = vmax.f32 %v540_v46, 0.0  ;;  %v555_v52 = vadd.f32 %v1171_v48, %v1443_v1 }
  0xe2   : > { %932 = vst.msk [vmem:[%s1452_s25 + $0x138] sm:$0xff] %vm892_vm2, %v867_v45  ;;  %v866_v51 = vmax.f32 %v700_v47, 0.0  ;;  %v715_v53 = vadd.f32 %v1219_v49, %v1443_v1  ;;  %v549_v54 = vpop.f32.mrf.mxu0 }
  0xe3   : > { %v709_v55 = vpop.f32.mrf.mxu1  ;;  %899 = vst.msk [vmem:[%s1452_s25 + $0x30] sm:$0xff] %vm892_vm2, %v834_v50  ;;  %v837_v56 = vmax.f32 %v555_v52, 0.0  ;;  %v550_v58 = vadd.f32 %v1443_v1, %v549_v54 }
  0xe4   : > { %931 = vst.msk [vmem:[%s1452_s25 + $0x130] sm:$0xff] %vm892_vm2, %v866_v51  ;;  %v869_v57 = vmax.f32 %v715_v53, 0.0  ;;  %v710_v59 = vadd.f32 %v1443_v1, %v709_v55  ;;  %v1174_v60 = vpop.f32.mrf.mxu0 }
  0xe5   : > { %v1222_v61 = vpop.f32.mrf.mxu1  ;;  %902 = vst.msk [vmem:[%s1452_s25 + $0x48] sm:$0xff] %vm892_vm2, %v837_v56  ;;  %v836_v62 = vmax.f32 %v550_v58, 0.0  ;;  %v565_v0 = vadd.f32 %v1174_v60, %v1443_v1 }
  0xe6   : > { %934 = vst.msk [vmem:[%s1452_s25 + $0x148] sm:$0xff] %vm892_vm2, %v869_v57  ;;  %v868_v63 = vmax.f32 %v710_v59, 0.0  ;;  %v725_v2 = vadd.f32 %v1222_v61, %v1443_v1  ;;  %v559_v3 = vpop.f32.mrf.mxu0 }
  0xe7   : > { %v719_v4 = vpop.f32.mrf.mxu1  ;;  %901 = vst.msk [vmem:[%s1452_s25 + $0x40] sm:$0xff] %vm892_vm2, %v836_v62  ;;  %v839_v5 = vmax.f32 %v565_v0, 0.0  ;;  %v560_v7 = vadd.f32 %v1443_v1, %v559_v3 }
  0xe8   : > { %933 = vst.msk [vmem:[%s1452_s25 + $0x140] sm:$0xff] %vm892_vm2, %v868_v63  ;;  %v871_v6 = vmax.f32 %v725_v2, 0.0  ;;  %v720_v8 = vadd.f32 %v1443_v1, %v719_v4  ;;  %v1177_v9 = vpop.f32.mrf.mxu0 }
  0xe9   : > { %v1225_v10 = vpop.f32.mrf.mxu1  ;;  %904 = vst.msk [vmem:[%s1452_s25 + $0x58] sm:$0xff] %vm892_vm2, %v839_v5  ;;  %v838_v11 = vmax.f32 %v560_v7, 0.0  ;;  %v575_v13 = vadd.f32 %v1177_v9, %v1443_v1 }
  0xea   : > { %936 = vst.msk [vmem:[%s1452_s25 + $0x158] sm:$0xff] %vm892_vm2, %v871_v6  ;;  %v870_v12 = vmax.f32 %v720_v8, 0.0  ;;  %v735_v14 = vadd.f32 %v1225_v10, %v1443_v1  ;;  %v569_v15 = vpop.f32.mrf.mxu0 }
  0xeb   : > { %v729_v16 = vpop.f32.mrf.mxu1  ;;  %903 = vst.msk [vmem:[%s1452_s25 + $0x50] sm:$0xff] %vm892_vm2, %v838_v11  ;;  %v841_v17 = vmax.f32 %v575_v13, 0.0  ;;  %v570_v19 = vadd.f32 %v1443_v1, %v569_v15 }
  0xec   : > { %935 = vst.msk [vmem:[%s1452_s25 + $0x150] sm:$0xff] %vm892_vm2, %v870_v12  ;;  %v873_v18 = vmax.f32 %v735_v14, 0.0  ;;  %v730_v20 = vadd.f32 %v1443_v1, %v729_v16  ;;  %v1180_v21 = vpop.f32.mrf.mxu0 }
  0xed   : > { %v1228_v22 = vpop.f32.mrf.mxu1  ;;  %906 = vst.msk [vmem:[%s1452_s25 + $0x68] sm:$0xff] %vm892_vm2, %v841_v17  ;;  %v840_v23 = vmax.f32 %v570_v19, 0.0  ;;  %v585_v25 = vadd.f32 %v1180_v21, %v1443_v1 }
  0xee   : > { %938 = vst.msk [vmem:[%s1452_s25 + $0x168] sm:$0xff] %vm892_vm2, %v873_v18  ;;  %v872_v24 = vmax.f32 %v730_v20, 0.0  ;;  %v745_v26 = vadd.f32 %v1228_v22, %v1443_v1  ;;  %v579_v27 = vpop.f32.mrf.mxu0 }
  0xef   : > { %v739_v28 = vpop.f32.mrf.mxu1  ;;  %905 = vst.msk [vmem:[%s1452_s25 + $0x60] sm:$0xff] %vm892_vm2, %v840_v23  ;;  %v843_v29 = vmax.f32 %v585_v25, 0.0  ;;  %v580_v31 = vadd.f32 %v1443_v1, %v579_v27 }
  0xf0   : > { %937 = vst.msk [vmem:[%s1452_s25 + $0x160] sm:$0xff] %vm892_vm2, %v872_v24  ;;  %v875_v30 = vmax.f32 %v745_v26, 0.0  ;;  %v740_v32 = vadd.f32 %v1443_v1, %v739_v28  ;;  %v1183_v33 = vpop.f32.mrf.mxu0 }
  0xf1   : > { %v1231_v34 = vpop.f32.mrf.mxu1  ;;  %908 = vst.msk [vmem:[%s1452_s25 + $0x78] sm:$0xff] %vm892_vm2, %v843_v29  ;;  %v842_v35 = vmax.f32 %v580_v31, 0.0  ;;  %v595_v37 = vadd.f32 %v1183_v33, %v1443_v1 }
  0xf2   : > { %940 = vst.msk [vmem:[%s1452_s25 + $0x178] sm:$0xff] %vm892_vm2, %v875_v30  ;;  %v874_v36 = vmax.f32 %v740_v32, 0.0  ;;  %v755_v38 = vadd.f32 %v1231_v34, %v1443_v1  ;;  %v589_v39 = vpop.f32.mrf.mxu0 }
  0xf3   : > { %v749_v40 = vpop.f32.mrf.mxu1  ;;  %907 = vst.msk [vmem:[%s1452_s25 + $0x70] sm:$0xff] %vm892_vm2, %v842_v35  ;;  %v845_v41 = vmax.f32 %v595_v37, 0.0  ;;  %v590_v43 = vadd.f32 %v1443_v1, %v589_v39 }
  0xf4   : > { %939 = vst.msk [vmem:[%s1452_s25 + $0x170] sm:$0xff] %vm892_vm2, %v874_v36  ;;  %v877_v42 = vmax.f32 %v755_v38, 0.0  ;;  %v750_v44 = vadd.f32 %v1443_v1, %v749_v40  ;;  %v1186_v45 = vpop.f32.mrf.mxu0 }
  0xf5   : > { %v1234_v46 = vpop.f32.mrf.mxu1  ;;  %910 = vst.msk [vmem:[%s1452_s25 + $0x88] sm:$0xff] %vm892_vm2, %v845_v41  ;;  %v844_v47 = vmax.f32 %v590_v43, 0.0  ;;  %v605_v49 = vadd.f32 %v1186_v45, %v1443_v1 }
  0xf6   : > { %942 = vst.msk [vmem:[%s1452_s25 + $0x188] sm:$0xff] %vm892_vm2, %v877_v42  ;;  %v876_v48 = vmax.f32 %v750_v44, 0.0  ;;  %v765_v50 = vadd.f32 %v1234_v46, %v1443_v1  ;;  %v599_v51 = vpop.f32.mrf.mxu0 }
  0xf7   : > { %v759_v52 = vpop.f32.mrf.mxu1  ;;  %909 = vst.msk [vmem:[%s1452_s25 + $0x80] sm:$0xff] %vm892_vm2, %v844_v47  ;;  %v847_v53 = vmax.f32 %v605_v49, 0.0  ;;  %v600_v55 = vadd.f32 %v1443_v1, %v599_v51 }
  0xf8   : > { %941 = vst.msk [vmem:[%s1452_s25 + $0x180] sm:$0xff] %vm892_vm2, %v876_v48  ;;  %v879_v54 = vmax.f32 %v765_v50, 0.0  ;;  %v760_v56 = vadd.f32 %v1443_v1, %v759_v52  ;;  %v1189_v57 = vpop.f32.mrf.mxu0 }
  0xf9   : > { %v1237_v58 = vpop.f32.mrf.mxu1  ;;  %912 = vst.msk [vmem:[%s1452_s25 + $0x98] sm:$0xff] %vm892_vm2, %v847_v53  ;;  %v846_v59 = vmax.f32 %v600_v55, 0.0  ;;  %v615_v61 = vadd.f32 %v1189_v57, %v1443_v1 }
  0xfa   : > { %944 = vst.msk [vmem:[%s1452_s25 + $0x198] sm:$0xff] %vm892_vm2, %v879_v54  ;;  %v878_v60 = vmax.f32 %v760_v56, 0.0  ;;  %v775_v62 = vadd.f32 %v1237_v58, %v1443_v1  ;;  %v609_v63 = vpop.f32.mrf.mxu0 }
  0xfb   : > { %v769_v0 = vpop.f32.mrf.mxu1  ;;  %911 = vst.msk [vmem:[%s1452_s25 + $0x90] sm:$0xff] %vm892_vm2, %v846_v59  ;;  %v849_v2 = vmax.f32 %v615_v61, 0.0  ;;  %v610_v4 = vadd.f32 %v1443_v1, %v609_v63 }
  0xfc   : > { %943 = vst.msk [vmem:[%s1452_s25 + $0x190] sm:$0xff] %vm892_vm2, %v878_v60  ;;  %v881_v3 = vmax.f32 %v775_v62, 0.0  ;;  %v770_v5 = vadd.f32 %v1443_v1, %v769_v0  ;;  %v1192_v6 = vpop.f32.mrf.mxu0 }
  0xfd   : > { %v1240_v7 = vpop.f32.mrf.mxu1  ;;  %914 = vst.msk [vmem:[%s1452_s25 + $0xa8] sm:$0xff] %vm892_vm2, %v849_v2  ;;  %v848_v8 = vmax.f32 %v610_v4, 0.0  ;;  %v625_v10 = vadd.f32 %v1192_v6, %v1443_v1 }
  0xfe   : > { %946 = vst.msk [vmem:[%s1452_s25 + $0x1a8] sm:$0xff] %vm892_vm2, %v881_v3  ;;  %v880_v9 = vmax.f32 %v770_v5, 0.0  ;;  %v785_v11 = vadd.f32 %v1240_v7, %v1443_v1  ;;  %v619_v12 = vpop.f32.mrf.mxu0 }
  0xff   : > { %v779_v13 = vpop.f32.mrf.mxu1  ;;  %913 = vst.msk [vmem:[%s1452_s25 + $0xa0] sm:$0xff] %vm892_vm2, %v848_v8  ;;  %v851_v14 = vmax.f32 %v625_v10, 0.0  ;;  %v620_v16 = vadd.f32 %v1443_v1, %v619_v12 }
 0x100   : > { %945 = vst.msk [vmem:[%s1452_s25 + $0x1a0] sm:$0xff] %vm892_vm2, %v880_v9  ;;  %v883_v15 = vmax.f32 %v785_v11, 0.0  ;;  %v780_v17 = vadd.f32 %v1443_v1, %v779_v13  ;;  %v1195_v18 = vpop.f32.mrf.mxu0 }
 0x101   : > { %v1243_v19 = vpop.f32.mrf.mxu1  ;;  %916 = vst.msk [vmem:[%s1452_s25 + $0xb8] sm:$0xff] %vm892_vm2, %v851_v14  ;;  %v850_v20 = vmax.f32 %v620_v16, 0.0  ;;  %v635_v22 = vadd.f32 %v1195_v18, %v1443_v1 }
 0x102   : > { %948 = vst.msk [vmem:[%s1452_s25 + $0x1b8] sm:$0xff] %vm892_vm2, %v883_v15  ;;  %v882_v21 = vmax.f32 %v780_v17, 0.0  ;;  %v795_v23 = vadd.f32 %v1243_v19, %v1443_v1  ;;  %v629_v24 = vpop.f32.mrf.mxu0 }
 0x103   : > { %v789_v25 = vpop.f32.mrf.mxu1  ;;  %915 = vst.msk [vmem:[%s1452_s25 + $0xb0] sm:$0xff] %vm892_vm2, %v850_v20  ;;  %v853_v26 = vmax.f32 %v635_v22, 0.0  ;;  %v630_v28 = vadd.f32 %v1443_v1, %v629_v24 }
 0x104   : > { %947 = vst.msk [vmem:[%s1452_s25 + $0x1b0] sm:$0xff] %vm892_vm2, %v882_v21  ;;  %v885_v27 = vmax.f32 %v795_v23, 0.0  ;;  %v790_v29 = vadd.f32 %v1443_v1, %v789_v25  ;;  %v1198_v30 = vpop.f32.mrf.mxu0 }
 0x105   : > { %v1246_v31 = vpop.f32.mrf.mxu1  ;;  %918 = vst.msk [vmem:[%s1452_s25 + $0xc8] sm:$0xff] %vm892_vm2, %v853_v26  ;;  %v852_v32 = vmax.f32 %v630_v28, 0.0  ;;  %v645_v34 = vadd.f32 %v1198_v30, %v1443_v1 }
 0x106   : > { %950 = vst.msk [vmem:[%s1452_s25 + $0x1c8] sm:$0xff] %vm892_vm2, %v885_v27  ;;  %v884_v33 = vmax.f32 %v790_v29, 0.0  ;;  %v805_v35 = vadd.f32 %v1246_v31, %v1443_v1  ;;  %v639_v36 = vpop.f32.mrf.mxu0 }
 0x107   : > { %v799_v37 = vpop.f32.mrf.mxu1  ;;  %917 = vst.msk [vmem:[%s1452_s25 + $0xc0] sm:$0xff] %vm892_vm2, %v852_v32  ;;  %v855_v38 = vmax.f32 %v645_v34, 0.0  ;;  %v640_v40 = vadd.f32 %v1443_v1, %v639_v36 }
 0x108   : > { %949 = vst.msk [vmem:[%s1452_s25 + $0x1c0] sm:$0xff] %vm892_vm2, %v884_v33  ;;  %v887_v39 = vmax.f32 %v805_v35, 0.0  ;;  %v800_v41 = vadd.f32 %v1443_v1, %v799_v37  ;;  %v1201_v42 = vpop.f32.mrf.mxu0 }
 0x109   : > { %v1249_v43 = vpop.f32.mrf.mxu1  ;;  %920 = vst.msk [vmem:[%s1452_s25 + $0xd8] sm:$0xff] %vm892_vm2, %v855_v38  ;;  %v854_v44 = vmax.f32 %v640_v40, 0.0  ;;  %v655_v46 = vadd.f32 %v1201_v42, %v1443_v1 }
 0x10a   : > { %952 = vst.msk [vmem:[%s1452_s25 + $0x1d8] sm:$0xff] %vm892_vm2, %v887_v39  ;;  %v886_v45 = vmax.f32 %v800_v41, 0.0  ;;  %v815_v47 = vadd.f32 %v1249_v43, %v1443_v1  ;;  %v649_v48 = vpop.f32.mrf.mxu0 }
 0x10b   : > { %v809_v49 = vpop.f32.mrf.mxu1  ;;  %919 = vst.msk [vmem:[%s1452_s25 + $0xd0] sm:$0xff] %vm892_vm2, %v854_v44  ;;  %v857_v50 = vmax.f32 %v655_v46, 0.0  ;;  %v650_v52 = vadd.f32 %v1443_v1, %v649_v48 }
 0x10c   : > { %951 = vst.msk [vmem:[%s1452_s25 + $0x1d0] sm:$0xff] %vm892_vm2, %v886_v45  ;;  %v889_v51 = vmax.f32 %v815_v47, 0.0  ;;  %v810_v53 = vadd.f32 %v1443_v1, %v809_v49  ;;  %v1204_v54 = vpop.f32.mrf.mxu0 }
 0x10d   : > { %v1252_v55 = vpop.f32.mrf.mxu1  ;;  %922 = vst.msk [vmem:[%s1452_s25 + $0xe8] sm:$0xff] %vm892_vm2, %v857_v50  ;;  %v856_v56 = vmax.f32 %v650_v52, 0.0  ;;  %v665_v58 = vadd.f32 %v1204_v54, %v1443_v1 }
 0x10e   : > { %954 = vst.msk [vmem:[%s1452_s25 + $0x1e8] sm:$0xff] %vm892_vm2, %v889_v51  ;;  %v888_v57 = vmax.f32 %v810_v53, 0.0  ;;  %v825_v59 = vadd.f32 %v1252_v55, %v1443_v1  ;;  %v659_v60 = vpop.f32.mrf.mxu0 }
 0x10f   : > { %v819_v61 = vpop.f32.mrf.mxu1  ;;  %921 = vst.msk [vmem:[%s1452_s25 + $0xe0] sm:$0xff] %vm892_vm2, %v856_v56  ;;  %v859_v62 = vmax.f32 %v665_v58, 0.0  ;;  %v660_v0 = vadd.f32 %v1443_v1, %v659_v60 }
 0x110   : > { %953 = vst.msk [vmem:[%s1452_s25 + $0x1e0] sm:$0xff] %vm892_vm2, %v888_v57  ;;  %v891_v63 = vmax.f32 %v825_v59, 0.0  ;;  %v820_v2 = vadd.f32 %v1443_v1, %v819_v61 }
 0x111   : > { %924 = vst.msk [vmem:[%s1452_s25 + $0xf8] sm:$0xff] %vm892_vm2, %v859_v62  ;;  %v858_v3 = vmax.f32 %v660_v0, 0.0 }
 0x112   : > { %956 = vst.msk [vmem:[%s1452_s25 + $0x1f8] sm:$0xff] %vm892_vm2, %v891_v63  ;;  %v890_v4 = vmax.f32 %v820_v2, 0.0 }
 0x113   : > { %923 = vst.msk [vmem:[%s1452_s25 + $0xf0] sm:$0xff] %vm892_vm2, %v858_v3 }
 0x114   : > { %955 = vst.msk [vmem:[%s1452_s25 + $0x1f0] sm:$0xff] %vm892_vm2, %v890_v4 }
 0x115 PF: > { %s13_s12 = sadd.s32 1, %s1269_s12  }
 0x116   : > { %p10_p4 = scmp.ge.s32.totalorder %s13_s12, 4  }
 0x118   :  { %12 = sbr.rel (!%p10_p4) target bundleno = 1 (0x1), region = 62 }

// kernel: inception_block.6
= control target key start
LH: loop header
LB: loop body
LE: loop exit
PB: predicated region body
PF: predicated region fallthrough
CT: control target
= control target key end

     0   :  { %s2475_s12 = smov 0   ;;  %s2477_s13 = smov 0   ;;  %s2974_s0 = inlined_call_operand.vmem [shape: f32[2,10,102,4], index: 0, kind: input, shape index: {}]   ;;  %s2975_s1 = inlined_call_operand.vmem [shape: f32[3,3,3,4,8], index: 1, kind: input, shape index: {}]   ;;  %s2976_s2 = inlined_call_operand.vmem [shape: f32[1,8], index: 2, kind: input, shape index: {}]   ;;  %s2977_s3 = inlined_call_operand.vmem [shape: f32[2,8,80,8], index: 3, kind: output, shape index: {}]  }
   0x1   :  { %s2479_s14 = smov 0   ;;  %s2481_s15 = smov 0  }
   0x2   :  { %s2483_s16 = smov 0   ;;  %s2485_s17 = smov 0  }
   0x3   :  { %s2487_s18 = smov 0  }
   0x4 LB: > { %s25_s19 = sadd.s32 1, %s2440_s15  ;;  %s28_s20 = sadd.s32 1, %s2444_s16  ;;  %s2452_s18 = sphi %s2487_s18, %s13_s18   ;;  %s2448_s17 = sphi %s2485_s17, %s3009_s17   ;;  %s2444_s16 = sphi %s2483_s16, %s3008_s16   ;;  %s2440_s15 = sphi %s2481_s15, %s3007_s15   ;;  %s2436_s14 = sphi %s2479_s14, %s3006_s14   ;;  %s2432_s13 = sphi %s2477_s13, %s3005_s13   ;;  %s2428_s12 = sphi %s2475_s12, %s3004_s12  }
   0x5   : > { %p26_p0 = scmp.ge.s32.totalorder %s25_s19, 3  ;;  %p1966_p1 = scmp.ge.s32.totalorder %s2452_s18, 1 }
   0x6   : > { %p178_p2 = scmp.lt.s32.totalorder %s2452_s18, 49  ;;  %s32_s21 = sadd.s32 1, %s2448_s17 }
   0x7   : > { %s3011_s19 = smov (%p26_p0, %s25_s19), 0  ;;  %s3013_s20 = smov (!%p26_p0, %s28_s20), %s2444_s16 }
   0x8   : > { %p179_p3 = pnand %p1966_p1, %p178_p2  ;;  %p30_p4 = scmp.ge.s32.totalorder %s3013_s20, 8 }
   0xa   : > { %s3015_s20 = smov (%p30_p4, %s3013_s20), 0  ;;  %s3017_s21 = smov (!%p30_p4, %s32_s21), %s2448_s17 }
   0xb   : > { %p34_p5 = scmp.ge.s32.totalorder %s3017_s21, 2  ;;  %182 = sbr.rel (%p179_p3) target bundleno = 338 (0x152), region = 32 }
   0xd   : > { %s3019_s21 = smov (%p34_p5, %s3017_s21), 0 }
  0x10   : > { %s216_s22 = sadd.s32 %s2428_s12, %s2432_s13  ;;  %p217_p6 = scmp.lt.s32.totalorder %s2436_s14, 1 }
  0x11   : > { %p219_p7 = scmp.lt.s32.totalorder %s216_s22, 9  ;;  %p227_p8 = scmp.lt.s32.totalorder %s2428_s12, 2 }
  0x12   : > { %s3021_s14 = smov (!%p217_p6, %s2436_s14), 1  ;;  %p234_p9 = scmp.lt.s32.totalorder %s2432_s13, 7 }
  0x13   : > { %s3023_s22 = smov (!%p219_p7, %s216_s22), 9  ;;  %s2337_s23 = smul.u32 130, %s3021_s14 }
  0x14   : > { %s2336_s24 = smul.u32 13, %s3023_s22  ;;  %s3025_s13 = smov (!%p234_p9, %s2432_s13), 7 }
  0x15   : > { %s228_s25 = scalar_select %p227_p8, %s2428_s12, 2 }
  0x16   : > { %s223_s26 = sadd.s32 %s2337_s23, %s2336_s24  ;;  %s2340_s8 = smul.u32 80, %s3021_s14 }
  0x17   : > { %s1967_s27 = sshll.u32 %s223_s26, 3  ;;  %s2338_s28 = smul.u32 36, %s228_s25 }
  0x18   : > { %s2529_s4 = scalar_lea.vmem %s2974_s0, %s1967_s27  ;;  %s2339_s9 = smul.u32 10, %s3025_s13 }
  0x19   : > { %s2534_s7 = scalar_lea.vmem %s2975_s1, %s2338_s28  ;;  %p1970_p10 = scmp.ne.s32.totalorder %s2428_s12, 0 }
  0x1a   : > { %s238_s10 = sadd.s32 %s2340_s8, %s2339_s9 }
  0x1b   : > { %s1969_s11 = sshll.u32 %s238_s10, 3  ;;  %244 = sbr.rel (%p1970_p10) target bundleno = 38 (0x26), region = 36 }
  0x1c   : > { %s2540_s24 = scalar_lea.vmem %s2977_s3, %s1969_s11 }
  0x20   : > { %vm245_vm0 = vcmask 64512   ;;  %v2454_v0 = vmov 0.0  }
  0x21   : > { %246 = vst.msk [vmem:[#allocation2] sm:$0xff] %vm245_vm0, %v2454_v0  ;;  %247 = vst.msk [vmem:[#allocation2 + $0x8] sm:$0xff] %vm245_vm0, %v2454_v0 }
  0x22   : > { %248 = vst.msk [vmem:[#allocation2 + $0x10] sm:$0xff] %vm245_vm0, %v2454_v0  ;;  %249 = vst.msk [vmem:[#allocation2 + $0x18] sm:$0xff] %vm245_vm0, %v2454_v0 }
  0x23   : > { %250 = vst.msk [vmem:[#allocation2 + $0x20] sm:$0xff] %vm245_vm0, %v2454_v0  ;;  %251 = vst.msk [vmem:[#allocation2 + $0x28] sm:$0xff] %vm245_vm0, %v2454_v0 }
  0x24   : > { %252 = vst.msk [vmem:[#allocation2 + $0x30] sm:$0xff] %vm245_vm0, %v2454_v0  ;;  %253 = vst.msk [vmem:[#allocation2 + $0x38] sm:$0xff] %vm245_vm0, %v2454_v0 }
  0x25   : > { %254 = vst.msk [vmem:[#allocation2 + $0x40] sm:$0xff] %vm245_vm0, %v2454_v0  ;;  %255 = vst.msk [vmem:[#allocation2 + $0x48] sm:$0xff] %vm245_vm0, %v2454_v0 }
  0x26 PF: > { %v276_v1 = vld [vmem:[%s2534_s7] sm:$0xf]  ;;  %vm308_vm1 = vcmask 1043456   ;;  %vm277_vm2 = vcmask 31744   ;;  %v272_v3 = vld [vmem:[%s2529_s4 + $0x30] sm:$0xff]  ;;  %v267_v4 = vld [vmem:[%s2529_s4 + $0x8] sm:$0xff] }
  0x27   : > { %v266_v2 = vld [vmem:[%s2529_s4] sm:$0xff]  ;;  %2181 = vmatprep.subr.msk.mxu0 %vm308_vm1, %v276_v1  ;;  %2334 = vmatprep.subr.msk.mxu1 %vm308_vm1, %v276_v1  ;;  %v273_v5 = vld [vmem:[%s2529_s4 + $0x38] sm:$0xff]  ;;  %v1994_v6 = vld [vmem:[%s2534_s7 + $0x8] sm:$0xf]  ;;  %vm1797_vm3 = vcmask 64512   ;;  %p2078_p11 = scmp.ne.s32.totalorder %s2428_s12, 2 }
  0x28   : > { %2182 = vmatpush3.msk.msra.mxu0 %vm308_vm1, %v276_v1  ;;  %2335 = vmatpush3.msk.msra.mxu1 %vm308_vm1, %v276_v1  ;;  %v1982_v7 = vld [vmem:[%s2534_s7 + $0x4] sm:$0xf]  ;;  %v268_v8 = vld [vmem:[%s2529_s4 + $0x10] sm:$0xff]  ;;  %v269_v10 = vld [vmem:[%s2529_s4 + $0x18] sm:$0xff] }
  0x29   : > { %2183 = vmatprep.mubr.msk.f32.mxu0 %vm277_vm2, %v266_v2  ;;  %2192 = vmatprep.mubr.msk.f32.mxu1 %vm277_vm2, %v272_v3  ;;  %v274_v9 = vld [vmem:[%s2529_s4 + $0x40] sm:$0xff]  ;;  %v275_v11 = vld [vmem:[%s2529_s4 + $0x48] sm:$0xff]  ;;  %v2018_v15 = vld [vmem:[%s2534_s7 + $0x10] sm:$0xf] }
  0x2a   : > { %2184 = vmatmul.mubr.msk.f32.vlgmr.msra.gmra.mxu0 %vm277_vm2, %v267_v4  ;;  %2193 = vmatmul.mubr.msk.f32.vlgmr.msra.gmra.mxu1 %vm277_vm2, %v273_v5  ;;  %v270_v12 = vld [vmem:[%s2529_s4 + $0x20] sm:$0xff]  ;;  %v2006_v14 = vld [vmem:[%s2534_s7 + $0xc] sm:$0xf]  ;;  %v439_v18 = vld [vmem:[%s2529_s4 + $0x11] sm:$0xff] }
  0x2b   : > { %2215 = vmatprep.subr.msk.mxu0 %vm308_vm1, %v1994_v6  ;;  %2198 = vmatprep.subr.msk.mxu1 %vm308_vm1, %v1982_v7  ;;  %v437_v13 = vld [vmem:[%s2529_s4 + $0x1] sm:$0xff]  ;;  %v438_v17 = vld [vmem:[%s2529_s4 + $0x9] sm:$0xff]  ;;  %v2030_v20 = vld [vmem:[%s2534_s7 + $0x14] sm:$0xf] }
  0x2c   : > { %2216 = vmatpush3.msk.msra.mxu0 %vm308_vm1, %v1994_v6  ;;  %2186 = vmatprep.mubr.msk.f32.mxu0 %vm277_vm2, %v268_v8  ;;  %v271_v16 = vld [vmem:[%s2529_s4 + $0x28] sm:$0xff]  ;;  %v440_v21 = vld [vmem:[%s2529_s4 + $0x19] sm:$0xff]  ;;  %v443_v28 = vld [vmem:[%s2529_s4 + $0x31] sm:$0xff] }
  0x2d   : > { %2195 = vmatprep.mubr.msk.f32.mxu1 %vm277_vm2, %v274_v9  ;;  %2199 = vmatpush3.msk.msra.mxu1 %vm308_vm1, %v1982_v7  ;;  %v607_v19 = vld [vmem:[%s2529_s4 + $0x2] sm:$0xff]  ;;  %v608_v22 = vld [vmem:[%s2529_s4 + $0xa] sm:$0xff]  ;;  %v609_v24 = vld [vmem:[%s2529_s4 + $0x12] sm:$0xff] }
  0x2e   : > { %2187 = vmatmul.mubr.msk.f32.gmra.mxu0 %vm277_vm2, %v269_v10  ;;  %2196 = vmatmul.mubr.msk.f32.gmra.mxu1 %vm277_vm2, %v275_v11  ;;  %v441_v23 = vld [vmem:[%s2529_s4 + $0x21] sm:$0xff]  ;;  %v2042_v25 = vld [vmem:[%s2534_s7 + $0x18] sm:$0xf]  ;;  %v442_v26 = vld [vmem:[%s2529_s4 + $0x29] sm:$0xff] }
  0x2f   : > { %2189 = vmatprep.mubr.msk.f32.mxu0 %vm277_vm2, %v270_v12  ;;  %2200 = vmatprep.mubr.msk.f32.mxu1 %vm277_vm2, %v437_v13  ;;  %v610_v27 = vld [vmem:[%s2529_s4 + $0x1a] sm:$0xff]  ;;  %v611_v29 = vld [vmem:[%s2529_s4 + $0x22] sm:$0xff]  ;;  %v612_v31 = vld [vmem:[%s2529_s4 + $0x2a] sm:$0xff] }
  0x30   : > { %2232 = vmatprep.subr.msk.mxu1 %vm308_vm1, %v2006_v14  ;;  %2249 = vmatprep.subr.msk.mxu0 %vm308_vm1, %v2018_v15  ;;  %v444_v30 = vld [vmem:[%s2529_s4 + $0x39] sm:$0xff]  ;;  %v445_v32 = vld [vmem:[%s2529_s4 + $0x41] sm:$0xff]  ;;  %v446_v34 = vld [vmem:[%s2529_s4 + $0x49] sm:$0xff] }
  0x31   : > { %v613_v33 = vld [vmem:[%s2529_s4 + $0x32] sm:$0xff]  ;;  %v614_v35 = vld [vmem:[%s2529_s4 + $0x3a] sm:$0xff]  ;;  %v615_v36 = vld [vmem:[%s2529_s4 + $0x42] sm:$0xff] }
  0x32   : > { %2190 = vmatmul.mubr.msk.f32.gmra.mxu0 %vm277_vm2, %v271_v16  ;;  %2201 = vmatmul.mubr.msk.f32.vlgmr.msra.gmra.mxu1 %vm277_vm2, %v438_v17  ;;  %v616_v37 = vld [vmem:[%s2529_s4 + $0x4a] sm:$0xff]  ;;  %v2054_v39 = vld [vmem:[%s2534_s7 + $0x1c] sm:$0xf]  ;;  %v948_v40 = vld [vmem:[%s2529_s4 + $0x13] sm:$0xff] }
  0x33   : > { %2203 = vmatprep.mubr.msk.f32.mxu1 %vm277_vm2, %v439_v18  ;;  %2217 = vmatprep.mubr.msk.f32.mxu0 %vm277_vm2, %v607_v19  ;;  %v947_v38 = vld [vmem:[%s2529_s4 + $0xb] sm:$0xff]  ;;  %v949_v41 = vld [vmem:[%s2529_s4 + $0x1b] sm:$0xff]  ;;  %v950_v43 = vld [vmem:[%s2529_s4 + $0x23] sm:$0xff] }
  0x34   : > { %2233 = vmatpush3.msk.msra.mxu1 %vm308_vm1, %v2006_v14  ;;  %v2066_v42 = vld [vmem:[%s2534_s7 + $0x20] sm:$0xf]  ;;  %v951_v44 = vld [vmem:[%s2529_s4 + $0x2b] sm:$0xff]  ;;  %v952_v45 = vld [vmem:[%s2529_s4 + $0x33] sm:$0xff] }
  0x35   : > { %2266 = vmatprep.subr.msk.mxu1 %vm308_vm1, %v2030_v20  ;;  %v953_v46 = vld [vmem:[%s2529_s4 + $0x3b] sm:$0xff]  ;;  %v786_v47 = vld [vmem:[%s2529_s4 + $0x52] sm:$0xff]  ;;  %v954_v48 = vld [vmem:[%s2529_s4 + $0x43] sm:$0xff] }
  0x36   : > { %2204 = vmatmul.mubr.msk.f32.gmra.mxu1 %vm277_vm2, %v440_v21  ;;  %2218 = vmatmul.mubr.msk.f32.vlgmr.msra.gmra.mxu0 %vm277_vm2, %v608_v22  ;;  %v955_v49 = vld [vmem:[%s2529_s4 + $0x4b] sm:$0xff]  ;;  %v956_v51 = vld [vmem:[%s2529_s4 + $0x53] sm:$0xff]  ;;  %v1119_v53 = vld [vmem:[%s2529_s4 + $0x1c] sm:$0xff] }
  0x37   : > { %2250 = vmatpush3.msk.msra.mxu0 %vm308_vm1, %v2018_v15  ;;  %2206 = vmatprep.mubr.msk.f32.mxu1 %vm277_vm2, %v441_v23  ;;  %v1117_v50 = vld [vmem:[%s2529_s4 + $0xc] sm:$0xff]  ;;  %v1118_v52 = vld [vmem:[%s2529_s4 + $0x14] sm:$0xff]  ;;  %v1120_v54 = vld [vmem:[%s2529_s4 + $0x24] sm:$0xff] }
  0x38   : > { %2220 = vmatprep.mubr.msk.f32.mxu0 %vm277_vm2, %v609_v24  ;;  %2283 = vmatprep.subr.msk.mxu0 %vm308_vm1, %v2042_v25  ;;  %v1121_v55 = vld [vmem:[%s2529_s4 + $0x2c] sm:$0xff]  ;;  %v1122_v56 = vld [vmem:[%s2529_s4 + $0x34] sm:$0xff]  ;;  %v1123_v57 = vld [vmem:[%s2529_s4 + $0x3c] sm:$0xff] }
  0x39   : > { %v1124_v58 = vld [vmem:[%s2529_s4 + $0x44] sm:$0xff]  ;;  %v1125_v59 = vld [vmem:[%s2529_s4 + $0x4c] sm:$0xff]  ;;  %v1126_v60 = vld [vmem:[%s2529_s4 + $0x54] sm:$0xff] }
  0x3a   : > { %2207 = vmatmul.mubr.msk.f32.gmra.mxu1 %vm277_vm2, %v442_v26  ;;  %2221 = vmatmul.mubr.msk.f32.gmra.mxu0 %vm277_vm2, %v610_v27  ;;  %v1457_v61 = vld [vmem:[%s2529_s4 + $0x15] sm:$0xff]  ;;  %v1458_v63 = vld [vmem:[%s2529_s4 + $0x1d] sm:$0xff]  ;;  %v1459_v0 = vld [vmem:[%s2529_s4 + $0x25] sm:$0xff] }
  0x3b   : > { %2209 = vmatprep.mubr.msk.f32.mxu1 %vm277_vm2, %v443_v28  ;;  %2223 = vmatprep.mubr.msk.f32.mxu0 %vm277_vm2, %v611_v29  ;;  %v1296_v62 = vld [vmem:[%s2529_s4 + $0x5c] sm:$0xff]  ;;  %v1460_v2 = vld [vmem:[%s2529_s4 + $0x2d] sm:$0xff]  ;;  %v1463_v8 = vld [vmem:[%s2529_s4 + $0x45] sm:$0xff] }
  0x3c   : > { %v1627_v1 = vld [vmem:[%s2529_s4 + $0x16] sm:$0xff]  ;;  %v1628_v3 = vld [vmem:[%s2529_s4 + $0x1e] sm:$0xff]  ;;  %v1629_v5 = vld [vmem:[%s2529_s4 + $0x26] sm:$0xff] }
  0x3d   : > { %v1461_v4 = vld [vmem:[%s2529_s4 + $0x35] sm:$0xff]  ;;  %v1462_v6 = vld [vmem:[%s2529_s4 + $0x3d] sm:$0xff]  ;;  %v1464_v10 = vld [vmem:[%s2529_s4 + $0x4d] sm:$0xff] }
  0x3e   : > { %2210 = vmatmul.mubr.msk.f32.gmra.mxu1 %vm277_vm2, %v444_v30  ;;  %2224 = vmatmul.mubr.msk.f32.gmra.mxu0 %vm277_vm2, %v612_v31  ;;  %v1630_v7 = vld [vmem:[%s2529_s4 + $0x2e] sm:$0xff]  ;;  %v1631_v9 = vld [vmem:[%s2529_s4 + $0x36] sm:$0xff]  ;;  %v1632_v11 = vld [vmem:[%s2529_s4 + $0x3e] sm:$0xff] }
  0x3f   : > { %2212 = vmatprep.mubr.msk.f32.mxu1 %vm277_vm2, %v445_v32  ;;  %2226 = vmatprep.mubr.msk.f32.mxu0 %vm277_vm2, %v613_v33  ;;  %v1465_v12 = vld [vmem:[%s2529_s4 + $0x55] sm:$0xff]  ;;  %v1633_v13 = vld [vmem:[%s2529_s4 + $0x46] sm:$0xff]  ;;  %v1466_v14 = vld [vmem:[%s2529_s4 + $0x5d] sm:$0xff] }
  0x40   : > { %v1634_v15 = vld [vmem:[%s2529_s4 + $0x4e] sm:$0xff]  ;;  %v1635_v16 = vld [vmem:[%s2529_s4 + $0x56] sm:$0xff]  ;;  %v1636_v17 = vld [vmem:[%s2529_s4 + $0x5e] sm:$0xff] }
  0x42   : > { %2213 = vmatmul.mubr.msk.f32.gmra.mxu1 %vm277_vm2, %v446_v34  ;;  %2227 = vmatmul.mubr.msk.f32.gmra.mxu0 %vm277_vm2, %v614_v35 }
  0x43   : > { %2229 = vmatprep.mubr.msk.f32.mxu0 %vm277_vm2, %v615_v36  ;;  %2234 = vmatprep.mubr.msk.f32.mxu1 %vm277_vm2, %v608_v22 }
  0x46   : > { %2230 = vmatmul.mubr.msk.f32.gmra.mxu0 %vm277_vm2, %v616_v37  ;;  %2235 = vmatmul.mubr.msk.f32.vlgmr.msra.gmra.mxu1 %vm277_vm2, %v609_v24 }
  0x47   : > { %2237 = vmatprep.mubr.msk.f32.mxu1 %vm277_vm2, %v610_v27  ;;  %2251 = vmatprep.mubr.msk.f32.mxu0 %vm277_vm2, %v947_v38 }
  0x48   : > { %2267 = vmatpush3.msk.msra.mxu1 %vm308_vm1, %v2030_v20 }
  0x49   : > { %2300 = vmatprep.subr.msk.mxu1 %vm308_vm1, %v2054_v39 }
  0x4a   : > { %2238 = vmatmul.mubr.msk.f32.gmra.mxu1 %vm277_vm2, %v611_v29  ;;  %2252 = vmatmul.mubr.msk.f32.vlgmr.msra.gmra.mxu0 %vm277_vm2, %v948_v40 }
  0x4b   : > { %2284 = vmatpush3.msk.msra.mxu0 %vm308_vm1, %v2042_v25  ;;  %2240 = vmatprep.mubr.msk.f32.mxu1 %vm277_vm2, %v612_v31 }
  0x4c   : > { %2254 = vmatprep.mubr.msk.f32.mxu0 %vm277_vm2, %v949_v41  ;;  %2317 = vmatprep.subr.msk.mxu0 %vm308_vm1, %v2066_v42 }
  0x4e   : > { %2241 = vmatmul.mubr.msk.f32.gmra.mxu1 %vm277_vm2, %v613_v33  ;;  %2255 = vmatmul.mubr.msk.f32.gmra.mxu0 %vm277_vm2, %v950_v43 }
  0x4f   : > { %2243 = vmatprep.mubr.msk.f32.mxu1 %vm277_vm2, %v614_v35  ;;  %2257 = vmatprep.mubr.msk.f32.mxu0 %vm277_vm2, %v951_v44 }
  0x52   : > { %2244 = vmatmul.mubr.msk.f32.gmra.mxu1 %vm277_vm2, %v615_v36  ;;  %2258 = vmatmul.mubr.msk.f32.gmra.mxu0 %vm277_vm2, %v952_v45 }
  0x53   : > { %2246 = vmatprep.mubr.msk.f32.mxu1 %vm277_vm2, %v616_v37  ;;  %2260 = vmatprep.mubr.msk.f32.mxu0 %vm277_vm2, %v953_v46 }
  0x56   : > { %2247 = vmatmul.mubr.msk.f32.gmra.mxu1 %vm277_vm2, %v786_v47  ;;  %2261 = vmatmul.mubr.msk.f32.gmra.mxu0 %vm277_vm2, %v954_v48 }
  0x57   : > { %2263 = vmatprep.mubr.msk.f32.mxu0 %vm277_vm2, %v955_v49  ;;  %2268 = vmatprep.mubr.msk.f32.mxu1 %vm277_vm2, %v1117_v50 }
  0x5a   : > { %2264 = vmatmul.mubr.msk.f32.gmra.mxu0 %vm277_vm2, %v956_v51  ;;  %2269 = vmatmul.mubr.msk.f32.vlgmr.msra.gmra.mxu1 %vm277_vm2, %v1118_v52 }
  0x5b   : > { %2271 = vmatprep.mubr.msk.f32.mxu1 %vm277_vm2, %v1119_v53  ;;  %2285 = vmatprep.mubr.msk.f32.mxu0 %vm277_vm2, %v1118_v52 }
  0x5c   : > { %2301 = vmatpush3.msk.msra.mxu1 %vm308_vm1, %v2054_v39 }
  0x5e   : > { %2272 = vmatmul.mubr.msk.f32.gmra.mxu1 %vm277_vm2, %v1120_v54  ;;  %2286 = vmatmul.mubr.msk.f32.vlgmr.msra.gmra.mxu0 %vm277_vm2, %v1119_v53 }
  0x5f   : > { %2318 = vmatpush3.msk.msra.mxu0 %vm308_vm1, %v2066_v42  ;;  %2274 = vmatprep.mubr.msk.f32.mxu1 %vm277_vm2, %v1121_v55 }
  0x60   : > { %2288 = vmatprep.mubr.msk.f32.mxu0 %vm277_vm2, %v1120_v54 }
  0x62   : > { %2275 = vmatmul.mubr.msk.f32.gmra.mxu1 %vm277_vm2, %v1122_v56  ;;  %2289 = vmatmul.mubr.msk.f32.gmra.mxu0 %vm277_vm2, %v1121_v55 }
  0x63   : > { %2277 = vmatprep.mubr.msk.f32.mxu1 %vm277_vm2, %v1123_v57  ;;  %2291 = vmatprep.mubr.msk.f32.mxu0 %vm277_vm2, %v1122_v56 }
  0x66   : > { %2278 = vmatmul.mubr.msk.f32.gmra.mxu1 %vm277_vm2, %v1124_v58  ;;  %2292 = vmatmul.mubr.msk.f32.gmra.mxu0 %vm277_vm2, %v1123_v57 }
  0x67   : > { %2280 = vmatprep.mubr.msk.f32.mxu1 %vm277_vm2, %v1125_v59  ;;  %2294 = vmatprep.mubr.msk.f32.mxu0 %vm277_vm2, %v1124_v58 }
  0x6a   : > { %2281 = vmatmul.mubr.msk.f32.gmra.mxu1 %vm277_vm2, %v1126_v60  ;;  %2295 = vmatmul.mubr.msk.f32.gmra.mxu0 %vm277_vm2, %v1125_v59 }
  0x6b   : > { %2297 = vmatprep.mubr.msk.f32.mxu0 %vm277_vm2, %v1126_v60  ;;  %2302 = vmatprep.mubr.msk.f32.mxu1 %vm277_vm2, %v1457_v61 }
  0x6e   : > { %2298 = vmatmul.mubr.msk.f32.gmra.mxu0 %vm277_vm2, %v1296_v62  ;;  %2303 = vmatmul.mubr.msk.f32.vlgmr.msra.gmra.mxu1 %vm277_vm2, %v1458_v63 }
  0x6f   : > { %2305 = vmatprep.mubr.msk.f32.mxu1 %vm277_vm2, %v1459_v0  ;;  %2319 = vmatprep.mubr.msk.f32.mxu0 %vm277_vm2, %v1627_v1 }
  0x72   : > { %2306 = vmatmul.mubr.msk.f32.gmra.mxu1 %vm277_vm2, %v1460_v2  ;;  %2320 = vmatmul.mubr.msk.f32.vlgmr.msra.gmra.mxu0 %vm277_vm2, %v1628_v3 }
  0x73   : > { %2308 = vmatprep.mubr.msk.f32.mxu1 %vm277_vm2, %v1461_v4  ;;  %2322 = vmatprep.mubr.msk.f32.mxu0 %vm277_vm2, %v1629_v5 }
  0x76   : > { %2309 = vmatmul.mubr.msk.f32.gmra.mxu1 %vm277_vm2, %v1462_v6  ;;  %2323 = vmatmul.mubr.msk.f32.gmra.mxu0 %vm277_vm2, %v1630_v7 }
  0x77   : > { %2311 = vmatprep.mubr.msk.f32.mxu1 %vm277_vm2, %v1463_v8  ;;  %2325 = vmatprep.mubr.msk.f32.mxu0 %vm277_vm2, %v1631_v9  ;;  %v257_v8 = vld [vmem:[#allocation2 + $0x8] sm:$0xff] }
  0x7a   : > { %2312 = vmatmul.mubr.msk.f32.gmra.mxu1 %vm277_vm2, %v1464_v10  ;;  %2326 = vmatmul.mubr.msk.f32.gmra.mxu0 %vm277_vm2, %v1632_v11  ;;  %v256_v11 = vld [vmem:[#allocation2] sm:$0xff] }
  0x7b   : > { %2314 = vmatprep.mubr.msk.f32.mxu1 %vm277_vm2, %v1465_v12  ;;  %2328 = vmatprep.mubr.msk.f32.mxu0 %vm277_vm2, %v1633_v13 }
  0x7e   : > { %2315 = vmatmul.mubr.msk.f32.gmra.mxu1 %vm277_vm2, %v1466_v14  ;;  %2329 = vmatmul.mubr.msk.f32.gmra.mxu0 %vm277_vm2, %v1634_v15  ;;  %v259_v15 = vld [vmem:[#allocation2 + $0x18] sm:$0xff] }
  0x7f   : > { %2331 = vmatprep.mubr.msk.f32.mxu0 %vm277_vm2, %v1635_v16 }
  0x82   : > { %2332 = vmatmul.mubr.msk.f32.gmra.mxu0 %vm277_vm2, %v1636_v17 }
  0xea   : > { %v2185_v18 = vpop.f32.mrf.mxu0  ;;  %v2734_v19 = vpop.f32.mrf.mxu1 }
  0xeb   : > { %v428_v14 = vadd.f32 %v2185_v18, %v257_v8  ;;  %v263_v8 = vld [vmem:[#allocation2 + $0x38] sm:$0xff] }
  0xec   : > { %v378_v20 = vpop.f32.mrf.mxu0  ;;  %v2736_v21 = vpop.f32.mrf.mxu1 }
  0xee   : > { %v2738_v22 = vpop.f32.mrf.mxu0  ;;  %v2740_v23 = vpop.f32.mrf.mxu1 }
  0xf0   : > { %v2742_v24 = vpop.f32.mrf.mxu0  ;;  %v2744_v25 = vpop.f32.mrf.mxu1 }
  0xf2   : > { %v2746_v26 = vpop.f32.mrf.mxu0  ;;  %v2202_v27 = vpop.f32.mrf.mxu1 }
  0xf4   : > { %v2748_v28 = vpop.f32.mrf.mxu0  ;;  %v548_v29 = vpop.f32.mrf.mxu1 }
  0xf6   : > { %v2750_v30 = vpop.f32.mrf.mxu1  ;;  %v2219_v31 = vpop.f32.mrf.mxu0 }
  0xf8   : > { %v2752_v32 = vpop.f32.mrf.mxu1  ;;  %v2754_v33 = vpop.f32.mrf.mxu0 }
  0xfa   : > { %v2756_v34 = vpop.f32.mrf.mxu1  ;;  %v2758_v35 = vpop.f32.mrf.mxu0 }
  0xfc   : > { %v2760_v36 = vpop.f32.mrf.mxu1  ;;  %v2762_v37 = vpop.f32.mrf.mxu0 }
  0xfe   : > { %v2764_v38 = vpop.f32.mrf.mxu1  ;;  %v2766_v39 = vpop.f32.mrf.mxu0 }
 0x100   : > { %v2768_v40 = vpop.f32.mrf.mxu1  ;;  %v2770_v41 = vpop.f32.mrf.mxu0 }
 0x102   : > { %v2772_v42 = vpop.f32.mrf.mxu1  ;;  %v2774_v43 = vpop.f32.mrf.mxu0 }
 0x104   : > { %v2776_v44 = vpop.f32.mrf.mxu1  ;;  %v2778_v45 = vpop.f32.mrf.mxu0 }
 0x105   : > { %2978 = vst [vmem:[#allocation3_spill] sm:$0xff] %v2776_v44 }
 0x106   : > { %v2780_v46 = vpop.f32.mrf.mxu0  ;;  %v2236_v47 = vpop.f32.mrf.mxu1 }
 0x107   : > { %2979 = vst [vmem:[#allocation4_spill] sm:$0xff] %v2780_v46 }
 0x108   : > { %v2782_v48 = vpop.f32.mrf.mxu0  ;;  %v888_v49 = vpop.f32.mrf.mxu1 }
 0x109   : > { %2980 = vst [vmem:[#allocation5_spill] sm:$0xff] %v2782_v48  ;;  %v430_v48 = vadd.f32 %v2738_v22, %v259_v15 }
 0x10a   : > { %v2784_v50 = vpop.f32.mrf.mxu1  ;;  %v2253_v51 = vpop.f32.mrf.mxu0 }
 0x10c   : > { %v2786_v52 = vpop.f32.mrf.mxu1  ;;  %v2788_v53 = vpop.f32.mrf.mxu0 }
 0x10e   : > { %v2790_v54 = vpop.f32.mrf.mxu1  ;;  %v2792_v55 = vpop.f32.mrf.mxu0 }
 0x110   : > { %v2794_v56 = vpop.f32.mrf.mxu1  ;;  %v2796_v57 = vpop.f32.mrf.mxu0 }
 0x112   : > { %v2798_v58 = vpop.f32.mrf.mxu1  ;;  %v2800_v59 = vpop.f32.mrf.mxu0 }
 0x114   : > { %v2802_v60 = vpop.f32.mrf.mxu1  ;;  %v2804_v61 = vpop.f32.mrf.mxu0 }
 0x115   : > { %2981 = vst [vmem:[#allocation6_spill] sm:$0xff] %v2802_v60 }
 0x116   : > { %v2806_v62 = vpop.f32.mrf.mxu1  ;;  %v2808_v63 = vpop.f32.mrf.mxu0 }
 0x117   : > { %2982 = vst [vmem:[#allocation7_spill] sm:$0xff] %v2806_v62  ;;  %2983 = vst [vmem:[#allocation8_spill] sm:$0xff] %v2808_v63  ;;  %v261_v63 = vld [vmem:[#allocation2 + $0x28] sm:$0xff] }
 0x118   : > { %v2810_v0 = vpop.f32.mrf.mxu1  ;;  %v2812_v1 = vpop.f32.mrf.mxu0 }
 0x119   : > { %2984 = vst [vmem:[#allocation9_spill] sm:$0xff] %v2810_v0  ;;  %2985 = vst [vmem:[#allocation10_spill] sm:$0xff] %v2812_v1  ;;  %v258_v0 = vld [vmem:[#allocation2 + $0x10] sm:$0xff] }
 0x11a   : > { %v2814_v2 = vpop.f32.mrf.mxu0  ;;  %v2270_v3 = vpop.f32.mrf.mxu1 }
 0x11b   : > { %2986 = vst [vmem:[#allocation11_spill] sm:$0xff] %v2814_v2  ;;  %v598_v2 = vadd.f32 %v2202_v27, %v428_v14  ;;  %v432_v14 = vadd.f32 %v2746_v26, %v261_v63 }
 0x11c   : > { %v2816_v4 = vpop.f32.mrf.mxu0  ;;  %v1228_v5 = vpop.f32.mrf.mxu1 }
 0x11d   : > { %2987 = vst [vmem:[#allocation12_spill] sm:$0xff] %v2816_v4  ;;  %v427_v4 = vadd.f32 %v378_v20, %v256_v11  ;;  %v768_v46 = vadd.f32 %v2219_v31, %v598_v2  ;;  %v600_v20 = vadd.f32 %v2750_v30, %v430_v48  ;;  %v265_v31 = vld [vmem:[#allocation2 + $0x48] sm:$0xff] }
 0x11e   : > { %v2818_v6 = vpop.f32.mrf.mxu1  ;;  %v2287_v7 = vpop.f32.mrf.mxu0 }
 0x11f   : > { %v597_v60 = vadd.f32 %v548_v29, %v427_v4  ;;  %v938_v11 = vadd.f32 %v2236_v47, %v768_v46  ;;  %v262_v29 = vld [vmem:[#allocation2 + $0x30] sm:$0xff]  ;;  %v770_v4 = vadd.f32 %v2758_v35, %v600_v20  ;;  %v264_v47 = vld [vmem:[#allocation2 + $0x40] sm:$0xff] }
 0x120   : > { %v2820_v9 = vpop.f32.mrf.mxu1  ;;  %v2822_v10 = vpop.f32.mrf.mxu0 }
 0x121   : > { %v767_v27 = vadd.f32 %v2754_v33, %v597_v60  ;;  %v602_v33 = vadd.f32 %v2756_v34, %v432_v14 }
 0x122   : > { %v2824_v12 = vpop.f32.mrf.mxu1  ;;  %v2826_v13 = vpop.f32.mrf.mxu0 }
 0x123   : > { %v937_v15 = vadd.f32 %v888_v49, %v767_v27  ;;  %v772_v34 = vadd.f32 %v2766_v39, %v602_v33 }
 0x124   : > { %v2828_v16 = vpop.f32.mrf.mxu1  ;;  %v2830_v17 = vpop.f32.mrf.mxu0 }
 0x125   : > { %2988 = vst [vmem:[#allocation13_spill] sm:$0xff] %v2828_v16  ;;  %2989 = vst [vmem:[#allocation14_spill] sm:$0xff] %v2830_v17  ;;  %v429_v16 = vadd.f32 %v2742_v24, %v258_v0  ;;  %v260_v17 = vld [vmem:[#allocation2 + $0x20] sm:$0xff]  ;;  %v1108_v24 = vadd.f32 %v2253_v51, %v938_v11  ;;  %v434_v0 = vadd.f32 %v2734_v19, %v263_v8 }
 0x126   : > { %v2832_v1 = vpop.f32.mrf.mxu1  ;;  %v2834_v62 = vpop.f32.mrf.mxu0  ;;  %v431_v30 = vadd.f32 %v2748_v28, %v260_v17  ;;  %v1107_v35 = vadd.f32 %v2788_v53, %v937_v15  ;;  %v433_v51 = vadd.f32 %v2736_v21, %v262_v29  ;;  %v436_v19 = vadd.f32 %v2740_v23, %v265_v31  ;;  %v2993_v15 = vld [vmem:[#allocation4_spill] sm:$0xff] }
 0x127   : > { %2990 = vst [vmem:[#allocation15_spill] sm:$0xff] %v2832_v1  ;;  %v599_v2 = vadd.f32 %v2752_v32, %v429_v16  ;;  %v940_v32 = vadd.f32 %v2784_v50, %v770_v4  ;;  %v1278_v49 = vadd.f32 %v2270_v3, %v1108_v24  ;;  %v435_v53 = vadd.f32 %v2744_v25, %v264_v47  ;;  %v2992_v4 = vld [vmem:[#allocation3_spill] sm:$0xff]  ;;  %v2994_v24 = vld [vmem:[#allocation6_spill] sm:$0xff] }
 0x128   : > { %v2837_v44 = vpop.f32.mrf.mxu1  ;;  %v2839_v18 = vpop.f32.mrf.mxu0  ;;  %v601_v28 = vadd.f32 %v2760_v36, %v431_v30  ;;  %v1277_v17 = vadd.f32 %v1228_v5, %v1107_v35  ;;  %v604_v3 = vadd.f32 %v2764_v38, %v434_v0  ;;  %v942_v23 = vadd.f32 %v2790_v54, %v772_v34  ;;  %v2995_v0 = vld [vmem:[#allocation8_spill] sm:$0xff]  ;;  %v2999_v34 = vld [vmem:[#allocation10_spill] sm:$0xff] }
 0x129   : > { %v769_v48 = vadd.f32 %v2762_v37, %v599_v2  ;;  %v1110_v37 = vadd.f32 %v2792_v55, %v940_v32  ;;  %v1448_v50 = vadd.f32 %v2287_v7, %v1278_v49  ;;  %v603_v5 = vadd.f32 %v2768_v40, %v433_v51  ;;  %v2997_v49 = vld [vmem:[#allocation5_spill] sm:$0xff] }
 0x12a   : > { %v2845_v1 = vpop.f32.mrf.mxu1  ;;  %v2847_v22 = vpop.f32.mrf.mxu0  ;;  %v771_v21 = vadd.f32 %v2770_v41, %v601_v28  ;;  %v774_v25 = vadd.f32 %v2774_v43, %v604_v3  ;;  %v1112_v41 = vadd.f32 %v2800_v59, %v942_v23 }
 0x12b   : > { %v939_v16 = vadd.f32 %v2786_v52, %v769_v48  ;;  %v1280_v20 = vadd.f32 %v2818_v6, %v1110_v37  ;;  %v1447_v52 = vadd.f32 %v2822_v10, %v1277_v17  ;;  %v606_v6 = vadd.f32 %v2772_v42, %v436_v19  ;;  %v2998_v19 = vld [vmem:[#allocation7_spill] sm:$0xff] }
 0x12c   : > { %v2854_v46 = vpop.f32.mrf.mxu1  ;;  %v2856_v26 = vpop.f32.mrf.mxu0  ;;  %v941_v38 = vadd.f32 %v2794_v56, %v771_v21  ;;  %v773_v10 = vadd.f32 %v2778_v45, %v603_v5  ;;  %v944_v40 = vadd.f32 %v2798_v58, %v774_v25  ;;  %v1282_v59 = vadd.f32 %v2824_v12, %v1112_v41  ;;  %v2991_v31 = vld [vmem:[#allocation14_spill] sm:$0xff]  ;;  %v2996_v47 = vld [vmem:[#allocation13_spill] sm:$0xff]  ;;  %v3003_v41 = vld [vmem:[#allocation12_spill] sm:$0xff] }
 0x12d   : > { %v1109_v8 = vadd.f32 %v2796_v57, %v939_v16  ;;  %v1450_v11 = vadd.f32 %v2826_v13, %v1280_v20  ;;  %v605_v42 = vadd.f32 %v2992_v4, %v435_v53  ;;  %v776_v45 = vadd.f32 %v2993_v15, %v606_v6  ;;  %v3001_v21 = vld [vmem:[#allocation9_spill] sm:$0xff] }
 0x12e   : > { %v2865_v60 = vpop.f32.mrf.mxu0  ;;  %v2304_v63 = vpop.f32.mrf.mxu1  ;;  %v1111_v43 = vadd.f32 %v2804_v61, %v941_v38  ;;  %v943_v58 = vadd.f32 %v2994_v24, %v773_v10  ;;  %v1114_v61 = vadd.f32 %v2995_v0, %v944_v40  ;;  %v1452_v48 = vadd.f32 %v2834_v62, %v1282_v59  ;;  %v3000_v17 = vld [vmem:[#allocation15_spill] sm:$0xff] }
 0x12f   : > { %v1618_v55 = vadd.f32 %v2304_v63, %v1448_v50  ;;  %v1279_v27 = vadd.f32 %v2820_v9, %v1109_v8  ;;  %v775_v51 = vadd.f32 %v2997_v49, %v605_v42  ;;  %v946_v28 = vadd.f32 %v2998_v19, %v776_v45 }
 0x130   : > { %v2873_v36 = vpop.f32.mrf.mxu0  ;;  %v1568_v39 = vpop.f32.mrf.mxu1  ;;  %v1281_v12 = vadd.f32 %v2996_v47, %v1111_v43  ;;  %v1113_v63 = vadd.f32 %v2999_v34, %v943_v58  ;;  %v1284_v50 = vadd.f32 %v3000_v17, %v1114_v61 }
 0x131   : > { %v1617_v57 = vadd.f32 %v1568_v39, %v1447_v52  ;;  %v1449_v2 = vadd.f32 %v2991_v31, %v1279_v27  ;;  %v945_v23 = vadd.f32 %v3001_v21, %v775_v51  ;;  %v3002_v39 = vld [vmem:[#allocation11_spill] sm:$0xff] }
 0x132   : > { %v2307_v7 = vpop.f32.mrf.mxu1  ;;  %v2321_v54 = vpop.f32.mrf.mxu0  ;;  %v1451_v53 = vadd.f32 %v2839_v18, %v1281_v12  ;;  %v1116_v8 = vadd.f32 %v3002_v39, %v946_v28  ;;  %v1454_v5 = vadd.f32 %v2847_v22, %v1284_v50 }
 0x133   : > { %v2884_v14 = vadd.f32 %v2321_v54, %v1618_v55  ;;  %v1620_v9 = vadd.f32 %v2307_v7, %v1450_v11  ;;  %v1283_v55 = vadd.f32 %v2837_v44, %v1113_v63  ;;  %v1115_v18 = vadd.f32 %v3003_v41, %v945_v23 }
 0x134   : > { %v1578_v56 = vpop.f32.mrf.mxu1  ;;  %v1738_v29 = vpop.f32.mrf.mxu0  ;;  %v1286_v27 = vadd.f32 %v2845_v1, %v1116_v8 }
 0x135   : > { %1799 = vst.msk [vmem:[#allocation2 + $0x8] sm:$0xff] %vm1797_vm3, %v2884_v14  ;;  %v2894_v13 = vadd.f32 %v1738_v29, %v1617_v57  ;;  %v1619_v32 = vadd.f32 %v1578_v56, %v1449_v2  ;;  %v1453_v11 = vadd.f32 %v2856_v26, %v1283_v55  ;;  %v1285_v22 = vadd.f32 %v2854_v46, %v1115_v18 }
 0x136   : > { %v2310_v30 = vpop.f32.mrf.mxu1  ;;  %v2324_v33 = vpop.f32.mrf.mxu0  ;;  %v1456_v40 = vadd.f32 %v2865_v60, %v1286_v27 }
 0x137   : > { %1798 = vst.msk [vmem:[#allocation2] sm:$0xff] %vm1797_vm3, %v2894_v13  ;;  %v1790_v35 = vadd.f32 %v2324_v33, %v1620_v9  ;;  %v1622_v3 = vadd.f32 %v2310_v30, %v1452_v48  ;;  %v1455_v1 = vadd.f32 %v2873_v36, %v1285_v22 }
 0x138   : > { %v1588_v16 = vpop.f32.mrf.mxu1  ;;  %v1748_v37 = vpop.f32.mrf.mxu0 }
 0x139   : > { %1801 = vst.msk [vmem:[#allocation2 + $0x18] sm:$0xff] %vm1797_vm3, %v1790_v35  ;;  %v1789_v62 = vadd.f32 %v1748_v37, %v1619_v32  ;;  %v1621_v25 = vadd.f32 %v1588_v16, %v1451_v53 }
 0x13a   : > { %v2313_v20 = vpop.f32.mrf.mxu1  ;;  %v2327_v52 = vpop.f32.mrf.mxu0 }
 0x13b   : > { %1800 = vst.msk [vmem:[#allocation2 + $0x10] sm:$0xff] %vm1797_vm3, %v1789_v62  ;;  %v1792_v38 = vadd.f32 %v2327_v52, %v1622_v3  ;;  %v1624_v57 = vadd.f32 %v2313_v20, %v1454_v5 }
 0x13c   : > { %v1598_v7 = vpop.f32.mrf.mxu1  ;;  %v1758_v54 = vpop.f32.mrf.mxu0 }
 0x13d   : > { %1803 = vst.msk [vmem:[#allocation2 + $0x28] sm:$0xff] %vm1797_vm3, %v1792_v38  ;;  %v1791_v6 = vadd.f32 %v1758_v54, %v1621_v25  ;;  %v1623_v43 = vadd.f32 %v1598_v7, %v1453_v11 }
 0x13e   : > { %v2316_v10 = vpop.f32.mrf.mxu1  ;;  %v2330_v44 = vpop.f32.mrf.mxu0 }
 0x13f   : > { %1802 = vst.msk [vmem:[#allocation2 + $0x20] sm:$0xff] %vm1797_vm3, %v1791_v6  ;;  %v1794_v56 = vadd.f32 %v2330_v44, %v1624_v57  ;;  %v1626_v31 = vadd.f32 %v2316_v10, %v1456_v40 }
 0x140   : > { %v1608_v29 = vpop.f32.mrf.mxu1  ;;  %v1768_v59 = vpop.f32.mrf.mxu0 }
 0x141   : > { %1805 = vst.msk [vmem:[#allocation2 + $0x38] sm:$0xff] %vm1797_vm3, %v1794_v56  ;;  %v1793_v26 = vadd.f32 %v1768_v59, %v1623_v43  ;;  %v1625_v9 = vadd.f32 %v1608_v29, %v1455_v1 }
 0x142   : > { %v2333_v2 = vpop.f32.mrf.mxu0 }
 0x143   : > { %1804 = vst.msk [vmem:[#allocation2 + $0x30] sm:$0xff] %vm1797_vm3, %v1793_v26  ;;  %v1796_v4 = vadd.f32 %v2333_v2, %v1626_v31  ;;  %1811 = sbr.rel (%p2078_p11) target bundleno = 338 (0x152), region = 40 }
 0x144   : > { %v1778_v46 = vpop.f32.mrf.mxu0 }
 0x145   : > { %1807 = vst.msk [vmem:[#allocation2 + $0x48] sm:$0xff] %vm1797_vm3, %v1796_v4  ;;  %v1795_v60 = vadd.f32 %v1778_v46, %v1625_v9 }
 0x147   : > { %1806 = vst.msk [vmem:[#allocation2 + $0x40] sm:$0xff] %vm1797_vm3, %v1795_v60 }
 0x148   : > { %v2079_v36 = vld [vmem:[%s2976_s2] ss:$0 sm:$0xff] }
 0x149   : > { %v1819_v42 = vadd.f32 %v2079_v36, %v2894_v13  ;;  %v1820_v15 = vadd.f32 %v2079_v36, %v2884_v14  ;;  %v1821_v45 = vadd.f32 %v2079_v36, %v1789_v62  ;;  %v1822_v24 = vadd.f32 %v2079_v36, %v1790_v35 }
 0x14a   : > { %v1823_v58 = vadd.f32 %v2079_v36, %v1791_v6  ;;  %v1824_v0 = vadd.f32 %v2079_v36, %v1792_v38  ;;  %v1825_v61 = vadd.f32 %v2079_v36, %v1793_v26  ;;  %v1826_v30 = vadd.f32 %v2079_v36, %v1794_v56 }
 0x14b   : > { %v1829_v33 = vmax.f32 %v1819_v42, 0.0  ;;  %v1830_v47 = vmax.f32 %v1820_v15, 0.0  ;;  %v1831_v12 = vmax.f32 %v1821_v45, 0.0  ;;  %v1832_v13 = vmax.f32 %v1822_v24, 0.0 }
 0x14c   : > { %v1833_v48 = vmax.f32 %v1823_v58, 0.0  ;;  %v1834_v14 = vmax.f32 %v1824_v0, 0.0  ;;  %v1835_v32 = vmax.f32 %v1825_v61, 0.0  ;;  %v1836_v49 = vmax.f32 %v1826_v30, 0.0 }
 0x14d   : > { %1839 = vst.msk [vmem:[%s2540_s24] sm:$0xff] %vm1797_vm3, %v1829_v33  ;;  %1840 = vst.msk [vmem:[%s2540_s24 + $0x8] sm:$0xff] %vm1797_vm3, %v1830_v47  ;;  %v1827_v35 = vadd.f32 %v2079_v36, %v1795_v60  ;;  %v1828_v51 = vadd.f32 %v2079_v36, %v1796_v4 }
 0x14e   : > { %1841 = vst.msk [vmem:[%s2540_s24 + $0x10] sm:$0xff] %vm1797_vm3, %v1831_v12  ;;  %1842 = vst.msk [vmem:[%s2540_s24 + $0x18] sm:$0xff] %vm1797_vm3, %v1832_v13 }
 0x14f   : > { %1843 = vst.msk [vmem:[%s2540_s24 + $0x20] sm:$0xff] %vm1797_vm3, %v1833_v48  ;;  %1844 = vst.msk [vmem:[%s2540_s24 + $0x28] sm:$0xff] %vm1797_vm3, %v1834_v14  ;;  %v1837_v19 = vmax.f32 %v1827_v35, 0.0  ;;  %v1838_v28 = vmax.f32 %v1828_v51, 0.0 }
 0x150   : > { %1845 = vst.msk [vmem:[%s2540_s24 + $0x30] sm:$0xff] %vm1797_vm3, %v1835_v32  ;;  %1846 = vst.msk [vmem:[%s2540_s24 + $0x38] sm:$0xff] %vm1797_vm3, %v1836_v49 }
 0x151   : > { %1847 = vst.msk [vmem:[%s2540_s24 + $0x40] sm:$0xff] %vm1797_vm3, %v1837_v19  ;;  %1848 = vst.msk [vmem:[%s2540_s24 + $0x48] sm:$0xff] %vm1797_vm3, %v1838_v28 }
 0x152 PF: > { %s13_s18 = sadd.s32 1, %s2452_s18   ;;  %s3004_s12 = smov %s2440_s15 }
 0x153   : > { %p10_p12 = scmp.ge.s32.totalorder %s13_s18, 50   ;;  %s3005_s13 = smov %s2444_s16 }
 0x154   : > { %s3006_s14 = smov %s2448_s17  ;;  %s3007_s15 = smov %s3011_s19 }
 0x155   : > { %s3008_s16 = smov %s3015_s20  ;;  %s3009_s17 = smov %s3019_s21 }
 0x156   :  { %12 = sbr.rel (!%p10_p12) target bundleno = 4 (0x4), region = 81 }

// kernel: inception_block.7
= control target key start
LH: loop header
LB: loop body
LE: loop exit
PB: predicated region body
PF: predicated region fallthrough
CT: control target
= control target key end

     0   :  { %s6521_s12 = smov 0   ;;  %s6523_s13 = smov 0   ;;  %s7936_s0 = inlined_call_operand.vmem [shape: f32[2,12,148,4], index: 0, kind: input, shape index: {}]   ;;  %s7937_s1 = inlined_call_operand.vmem [shape: f32[5,5,5,4,4], index: 1, kind: input, shape index: {}]   ;;  %s7938_s2 = inlined_call_operand.vmem [shape: f32[1,4], index: 2, kind: input, shape index: {}]   ;;  %s7939_s3 = inlined_call_operand.vmem [shape: f32[2,8,96,4], index: 3, kind: output, shape index: {}]  }
   0x1   :  { %s6525_s14 = smov 0   ;;  %s6527_s15 = smov 0  }
   0x2   :  { %s6529_s16 = smov 0   ;;  %s6531_s17 = smov 0  }
   0x3   :  { %s6533_s18 = smov 0  }
   0x4 LB: > { %s25_s19 = sadd.s32 1, %s6486_s15  ;;  %s28_s20 = sadd.s32 1, %s6490_s16  ;;  %s6498_s18 = sphi %s6533_s18, %s13_s18   ;;  %s6494_s17 = sphi %s6531_s17, %s8019_s17   ;;  %s6490_s16 = sphi %s6529_s16, %s8018_s16   ;;  %s6486_s15 = sphi %s6527_s15, %s8017_s15   ;;  %s6482_s14 = sphi %s6525_s14, %s8016_s14   ;;  %s6478_s13 = sphi %s6523_s13, %s8015_s13   ;;  %s6474_s12 = sphi %s6521_s12, %s8014_s12  }
   0x5   : > { %p26_p0 = scmp.ge.s32.totalorder %s25_s19, 5  ;;  %p5197_p1 = scmp.ge.s32.totalorder %s6498_s18, 1 }
   0x6   : > { %p178_p2 = scmp.lt.s32.totalorder %s6498_s18, 81  ;;  %s32_s21 = sadd.s32 1, %s6494_s17 }
   0x7   : > { %s8021_s19 = smov (%p26_p0, %s25_s19), 0  ;;  %s8023_s20 = smov (!%p26_p0, %s28_s20), %s6490_s16 }
   0x8   : > { %p179_p3 = pnand %p5197_p1, %p178_p2  ;;  %p30_p4 = scmp.ge.s32.totalorder %s8023_s20, 8 }
   0xa   : > { %s8025_s20 = smov (%p30_p4, %s8023_s20), 0  ;;  %s8027_s21 = smov (!%p30_p4, %s32_s21), %s6494_s17 }
   0xb   : > { %p34_p5 = scmp.ge.s32.totalorder %s8027_s21, 2  ;;  %182 = sbr.rel (%p179_p3) target bundleno = 550 (0x226), region = 32 }
   0xd   : > { %s8029_s21 = smov (%p34_p5, %s8027_s21), 0 }
  0x10   : > { %s216_s22 = sadd.s32 %s6474_s12, %s6478_s13  ;;  %p217_p6 = scmp.lt.s32.totalorder %s6482_s14, 1 }
  0x11   : > { %p219_p7 = scmp.lt.s32.totalorder %s216_s22, 11  ;;  %p227_p8 = scmp.lt.s32.totalorder %s6474_s12, 4 }
  0x12   : > { %s8031_s14 = smov (!%p217_p6, %s6482_s14), 1  ;;  %p234_p9 = scmp.lt.s32.totalorder %s6478_s13, 7 }
  0x13   : > { %s8033_s22 = smov (!%p219_p7, %s216_s22), 11  ;;  %s6383_s23 = smul.u32 228, %s8031_s14 }
  0x14   : > { %s6382_s24 = smul.u32 19, %s8033_s22  ;;  %s8035_s13 = smov (!%p234_p9, %s6478_s13), 7 }
  0x15   : > { %s228_s25 = scalar_select %p227_p8, %s6474_s12, 4 }
  0x16   : > { %s223_s26 = sadd.s32 %s6383_s23, %s6382_s24  ;;  %s6386_s8 = smul.u32 96, %s8031_s14 }
  0x17   : > { %s5198_s27 = sshll.u32 %s223_s26, 3  ;;  %s6384_s28 = smul.u32 100, %s228_s25 }
  0x18   : > { %s6575_s4 = scalar_lea.vmem %s7936_s0, %s5198_s27  ;;  %s6385_s9 = smul.u32 12, %s8035_s13 }
  0x19   : > { %s6580_s7 = scalar_lea.vmem %s7937_s1, %s6384_s28  ;;  %p5201_p10 = scmp.ne.s32.totalorder %s6474_s12, 0 }
  0x1a   : > { %s238_s10 = sadd.s32 %s6386_s8, %s6385_s9 }
  0x1b   : > { %s5200_s11 = sshll.u32 %s238_s10, 3  ;;  %244 = sbr.rel (%p5201_p10) target bundleno = 39 (0x27), region = 36 }
  0x1c   : > { %s6586_s24 = scalar_lea.vmem %s7939_s3, %s5200_s11 }
  0x20   : > { %vm245_vm0 = vcmask 31744   ;;  %v6500_v0 = vmov 0.0  }
  0x21   : > { %246 = vst.msk [vmem:[#allocation2] sm:$0xff] %vm245_vm0, %v6500_v0  ;;  %247 = vst.msk [vmem:[#allocation2 + $0x8] sm:$0xff] %vm245_vm0, %v6500_v0 }
  0x22   : > { %248 = vst.msk [vmem:[#allocation2 + $0x10] sm:$0xff] %vm245_vm0, %v6500_v0  ;;  %249 = vst.msk [vmem:[#allocation2 + $0x18] sm:$0xff] %vm245_vm0, %v6500_v0 }
  0x23   : > { %250 = vst.msk [vmem:[#allocation2 + $0x20] sm:$0xff] %vm245_vm0, %v6500_v0  ;;  %251 = vst.msk [vmem:[#allocation2 + $0x28] sm:$0xff] %vm245_vm0, %v6500_v0 }
  0x24   : > { %252 = vst.msk [vmem:[#allocation2 + $0x30] sm:$0xff] %vm245_vm0, %v6500_v0  ;;  %253 = vst.msk [vmem:[#allocation2 + $0x38] sm:$0xff] %vm245_vm0, %v6500_v0 }
  0x25   : > { %254 = vst.msk [vmem:[#allocation2 + $0x40] sm:$0xff] %vm245_vm0, %v6500_v0  ;;  %255 = vst.msk [vmem:[#allocation2 + $0x48] sm:$0xff] %vm245_vm0, %v6500_v0 }
  0x26   : > { %256 = vst.msk [vmem:[#allocation2 + $0x50] sm:$0xff] %vm245_vm0, %v6500_v0  ;;  %257 = vst.msk [vmem:[#allocation2 + $0x58] sm:$0xff] %vm245_vm0, %v6500_v0 }
  0x27 PF: > { %v282_v1 = vld [vmem:[%s6580_s7] sm:$0xf]  ;;  %vm320_vm1 = vcmask 1043456   ;;  %v6591_v2 = vld [vmem:[%s6575_s4 + $0x30] sm:$0xff]  ;;  %vm283_vm2 = vcmask 31744   ;;  %v6597_v4 = vld [vmem:[%s6575_s4 + $0x38] sm:$0xff] }
  0x28   : > { %v270_v3 = vld [vmem:[%s6575_s4] sm:$0xff]  ;;  %6380 = vmatprep.subr.msk.mxu1 %vm320_vm1, %v282_v1  ;;  %5880 = vmatprep.subr.msk.mxu0 %vm320_vm1, %v282_v1  ;;  %v271_v6 = vld [vmem:[%s6575_s4 + $0x8] sm:$0xff]  ;;  %v6614_v9 = vld [vmem:[%s6575_s4 + $0x10] sm:$0xff]  ;;  %p5551_p11 = scmp.ne.s32.totalorder %s6474_s12, 4 }
  0x29   : > { %v5215_v5 = vld [vmem:[%s6580_s7 + $0x4] sm:$0xf]  ;;  %6381 = vmatpush3.msk.msra.mxu1 %vm320_vm1, %v282_v1  ;;  %5891 = vmatprep.mubr.msk.f32.mxu1 %vm283_vm2, %v6591_v2  ;;  %v5229_v7 = vld [vmem:[%s6580_s7 + $0x8] sm:$0xf]  ;;  %v6625_v11 = vld [vmem:[%s6575_s4 + $0x18] sm:$0xff] }
  0x2a   : > { %5881 = vmatpush3.msk.msra.mxu0 %vm320_vm1, %v282_v1  ;;  %5882 = vmatprep.mubr.msk.f32.mxu0 %vm283_vm2, %v270_v3  ;;  %v6608_v8 = vld [vmem:[%s6575_s4 + $0x40] sm:$0xff]  ;;  %v6619_v10 = vld [vmem:[%s6575_s4 + $0x48] sm:$0xff]  ;;  %v6628_v12 = vld [vmem:[%s6575_s4 + $0x50] sm:$0xff] }
  0x2b   : > { %5892 = vmatmul.mubr.msk.f32.vlgmr.msra.gmra.mxu1 %vm283_vm2, %v6597_v4  ;;  %5900 = vmatprep.subr.msk.mxu1 %vm320_vm1, %v5215_v5  ;;  %v5243_v13 = vld [vmem:[%s6580_s7 + $0xc] sm:$0xf]  ;;  %v6635_v14 = vld [vmem:[%s6575_s4 + $0x20] sm:$0xff]  ;;  %v5257_v15 = vld [vmem:[%s6580_s7 + $0x10] sm:$0xf] }
  0x2c   : > { %5883 = vmatmul.mubr.msk.f32.vlgmr.msra.gmra.mxu0 %vm283_vm2, %v271_v6  ;;  %5901 = vmatpush3.msk.msra.mxu1 %vm320_vm1, %v5215_v5  ;;  %v6646_v16 = vld [vmem:[%s6575_s4 + $0x58] sm:$0xff]  ;;  %v6651_v17 = vld [vmem:[%s6575_s4 + $0x28] sm:$0xff]  ;;  %v5271_v24 = vld [vmem:[%s6580_s7 + $0x14] sm:$0xf] }
  0x2d   : > { %5920 = vmatprep.subr.msk.mxu0 %vm320_vm1, %v5229_v7  ;;  %5894 = vmatprep.mubr.msk.f32.mxu1 %vm283_vm2, %v6608_v8  ;;  %v461_v18 = vld [vmem:[%s6575_s4 + $0x1] sm:$0xff]  ;;  %v462_v20 = vld [vmem:[%s6575_s4 + $0x9] sm:$0xff]  ;;  %v463_v22 = vld [vmem:[%s6575_s4 + $0x11] sm:$0xff] }
  0x2e   : > { %5921 = vmatpush3.msk.msra.mxu0 %vm320_vm1, %v5229_v7  ;;  %5885 = vmatprep.mubr.msk.f32.mxu0 %vm283_vm2, %v6614_v9  ;;  %v651_v19 = vld [vmem:[%s6575_s4 + $0x2] sm:$0xff]  ;;  %v652_v21 = vld [vmem:[%s6575_s4 + $0xa] sm:$0xff]  ;;  %v653_v23 = vld [vmem:[%s6575_s4 + $0x12] sm:$0xff] }
  0x2f   : > { %5895 = vmatmul.mubr.msk.f32.gmra.mxu1 %vm283_vm2, %v6619_v10  ;;  %5940 = vmatprep.subr.msk.mxu1 %vm320_vm1, %v5243_v13  ;;  %v6671_v25 = vld [vmem:[%s6575_s4 + $0x19] sm:$0xff]  ;;  %v6680_v28 = vld [vmem:[%s6575_s4 + $0x21] sm:$0xff]  ;;  %v6695_v30 = vld [vmem:[%s6575_s4 + $0x29] sm:$0xff] }
  0x30   : > { %5886 = vmatmul.mubr.msk.f32.gmra.mxu0 %vm283_vm2, %v6625_v11  ;;  %5897 = vmatprep.mubr.msk.f32.mxu1 %vm283_vm2, %v6628_v12  ;;  %v5285_v26 = vld [vmem:[%s6580_s7 + $0x18] sm:$0xf]  ;;  %v6684_v29 = vld [vmem:[%s6575_s4 + $0x22] sm:$0xff]  ;;  %v6700_v31 = vld [vmem:[%s6575_s4 + $0x2a] sm:$0xff] }
  0x31   : > { %5888 = vmatprep.mubr.msk.f32.mxu0 %vm283_vm2, %v6635_v14  ;;  %5960 = vmatprep.subr.msk.mxu0 %vm320_vm1, %v5257_v15  ;;  %v6677_v27 = vld [vmem:[%s6575_s4 + $0x1a] sm:$0xff]  ;;  %v6703_v32 = vld [vmem:[%s6575_s4 + $0x31] sm:$0xff]  ;;  %v6726_v37 = vld [vmem:[%s6575_s4 + $0x42] sm:$0xff] }
  0x32   : > { %v6706_v33 = vld [vmem:[%s6575_s4 + $0x32] sm:$0xff]  ;;  %v6720_v35 = vld [vmem:[%s6575_s4 + $0x3a] sm:$0xff]  ;;  %v6735_v38 = vld [vmem:[%s6575_s4 + $0x49] sm:$0xff] }
  0x33   : > { %5898 = vmatmul.mubr.msk.f32.gmra.mxu1 %vm283_vm2, %v6646_v16  ;;  %v6715_v34 = vld [vmem:[%s6575_s4 + $0x39] sm:$0xff]  ;;  %v6723_v36 = vld [vmem:[%s6575_s4 + $0x41] sm:$0xff]  ;;  %v6740_v39 = vld [vmem:[%s6575_s4 + $0x4a] sm:$0xff] }
  0x34   : > { %5889 = vmatmul.mubr.msk.f32.gmra.mxu0 %vm283_vm2, %v6651_v17  ;;  %5902 = vmatprep.mubr.msk.f32.mxu1 %vm283_vm2, %v461_v18  ;;  %v6743_v40 = vld [vmem:[%s6575_s4 + $0x51] sm:$0xff]  ;;  %v6755_v42 = vld [vmem:[%s6575_s4 + $0x59] sm:$0xff]  ;;  %v841_v44 = vld [vmem:[%s6575_s4 + $0x3] sm:$0xff] }
  0x35   : > { %5922 = vmatprep.mubr.msk.f32.mxu0 %vm283_vm2, %v651_v19  ;;  %v6746_v41 = vld [vmem:[%s6575_s4 + $0x52] sm:$0xff]  ;;  %v6760_v43 = vld [vmem:[%s6575_s4 + $0x5a] sm:$0xff]  ;;  %v1031_v45 = vld [vmem:[%s6575_s4 + $0x4] sm:$0xff] }
  0x36   : > { %v842_v46 = vld [vmem:[%s6575_s4 + $0xb] sm:$0xff]  ;;  %v843_v48 = vld [vmem:[%s6575_s4 + $0x13] sm:$0xff]  ;;  %v5299_v50 = vld [vmem:[%s6580_s7 + $0x1c] sm:$0xf] }
  0x37   : > { %5903 = vmatmul.mubr.msk.f32.vlgmr.msra.gmra.mxu1 %vm283_vm2, %v462_v20  ;;  %v1032_v47 = vld [vmem:[%s6575_s4 + $0xc] sm:$0xff]  ;;  %v1033_v49 = vld [vmem:[%s6575_s4 + $0x14] sm:$0xff]  ;;  %v5313_v52 = vld [vmem:[%s6580_s7 + $0x20] sm:$0xf] }
  0x38   : > { %5923 = vmatmul.mubr.msk.f32.vlgmr.msra.gmra.mxu0 %vm283_vm2, %v652_v21  ;;  %5941 = vmatpush3.msk.msra.mxu1 %vm320_vm1, %v5243_v13  ;;  %v6779_v51 = vld [vmem:[%s6575_s4 + $0x1b] sm:$0xff]  ;;  %v6788_v54 = vld [vmem:[%s6575_s4 + $0x23] sm:$0xff]  ;;  %v6803_v56 = vld [vmem:[%s6575_s4 + $0x2b] sm:$0xff] }
  0x39   : > { %5905 = vmatprep.mubr.msk.f32.mxu1 %vm283_vm2, %v463_v22  ;;  %5961 = vmatpush3.msk.msra.mxu0 %vm320_vm1, %v5257_v15  ;;  %v6785_v53 = vld [vmem:[%s6575_s4 + $0x1c] sm:$0xff]  ;;  %v6792_v55 = vld [vmem:[%s6575_s4 + $0x24] sm:$0xff]  ;;  %v6808_v57 = vld [vmem:[%s6575_s4 + $0x2c] sm:$0xff] }
  0x3a   : > { %5925 = vmatprep.mubr.msk.f32.mxu0 %vm283_vm2, %v653_v23  ;;  %5980 = vmatprep.subr.msk.mxu1 %vm320_vm1, %v5271_v24  ;;  %v6811_v58 = vld [vmem:[%s6575_s4 + $0x33] sm:$0xff]  ;;  %v6823_v60 = vld [vmem:[%s6575_s4 + $0x3b] sm:$0xff]  ;;  %v6831_v62 = vld [vmem:[%s6575_s4 + $0x43] sm:$0xff] }
  0x3b   : > { %5906 = vmatmul.mubr.msk.f32.gmra.mxu1 %vm283_vm2, %v6671_v25  ;;  %6000 = vmatprep.subr.msk.mxu0 %vm320_vm1, %v5285_v26  ;;  %v6814_v59 = vld [vmem:[%s6575_s4 + $0x34] sm:$0xff]  ;;  %v6828_v61 = vld [vmem:[%s6575_s4 + $0x3c] sm:$0xff]  ;;  %v6834_v63 = vld [vmem:[%s6575_s4 + $0x44] sm:$0xff] }
  0x3c   : > { %5926 = vmatmul.mubr.msk.f32.gmra.mxu0 %vm283_vm2, %v6677_v27  ;;  %5908 = vmatprep.mubr.msk.f32.mxu1 %vm283_vm2, %v6680_v28  ;;  %v6843_v0 = vld [vmem:[%s6575_s4 + $0x4b] sm:$0xff]  ;;  %v6851_v3 = vld [vmem:[%s6575_s4 + $0x53] sm:$0xff]  ;;  %v6863_v6 = vld [vmem:[%s6575_s4 + $0x5b] sm:$0xff] }
  0x3d   : > { %5928 = vmatprep.mubr.msk.f32.mxu0 %vm283_vm2, %v6684_v29  ;;  %v6848_v1 = vld [vmem:[%s6575_s4 + $0x4c] sm:$0xff]  ;;  %v6854_v5 = vld [vmem:[%s6575_s4 + $0x54] sm:$0xff]  ;;  %v6868_v7 = vld [vmem:[%s6575_s4 + $0x5c] sm:$0xff] }
  0x3e   : > { %v1411_v13 = vld [vmem:[%s6575_s4 + $0xd] sm:$0xff]  ;;  %v1412_v15 = vld [vmem:[%s6575_s4 + $0x15] sm:$0xff]  ;;  %v1413_v18 = vld [vmem:[%s6575_s4 + $0x1d] sm:$0xff] }
  0x3f   : > { %5909 = vmatmul.mubr.msk.f32.gmra.mxu1 %vm283_vm2, %v6695_v30  ;;  %v5327_v19 = vld [vmem:[%s6580_s7 + $0x24] sm:$0xf]  ;;  %v5341_v20 = vld [vmem:[%s6580_s7 + $0x28] sm:$0xf]  ;;  %v6892_v22 = vld [vmem:[%s6575_s4 + $0x2d] sm:$0xff] }
  0x40   : > { %5929 = vmatmul.mubr.msk.f32.gmra.mxu0 %vm283_vm2, %v6700_v31  ;;  %5911 = vmatprep.mubr.msk.f32.mxu1 %vm283_vm2, %v6703_v32  ;;  %v6888_v21 = vld [vmem:[%s6575_s4 + $0x25] sm:$0xff]  ;;  %v6905_v23 = vld [vmem:[%s6575_s4 + $0x35] sm:$0xff] }
  0x41   : > { %5931 = vmatprep.mubr.msk.f32.mxu0 %vm283_vm2, %v6706_v33 }
  0x43   : > { %5912 = vmatmul.mubr.msk.f32.gmra.mxu1 %vm283_vm2, %v6715_v34 }
  0x44   : > { %5932 = vmatmul.mubr.msk.f32.gmra.mxu0 %vm283_vm2, %v6720_v35  ;;  %5914 = vmatprep.mubr.msk.f32.mxu1 %vm283_vm2, %v6723_v36 }
  0x45   : > { %5934 = vmatprep.mubr.msk.f32.mxu0 %vm283_vm2, %v6726_v37 }
  0x47   : > { %5915 = vmatmul.mubr.msk.f32.gmra.mxu1 %vm283_vm2, %v6735_v38 }
  0x48   : > { %5935 = vmatmul.mubr.msk.f32.gmra.mxu0 %vm283_vm2, %v6740_v39  ;;  %5917 = vmatprep.mubr.msk.f32.mxu1 %vm283_vm2, %v6743_v40 }
  0x49   : > { %5937 = vmatprep.mubr.msk.f32.mxu0 %vm283_vm2, %v6746_v41 }
  0x4b   : > { %5918 = vmatmul.mubr.msk.f32.gmra.mxu1 %vm283_vm2, %v6755_v42 }
  0x4c   : > { %5938 = vmatmul.mubr.msk.f32.gmra.mxu0 %vm283_vm2, %v6760_v43  ;;  %5942 = vmatprep.mubr.msk.f32.mxu1 %vm283_vm2, %v841_v44  ;;  %v6922_v44 = vld [vmem:[%s6575_s4 + $0x4d] sm:$0xff] }
  0x4d   : > { %5962 = vmatprep.mubr.msk.f32.mxu0 %vm283_vm2, %v1031_v45  ;;  %v6933_v45 = vld [vmem:[%s6575_s4 + $0x55] sm:$0xff] }
  0x4f   : > { %5943 = vmatmul.mubr.msk.f32.vlgmr.msra.gmra.mxu1 %vm283_vm2, %v842_v46  ;;  %v6936_v46 = vld [vmem:[%s6575_s4 + $0x5d] sm:$0xff] }
  0x50   : > { %5963 = vmatmul.mubr.msk.f32.vlgmr.msra.gmra.mxu0 %vm283_vm2, %v1032_v47  ;;  %5981 = vmatpush3.msk.msra.mxu1 %vm320_vm1, %v5271_v24  ;;  %v6908_v24 = vld [vmem:[%s6575_s4 + $0x3d] sm:$0xff]  ;;  %7954 = vst [vmem:[#allocation3_spill] sm:$0xff] %v6936_v46 }
  0x51   : > { %5945 = vmatprep.mubr.msk.f32.mxu1 %vm283_vm2, %v843_v48  ;;  %6001 = vmatpush3.msk.msra.mxu0 %vm320_vm1, %v5285_v26  ;;  %v6919_v26 = vld [vmem:[%s6575_s4 + $0x45] sm:$0xff] }
  0x52   : > { %5965 = vmatprep.mubr.msk.f32.mxu0 %vm283_vm2, %v1033_v49  ;;  %6020 = vmatprep.subr.msk.mxu1 %vm320_vm1, %v5299_v50  ;;  %v6950_v48 = vld [vmem:[%s6575_s4 + $0x65] sm:$0xff] }
  0x53   : > { %5946 = vmatmul.mubr.msk.f32.gmra.mxu1 %vm283_vm2, %v6779_v51  ;;  %6040 = vmatprep.subr.msk.mxu0 %vm320_vm1, %v5313_v52  ;;  %7955 = vst [vmem:[#allocation4_spill] sm:$0xff] %v6950_v48 }
  0x54   : > { %5966 = vmatmul.mubr.msk.f32.gmra.mxu0 %vm283_vm2, %v6785_v53  ;;  %5948 = vmatprep.mubr.msk.f32.mxu1 %vm283_vm2, %v6788_v54 }
  0x55   : > { %5968 = vmatprep.mubr.msk.f32.mxu0 %vm283_vm2, %v6792_v55 }
  0x57   : > { %5949 = vmatmul.mubr.msk.f32.gmra.mxu1 %vm283_vm2, %v6803_v56 }
  0x58   : > { %5969 = vmatmul.mubr.msk.f32.gmra.mxu0 %vm283_vm2, %v6808_v57  ;;  %5951 = vmatprep.mubr.msk.f32.mxu1 %vm283_vm2, %v6811_v58 }
  0x59   : > { %5971 = vmatprep.mubr.msk.f32.mxu0 %vm283_vm2, %v6814_v59 }
  0x5b   : > { %5952 = vmatmul.mubr.msk.f32.gmra.mxu1 %vm283_vm2, %v6823_v60 }
  0x5c   : > { %5972 = vmatmul.mubr.msk.f32.gmra.mxu0 %vm283_vm2, %v6828_v61  ;;  %5954 = vmatprep.mubr.msk.f32.mxu1 %vm283_vm2, %v6831_v62 }
  0x5d   : > { %5974 = vmatprep.mubr.msk.f32.mxu0 %vm283_vm2, %v6834_v63 }
  0x5f   : > { %5955 = vmatmul.mubr.msk.f32.gmra.mxu1 %vm283_vm2, %v6843_v0 }
  0x60   : > { %5975 = vmatmul.mubr.msk.f32.gmra.mxu0 %vm283_vm2, %v6848_v1  ;;  %5957 = vmatprep.mubr.msk.f32.mxu1 %vm283_vm2, %v6851_v3 }
  0x61   : > { %5977 = vmatprep.mubr.msk.f32.mxu0 %vm283_vm2, %v6854_v5 }
  0x63   : > { %5958 = vmatmul.mubr.msk.f32.gmra.mxu1 %vm283_vm2, %v6863_v6 }
  0x64   : > { %5978 = vmatmul.mubr.msk.f32.gmra.mxu0 %vm283_vm2, %v6868_v7  ;;  %5982 = vmatprep.mubr.msk.f32.mxu1 %vm283_vm2, %v1032_v47  ;;  %v6945_v47 = vld [vmem:[%s6575_s4 + $0x64] sm:$0xff] }
  0x65   : > { %6002 = vmatprep.mubr.msk.f32.mxu0 %vm283_vm2, %v1411_v13  ;;  %v1792_v13 = vld [vmem:[%s6575_s4 + $0x17] sm:$0xff] }
  0x67   : > { %5983 = vmatmul.mubr.msk.f32.vlgmr.msra.gmra.mxu1 %vm283_vm2, %v1033_v49  ;;  %v1601_v49 = vld [vmem:[%s6575_s4 + $0xe] sm:$0xff] }
  0x68   : > { %6003 = vmatmul.mubr.msk.f32.vlgmr.msra.gmra.mxu0 %vm283_vm2, %v1412_v15  ;;  %6021 = vmatpush3.msk.msra.mxu1 %vm320_vm1, %v5299_v50  ;;  %v1791_v50 = vld [vmem:[%s6575_s4 + $0xf] sm:$0xff]  ;;  %v1603_v15 = vld [vmem:[%s6575_s4 + $0x1e] sm:$0xff] }
  0x69   : > { %5985 = vmatprep.mubr.msk.f32.mxu1 %vm283_vm2, %v6785_v53  ;;  %6041 = vmatpush3.msk.msra.mxu0 %vm320_vm1, %v5313_v52  ;;  %v1602_v52 = vld [vmem:[%s6575_s4 + $0x16] sm:$0xff] }
  0x6a   : > { %6005 = vmatprep.mubr.msk.f32.mxu0 %vm283_vm2, %v1413_v18  ;;  %6060 = vmatprep.subr.msk.mxu1 %vm320_vm1, %v5327_v19  ;;  %v1793_v18 = vld [vmem:[%s6575_s4 + $0x1f] sm:$0xff] }
  0x6b   : > { %5986 = vmatmul.mubr.msk.f32.gmra.mxu1 %vm283_vm2, %v6792_v55  ;;  %6080 = vmatprep.subr.msk.mxu0 %vm320_vm1, %v5341_v20 }
  0x6c   : > { %6006 = vmatmul.mubr.msk.f32.gmra.mxu0 %vm283_vm2, %v6888_v21  ;;  %5988 = vmatprep.mubr.msk.f32.mxu1 %vm283_vm2, %v6808_v57 }
  0x6d   : > { %6008 = vmatprep.mubr.msk.f32.mxu0 %vm283_vm2, %v6892_v22 }
  0x6f   : > { %5989 = vmatmul.mubr.msk.f32.gmra.mxu1 %vm283_vm2, %v6814_v59 }
  0x70   : > { %6009 = vmatmul.mubr.msk.f32.gmra.mxu0 %vm283_vm2, %v6905_v23  ;;  %5991 = vmatprep.mubr.msk.f32.mxu1 %vm283_vm2, %v6828_v61 }
  0x71   : > { %6011 = vmatprep.mubr.msk.f32.mxu0 %vm283_vm2, %v6908_v24 }
  0x73   : > { %5992 = vmatmul.mubr.msk.f32.gmra.mxu1 %vm283_vm2, %v6834_v63 }
  0x74   : > { %6012 = vmatmul.mubr.msk.f32.gmra.mxu0 %vm283_vm2, %v6919_v26  ;;  %5994 = vmatprep.mubr.msk.f32.mxu1 %vm283_vm2, %v6848_v1 }
  0x75   : > { %6014 = vmatprep.mubr.msk.f32.mxu0 %vm283_vm2, %v6922_v44 }
  0x77   : > { %5995 = vmatmul.mubr.msk.f32.gmra.mxu1 %vm283_vm2, %v6854_v5 }
  0x78   : > { %6015 = vmatmul.mubr.msk.f32.gmra.mxu0 %vm283_vm2, %v6933_v45  ;;  %5997 = vmatprep.mubr.msk.f32.mxu1 %vm283_vm2, %v6868_v7 }
  0x79   : > { %6017 = vmatprep.mubr.msk.f32.mxu0 %vm283_vm2, %v6936_v46  ;;  %v5355_v46 = vld [vmem:[%s6580_s7 + $0x2c] sm:$0xf] }
  0x7b   : > { %5998 = vmatmul.mubr.msk.f32.gmra.mxu1 %vm283_vm2, %v6945_v47 }
  0x7c   : > { %6018 = vmatmul.mubr.msk.f32.gmra.mxu0 %vm283_vm2, %v6950_v48  ;;  %6022 = vmatprep.mubr.msk.f32.mxu1 %vm283_vm2, %v1601_v49  ;;  %v6969_v48 = vld [vmem:[%s6575_s4 + $0x26] sm:$0xff]  ;;  %v5369_v49 = vld [vmem:[%s6580_s7 + $0x30] sm:$0xf] }
  0x7d   : > { %6042 = vmatprep.mubr.msk.f32.mxu0 %vm283_vm2, %v1791_v50  ;;  %7956 = vst [vmem:[#allocation5_spill] sm:$0xff] %v6969_v48  ;;  %v6975_v50 = vld [vmem:[%s6575_s4 + $0x27] sm:$0xff] }
  0x7e   : > { %7957 = vst [vmem:[#allocation6_spill] sm:$0xff] %v6975_v50 }
  0x7f   : > { %6023 = vmatmul.mubr.msk.f32.vlgmr.msra.gmra.mxu1 %vm283_vm2, %v1602_v52  ;;  %v6978_v52 = vld [vmem:[%s6575_s4 + $0x2e] sm:$0xff] }
  0x80   : > { %6043 = vmatmul.mubr.msk.f32.vlgmr.msra.gmra.mxu0 %vm283_vm2, %v1792_v13  ;;  %6061 = vmatpush3.msk.msra.mxu1 %vm320_vm1, %v5327_v19  ;;  %7958 = vst [vmem:[#allocation7_spill] sm:$0xff] %v6978_v52  ;;  %v6982_v13 = vld [vmem:[%s6575_s4 + $0x2f] sm:$0xff] }
  0x81   : > { %6025 = vmatprep.mubr.msk.f32.mxu1 %vm283_vm2, %v1603_v15  ;;  %6081 = vmatpush3.msk.msra.mxu0 %vm320_vm1, %v5341_v20  ;;  %7959 = vst [vmem:[#allocation8_spill] sm:$0xff] %v6982_v13  ;;  %v6993_v19 = vld [vmem:[%s6575_s4 + $0x36] sm:$0xff]  ;;  %v7001_v15 = vld [vmem:[%s6575_s4 + $0x3e] sm:$0xff] }
  0x82   : > { %6045 = vmatprep.mubr.msk.f32.mxu0 %vm283_vm2, %v1793_v18  ;;  %6100 = vmatprep.subr.msk.mxu1 %vm320_vm1, %v5355_v46  ;;  %7960 = vst [vmem:[#allocation9_spill] sm:$0xff] %v6993_v19  ;;  %v6998_v20 = vld [vmem:[%s6575_s4 + $0x37] sm:$0xff]  ;;  %7962 = vst [vmem:[#allocation11_spill] sm:$0xff] %v7001_v15  ;;  %v7004_v18 = vld [vmem:[%s6575_s4 + $0x3f] sm:$0xff] }
  0x83   : > { %6026 = vmatmul.mubr.msk.f32.gmra.mxu1 %vm283_vm2, %v6969_v48  ;;  %6120 = vmatprep.subr.msk.mxu0 %vm320_vm1, %v5369_v49  ;;  %7961 = vst [vmem:[#allocation10_spill] sm:$0xff] %v6998_v20  ;;  %7963 = vst [vmem:[#allocation12_spill] sm:$0xff] %v7004_v18  ;;  %v7024_v48 = vld [vmem:[%s6575_s4 + $0x4f] sm:$0xff] }
  0x84   : > { %6046 = vmatmul.mubr.msk.f32.gmra.mxu0 %vm283_vm2, %v6975_v50  ;;  %6028 = vmatprep.mubr.msk.f32.mxu1 %vm283_vm2, %v6978_v52  ;;  %v7013_v52 = vld [vmem:[%s6575_s4 + $0x46] sm:$0xff]  ;;  %v7021_v50 = vld [vmem:[%s6575_s4 + $0x4e] sm:$0xff]  ;;  %7965 = vst [vmem:[#allocation14_spill] sm:$0xff] %v7024_v48 }
  0x85   : > { %6048 = vmatprep.mubr.msk.f32.mxu0 %vm283_vm2, %v6982_v13  ;;  %v7018_v13 = vld [vmem:[%s6575_s4 + $0x47] sm:$0xff]  ;;  %7964 = vst [vmem:[#allocation13_spill] sm:$0xff] %v7021_v50 }
  0x87   : > { %6029 = vmatmul.mubr.msk.f32.gmra.mxu1 %vm283_vm2, %v6993_v19  ;;  %v7044_v19 = vld [vmem:[%s6575_s4 + $0x5f] sm:$0xff] }
  0x88   : > { %6049 = vmatmul.mubr.msk.f32.gmra.mxu0 %vm283_vm2, %v6998_v20  ;;  %6031 = vmatprep.mubr.msk.f32.mxu1 %vm283_vm2, %v7001_v15  ;;  %v7033_v15 = vld [vmem:[%s6575_s4 + $0x56] sm:$0xff]  ;;  %v7041_v20 = vld [vmem:[%s6575_s4 + $0x5e] sm:$0xff]  ;;  %7967 = vst [vmem:[#allocation16_spill] sm:$0xff] %v7044_v19 }
  0x89   : > { %6051 = vmatprep.mubr.msk.f32.mxu0 %vm283_vm2, %v7004_v18  ;;  %v7038_v18 = vld [vmem:[%s6575_s4 + $0x57] sm:$0xff]  ;;  %7966 = vst [vmem:[#allocation15_spill] sm:$0xff] %v7041_v20 }
  0x8b   : > { %6032 = vmatmul.mubr.msk.f32.gmra.mxu1 %vm283_vm2, %v7013_v52 }
  0x8c   : > { %6052 = vmatmul.mubr.msk.f32.gmra.mxu0 %vm283_vm2, %v7018_v13  ;;  %6034 = vmatprep.mubr.msk.f32.mxu1 %vm283_vm2, %v7021_v50  ;;  %v7053_v50 = vld [vmem:[%s6575_s4 + $0x66] sm:$0xff] }
  0x8d   : > { %6054 = vmatprep.mubr.msk.f32.mxu0 %vm283_vm2, %v7024_v48  ;;  %v7058_v48 = vld [vmem:[%s6575_s4 + $0x67] sm:$0xff] }
  0x8f   : > { %6035 = vmatmul.mubr.msk.f32.gmra.mxu1 %vm283_vm2, %v7033_v15 }
  0x90   : > { %6055 = vmatmul.mubr.msk.f32.gmra.mxu0 %vm283_vm2, %v7038_v18  ;;  %6037 = vmatprep.mubr.msk.f32.mxu1 %vm283_vm2, %v7041_v20  ;;  %v5383_v20 = vld [vmem:[%s6580_s7 + $0x34] sm:$0xf] }
  0x91   : > { %6057 = vmatprep.mubr.msk.f32.mxu0 %vm283_vm2, %v7044_v19  ;;  %v5397_v19 = vld [vmem:[%s6580_s7 + $0x38] sm:$0xf] }
  0x93   : > { %6038 = vmatmul.mubr.msk.f32.gmra.mxu1 %vm283_vm2, %v7053_v50 }
  0x94   : > { %6058 = vmatmul.mubr.msk.f32.gmra.mxu0 %vm283_vm2, %v7058_v48  ;;  %6062 = vmatprep.mubr.msk.f32.mxu1 %vm283_vm2, %v6614_v9  ;;  %v5411_v9 = vld [vmem:[%s6580_s7 + $0x3c] sm:$0xf] }
  0x95   : > { %6082 = vmatprep.mubr.msk.f32.mxu0 %vm283_vm2, %v6625_v11 }
  0x97   : > { %6063 = vmatmul.mubr.msk.f32.vlgmr.msra.gmra.mxu1 %vm283_vm2, %v6625_v11  ;;  %v7168_v11 = vld [vmem:[%s6575_s4 + $0x61] sm:$0xff] }
  0x98   : > { %6083 = vmatmul.mubr.msk.f32.vlgmr.msra.gmra.mxu0 %vm283_vm2, %v6635_v14  ;;  %6101 = vmatpush3.msk.msra.mxu1 %vm320_vm1, %v5355_v46 }
  0x99   : > { %6065 = vmatprep.mubr.msk.f32.mxu1 %vm283_vm2, %v6635_v14  ;;  %6121 = vmatpush3.msk.msra.mxu0 %vm320_vm1, %v5369_v49  ;;  %v7176_v14 = vld [vmem:[%s6575_s4 + $0x69] sm:$0xff] }
  0x9a   : > { %6085 = vmatprep.mubr.msk.f32.mxu0 %vm283_vm2, %v6651_v17  ;;  %6140 = vmatprep.subr.msk.mxu1 %vm320_vm1, %v5383_v20 }
  0x9b   : > { %6066 = vmatmul.mubr.msk.f32.gmra.mxu1 %vm283_vm2, %v6651_v17  ;;  %6160 = vmatprep.subr.msk.mxu0 %vm320_vm1, %v5397_v19  ;;  %v7188_v17 = vld [vmem:[%s6575_s4 + $0x71] sm:$0xff] }
  0x9c   : > { %6086 = vmatmul.mubr.msk.f32.gmra.mxu0 %vm283_vm2, %v6591_v2  ;;  %6068 = vmatprep.mubr.msk.f32.mxu1 %vm283_vm2, %v6591_v2  ;;  %v7107_v2 = vld [vmem:[%s6575_s4 + $0x60] sm:$0xff] }
  0x9d   : > { %6088 = vmatprep.mubr.msk.f32.mxu0 %vm283_vm2, %v6597_v4 }
  0x9f   : > { %6069 = vmatmul.mubr.msk.f32.gmra.mxu1 %vm283_vm2, %v6597_v4  ;;  %v7110_v4 = vld [vmem:[%s6575_s4 + $0x68] sm:$0xff] }
  0xa0   : > { %6089 = vmatmul.mubr.msk.f32.gmra.mxu0 %vm283_vm2, %v6608_v8  ;;  %6071 = vmatprep.mubr.msk.f32.mxu1 %vm283_vm2, %v6608_v8  ;;  %v7121_v8 = vld [vmem:[%s6575_s4 + $0x70] sm:$0xff] }
  0xa1   : > { %6091 = vmatprep.mubr.msk.f32.mxu0 %vm283_vm2, %v6619_v10 }
  0xa3   : > { %6072 = vmatmul.mubr.msk.f32.gmra.mxu1 %vm283_vm2, %v6619_v10  ;;  %v5425_v10 = vld [vmem:[%s6580_s7 + $0x40] sm:$0xf] }
  0xa4   : > { %6092 = vmatmul.mubr.msk.f32.gmra.mxu0 %vm283_vm2, %v6628_v12  ;;  %6074 = vmatprep.mubr.msk.f32.mxu1 %vm283_vm2, %v6628_v12  ;;  %v7173_v12 = vld [vmem:[%s6575_s4 + $0x62] sm:$0xff] }
  0xa5   : > { %6094 = vmatprep.mubr.msk.f32.mxu0 %vm283_vm2, %v6646_v16 }
  0xa7   : > { %6075 = vmatmul.mubr.msk.f32.gmra.mxu1 %vm283_vm2, %v6646_v16  ;;  %v7179_v16 = vld [vmem:[%s6575_s4 + $0x6a] sm:$0xff] }
  0xa8   : > { %6095 = vmatmul.mubr.msk.f32.gmra.mxu0 %vm283_vm2, %v7107_v2  ;;  %6077 = vmatprep.mubr.msk.f32.mxu1 %vm283_vm2, %v7107_v2 }
  0xa9   : > { %6097 = vmatprep.mubr.msk.f32.mxu0 %vm283_vm2, %v7110_v4 }
  0xab   : > { %6078 = vmatmul.mubr.msk.f32.gmra.mxu1 %vm283_vm2, %v7110_v4 }
  0xac   : > { %6098 = vmatmul.mubr.msk.f32.gmra.mxu0 %vm283_vm2, %v7121_v8  ;;  %6102 = vmatprep.mubr.msk.f32.mxu1 %vm283_vm2, %v6671_v25  ;;  %v7193_v25 = vld [vmem:[%s6575_s4 + $0x72] sm:$0xff] }
  0xad   : > { %6122 = vmatprep.mubr.msk.f32.mxu0 %vm283_vm2, %v6677_v27  ;;  %v5439_v27 = vld [vmem:[%s6580_s7 + $0x44] sm:$0xf] }
  0xaf   : > { %6103 = vmatmul.mubr.msk.f32.vlgmr.msra.gmra.mxu1 %vm283_vm2, %v6680_v28  ;;  %v5453_v28 = vld [vmem:[%s6580_s7 + $0x48] sm:$0xf] }
  0xb0   : > { %6123 = vmatmul.mubr.msk.f32.vlgmr.msra.gmra.mxu0 %vm283_vm2, %v6684_v29  ;;  %6141 = vmatpush3.msk.msra.mxu1 %vm320_vm1, %v5383_v20  ;;  %v7240_v29 = vld [vmem:[%s6575_s4 + $0x63] sm:$0xff] }
  0xb1   : > { %6105 = vmatprep.mubr.msk.f32.mxu1 %vm283_vm2, %v6695_v30  ;;  %6161 = vmatpush3.msk.msra.mxu0 %vm320_vm1, %v5397_v19  ;;  %v7245_v30 = vld [vmem:[%s6575_s4 + $0x6b] sm:$0xff] }
  0xb2   : > { %6125 = vmatprep.mubr.msk.f32.mxu0 %vm283_vm2, %v6700_v31  ;;  %6180 = vmatprep.subr.msk.mxu1 %vm320_vm1, %v5411_v9  ;;  %v7248_v31 = vld [vmem:[%s6575_s4 + $0x6c] sm:$0xff] }
  0xb3   : > { %6106 = vmatmul.mubr.msk.f32.gmra.mxu1 %vm283_vm2, %v6703_v32  ;;  %6200 = vmatprep.subr.msk.mxu0 %vm320_vm1, %v5425_v10  ;;  %v7257_v32 = vld [vmem:[%s6575_s4 + $0x73] sm:$0xff] }
  0xb4   : > { %6126 = vmatmul.mubr.msk.f32.gmra.mxu0 %vm283_vm2, %v6706_v33  ;;  %6108 = vmatprep.mubr.msk.f32.mxu1 %vm283_vm2, %v6715_v34  ;;  %v7262_v33 = vld [vmem:[%s6575_s4 + $0x74] sm:$0xff]  ;;  %v5467_v34 = vld [vmem:[%s6580_s7 + $0x4c] sm:$0xf] }
  0xb5   : > { %6128 = vmatprep.mubr.msk.f32.mxu0 %vm283_vm2, %v6720_v35  ;;  %v5481_v35 = vld [vmem:[%s6580_s7 + $0x50] sm:$0xf] }
  0xb7   : > { %6109 = vmatmul.mubr.msk.f32.gmra.mxu1 %vm283_vm2, %v6723_v36 }
  0xb8   : > { %6129 = vmatmul.mubr.msk.f32.gmra.mxu0 %vm283_vm2, %v6726_v37  ;;  %6111 = vmatprep.mubr.msk.f32.mxu1 %vm283_vm2, %v6735_v38  ;;  %v7968_v38 = vld [vmem:[#allocation3_spill] sm:$0xff] }
  0xb9   : > { %6131 = vmatprep.mubr.msk.f32.mxu0 %vm283_vm2, %v6740_v39 }
  0xbb   : > { %6112 = vmatmul.mubr.msk.f32.gmra.mxu1 %vm283_vm2, %v6743_v40  ;;  %v7969_v40 = vld [vmem:[#allocation4_spill] sm:$0xff] }
  0xbc   : > { %6132 = vmatmul.mubr.msk.f32.gmra.mxu0 %vm283_vm2, %v6746_v41  ;;  %6114 = vmatprep.mubr.msk.f32.mxu1 %vm283_vm2, %v6755_v42  ;;  %v3320_v41 = vld [vmem:[%s6575_s4 + $0x6d] sm:$0xff] }
  0xbd   : > { %6134 = vmatprep.mubr.msk.f32.mxu0 %vm283_vm2, %v6760_v43  ;;  %v3321_v43 = vld [vmem:[%s6575_s4 + $0x75] sm:$0xff] }
  0xbf   : > { %6115 = vmatmul.mubr.msk.f32.gmra.mxu1 %vm283_vm2, %v7168_v11 }
  0xc0   : > { %6135 = vmatmul.mubr.msk.f32.gmra.mxu0 %vm283_vm2, %v7173_v12  ;;  %6117 = vmatprep.mubr.msk.f32.mxu1 %vm283_vm2, %v7176_v14 }
  0xc1   : > { %6137 = vmatprep.mubr.msk.f32.mxu0 %vm283_vm2, %v7179_v16 }
  0xc3   : > { %6118 = vmatmul.mubr.msk.f32.gmra.mxu1 %vm283_vm2, %v7188_v17 }
  0xc4   : > { %6138 = vmatmul.mubr.msk.f32.gmra.mxu0 %vm283_vm2, %v7193_v25  ;;  %6142 = vmatprep.mubr.msk.f32.mxu1 %vm283_vm2, %v6779_v51 }
  0xc5   : > { %6162 = vmatprep.mubr.msk.f32.mxu0 %vm283_vm2, %v6785_v53 }
  0xc7   : > { %6143 = vmatmul.mubr.msk.f32.vlgmr.msra.gmra.mxu1 %vm283_vm2, %v6788_v54  ;;  %v7324_v54 = vld [vmem:[%s6575_s4 + $0x7c] sm:$0xff] }
  0xc8   : > { %6163 = vmatmul.mubr.msk.f32.vlgmr.msra.gmra.mxu0 %vm283_vm2, %v6792_v55  ;;  %6181 = vmatpush3.msk.msra.mxu1 %vm320_vm1, %v5411_v9 }
  0xc9   : > { %6145 = vmatprep.mubr.msk.f32.mxu1 %vm283_vm2, %v6803_v56  ;;  %6201 = vmatpush3.msk.msra.mxu0 %vm320_vm1, %v5425_v10  ;;  %v3322_v56 = vld [vmem:[%s6575_s4 + $0x7d] sm:$0xff] }
  0xca   : > { %6165 = vmatprep.mubr.msk.f32.mxu0 %vm283_vm2, %v6808_v57  ;;  %6220 = vmatprep.subr.msk.mxu1 %vm320_vm1, %v5439_v27  ;;  %v7975_v10 = vld [vmem:[#allocation10_spill] sm:$0xff] }
  0xcb   : > { %6146 = vmatmul.mubr.msk.f32.gmra.mxu1 %vm283_vm2, %v6811_v58  ;;  %6240 = vmatprep.subr.msk.mxu0 %vm320_vm1, %v5453_v28  ;;  %v259_v58 = vld [vmem:[#allocation2 + $0x8] sm:$0xff] }
  0xcc   : > { %6166 = vmatmul.mubr.msk.f32.gmra.mxu0 %vm283_vm2, %v6814_v59  ;;  %6148 = vmatprep.mubr.msk.f32.mxu1 %vm283_vm2, %v6823_v60 }
  0xcd   : > { %6168 = vmatprep.mubr.msk.f32.mxu0 %vm283_vm2, %v6828_v61 }
  0xcf   : > { %6149 = vmatmul.mubr.msk.f32.gmra.mxu1 %vm283_vm2, %v6831_v62  ;;  %v258_v62 = vld [vmem:[#allocation2] sm:$0xff] }
  0xd0   : > { %6169 = vmatmul.mubr.msk.f32.gmra.mxu0 %vm283_vm2, %v6834_v63  ;;  %6151 = vmatprep.mubr.msk.f32.mxu1 %vm283_vm2, %v6843_v0  ;;  %v7971_v0 = vld [vmem:[#allocation6_spill] sm:$0xff] }
  0xd1   : > { %6171 = vmatprep.mubr.msk.f32.mxu0 %vm283_vm2, %v6848_v1 }
  0xd3   : > { %6152 = vmatmul.mubr.msk.f32.gmra.mxu1 %vm283_vm2, %v6851_v3 }
  0xd4   : > { %6172 = vmatmul.mubr.msk.f32.gmra.mxu0 %vm283_vm2, %v6854_v5  ;;  %6154 = vmatprep.mubr.msk.f32.mxu1 %vm283_vm2, %v6863_v6 }
  0xd5   : > { %6174 = vmatprep.mubr.msk.f32.mxu0 %vm283_vm2, %v6868_v7 }
  0xd7   : > { %6155 = vmatmul.mubr.msk.f32.gmra.mxu1 %vm283_vm2, %v7240_v29 }
  0xd8   : > { %6175 = vmatmul.mubr.msk.f32.gmra.mxu0 %vm283_vm2, %v6945_v47  ;;  %6157 = vmatprep.mubr.msk.f32.mxu1 %vm283_vm2, %v7245_v30 }
  0xd9   : > { %6177 = vmatprep.mubr.msk.f32.mxu0 %vm283_vm2, %v7248_v31 }
  0xdb   : > { %6158 = vmatmul.mubr.msk.f32.gmra.mxu1 %vm283_vm2, %v7257_v32 }
  0xdc   : > { %6178 = vmatmul.mubr.msk.f32.gmra.mxu0 %vm283_vm2, %v7262_v33  ;;  %6182 = vmatprep.mubr.msk.f32.mxu1 %vm283_vm2, %v6792_v55 }
  0xdd   : > { %6202 = vmatprep.mubr.msk.f32.mxu0 %vm283_vm2, %v6888_v21  ;;  %v7344_v21 = vld [vmem:[%s6580_s7 + $0x54] sm:$0xf] }
  0xdf   : > { %6183 = vmatmul.mubr.msk.f32.vlgmr.msra.gmra.mxu1 %vm283_vm2, %v6808_v57 }
  0xe0   : > { %6203 = vmatmul.mubr.msk.f32.vlgmr.msra.gmra.mxu0 %vm283_vm2, %v6892_v22  ;;  %6221 = vmatpush3.msk.msra.mxu1 %vm320_vm1, %v5439_v27  ;;  %v263_v27 = vld [vmem:[#allocation2 + $0x28] sm:$0xff] }
  0xe1   : > { %6185 = vmatprep.mubr.msk.f32.mxu1 %vm283_vm2, %v6814_v59  ;;  %6241 = vmatpush3.msk.msra.mxu0 %vm320_vm1, %v5453_v28 }
  0xe2   : > { %6205 = vmatprep.mubr.msk.f32.mxu0 %vm283_vm2, %v6905_v23  ;;  %6260 = vmatprep.subr.msk.mxu1 %vm320_vm1, %v5467_v34 }
  0xe3   : > { %6186 = vmatmul.mubr.msk.f32.gmra.mxu1 %vm283_vm2, %v6828_v61  ;;  %6280 = vmatprep.subr.msk.mxu0 %vm320_vm1, %v5481_v35  ;;  %v7970_v61 = vld [vmem:[#allocation5_spill] sm:$0xff] }
  0xe4   : > { %6206 = vmatmul.mubr.msk.f32.gmra.mxu0 %vm283_vm2, %v6908_v24  ;;  %6188 = vmatprep.mubr.msk.f32.mxu1 %vm283_vm2, %v6834_v63 }
  0xe5   : > { %6208 = vmatprep.mubr.msk.f32.mxu0 %vm283_vm2, %v6919_v26  ;;  %v7973_v26 = vld [vmem:[#allocation8_spill] sm:$0xff] }
  0xe7   : > { %6189 = vmatmul.mubr.msk.f32.gmra.mxu1 %vm283_vm2, %v6848_v1 }
  0xe8   : > { %6209 = vmatmul.mubr.msk.f32.gmra.mxu0 %vm283_vm2, %v6922_v44  ;;  %6191 = vmatprep.mubr.msk.f32.mxu1 %vm283_vm2, %v6854_v5  ;;  %v261_v5 = vld [vmem:[#allocation2 + $0x18] sm:$0xff] }
  0xe9   : > { %6211 = vmatprep.mubr.msk.f32.mxu0 %vm283_vm2, %v6933_v45  ;;  %v7350_v44 = vld [vmem:[%s6580_s7 + $0x58] sm:$0xf]  ;;  %v260_v45 = vld [vmem:[#allocation2 + $0x10] sm:$0xff] }
  0xeb   : > { %v7302_v36 = vpop.f32.mrf.mxu1  ;;  %6192 = vmatmul.mubr.msk.f32.gmra.mxu1 %vm283_vm2, %v6868_v7  ;;  %v7972_v7 = vld [vmem:[#allocation7_spill] sm:$0xff] }
  0xec   : > { %v5884_v37 = vpop.f32.mrf.mxu0  ;;  %6212 = vmatmul.mubr.msk.f32.gmra.mxu0 %vm283_vm2, %v7968_v38  ;;  %6194 = vmatprep.mubr.msk.f32.mxu1 %vm283_vm2, %v6945_v47  ;;  %v7974_v47 = vld [vmem:[#allocation9_spill] sm:$0xff] }
  0xed   : > { %v7310_v39 = vpop.f32.mrf.mxu1  ;;  %6214 = vmatprep.mubr.msk.f32.mxu0 %vm283_vm2, %v7969_v40  ;;  %v450_v1 = vadd.f32 %v5884_v37, %v259_v58 }
  0xee   : > { %v390_v42 = vpop.f32.mrf.mxu0 }
  0xef   : > { %v7316_v51 = vpop.f32.mrf.mxu1  ;;  %6195 = vmatmul.mubr.msk.f32.gmra.mxu1 %vm283_vm2, %v7248_v31  ;;  %v449_v22 = vadd.f32 %v390_v42, %v258_v62  ;;  %v262_v42 = vld [vmem:[#allocation2 + $0x20] sm:$0xff] }
  0xf0   : > { %v5887_v53 = vpop.f32.mrf.mxu0  ;;  %6215 = vmatmul.mubr.msk.f32.gmra.mxu0 %vm283_vm2, %v3320_v41  ;;  %6197 = vmatprep.mubr.msk.f32.mxu1 %vm283_vm2, %v7262_v33  ;;  %v7977_v41 = vld [vmem:[#allocation12_spill] sm:$0xff] }
  0xf1   : > { %v7326_v55 = vpop.f32.mrf.mxu1  ;;  %6217 = vmatprep.mubr.msk.f32.mxu0 %vm283_vm2, %v3321_v43  ;;  %v452_v49 = vadd.f32 %v5887_v53, %v261_v5 }
  0xf2   : > { %v400_v57 = vpop.f32.mrf.mxu0 }
  0xf3   : > { %v7330_v59 = vpop.f32.mrf.mxu1  ;;  %6198 = vmatmul.mubr.msk.f32.gmra.mxu1 %vm283_vm2, %v7324_v54 }
  0xf4   : > { %v5890_v60 = vpop.f32.mrf.mxu0  ;;  %6218 = vmatmul.mubr.msk.f32.gmra.mxu0 %vm283_vm2, %v3322_v56  ;;  %6222 = vmatprep.mubr.msk.f32.mxu1 %vm283_vm2, %v7970_v61  ;;  %v265_v61 = vld [vmem:[#allocation2 + $0x38] sm:$0xff] }
  0xf5   : > { %v7337_v63 = vpop.f32.mrf.mxu1  ;;  %6242 = vmatprep.mubr.msk.f32.mxu0 %vm283_vm2, %v7971_v0  ;;  %v454_v53 = vadd.f32 %v5890_v60, %v263_v27  ;;  %v7978_v0 = vld [vmem:[#allocation13_spill] sm:$0xff] }
  0xf6   : > { %v410_v3 = vpop.f32.mrf.mxu0  ;;  %v3700_v27 = vld [vmem:[%s6575_s4 + $0x6f] sm:$0xff] }
  0xf7   : > { %v5904_v6 = vpop.f32.mrf.mxu1  ;;  %6223 = vmatmul.mubr.msk.f32.vlgmr.msra.gmra.mxu1 %vm283_vm2, %v7972_v7  ;;  %v7979_v7 = vld [vmem:[#allocation14_spill] sm:$0xff] }
  0xf8   : > { %v640_v23 = vadd.f32 %v5904_v6, %v450_v1  ;;  %v5924_v24 = vpop.f32.mrf.mxu0  ;;  %6243 = vmatmul.mubr.msk.f32.vlgmr.msra.gmra.mxu0 %vm283_vm2, %v7973_v26  ;;  %6261 = vmatpush3.msk.msra.mxu1 %vm320_vm1, %v5467_v34  ;;  %v7976_v34 = vld [vmem:[#allocation11_spill] sm:$0xff]  ;;  %v453_v1 = vadd.f32 %v410_v3, %v262_v42  ;;  %v267_v26 = vld [vmem:[#allocation2 + $0x48] sm:$0xff] }
  0xf9   : > { %v580_v46 = vpop.f32.mrf.mxu1  ;;  %6225 = vmatprep.mubr.msk.f32.mxu1 %vm283_vm2, %v7974_v47  ;;  %6281 = vmatpush3.msk.msra.mxu0 %vm320_vm1, %v5481_v35  ;;  %v451_v35 = vadd.f32 %v400_v57, %v260_v45 }
  0xfa   : > { %v7355_v19 = vadd.f32 %v5924_v24, %v640_v23  ;;  %v639_v20 = vadd.f32 %v580_v46, %v449_v22  ;;  %v770_v9 = vpop.f32.mrf.mxu0  ;;  %6245 = vmatprep.mubr.msk.f32.mxu0 %vm283_vm2, %v7975_v10  ;;  %6300 = vmatprep.subr.msk.mxu1 %vm320_vm1, %v7344_v21  ;;  %v456_v22 = vadd.f32 %v7302_v36, %v265_v61  ;;  %v7980_v46 = vld [vmem:[#allocation15_spill] sm:$0xff]  ;;  %v3510_v36 = vld [vmem:[%s6575_s4 + $0x6e] sm:$0xff] }
  0xfb   : > { %v5907_v28 = vpop.f32.mrf.mxu1  ;;  %6226 = vmatmul.mubr.msk.f32.gmra.mxu1 %vm283_vm2, %v7976_v34  ;;  %6320 = vmatprep.subr.msk.mxu0 %vm320_vm1, %v7350_v44  ;;  %v3702_v61 = vld [vmem:[%s6575_s4 + $0x7f] sm:$0xff] }
  0xfc   : > { %v7365_v37 = vadd.f32 %v770_v9, %v639_v20  ;;  %v642_v38 = vadd.f32 %v5907_v28, %v452_v49  ;;  %v5927_v40 = vpop.f32.mrf.mxu0  ;;  %6246 = vmatmul.mubr.msk.f32.gmra.mxu0 %vm283_vm2, %v7977_v41  ;;  %6228 = vmatprep.mubr.msk.f32.mxu1 %vm283_vm2, %v7013_v52  ;;  %v7981_v20 = vld [vmem:[#allocation16_spill] sm:$0xff]  ;;  %v266_v9 = vld [vmem:[#allocation2 + $0x40] sm:$0xff]  ;;  %v458_v28 = vadd.f32 %v7316_v51, %v267_v26  ;;  %v269_v41 = vld [vmem:[#allocation2 + $0x58] sm:$0xff] }
  0xfd   : > { %v590_v43 = vpop.f32.mrf.mxu1  ;;  %6248 = vmatprep.mubr.msk.f32.mxu0 %vm283_vm2, %v7018_v13  ;;  %v264_v13 = vld [vmem:[#allocation2 + $0x30] sm:$0xff]  ;;  %v457_v42 = vadd.f32 %v7326_v55, %v266_v9  ;;  %v3512_v51 = vld [vmem:[%s6575_s4 + $0x7e] sm:$0xff] }
  0xfe   : > { %v7373_v56 = vadd.f32 %v5927_v40, %v642_v38  ;;  %v641_v58 = vadd.f32 %v590_v43, %v451_v35  ;;  %v780_v57 = vpop.f32.mrf.mxu0  ;;  %v3701_v40 = vld [vmem:[%s6575_s4 + $0x77] sm:$0xff]  ;;  %v7442_v9 = vld [vmem:[%s6580_s7 + $0x60] sm:$0xf] }
  0xff   : > { %v5910_v62 = vpop.f32.mrf.mxu1  ;;  %6229 = vmatmul.mubr.msk.f32.gmra.mxu1 %vm283_vm2, %v7978_v0  ;;  %v460_v0 = vadd.f32 %v7330_v59, %v269_v41  ;;  %v4076_v41 = vld [vmem:[%s6575_s4 + $0x58] sm:$0xff] }
 0x100   : > { %v7377_v5 = vadd.f32 %v780_v57, %v641_v58  ;;  %v644_v6 = vadd.f32 %v5910_v62, %v454_v53  ;;  %v5930_v52 = vpop.f32.mrf.mxu0  ;;  %6249 = vmatmul.mubr.msk.f32.gmra.mxu0 %vm283_vm2, %v7979_v7  ;;  %6231 = vmatprep.mubr.msk.f32.mxu1 %vm283_vm2, %v7033_v15  ;;  %v455_v15 = vadd.f32 %v7310_v39, %v264_v13  ;;  %v3511_v39 = vld [vmem:[%s6575_s4 + $0x76] sm:$0xff]  ;;  %v3881_v62 = vld [vmem:[%s6575_s4 + $0x28] sm:$0xff] }
 0x101   : > { %v600_v60 = vpop.f32.mrf.mxu1  ;;  %6251 = vmatprep.mubr.msk.f32.mxu0 %vm283_vm2, %v7038_v18  ;;  %v268_v58 = vld [vmem:[#allocation2 + $0x50] sm:$0xff] }
 0x102   : > { %v7386_v23 = vadd.f32 %v5930_v52, %v644_v6  ;;  %v643_v3 = vadd.f32 %v600_v60, %v453_v1  ;;  %v790_v24 = vpop.f32.mrf.mxu0  ;;  %v3882_v52 = vld [vmem:[%s6575_s4 + $0x30] sm:$0xff]  ;;  %v459_v13 = vadd.f32 %v7337_v63, %v268_v58  ;;  %v3884_v63 = vld [vmem:[%s6575_s4 + $0x40] sm:$0xff] }
 0x103   : > { %v5913_v45 = vpop.f32.mrf.mxu1  ;;  %6232 = vmatmul.mubr.msk.f32.gmra.mxu1 %vm283_vm2, %v7980_v46 }
 0x104   : > { %v7391_v47 = vadd.f32 %v790_v24, %v643_v3  ;;  %v646_v49 = vadd.f32 %v5913_v45, %v456_v22  ;;  %v5933_v18 = vpop.f32.mrf.mxu0  ;;  %6252 = vmatmul.mubr.msk.f32.gmra.mxu0 %vm283_vm2, %v7981_v20  ;;  %6234 = vmatprep.mubr.msk.f32.mxu1 %vm283_vm2, %v7053_v50  ;;  %v4072_v24 = vld [vmem:[%s6575_s4 + $0x38] sm:$0xff] }
 0x105   : > { %v610_v10 = vpop.f32.mrf.mxu1  ;;  %6254 = vmatprep.mubr.msk.f32.mxu0 %vm283_vm2, %v7058_v48 }
 0x106   : > { %v7403_v34 = vadd.f32 %v5933_v18, %v646_v49  ;;  %v645_v35 = vadd.f32 %v610_v10, %v455_v15  ;;  %v800_v38 = vpop.f32.mrf.mxu0  ;;  %v7433_v49 = vld [vmem:[%s6580_s7 + $0x5c] sm:$0xf] }
 0x107   : > { %v5916_v50 = vpop.f32.mrf.mxu1  ;;  %6235 = vmatmul.mubr.msk.f32.gmra.mxu1 %vm283_vm2, %v3510_v36 }
 0x108   : > { %v7408_v48 = vadd.f32 %v800_v38, %v645_v35  ;;  %v648_v43 = vadd.f32 %v5916_v50, %v458_v28  ;;  %v5936_v53 = vpop.f32.mrf.mxu0  ;;  %6255 = vmatmul.mubr.msk.f32.gmra.mxu0 %vm283_vm2, %v3700_v27  ;;  %6237 = vmatprep.mubr.msk.f32.mxu1 %vm283_vm2, %v3511_v39  ;;  %v4074_v27 = vld [vmem:[%s6575_s4 + $0x48] sm:$0xff]  ;;  %v3886_v35 = vld [vmem:[%s6575_s4 + $0x50] sm:$0xff] }
 0x109   : > { %v620_v57 = vpop.f32.mrf.mxu1  ;;  %6257 = vmatprep.mubr.msk.f32.mxu0 %vm283_vm2, %v3701_v40 }
 0x10a   : > { %v7417_v55 = vadd.f32 %v5936_v53, %v648_v43  ;;  %v647_v1 = vadd.f32 %v620_v57, %v457_v42  ;;  %v810_v6 = vpop.f32.mrf.mxu0 }
 0x10b   : > { %v5919_v7 = vpop.f32.mrf.mxu1  ;;  %6238 = vmatmul.mubr.msk.f32.gmra.mxu1 %vm283_vm2, %v3512_v51 }
 0x10c   : > { %v7422_v60 = vadd.f32 %v810_v6, %v647_v1  ;;  %v650_v22 = vadd.f32 %v5919_v7, %v460_v0  ;;  %v5939_v3 = vpop.f32.mrf.mxu0  ;;  %6258 = vmatmul.mubr.msk.f32.gmra.mxu0 %vm283_vm2, %v3702_v61  ;;  %6262 = vmatprep.mubr.msk.f32.mxu1 %vm283_vm2, %v3881_v62 }
 0x10d   : > { %v630_v59 = vpop.f32.mrf.mxu1  ;;  %6282 = vmatprep.mubr.msk.f32.mxu0 %vm283_vm2, %v3882_v52 }
 0x10e   : > { %v7428_v26 = vadd.f32 %v5939_v3, %v650_v22  ;;  %v649_v45 = vadd.f32 %v630_v59, %v459_v13  ;;  %v820_v46 = vpop.f32.mrf.mxu0 }
 0x10f   : > { %v5944_v15 = vpop.f32.mrf.mxu1  ;;  %6263 = vmatmul.mubr.msk.f32.vlgmr.msra.gmra.mxu1 %vm283_vm2, %v3882_v52 }
 0x110   : > { %v7435_v18 = vadd.f32 %v820_v46, %v649_v45  ;;  %v1020_v20 = vadd.f32 %v5944_v15, %v7355_v19  ;;  %v5964_v36 = vpop.f32.mrf.mxu0  ;;  %6283 = vmatmul.mubr.msk.f32.vlgmr.msra.gmra.mxu0 %vm283_vm2, %v4072_v24  ;;  %6301 = vmatpush3.msk.msra.mxu1 %vm320_vm1, %v7344_v21  ;;  %v4261_v45 = vld [vmem:[%s6575_s4 + $0x31] sm:$0xff] }
 0x111   : > { %v960_v10 = vpop.f32.mrf.mxu1  ;;  %6265 = vmatprep.mubr.msk.f32.mxu1 %vm283_vm2, %v4072_v24  ;;  %6321 = vmatpush3.msk.msra.mxu0 %vm320_vm1, %v7350_v44 }
 0x112   : > { %v7448_v39 = vadd.f32 %v5964_v36, %v1020_v20  ;;  %v1019_v19 = vadd.f32 %v960_v10, %v7365_v37  ;;  %v1150_v28 = vpop.f32.mrf.mxu0  ;;  %6285 = vmatprep.mubr.msk.f32.mxu0 %vm283_vm2, %v3884_v63  ;;  %6340 = vmatprep.subr.msk.mxu1 %vm320_vm1, %v7433_v49 }
 0x113   : > { %v5947_v21 = vpop.f32.mrf.mxu1  ;;  %6266 = vmatmul.mubr.msk.f32.gmra.mxu1 %vm283_vm2, %v3884_v63  ;;  %6360 = vmatprep.subr.msk.mxu0 %vm320_vm1, %v7442_v9  ;;  %v4451_v63 = vld [vmem:[%s6575_s4 + $0x32] sm:$0xff] }
 0x114   : > { %v7458_v44 = vadd.f32 %v1150_v28, %v1019_v19  ;;  %v1022_v38 = vadd.f32 %v5947_v21, %v7373_v56  ;;  %v5967_v40 = vpop.f32.mrf.mxu0  ;;  %6286 = vmatmul.mubr.msk.f32.gmra.mxu0 %vm283_vm2, %v4074_v27  ;;  %6268 = vmatprep.mubr.msk.f32.mxu1 %vm283_vm2, %v4074_v27  ;;  %v4262_v27 = vld [vmem:[%s6575_s4 + $0x39] sm:$0xff] }
 0x115   : > { %v970_v37 = vpop.f32.mrf.mxu1  ;;  %6288 = vmatprep.mubr.msk.f32.mxu0 %vm283_vm2, %v3886_v35 }
 0x116   : > { %v7465_v50 = vadd.f32 %v5967_v40, %v1022_v38  ;;  %v1021_v42 = vadd.f32 %v970_v37, %v7377_v5  ;;  %v1160_v43 = vpop.f32.mrf.mxu0  ;;  %v4263_v38 = vld [vmem:[%s6575_s4 + $0x41] sm:$0xff] }
 0x117   : > { %v5950_v53 = vpop.f32.mrf.mxu1  ;;  %6269 = vmatmul.mubr.msk.f32.gmra.mxu1 %vm283_vm2, %v3886_v35  ;;  %v4453_v40 = vld [vmem:[%s6575_s4 + $0x42] sm:$0xff] }
 0x118   : > { %v7469_v51 = vadd.f32 %v1160_v43, %v1021_v42  ;;  %v1024_v56 = vadd.f32 %v5950_v53, %v7386_v23  ;;  %v5970_v58 = vpop.f32.mrf.mxu0  ;;  %6289 = vmatmul.mubr.msk.f32.gmra.mxu0 %vm283_vm2, %v4076_v41  ;;  %6271 = vmatprep.mubr.msk.f32.mxu1 %vm283_vm2, %v4076_v41  ;;  %v4264_v43 = vld [vmem:[%s6575_s4 + $0x49] sm:$0xff] }
 0x119   : > { %v980_v57 = vpop.f32.mrf.mxu1  ;;  %6291 = vmatprep.mubr.msk.f32.mxu0 %vm283_vm2, %v7107_v2  ;;  %v4454_v53 = vld [vmem:[%s6575_s4 + $0x4a] sm:$0xff] }
 0x11a   : > { %v7476_v61 = vadd.f32 %v5970_v58, %v1024_v56  ;;  %v1023_v5 = vadd.f32 %v980_v57, %v7391_v47  ;;  %v1170_v62 = vpop.f32.mrf.mxu0  ;;  %v4080_v47 = vld [vmem:[%s6575_s4 + $0x78] sm:$0xff] }
 0x11b   : > { %v5953_v0 = vpop.f32.mrf.mxu1  ;;  %6272 = vmatmul.mubr.msk.f32.gmra.mxu1 %vm283_vm2, %v7107_v2  ;;  %v4265_v56 = vld [vmem:[%s6575_s4 + $0x51] sm:$0xff] }
 0x11c   : > { %v7481_v23 = vadd.f32 %v1170_v62, %v1023_v5  ;;  %v1026_v1 = vadd.f32 %v5953_v0, %v7403_v34  ;;  %v5973_v6 = vpop.f32.mrf.mxu0  ;;  %6292 = vmatmul.mubr.msk.f32.gmra.mxu0 %vm283_vm2, %v7110_v4  ;;  %6274 = vmatprep.mubr.msk.f32.mxu1 %vm283_vm2, %v7110_v4  ;;  %v3892_v34 = vld [vmem:[%s6575_s4 + $0x80] sm:$0xff]  ;;  %v4455_v5 = vld [vmem:[%s6575_s4 + $0x52] sm:$0xff] }
 0x11d   : > { %v990_v52 = vpop.f32.mrf.mxu1  ;;  %6294 = vmatprep.mubr.msk.f32.mxu0 %vm283_vm2, %v7121_v8 }
 0x11e   : > { %v7491_v7 = vadd.f32 %v5973_v6, %v1026_v1  ;;  %v1025_v2 = vadd.f32 %v990_v52, %v7408_v48  ;;  %v1180_v13 = vpop.f32.mrf.mxu0  ;;  %v4082_v48 = vld [vmem:[%s6575_s4 + $0x88] sm:$0xff] }
 0x11f   : > { %v5956_v22 = vpop.f32.mrf.mxu1  ;;  %6275 = vmatmul.mubr.msk.f32.gmra.mxu1 %vm283_vm2, %v7121_v8 }
 0x120   : > { %v7497_v3 = vadd.f32 %v1180_v13, %v1025_v2  ;;  %v1028_v4 = vadd.f32 %v5956_v22, %v7417_v55  ;;  %v5976_v59 = vpop.f32.mrf.mxu0  ;;  %6295 = vmatmul.mubr.msk.f32.gmra.mxu0 %vm283_vm2, %v4080_v47  ;;  %6277 = vmatprep.mubr.msk.f32.mxu1 %vm283_vm2, %v4080_v47 }
 0x121   : > { %v1000_v24 = vpop.f32.mrf.mxu1  ;;  %6297 = vmatprep.mubr.msk.f32.mxu0 %vm283_vm2, %v3892_v34 }
 0x122   : > { %v7505_v46 = vadd.f32 %v5976_v59, %v1028_v4  ;;  %v1027_v8 = vadd.f32 %v1000_v24, %v7422_v60  ;;  %v1190_v15 = vpop.f32.mrf.mxu0  ;;  %v4452_v60 = vld [vmem:[%s6575_s4 + $0x3a] sm:$0xff] }
 0x123   : > { %v5959_v55 = vpop.f32.mrf.mxu1  ;;  %6278 = vmatmul.mubr.msk.f32.gmra.mxu1 %vm283_vm2, %v3892_v34 }
 0x124   : > { %v7510_v20 = vadd.f32 %v1190_v15, %v1027_v8  ;;  %v1030_v36 = vadd.f32 %v5959_v55, %v7428_v26  ;;  %v5979_v10 = vpop.f32.mrf.mxu0  ;;  %6298 = vmatmul.mubr.msk.f32.gmra.mxu0 %vm283_vm2, %v4082_v48  ;;  %6302 = vmatprep.mubr.msk.f32.mxu1 %vm283_vm2, %v4261_v45  ;;  %v4460_v8 = vld [vmem:[%s6575_s4 + $0x7a] sm:$0xff]  ;;  %v4461_v55 = vld [vmem:[%s6575_s4 + $0x82] sm:$0xff] }
 0x125   : > { %v1010_v19 = vpop.f32.mrf.mxu1  ;;  %6322 = vmatprep.mubr.msk.f32.mxu0 %vm283_vm2, %v4451_v63 }
 0x126   : > { %v7518_v28 = vadd.f32 %v5979_v10, %v1030_v36  ;;  %v1029_v35 = vadd.f32 %v1010_v19, %v7435_v18  ;;  %v1200_v21 = vpop.f32.mrf.mxu0  ;;  %v4641_v19 = vld [vmem:[%s6575_s4 + $0x33] sm:$0xff] }
 0x127   : > { %v5984_v26 = vpop.f32.mrf.mxu1  ;;  %6303 = vmatmul.mubr.msk.f32.vlgmr.msra.gmra.mxu1 %vm283_vm2, %v4262_v27 }
 0x128   : > { %v7524_v37 = vadd.f32 %v1200_v21, %v1029_v35  ;;  %v1400_v41 = vadd.f32 %v5984_v26, %v7448_v39  ;;  %v6004_v42 = vpop.f32.mrf.mxu0  ;;  %6323 = vmatmul.mubr.msk.f32.vlgmr.msra.gmra.mxu0 %vm283_vm2, %v4452_v60  ;;  %6341 = vmatpush3.msk.msra.mxu1 %vm320_vm1, %v7433_v49 }
 0x129   : > { %v1340_v18 = vpop.f32.mrf.mxu1  ;;  %6305 = vmatprep.mubr.msk.f32.mxu1 %vm283_vm2, %v4263_v38  ;;  %6361 = vmatpush3.msk.msra.mxu0 %vm320_vm1, %v7442_v9  ;;  %v4266_v9 = vld [vmem:[%s6575_s4 + $0x59] sm:$0xff] }
 0x12a   : > { %v7536_v58 = vadd.f32 %v6004_v42, %v1400_v41  ;;  %v1399_v39 = vadd.f32 %v1340_v18, %v7458_v44  ;;  %v1530_v57 = vpop.f32.mrf.mxu0  ;;  %6325 = vmatprep.mubr.msk.f32.mxu0 %vm283_vm2, %v4453_v40  ;;  %v4456_v44 = vld [vmem:[%s6575_s4 + $0x5a] sm:$0xff]  ;;  %v4643_v18 = vld [vmem:[%s6575_s4 + $0x43] sm:$0xff] }
 0x12b   : > { %v5987_v49 = vpop.f32.mrf.mxu1  ;;  %6306 = vmatmul.mubr.msk.f32.gmra.mxu1 %vm283_vm2, %v4264_v43  ;;  %v4642_v42 = vld [vmem:[%s6575_s4 + $0x3b] sm:$0xff] }
 0x12c   : > { %v7542_v62 = vadd.f32 %v1530_v57, %v1399_v39  ;;  %v1402_v0 = vadd.f32 %v5987_v49, %v7465_v50  ;;  %v6007_v1 = vpop.f32.mrf.mxu0  ;;  %6326 = vmatmul.mubr.msk.f32.gmra.mxu0 %vm283_vm2, %v4454_v53  ;;  %6308 = vmatprep.mubr.msk.f32.mxu1 %vm283_vm2, %v4265_v56 }
 0x12d   : > { %v1350_v6 = vpop.f32.mrf.mxu1  ;;  %6328 = vmatprep.mubr.msk.f32.mxu0 %vm283_vm2, %v4455_v5 }
 0x12e   : > { %v7550_v52 = vadd.f32 %v6007_v1, %v1402_v0  ;;  %v1401_v47 = vadd.f32 %v1350_v6, %v7469_v51  ;;  %v1540_v2 = vpop.f32.mrf.mxu0  ;;  %v4644_v1 = vld [vmem:[%s6575_s4 + $0x4b] sm:$0xff]  ;;  %v4645_v6 = vld [vmem:[%s6575_s4 + $0x53] sm:$0xff] }
 0x12f   : > { %v5990_v13 = vpop.f32.mrf.mxu1  ;;  %6309 = vmatmul.mubr.msk.f32.gmra.mxu1 %vm283_vm2, %v4266_v9 }
 0x130   : > { %v7554_v34 = vadd.f32 %v1540_v2, %v1401_v47  ;;  %v1404_v50 = vadd.f32 %v5990_v13, %v7476_v61  ;;  %v6010_v22 = vpop.f32.mrf.mxu0  ;;  %6329 = vmatmul.mubr.msk.f32.gmra.mxu0 %vm283_vm2, %v4456_v44  ;;  %6311 = vmatprep.mubr.msk.f32.mxu1 %vm283_vm2, %v7168_v11 }
 0x131   : > { %v1360_v4 = vpop.f32.mrf.mxu1  ;;  %6331 = vmatprep.mubr.msk.f32.mxu0 %vm283_vm2, %v7173_v12  ;;  %v4270_v12 = vld [vmem:[%s6575_s4 + $0x79] sm:$0xff] }
 0x132   : > { %v7562_v51 = vadd.f32 %v6010_v22, %v1404_v50  ;;  %v1403_v59 = vadd.f32 %v1360_v4, %v7481_v23  ;;  %v1550_v24 = vpop.f32.mrf.mxu0 }
 0x133   : > { %v5993_v61 = vpop.f32.mrf.mxu1  ;;  %6312 = vmatmul.mubr.msk.f32.gmra.mxu1 %vm283_vm2, %v7176_v14  ;;  %v4271_v14 = vld [vmem:[%s6575_s4 + $0x81] sm:$0xff] }
 0x134   : > { %v7567_v48 = vadd.f32 %v1550_v24, %v1403_v59  ;;  %v1406_v11 = vadd.f32 %v5993_v61, %v7491_v7  ;;  %v6013_v45 = vpop.f32.mrf.mxu0  ;;  %6332 = vmatmul.mubr.msk.f32.gmra.mxu0 %vm283_vm2, %v7179_v16  ;;  %6314 = vmatprep.mubr.msk.f32.mxu1 %vm283_vm2, %v7188_v17  ;;  %v4646_v59 = vld [vmem:[%s6575_s4 + $0x5b] sm:$0xff] }
 0x135   : > { %v1370_v23 = vpop.f32.mrf.mxu1  ;;  %6334 = vmatprep.mubr.msk.f32.mxu0 %vm283_vm2, %v7193_v25  ;;  %v4272_v25 = vld [vmem:[%s6575_s4 + $0x89] sm:$0xff] }
 0x136   : > { %v7579_v15 = vadd.f32 %v6013_v45, %v1406_v11  ;;  %v1405_v7 = vadd.f32 %v1370_v23, %v7497_v3  ;;  %v1560_v63 = vpop.f32.mrf.mxu0  ;;  %v4462_v3 = vld [vmem:[%s6575_s4 + $0x8a] sm:$0xff] }
 0x137   : > { %v5996_v16 = vpop.f32.mrf.mxu1  ;;  %6315 = vmatmul.mubr.msk.f32.gmra.mxu1 %vm283_vm2, %v4270_v12  ;;  %v4837_v12 = vld [vmem:[%s6575_s4 + $0x64] sm:$0xff] }
 0x138   : > { %v7584_v17 = vadd.f32 %v1560_v63, %v1405_v7  ;;  %v1408_v36 = vadd.f32 %v5996_v16, %v7505_v46  ;;  %v6016_v10 = vpop.f32.mrf.mxu0  ;;  %6335 = vmatmul.mubr.msk.f32.gmra.mxu0 %vm283_vm2, %v4460_v8  ;;  %6317 = vmatprep.mubr.msk.f32.mxu1 %vm283_vm2, %v4271_v14  ;;  %v4831_v46 = vld [vmem:[%s6575_s4 + $0x34] sm:$0xff] }
 0x139   : > { %v1380_v27 = vpop.f32.mrf.mxu1  ;;  %6337 = vmatprep.mubr.msk.f32.mxu0 %vm283_vm2, %v4461_v55 }
 0x13a   : > { %v7593_v60 = vadd.f32 %v6016_v10, %v1408_v36  ;;  %v1407_v35 = vadd.f32 %v1380_v27, %v7510_v20  ;;  %v1570_v21 = vpop.f32.mrf.mxu0  ;;  %v4832_v20 = vld [vmem:[%s6575_s4 + $0x3c] sm:$0xff] }
 0x13b   : > { %v5999_v38 = vpop.f32.mrf.mxu1  ;;  %6318 = vmatmul.mubr.msk.f32.gmra.mxu1 %vm283_vm2, %v4272_v25 }
 0x13c   : > { %v7598_v26 = vadd.f32 %v1570_v21, %v1407_v35  ;;  %v1410_v40 = vadd.f32 %v5999_v38, %v7518_v28  ;;  %v6019_v41 = vpop.f32.mrf.mxu0  ;;  %6338 = vmatmul.mubr.msk.f32.gmra.mxu0 %vm283_vm2, %v4462_v3  ;;  %6342 = vmatprep.mubr.msk.f32.mxu1 %vm283_vm2, %v4641_v19  ;;  %v4833_v28 = vld [vmem:[%s6575_s4 + $0x44] sm:$0xff] }
 0x13d   : > { %v1390_v43 = vpop.f32.mrf.mxu1  ;;  %6362 = vmatprep.mubr.msk.f32.mxu0 %vm283_vm2, %v4831_v46  ;;  %v4842_v46 = vld [vmem:[%s6575_s4 + $0x8c] sm:$0xff] }
 0x13e   : > { %v7607_v53 = vadd.f32 %v6019_v41, %v1410_v40  ;;  %v1409_v56 = vadd.f32 %v1390_v43, %v7524_v37  ;;  %v1580_v39 = vpop.f32.mrf.mxu0  ;;  %v4834_v37 = vld [vmem:[%s6575_s4 + $0x4c] sm:$0xff] }
 0x13f   : > { %v6024_v57 = vpop.f32.mrf.mxu1  ;;  %6343 = vmatmul.mubr.msk.f32.vlgmr.msra.gmra.mxu1 %vm283_vm2, %v4642_v42 }
 0x140   : > { %v7612_v5 = vadd.f32 %v1580_v39, %v1409_v56  ;;  %v1780_v49 = vadd.f32 %v6024_v57, %v7536_v58  ;;  %v6044_v0 = vpop.f32.mrf.mxu0  ;;  %6363 = vmatmul.mubr.msk.f32.vlgmr.msra.gmra.mxu0 %vm283_vm2, %v4832_v20  ;;  %6345 = vmatprep.mubr.msk.f32.mxu1 %vm283_vm2, %v4643_v18  ;;  %v4835_v58 = vld [vmem:[%s6575_s4 + $0x54] sm:$0xff] }
 0x141   : > { %v1720_v9 = vpop.f32.mrf.mxu1  ;;  %6365 = vmatprep.mubr.msk.f32.mxu0 %vm283_vm2, %v4833_v28 }
 0x142   : > { %v7621_v44 = vadd.f32 %v6044_v0, %v1780_v49  ;;  %v1779_v47 = vadd.f32 %v1720_v9, %v7542_v62  ;;  %v1910_v2 = vpop.f32.mrf.mxu0  ;;  %v4836_v62 = vld [vmem:[%s6575_s4 + $0x5c] sm:$0xff] }
 0x143   : > { %v6027_v13 = vpop.f32.mrf.mxu1  ;;  %6346 = vmatmul.mubr.msk.f32.gmra.mxu1 %vm283_vm2, %v4644_v1 }
 0x144   : > { %v7626_v50 = vadd.f32 %v1910_v2, %v1779_v47  ;;  %v1782_v22 = vadd.f32 %v6027_v13, %v7550_v52  ;;  %v6047_v4 = vpop.f32.mrf.mxu0  ;;  %6366 = vmatmul.mubr.msk.f32.gmra.mxu0 %vm283_vm2, %v4834_v37  ;;  %6348 = vmatprep.mubr.msk.f32.mxu1 %vm283_vm2, %v4645_v6 }
 0x145   : > { %v1730_v24 = vpop.f32.mrf.mxu1  ;;  %6368 = vmatprep.mubr.msk.f32.mxu0 %vm283_vm2, %v4835_v58 }
 0x146   : > { %v7634_v61 = vadd.f32 %v6047_v4, %v1782_v22  ;;  %v1781_v11 = vadd.f32 %v1730_v24, %v7554_v34  ;;  %v1920_v45 = vpop.f32.mrf.mxu0 }
 0x147   : > { %v6030_v23 = vpop.f32.mrf.mxu1  ;;  %6349 = vmatmul.mubr.msk.f32.gmra.mxu1 %vm283_vm2, %v4646_v59 }
 0x148   : > { %v7639_v52 = vadd.f32 %v1920_v45, %v1781_v11  ;;  %v1784_v8 = vadd.f32 %v6030_v23, %v7562_v51  ;;  %v6050_v14 = vpop.f32.mrf.mxu0  ;;  %6369 = vmatmul.mubr.msk.f32.gmra.mxu0 %vm283_vm2, %v4836_v62  ;;  %6351 = vmatprep.mubr.msk.f32.mxu1 %vm283_vm2, %v7240_v29  ;;  %v4650_v29 = vld [vmem:[%s6575_s4 + $0x7b] sm:$0xff] }
 0x149   : > { %v1740_v7 = vpop.f32.mrf.mxu1  ;;  %6371 = vmatprep.mubr.msk.f32.mxu0 %vm283_vm2, %v4837_v12 }
 0x14a   : > { %v1974_v34 = vadd.f32 %v6050_v14, %v1784_v8  ;;  %v1783_v63 = vadd.f32 %v1740_v7, %v7567_v48  ;;  %v1930_v55 = vpop.f32.mrf.mxu0  ;;  %v4651_v48 = vld [vmem:[%s6575_s4 + $0x83] sm:$0xff] }
 0x14b   : > { %v6033_v16 = vpop.f32.mrf.mxu1  ;;  %6352 = vmatmul.mubr.msk.f32.gmra.mxu1 %vm283_vm2, %v7245_v30 }
 0x14c   : > { %v1973_v51 = vadd.f32 %v1930_v55, %v1783_v63  ;;  %v1786_v36 = vadd.f32 %v6033_v16, %v7579_v15  ;;  %v6053_v10 = vpop.f32.mrf.mxu0  ;;  %6372 = vmatmul.mubr.msk.f32.gmra.mxu0 %vm283_vm2, %v7248_v31  ;;  %6354 = vmatprep.mubr.msk.f32.mxu1 %vm283_vm2, %v7257_v32  ;;  %v4841_v15 = vld [vmem:[%s6575_s4 + $0x84] sm:$0xff] }
 0x14d   : > { %v1750_v25 = vpop.f32.mrf.mxu1  ;;  %6374 = vmatprep.mubr.msk.f32.mxu0 %vm283_vm2, %v7262_v33  ;;  %v4652_v33 = vld [vmem:[%s6575_s4 + $0x8b] sm:$0xff] }
 0x14e   : > { %v1976_v27 = vadd.f32 %v6053_v10, %v1786_v36  ;;  %v1785_v30 = vadd.f32 %v1750_v25, %v7584_v17  ;;  %v1940_v3 = vpop.f32.mrf.mxu0 }
 0x14f   : > { %v6036_v19 = vpop.f32.mrf.mxu1  ;;  %6355 = vmatmul.mubr.msk.f32.gmra.mxu1 %vm283_vm2, %v4650_v29 }
 0x150   : > { %v1975_v31 = vadd.f32 %v1940_v3, %v1785_v30  ;;  %v1788_v35 = vadd.f32 %v6036_v19, %v7593_v60  ;;  %v6056_v32 = vpop.f32.mrf.mxu0  ;;  %6375 = vmatmul.mubr.msk.f32.gmra.mxu0 %vm283_vm2, %v7324_v54  ;;  %6357 = vmatprep.mubr.msk.f32.mxu1 %vm283_vm2, %v4651_v48 }
 0x151   : > { %v1760_v21 = vpop.f32.mrf.mxu1  ;;  %6377 = vmatprep.mubr.msk.f32.mxu0 %vm283_vm2, %v4841_v15 }
 0x152   : > { %v1978_v17 = vadd.f32 %v6056_v32, %v1788_v35  ;;  %v1787_v38 = vadd.f32 %v1760_v21, %v7598_v26  ;;  %v1950_v40 = vpop.f32.mrf.mxu0 }
 0x153   : > { %v6039_v41 = vpop.f32.mrf.mxu1  ;;  %6358 = vmatmul.mubr.msk.f32.gmra.mxu1 %vm283_vm2, %v4652_v33 }
 0x154   : > { %v1977_v42 = vadd.f32 %v1950_v40, %v1787_v38  ;;  %v1790_v60 = vadd.f32 %v6039_v41, %v7607_v53  ;;  %v6059_v43 = vpop.f32.mrf.mxu0  ;;  %6378 = vmatmul.mubr.msk.f32.gmra.mxu0 %vm283_vm2, %v4842_v46 }
 0x155   : > { %v1770_v54 = vpop.f32.mrf.mxu1 }
 0x156   : > { %v1980_v20 = vadd.f32 %v6059_v43, %v1790_v60  ;;  %v1789_v18 = vadd.f32 %v1770_v54, %v7612_v5  ;;  %v1960_v56 = vpop.f32.mrf.mxu0 }
 0x157   : > { %v6064_v39 = vpop.f32.mrf.mxu1 }
 0x158   : > { %v1979_v28 = vadd.f32 %v1960_v56, %v1789_v18  ;;  %v2160_v57 = vadd.f32 %v6064_v39, %v7621_v44  ;;  %v6084_v26 = vpop.f32.mrf.mxu0 }
 0x159   : > { %v2100_v49 = vpop.f32.mrf.mxu1 }
 0x15a   : > { %v2350_v0 = vadd.f32 %v6084_v26, %v2160_v57  ;;  %v2159_v1 = vadd.f32 %v2100_v49, %v7626_v50  ;;  %v2290_v9 = vpop.f32.mrf.mxu0 }
 0x15b   : > { %v6067_v37 = vpop.f32.mrf.mxu1 }
 0x15c   : > { %v2349_v53 = vadd.f32 %v2290_v9, %v2159_v1  ;;  %v2162_v6 = vadd.f32 %v6067_v37, %v7634_v61  ;;  %v6087_v47 = vpop.f32.mrf.mxu0 }
 0x15d   : > { %v2110_v2 = vpop.f32.mrf.mxu1 }
 0x15e   : > { %v2352_v58 = vadd.f32 %v6087_v47, %v2162_v6  ;;  %v2161_v5 = vadd.f32 %v2110_v2, %v7639_v52  ;;  %v2300_v13 = vpop.f32.mrf.mxu0 }
 0x15f   : > { %v6070_v22 = vpop.f32.mrf.mxu1 }
 0x160   : > { %v2351_v4 = vadd.f32 %v2300_v13, %v2161_v5  ;;  %v2164_v59 = vadd.f32 %v6070_v22, %v1974_v34  ;;  %v6090_v44 = vpop.f32.mrf.mxu0 }
 0x161   : > { %v2120_v24 = vpop.f32.mrf.mxu1 }
 0x162   : > { %v2354_v62 = vadd.f32 %v6090_v44, %v2164_v59  ;;  %v2163_v11 = vadd.f32 %v2120_v24, %v1973_v51  ;;  %v2310_v45 = vpop.f32.mrf.mxu0 }
 0x163   : > { %v6073_v50 = vpop.f32.mrf.mxu1 }
 0x164   : > { %v2353_v12 = vadd.f32 %v2310_v45, %v2163_v11  ;;  %v2166_v23 = vadd.f32 %v6073_v50, %v1976_v27  ;;  %v6093_v8 = vpop.f32.mrf.mxu0 }
 0x165   : > { %v2130_v14 = vpop.f32.mrf.mxu1 }
 0x166   : > { %v2356_v61 = vadd.f32 %v6093_v8, %v2166_v23  ;;  %v2165_v7 = vadd.f32 %v2130_v14, %v1975_v31  ;;  %v2320_v63 = vpop.f32.mrf.mxu0 }
 0x167   : > { %v6076_v55 = vpop.f32.mrf.mxu1 }
 0x168   : > { %v2355_v16 = vadd.f32 %v2320_v63, %v2165_v7  ;;  %v2168_v52 = vadd.f32 %v6076_v55, %v1978_v17  ;;  %v6096_v36 = vpop.f32.mrf.mxu0 }
 0x169   : > { %v2140_v10 = vpop.f32.mrf.mxu1 }
 0x16a   : > { %v2358_v29 = vadd.f32 %v6096_v36, %v2168_v52  ;;  %v2167_v34 = vadd.f32 %v2140_v10, %v1977_v42  ;;  %v2330_v25 = vpop.f32.mrf.mxu0 }
 0x16b   : > { %v6079_v48 = vpop.f32.mrf.mxu1 }
 0x16c   : > { %v2357_v30 = vadd.f32 %v2330_v25, %v2167_v34  ;;  %v2170_v51 = vadd.f32 %v6079_v48, %v1980_v20  ;;  %v6099_v3 = vpop.f32.mrf.mxu0 }
 0x16d   : > { %v2150_v15 = vpop.f32.mrf.mxu1 }
 0x16e   : > { %v2360_v19 = vadd.f32 %v6099_v3, %v2170_v51  ;;  %v2169_v27 = vadd.f32 %v2150_v15, %v1979_v28  ;;  %v2340_v35 = vpop.f32.mrf.mxu0 }
 0x16f   : > { %v6104_v32 = vpop.f32.mrf.mxu1 }
 0x170   : > { %v2359_v33 = vadd.f32 %v2340_v35, %v2169_v27  ;;  %v2540_v31 = vadd.f32 %v6104_v32, %v2350_v0  ;;  %v6124_v21 = vpop.f32.mrf.mxu0 }
 0x171   : > { %v2480_v46 = vpop.f32.mrf.mxu1 }
 0x172   : > { %v2730_v38 = vadd.f32 %v6124_v21, %v2540_v31  ;;  %v2539_v17 = vadd.f32 %v2480_v46, %v2349_v53  ;;  %v2670_v40 = vpop.f32.mrf.mxu0 }
 0x173   : > { %v6107_v41 = vpop.f32.mrf.mxu1 }
 0x174   : > { %v2729_v60 = vadd.f32 %v2670_v40, %v2539_v17  ;;  %v2542_v42 = vadd.f32 %v6107_v41, %v2352_v58  ;;  %v6127_v43 = vpop.f32.mrf.mxu0 }
 0x175   : > { %v2490_v54 = vpop.f32.mrf.mxu1 }
 0x176   : > { %v2732_v18 = vadd.f32 %v6127_v43, %v2542_v42  ;;  %v2541_v20 = vadd.f32 %v2490_v54, %v2351_v4  ;;  %v2680_v56 = vpop.f32.mrf.mxu0 }
 0x177   : > { %v6110_v39 = vpop.f32.mrf.mxu1 }
 0x178   : > { %v2731_v57 = vadd.f32 %v2680_v56, %v2541_v20  ;;  %v2544_v28 = vadd.f32 %v6110_v39, %v2354_v62  ;;  %v6130_v26 = vpop.f32.mrf.mxu0 }
 0x179   : > { %v2500_v49 = vpop.f32.mrf.mxu1 }
 0x17a   : > { %v2734_v1 = vadd.f32 %v6130_v26, %v2544_v28  ;;  %v2543_v0 = vadd.f32 %v2500_v49, %v2353_v12  ;;  %v2690_v9 = vpop.f32.mrf.mxu0 }
 0x17b   : > { %v6113_v37 = vpop.f32.mrf.mxu1 }
 0x17c   : > { %v2733_v6 = vadd.f32 %v2690_v9, %v2543_v0  ;;  %v2546_v53 = vadd.f32 %v6113_v37, %v2356_v61  ;;  %v6133_v47 = vpop.f32.mrf.mxu0 }
 0x17d   : > { %v2510_v2 = vpop.f32.mrf.mxu1 }
 0x17e   : > { %v2736_v5 = vadd.f32 %v6133_v47, %v2546_v53  ;;  %v2545_v58 = vadd.f32 %v2510_v2, %v2355_v16  ;;  %v2700_v13 = vpop.f32.mrf.mxu0 }
 0x17f   : > { %v6116_v22 = vpop.f32.mrf.mxu1 }
 0x180   : > { %v2735_v59 = vadd.f32 %v2700_v13, %v2545_v58  ;;  %v2548_v4 = vadd.f32 %v6116_v22, %v2358_v29  ;;  %v6136_v44 = vpop.f32.mrf.mxu0 }
 0x181   : > { %v2520_v24 = vpop.f32.mrf.mxu1 }
 0x182   : > { %v2738_v11 = vadd.f32 %v6136_v44, %v2548_v4  ;;  %v2547_v62 = vadd.f32 %v2520_v24, %v2357_v30  ;;  %v2710_v45 = vpop.f32.mrf.mxu0 }
 0x183   : > { %v6119_v50 = vpop.f32.mrf.mxu1 }
 0x184   : > { %v2737_v23 = vadd.f32 %v2710_v45, %v2547_v62  ;;  %v2550_v12 = vadd.f32 %v6119_v50, %v2360_v19  ;;  %v6139_v8 = vpop.f32.mrf.mxu0 }
 0x185   : > { %v2530_v14 = vpop.f32.mrf.mxu1 }
 0x186   : > { %v2740_v7 = vadd.f32 %v6139_v8, %v2550_v12  ;;  %v2549_v61 = vadd.f32 %v2530_v14, %v2359_v33  ;;  %v2720_v63 = vpop.f32.mrf.mxu0 }
 0x187   : > { %v6144_v55 = vpop.f32.mrf.mxu1 }
 0x188   : > { %v2739_v52 = vadd.f32 %v2720_v63, %v2549_v61  ;;  %v2920_v16 = vadd.f32 %v6144_v55, %v2730_v38  ;;  %v6164_v36 = vpop.f32.mrf.mxu0 }
 0x189   : > { %v2860_v10 = vpop.f32.mrf.mxu1 }
 0x18a   : > { %v3110_v34 = vadd.f32 %v6164_v36, %v2920_v16  ;;  %v2919_v29 = vadd.f32 %v2860_v10, %v2729_v60  ;;  %v3050_v25 = vpop.f32.mrf.mxu0 }
 0x18b   : > { %v6147_v48 = vpop.f32.mrf.mxu1 }
 0x18c   : > { %v3109_v51 = vadd.f32 %v3050_v25, %v2919_v29  ;;  %v2922_v30 = vadd.f32 %v6147_v48, %v2732_v18  ;;  %v6167_v3 = vpop.f32.mrf.mxu0 }
 0x18d   : > { %v2870_v15 = vpop.f32.mrf.mxu1 }
 0x18e   : > { %v3112_v27 = vadd.f32 %v6167_v3, %v2922_v30  ;;  %v2921_v19 = vadd.f32 %v2870_v15, %v2731_v57  ;;  %v3060_v35 = vpop.f32.mrf.mxu0 }
 0x18f   : > { %v6150_v32 = vpop.f32.mrf.mxu1 }
 0x190   : > { %v3111_v31 = vadd.f32 %v3060_v35, %v2921_v19  ;;  %v2924_v33 = vadd.f32 %v6150_v32, %v2734_v1  ;;  %v6170_v21 = vpop.f32.mrf.mxu0 }
 0x191   : > { %v2880_v46 = vpop.f32.mrf.mxu1 }
 0x192   : > { %v3114_v17 = vadd.f32 %v6170_v21, %v2924_v33  ;;  %v2923_v38 = vadd.f32 %v2880_v46, %v2733_v6  ;;  %v3070_v40 = vpop.f32.mrf.mxu0 }
 0x193   : > { %v6153_v41 = vpop.f32.mrf.mxu1 }
 0x194   : > { %v3113_v42 = vadd.f32 %v3070_v40, %v2923_v38  ;;  %v2926_v60 = vadd.f32 %v6153_v41, %v2736_v5  ;;  %v6173_v43 = vpop.f32.mrf.mxu0 }
 0x195   : > { %v2890_v54 = vpop.f32.mrf.mxu1 }
 0x196   : > { %v3116_v20 = vadd.f32 %v6173_v43, %v2926_v60  ;;  %v2925_v18 = vadd.f32 %v2890_v54, %v2735_v59  ;;  %v3080_v56 = vpop.f32.mrf.mxu0 }
 0x197   : > { %v6156_v39 = vpop.f32.mrf.mxu1 }
 0x198   : > { %v3115_v28 = vadd.f32 %v3080_v56, %v2925_v18  ;;  %v2928_v57 = vadd.f32 %v6156_v39, %v2738_v11  ;;  %v6176_v26 = vpop.f32.mrf.mxu0 }
 0x199   : > { %v2900_v49 = vpop.f32.mrf.mxu1 }
 0x19a   : > { %v3118_v0 = vadd.f32 %v6176_v26, %v2928_v57  ;;  %v2927_v1 = vadd.f32 %v2900_v49, %v2737_v23  ;;  %v3090_v9 = vpop.f32.mrf.mxu0 }
 0x19b   : > { %v6159_v37 = vpop.f32.mrf.mxu1 }
 0x19c   : > { %v3117_v53 = vadd.f32 %v3090_v9, %v2927_v1  ;;  %v2930_v6 = vadd.f32 %v6159_v37, %v2740_v7  ;;  %v6179_v47 = vpop.f32.mrf.mxu0 }
 0x19d   : > { %v2910_v2 = vpop.f32.mrf.mxu1 }
 0x19e   : > { %v3120_v58 = vadd.f32 %v6179_v47, %v2930_v6  ;;  %v2929_v5 = vadd.f32 %v2910_v2, %v2739_v52  ;;  %v3100_v13 = vpop.f32.mrf.mxu0 }
 0x19f   : > { %v6184_v22 = vpop.f32.mrf.mxu1 }
 0x1a0   : > { %v3119_v4 = vadd.f32 %v3100_v13, %v2929_v5  ;;  %v3300_v59 = vadd.f32 %v6184_v22, %v3110_v34  ;;  %v6204_v44 = vpop.f32.mrf.mxu0 }
 0x1a1   : > { %v3240_v24 = vpop.f32.mrf.mxu1 }
 0x1a2   : > { %v7677_v62 = vadd.f32 %v6204_v44, %v3300_v59  ;;  %v3299_v11 = vadd.f32 %v3240_v24, %v3109_v51  ;;  %v3430_v45 = vpop.f32.mrf.mxu0 }
 0x1a3   : > { %v6187_v50 = vpop.f32.mrf.mxu1 }
 0x1a4   : > { %v7679_v23 = vadd.f32 %v3430_v45, %v3299_v11  ;;  %v3302_v12 = vadd.f32 %v6187_v50, %v3112_v27  ;;  %v6207_v8 = vpop.f32.mrf.mxu0 }
 0x1a5   : > { %v3250_v14 = vpop.f32.mrf.mxu1 }
 0x1a6   : > { %v7681_v7 = vadd.f32 %v6207_v8, %v3302_v12  ;;  %v3301_v61 = vadd.f32 %v3250_v14, %v3111_v31  ;;  %v3440_v63 = vpop.f32.mrf.mxu0 }
 0x1a7   : > { %v6190_v55 = vpop.f32.mrf.mxu1 }
 0x1a8   : > { %v7683_v52 = vadd.f32 %v3440_v63, %v3301_v61  ;;  %v3304_v16 = vadd.f32 %v6190_v55, %v3114_v17  ;;  %v6210_v36 = vpop.f32.mrf.mxu0 }
 0x1a9   : > { %v3260_v10 = vpop.f32.mrf.mxu1 }
 0x1aa   : > { %v7685_v34 = vadd.f32 %v6210_v36, %v3304_v16  ;;  %v3303_v29 = vadd.f32 %v3260_v10, %v3113_v42  ;;  %v3450_v25 = vpop.f32.mrf.mxu0 }
 0x1ab   : > { %v6193_v48 = vpop.f32.mrf.mxu1 }
 0x1ac   : > { %v7687_v51 = vadd.f32 %v3450_v25, %v3303_v29  ;;  %v3306_v30 = vadd.f32 %v6193_v48, %v3116_v20  ;;  %v6213_v3 = vpop.f32.mrf.mxu0 }
 0x1ad   : > { %v3270_v15 = vpop.f32.mrf.mxu1 }
 0x1ae   : > { %v7689_v27 = vadd.f32 %v6213_v3, %v3306_v30  ;;  %v3305_v19 = vadd.f32 %v3270_v15, %v3115_v28  ;;  %v3460_v35 = vpop.f32.mrf.mxu0 }
 0x1af   : > { %v6196_v32 = vpop.f32.mrf.mxu1 }
 0x1b0   : > { %v7691_v31 = vadd.f32 %v3460_v35, %v3305_v19  ;;  %v3308_v33 = vadd.f32 %v6196_v32, %v3118_v0  ;;  %v6216_v21 = vpop.f32.mrf.mxu0 }
 0x1b1   : > { %v3280_v46 = vpop.f32.mrf.mxu1 }
 0x1b2   : > { %v7693_v17 = vadd.f32 %v6216_v21, %v3308_v33  ;;  %v3307_v38 = vadd.f32 %v3280_v46, %v3117_v53  ;;  %v3470_v40 = vpop.f32.mrf.mxu0 }
 0x1b3   : > { %v6199_v41 = vpop.f32.mrf.mxu1 }
 0x1b4   : > { %v7695_v42 = vadd.f32 %v3470_v40, %v3307_v38  ;;  %v3310_v60 = vadd.f32 %v6199_v41, %v3120_v58  ;;  %v6219_v43 = vpop.f32.mrf.mxu0 }
 0x1b5   : > { %v3290_v54 = vpop.f32.mrf.mxu1 }
 0x1b6   : > { %v7697_v20 = vadd.f32 %v6219_v43, %v3310_v60  ;;  %v3309_v18 = vadd.f32 %v3290_v54, %v3119_v4  ;;  %v3480_v56 = vpop.f32.mrf.mxu0 }
 0x1b7   : > { %v6224_v39 = vpop.f32.mrf.mxu1 }
 0x1b8   : > { %v7699_v28 = vadd.f32 %v3480_v56, %v3309_v18  ;;  %v6244_v57 = vpop.f32.mrf.mxu0 }
 0x1b9   : > { %v3620_v26 = vpop.f32.mrf.mxu1 }
 0x1ba   : > { %7982 = vst [vmem:[#allocation3_spill] sm:$0xff] %v7699_v28  ;;  %v3810_v49 = vpop.f32.mrf.mxu0 }
 0x1bb   : > { %v6227_v0 = vpop.f32.mrf.mxu1 }
 0x1bc   : > { %v7701_v1 = vpop.f32.mrf.mxu0 }
 0x1bd   : > { %v3630_v9 = vpop.f32.mrf.mxu1 }
 0x1be   : > { %v7703_v37 = vpop.f32.mrf.mxu0 }
 0x1bf   : > { %v7705_v53 = vpop.f32.mrf.mxu1 }
 0x1c0   : > { %v7707_v6 = vpop.f32.mrf.mxu0 }
 0x1c1   : > { %v7709_v47 = vpop.f32.mrf.mxu1 }
 0x1c2   : > { %v7711_v2 = vpop.f32.mrf.mxu0 }
 0x1c3   : > { %v7713_v58 = vpop.f32.mrf.mxu1 }
 0x1c4   : > { %v7715_v5 = vpop.f32.mrf.mxu0 }
 0x1c5   : > { %v7717_v13 = vpop.f32.mrf.mxu1 }
 0x1c6   : > { %v7719_v22 = vpop.f32.mrf.mxu0 }
 0x1c7   : > { %v7721_v4 = vpop.f32.mrf.mxu1 }
 0x1c8   : > { %v7723_v59 = vpop.f32.mrf.mxu0 }
 0x1c9   : > { %v7725_v44 = vpop.f32.mrf.mxu1 }
 0x1ca   : > { %v7727_v24 = vpop.f32.mrf.mxu0 }
 0x1cb   : > { %7983 = vst [vmem:[#allocation4_spill] sm:$0xff] %v7727_v24  ;;  %v7729_v11 = vpop.f32.mrf.mxu1  ;;  %v3681_v24 = vadd.f32 %v3630_v9, %v7683_v52 }
 0x1cc   : > { %v7731_v45 = vpop.f32.mrf.mxu0 }
 0x1cd   : > { %7984 = vst [vmem:[#allocation5_spill] sm:$0xff] %v7731_v45  ;;  %v7733_v50 = vpop.f32.mrf.mxu1  ;;  %v3871_v52 = vadd.f32 %v7703_v37, %v3681_v24  ;;  %v3685_v37 = vadd.f32 %v7717_v13, %v7691_v31 }
 0x1ce   : > { %7985 = vst [vmem:[#allocation6_spill] sm:$0xff] %v7733_v50  ;;  %v7735_v12 = vpop.f32.mrf.mxu0 }
 0x1cf   : > { %7986 = vst [vmem:[#allocation7_spill] sm:$0xff] %v7735_v12  ;;  %v6264_v8 = vpop.f32.mrf.mxu1  ;;  %v3875_v13 = vadd.f32 %v7719_v22, %v3685_v37 }
 0x1d0   : > { %v6284_v14 = vpop.f32.mrf.mxu0 }
 0x1d1   : > { %v4000_v61 = vpop.f32.mrf.mxu1 }
 0x1d2   : > { %v4190_v63 = vpop.f32.mrf.mxu0 }
 0x1d3   : > { %v6267_v55 = vpop.f32.mrf.mxu1 }
 0x1d4   : > { %v6287_v16 = vpop.f32.mrf.mxu0 }
 0x1d5   : > { %v4010_v36 = vpop.f32.mrf.mxu1 }
 0x1d6   : > { %v7737_v10 = vpop.f32.mrf.mxu0 }
 0x1d7   : > { %v6270_v29 = vpop.f32.mrf.mxu1 }
 0x1d8   : > { %v7739_v25 = vpop.f32.mrf.mxu0 }
 0x1d9   : > { %v4020_v48 = vpop.f32.mrf.mxu1 }
 0x1da   : > { %v7741_v30 = vpop.f32.mrf.mxu0 }
 0x1db   : > { %v7743_v3 = vpop.f32.mrf.mxu1 }
 0x1dc   : > { %v7745_v15 = vpop.f32.mrf.mxu0 }
 0x1dd   : > { %7987 = vst [vmem:[#allocation8_spill] sm:$0xff] %v7745_v15  ;;  %v7747_v19 = vpop.f32.mrf.mxu1 }
 0x1de   : > { %v7749_v35 = vpop.f32.mrf.mxu0  ;;  %v4065_v22 = vadd.f32 %v7747_v19, %v3875_v13 }
 0x1df   : > { %7988 = vst [vmem:[#allocation9_spill] sm:$0xff] %v7749_v35  ;;  %v7751_v32 = vpop.f32.mrf.mxu1 }
 0x1e0   : > { %7989 = vst [vmem:[#allocation10_spill] sm:$0xff] %v7751_v32  ;;  %v7753_v33 = vpop.f32.mrf.mxu0  ;;  %v3682_v32 = vadd.f32 %v6227_v0, %v7681_v7  ;;  %v3683_v7 = vadd.f32 %v7709_v47, %v7687_v51 }
 0x1e1   : > { %7990 = vst [vmem:[#allocation11_spill] sm:$0xff] %v7753_v33  ;;  %v7755_v21 = vpop.f32.mrf.mxu1 }
 0x1e2   : > { %7991 = vst [vmem:[#allocation12_spill] sm:$0xff] %v7755_v21  ;;  %v7757_v46 = vpop.f32.mrf.mxu0  ;;  %v3680_v21 = vadd.f32 %v6224_v39, %v7677_v62  ;;  %v3873_v51 = vadd.f32 %v7711_v2, %v3683_v7  ;;  %v8000_v7 = vld [vmem:[#allocation6_spill] sm:$0xff] }
 0x1e3   : > { %7992 = vst [vmem:[#allocation13_spill] sm:$0xff] %v7757_v46  ;;  %v7759_v38 = vpop.f32.mrf.mxu1 }
 0x1e4   : > { %7993 = vst [vmem:[#allocation14_spill] sm:$0xff] %v7759_v38  ;;  %v7761_v40 = vpop.f32.mrf.mxu0  ;;  %v3679_v38 = vadd.f32 %v3620_v26, %v7679_v23  ;;  %v3872_v23 = vadd.f32 %v7701_v1, %v3682_v32  ;;  %v3684_v26 = vadd.f32 %v7705_v53, %v7685_v34  ;;  %v3686_v1 = vadd.f32 %v7713_v58, %v7689_v27 }
 0x1e5   : > { %7994 = vst [vmem:[#allocation15_spill] sm:$0xff] %v7761_v40  ;;  %v7763_v41 = vpop.f32.mrf.mxu1  ;;  %v4061_v53 = vadd.f32 %v4010_v36, %v3871_v52  ;;  %v8001_v52 = vld [vmem:[#allocation8_spill] sm:$0xff] }
 0x1e6   : > { %7995 = vst [vmem:[#allocation16_spill] sm:$0xff] %v7763_v41  ;;  %v7765_v60 = vpop.f32.mrf.mxu0  ;;  %v3869_v28 = vadd.f32 %v3810_v49, %v3679_v38  ;;  %v4062_v9 = vadd.f32 %v6267_v55, %v3872_v23  ;;  %v3874_v34 = vadd.f32 %v7707_v6, %v3684_v26  ;;  %v3876_v58 = vadd.f32 %v7715_v5, %v3686_v1 }
 0x1e7   : > { %7996 = vst [vmem:[#allocation17_spill] sm:$0xff] %v7765_v60  ;;  %v6304_v43 = vpop.f32.mrf.mxu1  ;;  %v3870_v60 = vadd.f32 %v6244_v57, %v3680_v21  ;;  %v3688_v6 = vadd.f32 %v7721_v4, %v7693_v17  ;;  %v4251_v2 = vadd.f32 %v7737_v10, %v4061_v53 }
 0x1e8   : > { %v6324_v54 = vpop.f32.mrf.mxu0  ;;  %v4059_v57 = vadd.f32 %v4000_v61, %v3869_v28  ;;  %v4252_v24 = vadd.f32 %v6287_v16, %v4062_v9  ;;  %v3687_v16 = vadd.f32 %v7725_v44, %v7695_v42 }
 0x1e9   : > { %v4380_v18 = vpop.f32.mrf.mxu1  ;;  %v4060_v62 = vadd.f32 %v6264_v8, %v3870_v60  ;;  %v3878_v10 = vadd.f32 %v7723_v59, %v3688_v6  ;;  %v8006_v37 = vld [vmem:[#allocation12_spill] sm:$0xff] }
 0x1ea   : > { %v4570_v56 = vpop.f32.mrf.mxu0  ;;  %v4249_v28 = vadd.f32 %v4190_v63, %v4059_v57  ;;  %v4063_v63 = vadd.f32 %v4020_v48, %v3873_v51  ;;  %v7999_v57 = vld [vmem:[#allocation3_spill] sm:$0xff] }
 0x1eb   : > { %v6307_v12 = vpop.f32.mrf.mxu1  ;;  %v4250_v49 = vadd.f32 %v6284_v14, %v4060_v62  ;;  %v4064_v14 = vadd.f32 %v6270_v29, %v3874_v34  ;;  %v4066_v29 = vadd.f32 %v7743_v3, %v3876_v58  ;;  %v3689_v59 = vadd.f32 %v8000_v7, %v7999_v57 }
 0x1ec   : > { %v7767_v35 = vpop.f32.mrf.mxu0  ;;  %v4439_v55 = vadd.f32 %v4380_v18, %v4249_v28  ;;  %v8004_v28 = vld [vmem:[#allocation5_spill] sm:$0xff] }
 0x1ed   : > { %v4390_v33 = vpop.f32.mrf.mxu1  ;;  %v4440_v61 = vadd.f32 %v6304_v43, %v4250_v49  ;;  %v4442_v43 = vadd.f32 %v6307_v12, %v4252_v24  ;;  %v4254_v18 = vadd.f32 %v7739_v25, %v4064_v14  ;;  %v3690_v12 = vadd.f32 %v7729_v11, %v7697_v20  ;;  %v8002_v20 = vld [vmem:[#allocation10_spill] sm:$0xff] }
 0x1ee   : > { %v7770_v45 = vpop.f32.mrf.mxu0  ;;  %v4629_v17 = vadd.f32 %v4570_v56, %v4439_v55  ;;  %v4441_v4 = vadd.f32 %v4390_v33, %v4251_v2  ;;  %v7998_v33 = vld [vmem:[#allocation4_spill] sm:$0xff]  ;;  %v4256_v49 = vadd.f32 %v8001_v52, %v4066_v29  ;;  %v4068_v11 = vadd.f32 %v8002_v20, %v3878_v10  ;;  %v8007_v2 = vld [vmem:[#allocation7_spill] sm:$0xff] }
 0x1ef   : > { %7997 = vst [vmem:[#allocation18_spill] sm:$0xff] %v7770_v45  ;;  %v6310_v46 = vpop.f32.mrf.mxu1  ;;  %v4630_v60 = vadd.f32 %v6324_v54, %v4440_v61  ;;  %v4253_v54 = vadd.f32 %v7741_v30, %v4063_v63  ;;  %v4632_v42 = vadd.f32 %v7767_v35, %v4442_v43  ;;  %v3877_v26 = vadd.f32 %v7998_v33, %v3687_v16  ;;  %v8005_v61 = vld [vmem:[#allocation9_spill] sm:$0xff]  ;;  %v8008_v43 = vld [vmem:[#allocation11_spill] sm:$0xff]  ;;  %v8009_v16 = vld [vmem:[#allocation14_spill] sm:$0xff] }
 0x1f0   : > { %v7773_v40 = vpop.f32.mrf.mxu0  ;;  %v4444_v44 = vadd.f32 %v6310_v46, %v4254_v18  ;;  %v3880_v53 = vadd.f32 %v8004_v28, %v3690_v12  ;;  %v4255_v51 = vadd.f32 %v8005_v61, %v4065_v22  ;;  %v4258_v13 = vadd.f32 %v8008_v43, %v4068_v11  ;;  %v8011_v10 = vld [vmem:[#allocation16_spill] sm:$0xff] }
 0x1f1   : > { %v7775_v41 = vpop.f32.mrf.mxu1  ;;  %v4067_v24 = vadd.f32 %v8006_v37, %v3877_v26 }
 0x1f2   : > { %v7778_v15 = vpop.f32.mrf.mxu0  ;;  %v4443_v1 = vadd.f32 %v7775_v41, %v4253_v54  ;;  %v4634_v55 = vadd.f32 %v7773_v40, %v4444_v44  ;;  %v4070_v29 = vadd.f32 %v8009_v16, %v3880_v53  ;;  %v8012_v44 = vld [vmem:[#allocation15_spill] sm:$0xff] }
 0x1f3   : > { %v7780_v50 = vpop.f32.mrf.mxu1 }
 0x1f4   : > { %v7783_v39 = vpop.f32.mrf.mxu0  ;;  %v4446_v58 = vadd.f32 %v7780_v50, %v4256_v49  ;;  %v4633_v18 = vadd.f32 %v7778_v15, %v4443_v1 }
 0x1f5   : > { %v7785_v45 = vpop.f32.mrf.mxu1 }
 0x1f6   : > { %v7790_v21 = vpop.f32.mrf.mxu0  ;;  %v8003_v9 = vld [vmem:[#allocation18_spill] sm:$0xff]  ;;  %v4445_v40 = vadd.f32 %v7785_v45, %v4255_v51  ;;  %v4636_v22 = vadd.f32 %v7783_v39, %v4446_v58  ;;  %v8013_v39 = vld [vmem:[#allocation17_spill] sm:$0xff] }
 0x1f7   : > { %v7794_v0 = vpop.f32.mrf.mxu1  ;;  %v4631_v19 = vadd.f32 %v8003_v9, %v4441_v4 }
 0x1f8   : > { %v7797_v8 = vpop.f32.mrf.mxu0  ;;  %v4635_v33 = vadd.f32 %v7790_v21, %v4445_v40 }
 0x1f9   : > { %v7801_v32 = vpop.f32.mrf.mxu1 }
 0x1fa   : > { %v7804_v38 = vpop.f32.mrf.mxu0 }
 0x1fb   : > { %v7809_v47 = vpop.f32.mrf.mxu1 }
 0x1fc   : > { %v7811_v27 = vpop.f32.mrf.mxu0 }
 0x1fd   : > { %v7816_v36 = vpop.f32.mrf.mxu1 }
 0x1fe   : > { %v7819_v31 = vpop.f32.mrf.mxu0 }
 0x1ff   : > { %v6344_v5 = vpop.f32.mrf.mxu1 }
 0x200   : > { %v4820_v48 = vadd.f32 %v6344_v5, %v4630_v60  ;;  %v6364_v62 = vpop.f32.mrf.mxu0  ;;  %v3879_v60 = vadd.f32 %v8007_v2, %v3689_v59 }
 0x201   : > { %v4760_v23 = vpop.f32.mrf.mxu1 }
 0x202   : > { %v7832_v3 = vadd.f32 %v6364_v62, %v4820_v48  ;;  %v4819_v25 = vadd.f32 %v4760_v23, %v4629_v17  ;;  %v4950_v56 = vpop.f32.mrf.mxu0  ;;  %v8010_v48 = vld [vmem:[#allocation13_spill] sm:$0xff]  ;;  %v4069_v12 = vadd.f32 %v8011_v10, %v3879_v60  ;;  %v4448_v23 = vadd.f32 %v7794_v0, %v4258_v13 }
 0x203   : > { %v6347_v30 = vpop.f32.mrf.mxu1  ;;  %v4257_v62 = vadd.f32 %v8010_v48, %v4067_v24 }
 0x204   : > { %5022 = vst.msk [vmem:[#allocation2 + $0x8] sm:$0xff] %vm283_vm2, %v7832_v3  ;;  %v7843_v35 = vadd.f32 %v4950_v56, %v4819_v25  ;;  %v4822_v46 = vadd.f32 %v6347_v30, %v4632_v42  ;;  %v6367_v34 = vpop.f32.mrf.mxu0  ;;  %v4260_v25 = vadd.f32 %v8012_v44, %v4070_v29  ;;  %v4259_v52 = vadd.f32 %v8013_v39, %v4069_v12 }
 0x205   : > { %v4770_v14 = vpop.f32.mrf.mxu1  ;;  %v4447_v26 = vadd.f32 %v7801_v32, %v4257_v62  ;;  %v4638_v49 = vadd.f32 %v7797_v8, %v4448_v23 }
 0x206   : > { %5021 = vst.msk [vmem:[#allocation2] sm:$0xff] %vm283_vm2, %v7843_v35  ;;  %v7852_v41 = vadd.f32 %v6367_v34, %v4822_v46  ;;  %v4821_v6 = vadd.f32 %v4770_v14, %v4631_v19  ;;  %v4960_v63 = vpop.f32.mrf.mxu0  ;;  %v4450_v20 = vadd.f32 %v7809_v47, %v4260_v25  ;;  %v4449_v19 = vadd.f32 %v7816_v36, %v4259_v52 }
 0x207   : > { %v6350_v5 = vpop.f32.mrf.mxu1  ;;  %v4637_v32 = vadd.f32 %v7804_v38, %v4447_v26 }
 0x208   : > { %5024 = vst.msk [vmem:[#allocation2 + $0x18] sm:$0xff] %vm283_vm2, %v7852_v41  ;;  %v5011_v50 = vadd.f32 %v4960_v63, %v4821_v6  ;;  %v4824_v17 = vadd.f32 %v6350_v5, %v4634_v55  ;;  %v6370_v4 = vpop.f32.mrf.mxu0  ;;  %v4640_v8 = vadd.f32 %v7811_v27, %v4450_v20  ;;  %v4639_v37 = vadd.f32 %v7819_v31, %v4449_v19 }
 0x209   : > { %v4780_v54 = vpop.f32.mrf.mxu1 }
 0x20a   : > { %5023 = vst.msk [vmem:[#allocation2 + $0x10] sm:$0xff] %vm283_vm2, %v5011_v50  ;;  %v5014_v15 = vadd.f32 %v6370_v4, %v4824_v17  ;;  %v4823_v42 = vadd.f32 %v4780_v54, %v4633_v18  ;;  %v4970_v45 = vpop.f32.mrf.mxu0 }
 0x20b   : > { %v6353_v56 = vpop.f32.mrf.mxu1 }
 0x20c   : > { %5026 = vst.msk [vmem:[#allocation2 + $0x28] sm:$0xff] %vm283_vm2, %v5014_v15  ;;  %v5013_v57 = vadd.f32 %v4970_v45, %v4823_v42  ;;  %v4826_v7 = vadd.f32 %v6353_v56, %v4636_v22  ;;  %v6373_v59 = vpop.f32.mrf.mxu0 }
 0x20d   : > { %v4790_v0 = vpop.f32.mrf.mxu1 }
 0x20e   : > { %5025 = vst.msk [vmem:[#allocation2 + $0x20] sm:$0xff] %vm283_vm2, %v5013_v57  ;;  %v5016_v11 = vadd.f32 %v6373_v59, %v4826_v7  ;;  %v4825_v30 = vadd.f32 %v4790_v0, %v4635_v33  ;;  %v4980_v9 = vpop.f32.mrf.mxu0 }
 0x20f   : > { %v6356_v21 = vpop.f32.mrf.mxu1 }
 0x210   : > { %5028 = vst.msk [vmem:[#allocation2 + $0x38] sm:$0xff] %vm283_vm2, %v5016_v11  ;;  %v5015_v1 = vadd.f32 %v4980_v9, %v4825_v30  ;;  %v4828_v46 = vadd.f32 %v6356_v21, %v4638_v49  ;;  %v6376_v34 = vpop.f32.mrf.mxu0 }
 0x211   : > { %v4800_v28 = vpop.f32.mrf.mxu1 }
 0x212   : > { %5027 = vst.msk [vmem:[#allocation2 + $0x30] sm:$0xff] %vm283_vm2, %v5015_v1  ;;  %v5018_v47 = vadd.f32 %v6376_v34, %v4828_v46  ;;  %v4827_v53 = vadd.f32 %v4800_v28, %v4637_v32  ;;  %v4990_v61 = vpop.f32.mrf.mxu0 }
 0x213   : > { %v6359_v51 = vpop.f32.mrf.mxu1 }
 0x214   : > { %5030 = vst.msk [vmem:[#allocation2 + $0x48] sm:$0xff] %vm283_vm2, %v5018_v47  ;;  %v5017_v38 = vadd.f32 %v4990_v61, %v4827_v53  ;;  %v4830_v36 = vadd.f32 %v6359_v51, %v4640_v8  ;;  %v6379_v24 = vpop.f32.mrf.mxu0 }
 0x215   : > { %v4810_v14 = vpop.f32.mrf.mxu1 }
 0x216   : > { %5029 = vst.msk [vmem:[#allocation2 + $0x40] sm:$0xff] %vm283_vm2, %v5017_v38  ;;  %v5020_v55 = vadd.f32 %v6379_v24, %v4830_v36  ;;  %v4829_v58 = vadd.f32 %v4810_v14, %v4639_v37  ;;  %v5000_v6 = vpop.f32.mrf.mxu0  ;;  %5036 = sbr.rel (%p5551_p11) target bundleno = 550 (0x226), region = 40 }
 0x218   : > { %5032 = vst.msk [vmem:[#allocation2 + $0x58] sm:$0xff] %vm283_vm2, %v5020_v55  ;;  %v5019_v27 = vadd.f32 %v5000_v6, %v4829_v58 }
 0x21a   : > { %5031 = vst.msk [vmem:[#allocation2 + $0x50] sm:$0xff] %vm283_vm2, %v5019_v27 }
 0x21b   : > { %v5552_v31 = vld [vmem:[%s7938_s2] ss:$0 sm:$0xff] }
 0x21c   : > { %v5044_v63 = vadd.f32 %v5552_v31, %v7843_v35  ;;  %v5045_v2 = vadd.f32 %v5552_v31, %v7832_v3  ;;  %v5046_v60 = vadd.f32 %v5552_v31, %v5011_v50  ;;  %v5047_v43 = vadd.f32 %v5552_v31, %v7852_v41 }
 0x21d   : > { %v5048_v13 = vadd.f32 %v5552_v31, %v5013_v57  ;;  %v5049_v16 = vadd.f32 %v5552_v31, %v5014_v15  ;;  %v5050_v29 = vadd.f32 %v5552_v31, %v5015_v1  ;;  %v5051_v5 = vadd.f32 %v5552_v31, %v5016_v11 }
 0x21e   : > { %v5056_v18 = vmax.f32 %v5044_v63, 0.0  ;;  %v5057_v40 = vmax.f32 %v5045_v2, 0.0  ;;  %v5058_v17 = vmax.f32 %v5046_v60, 0.0  ;;  %v5059_v35 = vmax.f32 %v5047_v43, 0.0 }
 0x21f   : > { %v5060_v4 = vmax.f32 %v5048_v13, 0.0  ;;  %v5061_v3 = vmax.f32 %v5049_v16, 0.0  ;;  %v5062_v48 = vmax.f32 %v5050_v29, 0.0  ;;  %v5063_v50 = vmax.f32 %v5051_v5, 0.0 }
 0x220   : > { %5068 = vst.msk [vmem:[%s6586_s24] sm:$0xff] %vm283_vm2, %v5056_v18  ;;  %5069 = vst.msk [vmem:[%s6586_s24 + $0x8] sm:$0xff] %vm283_vm2, %v5057_v40  ;;  %v5052_v41 = vadd.f32 %v5552_v31, %v5017_v38  ;;  %v5053_v62 = vadd.f32 %v5552_v31, %v5018_v47  ;;  %v5054_v10 = vadd.f32 %v5552_v31, %v5019_v27 }
 0x221   : > { %5070 = vst.msk [vmem:[%s6586_s24 + $0x10] sm:$0xff] %vm283_vm2, %v5058_v17  ;;  %5071 = vst.msk [vmem:[%s6586_s24 + $0x18] sm:$0xff] %vm283_vm2, %v5059_v35  ;;  %v5055_v12 = vadd.f32 %v5552_v31, %v5020_v55 }
 0x222   : > { %5072 = vst.msk [vmem:[%s6586_s24 + $0x20] sm:$0xff] %vm283_vm2, %v5060_v4  ;;  %5073 = vst.msk [vmem:[%s6586_s24 + $0x28] sm:$0xff] %vm283_vm2, %v5061_v3  ;;  %v5064_v54 = vmax.f32 %v5052_v41, 0.0  ;;  %v5065_v22 = vmax.f32 %v5053_v62, 0.0  ;;  %v5066_v23 = vmax.f32 %v5054_v10, 0.0 }
 0x223   : > { %5074 = vst.msk [vmem:[%s6586_s24 + $0x30] sm:$0xff] %vm283_vm2, %v5062_v48  ;;  %5075 = vst.msk [vmem:[%s6586_s24 + $0x38] sm:$0xff] %vm283_vm2, %v5063_v50  ;;  %v5067_v15 = vmax.f32 %v5055_v12, 0.0 }
 0x224   : > { %5076 = vst.msk [vmem:[%s6586_s24 + $0x40] sm:$0xff] %vm283_vm2, %v5064_v54  ;;  %5077 = vst.msk [vmem:[%s6586_s24 + $0x48] sm:$0xff] %vm283_vm2, %v5065_v22 }
 0x225   : > { %5078 = vst.msk [vmem:[%s6586_s24 + $0x50] sm:$0xff] %vm283_vm2, %v5066_v23  ;;  %5079 = vst.msk [vmem:[%s6586_s24 + $0x58] sm:$0xff] %vm283_vm2, %v5067_v15 }
 0x226 PF: > { %s13_s18 = sadd.s32 1, %s6498_s18   ;;  %s8014_s12 = smov %s6486_s15 }
 0x227   : > { %p10_p12 = scmp.ge.s32.totalorder %s13_s18, 82   ;;  %s8015_s13 = smov %s6490_s16 }
 0x228   : > { %s8016_s14 = smov %s6494_s17  ;;  %s8017_s15 = smov %s8021_s19 }
 0x229   : > { %s8018_s16 = smov %s8025_s20  ;;  %s8019_s17 = smov %s8029_s21 }
 0x22a   :  { %12 = sbr.rel (!%p10_p12) target bundleno = 4 (0x4), region = 97 }

// kernel: inception_block.9
= control target key start
LH: loop header
LB: loop body
LE: loop exit
PB: predicated region body
PF: predicated region fallthrough
CT: control target
= control target key end

     0   :  { %s13544_s12 = smov 0   ;;  %s13546_s13 = smov 0   ;;  %s16818_s0 = inlined_call_operand.vmem [shape: f32[2,14,202,4], index: 0, kind: input, shape index: {}]   ;;  %s16819_s1 = inlined_call_operand.vmem [shape: f32[7,7,7,4,4], index: 1, kind: input, shape index: {}]   ;;  %s16820_s2 = inlined_call_operand.vmem [shape: f32[1,4], index: 2, kind: input, shape index: {}]   ;;  %s16821_s3 = inlined_call_operand.vmem [shape: f32[2,8,112,4], index: 3, kind: output, shape index: {}]  }
   0x1   :  { %s13548_s14 = smov 0   ;;  %s13550_s15 = smov 0  }
   0x2   :  { %s13552_s16 = smov 0   ;;  %s13554_s17 = smov 0  }
   0x3   :  { %s13556_s18 = smov 0  }
   0x4 LB: > { %s25_s19 = sadd.s32 1, %s13509_s15  ;;  %s28_s20 = sadd.s32 1, %s13513_s16  ;;  %s13521_s18 = sphi %s13556_s18, %s13_s18   ;;  %s13517_s17 = sphi %s13554_s17, %s16980_s17   ;;  %s13513_s16 = sphi %s13552_s16, %s16979_s16   ;;  %s13509_s15 = sphi %s13550_s15, %s16978_s15   ;;  %s13505_s14 = sphi %s13548_s14, %s16977_s14   ;;  %s13501_s13 = sphi %s13546_s13, %s16976_s13   ;;  %s13497_s12 = sphi %s13544_s12, %s16975_s12  }
   0x5   : > { %p26_p0 = scmp.ge.s32.totalorder %s25_s19, 7  ;;  %p10749_p1 = scmp.ge.s32.totalorder %s13521_s18, 1 }
   0x6   : > { %p178_p2 = scmp.lt.s32.totalorder %s13521_s18, 113  ;;  %s32_s21 = sadd.s32 1, %s13517_s17 }
   0x7   : > { %s16982_s19 = smov (%p26_p0, %s25_s19), 0  ;;  %s16984_s20 = smov (!%p26_p0, %s28_s20), %s13513_s16 }
   0x8   : > { %p179_p3 = pnand %p10749_p1, %p178_p2  ;;  %p30_p4 = scmp.ge.s32.totalorder %s16984_s20, 8 }
   0xa   : > { %s16986_s20 = smov (%p30_p4, %s16984_s20), 0  ;;  %s16988_s21 = smov (!%p30_p4, %s32_s21), %s13517_s17 }
   0xb   : > { %p34_p5 = scmp.ge.s32.totalorder %s16988_s21, 2  ;;  %182 = sbr.rel (%p179_p3) target bundleno = 938 (0x3aa), region = 32 }
   0xd   : > { %s16990_s21 = smov (%p34_p5, %s16988_s21), 0 }
  0x10   : > { %s216_s22 = sadd.s32 %s13497_s12, %s13501_s13  ;;  %p217_p6 = scmp.lt.s32.totalorder %s13505_s14, 1 }
  0x11   : > { %p219_p7 = scmp.lt.s32.totalorder %s216_s22, 13  ;;  %p227_p8 = scmp.lt.s32.totalorder %s13497_s12, 6 }
  0x12   : > { %s16992_s14 = smov (!%p217_p6, %s13505_s14), 1  ;;  %p234_p9 = scmp.lt.s32.totalorder %s13501_s13, 7 }
  0x13   : > { %s16994_s22 = smov (!%p219_p7, %s216_s22), 13  ;;  %s13406_s23 = smul.u32 364, %s16992_s14 }
  0x14   : > { %s13405_s24 = smul.u32 26, %s16994_s22  ;;  %s16996_s13 = smov (!%p234_p9, %s13501_s13), 7 }
  0x15   : > { %s228_s25 = scalar_select %p227_p8, %s13497_s12, 6 }
  0x16   : > { %s223_s26 = sadd.s32 %s13406_s23, %s13405_s24  ;;  %s13409_s8 = smul.u32 112, %s16992_s14 }
  0x17   : > { %s10750_s27 = sshll.u32 %s223_s26, 3  ;;  %s13407_s28 = smul.u32 196, %s228_s25 }
  0x18   : > { %s13598_s4 = scalar_lea.vmem %s16818_s0, %s10750_s27  ;;  %s13408_s9 = smul.u32 14, %s16996_s13 }
  0x19   : > { %s13603_s7 = scalar_lea.vmem %s16819_s1, %s13407_s28  ;;  %p10753_p10 = scmp.ne.s32.totalorder %s13497_s12, 0 }
  0x1a   : > { %s238_s10 = sadd.s32 %s13409_s8, %s13408_s9 }
  0x1b   : > { %s10752_s11 = sshll.u32 %s238_s10, 3  ;;  %244 = sbr.rel (%p10753_p10) target bundleno = 40 (0x28), region = 36 }
  0x1c   : > { %s13609_s24 = scalar_lea.vmem %s16821_s3, %s10752_s11 }
  0x20   : > { %vm245_vm0 = vcmask 31744   ;;  %v13523_v0 = vmov 0.0  }
  0x21   : > { %246 = vst.msk [vmem:[#allocation2] sm:$0xff] %vm245_vm0, %v13523_v0  ;;  %247 = vst.msk [vmem:[#allocation2 + $0x8] sm:$0xff] %vm245_vm0, %v13523_v0 }
  0x22   : > { %248 = vst.msk [vmem:[#allocation2 + $0x10] sm:$0xff] %vm245_vm0, %v13523_v0  ;;  %249 = vst.msk [vmem:[#allocation2 + $0x18] sm:$0xff] %vm245_vm0, %v13523_v0 }
  0x23   : > { %250 = vst.msk [vmem:[#allocation2 + $0x20] sm:$0xff] %vm245_vm0, %v13523_v0  ;;  %251 = vst.msk [vmem:[#allocation2 + $0x28] sm:$0xff] %vm245_vm0, %v13523_v0 }
  0x24   : > { %252 = vst.msk [vmem:[#allocation2 + $0x30] sm:$0xff] %vm245_vm0, %v13523_v0  ;;  %253 = vst.msk [vmem:[#allocation2 + $0x38] sm:$0xff] %vm245_vm0, %v13523_v0 }
  0x25   : > { %254 = vst.msk [vmem:[#allocation2 + $0x40] sm:$0xff] %vm245_vm0, %v13523_v0  ;;  %255 = vst.msk [vmem:[#allocation2 + $0x48] sm:$0xff] %vm245_vm0, %v13523_v0 }
  0x26   : > { %256 = vst.msk [vmem:[#allocation2 + $0x50] sm:$0xff] %vm245_vm0, %v13523_v0  ;;  %257 = vst.msk [vmem:[#allocation2 + $0x58] sm:$0xff] %vm245_vm0, %v13523_v0 }
  0x27   : > { %258 = vst.msk [vmem:[#allocation2 + $0x60] sm:$0xff] %vm245_vm0, %v13523_v0  ;;  %259 = vst.msk [vmem:[#allocation2 + $0x68] sm:$0xff] %vm245_vm0, %v13523_v0 }
  0x28 PF: > { %v288_v1 = vld [vmem:[%s13603_s7] sm:$0xf]  ;;  %vm332_vm1 = vcmask 1043456   ;;  %vm289_vm2 = vcmask 31744   ;;  %v275_v4 = vld [vmem:[%s13598_s4 + $0x8] sm:$0xff]  ;;  %v13631_v8 = vld [vmem:[%s13598_s4 + $0x10] sm:$0xff] }
  0x29   : > { %v274_v2 = vld [vmem:[%s13598_s4] sm:$0xff]  ;;  %12276 = vmatprep.subr.msk.mxu0 %vm332_vm1, %v288_v1  ;;  %13403 = vmatprep.subr.msk.mxu1 %vm332_vm1, %v288_v1  ;;  %v13621_v5 = vld [vmem:[%s13598_s4 + $0x48] sm:$0xff]  ;;  %v13637_v9 = vld [vmem:[%s13598_s4 + $0x50] sm:$0xff]  ;;  %p11537_p11 = scmp.ne.s32.totalorder %s13497_s12, 6 }
  0x2a   : > { %v13615_v3 = vld [vmem:[%s13598_s4 + $0x40] sm:$0xff]  ;;  %12277 = vmatpush3.msk.msra.mxu0 %vm332_vm1, %v288_v1  ;;  %13404 = vmatpush3.msk.msra.mxu1 %vm332_vm1, %v288_v1  ;;  %v10785_v6 = vld [vmem:[%s13603_s7 + $0x8] sm:$0xf]  ;;  %v13642_v10 = vld [vmem:[%s13598_s4 + $0x18] sm:$0xff] }
  0x2b   : > { %v10769_v7 = vld [vmem:[%s13603_s7 + $0x4] sm:$0xf]  ;;  %12278 = vmatprep.mubr.msk.f32.mxu0 %vm289_vm2, %v274_v2  ;;  %12290 = vmatprep.mubr.msk.f32.mxu1 %vm289_vm2, %v13615_v3  ;;  %v13645_v11 = vld [vmem:[%s13598_s4 + $0x58] sm:$0xff]  ;;  %v10801_v14 = vld [vmem:[%s13603_s7 + $0xc] sm:$0xf] }
  0x2c   : > { %12279 = vmatmul.mubr.msk.f32.vlgmr.msra.gmra.mxu0 %vm289_vm2, %v275_v4  ;;  %12291 = vmatmul.mubr.msk.f32.vlgmr.msra.gmra.mxu1 %vm289_vm2, %v13621_v5  ;;  %v13651_v12 = vld [vmem:[%s13598_s4 + $0x20] sm:$0xff]  ;;  %v10817_v15 = vld [vmem:[%s13603_s7 + $0x10] sm:$0xf]  ;;  %v13670_v16 = vld [vmem:[%s13598_s4 + $0x28] sm:$0xff] }
  0x2d   : > { %12322 = vmatprep.subr.msk.mxu0 %vm332_vm1, %v10785_v6  ;;  %12299 = vmatprep.subr.msk.mxu1 %vm332_vm1, %v10769_v7  ;;  %v13654_v13 = vld [vmem:[%s13598_s4 + $0x60] sm:$0xff]  ;;  %v13673_v17 = vld [vmem:[%s13598_s4 + $0x68] sm:$0xff]  ;;  %v13676_v18 = vld [vmem:[%s13598_s4 + $0x30] sm:$0xff] }
  0x2e   : > { %12323 = vmatpush3.msk.msra.mxu0 %vm332_vm1, %v10785_v6  ;;  %12281 = vmatprep.mubr.msk.f32.mxu0 %vm289_vm2, %v13631_v8  ;;  %v485_v19 = vld [vmem:[%s13598_s4 + $0x1] sm:$0xff]  ;;  %v13689_v20 = vld [vmem:[%s13598_s4 + $0x38] sm:$0xff]  ;;  %v486_v21 = vld [vmem:[%s13598_s4 + $0x9] sm:$0xff] }
  0x2f   : > { %12293 = vmatprep.mubr.msk.f32.mxu1 %vm289_vm2, %v13637_v9  ;;  %12300 = vmatpush3.msk.msra.mxu1 %vm332_vm1, %v10769_v7  ;;  %v13693_v22 = vld [vmem:[%s13598_s4 + $0x11] sm:$0xff]  ;;  %v695_v23 = vld [vmem:[%s13598_s4 + $0x2] sm:$0xff]  ;;  %v13706_v25 = vld [vmem:[%s13598_s4 + $0x19] sm:$0xff] }
  0x30   : > { %12282 = vmatmul.mubr.msk.f32.gmra.mxu0 %vm289_vm2, %v13642_v10  ;;  %12294 = vmatmul.mubr.msk.f32.gmra.mxu1 %vm289_vm2, %v13645_v11  ;;  %v13700_v24 = vld [vmem:[%s13603_s7 + $0x14] sm:$0xf]  ;;  %v696_v26 = vld [vmem:[%s13598_s4 + $0xa] sm:$0xff]  ;;  %v13711_v27 = vld [vmem:[%s13598_s4 + $0x21] sm:$0xff] }
  0x31   : > { %12284 = vmatprep.mubr.msk.f32.mxu0 %vm289_vm2, %v13651_v12  ;;  %12296 = vmatprep.mubr.msk.f32.mxu1 %vm289_vm2, %v13654_v13  ;;  %v13714_v28 = vld [vmem:[%s13598_s4 + $0x12] sm:$0xff]  ;;  %v13728_v30 = vld [vmem:[%s13598_s4 + $0x29] sm:$0xff]  ;;  %v13731_v31 = vld [vmem:[%s13598_s4 + $0x1a] sm:$0xff] }
  0x32   : > { %12345 = vmatprep.subr.msk.mxu1 %vm332_vm1, %v10801_v14  ;;  %12368 = vmatprep.subr.msk.mxu0 %vm332_vm1, %v10817_v15  ;;  %v13719_v29 = vld [vmem:[%s13603_s7 + $0x18] sm:$0xf]  ;;  %v13739_v33 = vld [vmem:[%s13598_s4 + $0x22] sm:$0xff]  ;;  %v13755_v35 = vld [vmem:[%s13598_s4 + $0x2a] sm:$0xff] }
  0x33   : > { %v13736_v32 = vld [vmem:[%s13598_s4 + $0x31] sm:$0xff]  ;;  %v13752_v34 = vld [vmem:[%s13598_s4 + $0x39] sm:$0xff]  ;;  %v13758_v36 = vld [vmem:[%s13598_s4 + $0x41] sm:$0xff] }
  0x34   : > { %12285 = vmatmul.mubr.msk.f32.gmra.mxu0 %vm289_vm2, %v13670_v16  ;;  %12297 = vmatmul.mubr.msk.f32.gmra.mxu1 %vm289_vm2, %v13673_v17  ;;  %v13761_v37 = vld [vmem:[%s13598_s4 + $0x32] sm:$0xff]  ;;  %v13772_v38 = vld [vmem:[%s13598_s4 + $0x49] sm:$0xff]  ;;  %v13775_v39 = vld [vmem:[%s13598_s4 + $0x3a] sm:$0xff] }
  0x35   : > { %12287 = vmatprep.mubr.msk.f32.mxu0 %vm289_vm2, %v13676_v18  ;;  %12301 = vmatprep.mubr.msk.f32.mxu1 %vm289_vm2, %v485_v19  ;;  %v13778_v40 = vld [vmem:[%s13598_s4 + $0x51] sm:$0xff]  ;;  %v13781_v41 = vld [vmem:[%s13598_s4 + $0x42] sm:$0xff]  ;;  %v13792_v42 = vld [vmem:[%s13598_s4 + $0x59] sm:$0xff] }
  0x36   : > { %v13795_v43 = vld [vmem:[%s13598_s4 + $0x4a] sm:$0xff]  ;;  %v13798_v44 = vld [vmem:[%s13598_s4 + $0x61] sm:$0xff]  ;;  %v13801_v45 = vld [vmem:[%s13598_s4 + $0x52] sm:$0xff] }
  0x37   : > { %v13812_v46 = vld [vmem:[%s13598_s4 + $0x69] sm:$0xff]  ;;  %v13815_v47 = vld [vmem:[%s13598_s4 + $0x5a] sm:$0xff] }
  0x38   : > { %12288 = vmatmul.mubr.msk.f32.gmra.mxu0 %vm289_vm2, %v13689_v20  ;;  %12302 = vmatmul.mubr.msk.f32.vlgmr.msra.gmra.mxu1 %vm289_vm2, %v486_v21  ;;  %v13818_v48 = vld [vmem:[%s13598_s4 + $0x62] sm:$0xff]  ;;  %v13829_v50 = vld [vmem:[%s13598_s4 + $0x6a] sm:$0xff]  ;;  %v13833_v52 = vld [vmem:[%s13598_s4 + $0x13] sm:$0xff] }
  0x39   : > { %12304 = vmatprep.mubr.msk.f32.mxu1 %vm289_vm2, %v13693_v22  ;;  %12324 = vmatprep.mubr.msk.f32.mxu0 %vm289_vm2, %v695_v23  ;;  %v905_v49 = vld [vmem:[%s13598_s4 + $0x3] sm:$0xff]  ;;  %v906_v51 = vld [vmem:[%s13598_s4 + $0xb] sm:$0xff]  ;;  %v13840_v54 = vld [vmem:[%s13603_s7 + $0x1c] sm:$0xf] }
  0x3a   : > { %12346 = vmatpush3.msk.msra.mxu1 %vm332_vm1, %v10801_v14  ;;  %v1115_v53 = vld [vmem:[%s13598_s4 + $0x4] sm:$0xff]  ;;  %v13846_v55 = vld [vmem:[%s13598_s4 + $0x1b] sm:$0xff]  ;;  %v1116_v56 = vld [vmem:[%s13598_s4 + $0xc] sm:$0xff] }
  0x3b   : > { %12391 = vmatprep.subr.msk.mxu1 %vm332_vm1, %v13700_v24  ;;  %v13852_v57 = vld [vmem:[%s13598_s4 + $0x23] sm:$0xff]  ;;  %v13855_v58 = vld [vmem:[%s13598_s4 + $0x14] sm:$0xff]  ;;  %v13870_v60 = vld [vmem:[%s13598_s4 + $0x2b] sm:$0xff] }
  0x3c   : > { %12305 = vmatmul.mubr.msk.f32.gmra.mxu1 %vm289_vm2, %v13706_v25  ;;  %12325 = vmatmul.mubr.msk.f32.vlgmr.msra.gmra.mxu0 %vm289_vm2, %v696_v26  ;;  %16869 = vst [vmem:[#allocation3_spill] sm:$0xff] %v13855_v58  ;;  %v13860_v59 = vld [vmem:[%s13603_s7 + $0x20] sm:$0xf]  ;;  %v13878_v62 = vld [vmem:[%s13598_s4 + $0x33] sm:$0xff]  ;;  %v13881_v63 = vld [vmem:[%s13598_s4 + $0x24] sm:$0xff] }
  0x3d   : > { %12369 = vmatpush3.msk.msra.mxu0 %vm332_vm1, %v10817_v15  ;;  %12307 = vmatprep.mubr.msk.f32.mxu1 %vm289_vm2, %v13711_v27  ;;  %v13873_v61 = vld [vmem:[%s13598_s4 + $0x1c] sm:$0xff]  ;;  %16871 = vst [vmem:[#allocation5_spill] sm:$0xff] %v13881_v63  ;;  %v13897_v1 = vld [vmem:[%s13598_s4 + $0x2c] sm:$0xff]  ;;  %v13903_v4 = vld [vmem:[%s13598_s4 + $0x34] sm:$0xff] }
  0x3e   : > { %12327 = vmatprep.mubr.msk.f32.mxu0 %vm289_vm2, %v13714_v28  ;;  %12414 = vmatprep.subr.msk.mxu0 %vm332_vm1, %v13719_v29  ;;  %16870 = vst [vmem:[#allocation4_spill] sm:$0xff] %v13873_v61  ;;  %v13894_v0 = vld [vmem:[%s13598_s4 + $0x3b] sm:$0xff]  ;;  %16872 = vst [vmem:[#allocation6_spill] sm:$0xff] %v13897_v1  ;;  %v13900_v2 = vld [vmem:[%s13598_s4 + $0x43] sm:$0xff] }
  0x3f   : > { %16873 = vst [vmem:[#allocation7_spill] sm:$0xff] %v13903_v4  ;;  %v13914_v6 = vld [vmem:[%s13598_s4 + $0x4b] sm:$0xff]  ;;  %v13917_v7 = vld [vmem:[%s13598_s4 + $0x3c] sm:$0xff]  ;;  %v13920_v14 = vld [vmem:[%s13598_s4 + $0x53] sm:$0xff] }
  0x40   : > { %12308 = vmatmul.mubr.msk.f32.gmra.mxu1 %vm289_vm2, %v13728_v30  ;;  %12328 = vmatmul.mubr.msk.f32.gmra.mxu0 %vm289_vm2, %v13731_v31  ;;  %16874 = vst [vmem:[#allocation8_spill] sm:$0xff] %v13917_v7  ;;  %v13923_v15 = vld [vmem:[%s13598_s4 + $0x44] sm:$0xff]  ;;  %v13934_v19 = vld [vmem:[%s13598_s4 + $0x5b] sm:$0xff]  ;;  %v13937_v21 = vld [vmem:[%s13598_s4 + $0x4c] sm:$0xff] }
  0x41   : > { %12310 = vmatprep.mubr.msk.f32.mxu1 %vm289_vm2, %v13736_v32  ;;  %12330 = vmatprep.mubr.msk.f32.mxu0 %vm289_vm2, %v13739_v33  ;;  %16875 = vst [vmem:[#allocation9_spill] sm:$0xff] %v13923_v15  ;;  %16876 = vst [vmem:[#allocation10_spill] sm:$0xff] %v13934_v19  ;;  %v13940_v23 = vld [vmem:[%s13598_s4 + $0x63] sm:$0xff]  ;;  %v13954_v26 = vld [vmem:[%s13598_s4 + $0x6b] sm:$0xff] }
  0x42   : > { %16877 = vst [vmem:[#allocation11_spill] sm:$0xff] %v13937_v21  ;;  %16878 = vst [vmem:[#allocation12_spill] sm:$0xff] %v13940_v23 }
  0x43   : > { %16880 = vst [vmem:[#allocation14_spill] sm:$0xff] %v13954_v26 }
  0x44   : > { %12311 = vmatmul.mubr.msk.f32.gmra.mxu1 %vm289_vm2, %v13752_v34  ;;  %12331 = vmatmul.mubr.msk.f32.gmra.mxu0 %vm289_vm2, %v13755_v35 }
  0x45   : > { %12313 = vmatprep.mubr.msk.f32.mxu1 %vm289_vm2, %v13758_v36  ;;  %12333 = vmatprep.mubr.msk.f32.mxu0 %vm289_vm2, %v13761_v37 }
  0x48   : > { %12314 = vmatmul.mubr.msk.f32.gmra.mxu1 %vm289_vm2, %v13772_v38  ;;  %12334 = vmatmul.mubr.msk.f32.gmra.mxu0 %vm289_vm2, %v13775_v39 }
  0x49   : > { %12316 = vmatprep.mubr.msk.f32.mxu1 %vm289_vm2, %v13778_v40  ;;  %12336 = vmatprep.mubr.msk.f32.mxu0 %vm289_vm2, %v13781_v41 }
  0x4c   : > { %12317 = vmatmul.mubr.msk.f32.gmra.mxu1 %vm289_vm2, %v13792_v42  ;;  %12337 = vmatmul.mubr.msk.f32.gmra.mxu0 %vm289_vm2, %v13795_v43 }
  0x4d   : > { %12319 = vmatprep.mubr.msk.f32.mxu1 %vm289_vm2, %v13798_v44  ;;  %12339 = vmatprep.mubr.msk.f32.mxu0 %vm289_vm2, %v13801_v45 }
  0x50   : > { %12320 = vmatmul.mubr.msk.f32.gmra.mxu1 %vm289_vm2, %v13812_v46  ;;  %12340 = vmatmul.mubr.msk.f32.gmra.mxu0 %vm289_vm2, %v13815_v47 }
  0x51   : > { %12342 = vmatprep.mubr.msk.f32.mxu0 %vm289_vm2, %v13818_v48  ;;  %12347 = vmatprep.mubr.msk.f32.mxu1 %vm289_vm2, %v905_v49  ;;  %v13960_v49 = vld [vmem:[%s13598_s4 + $0x64] sm:$0xff] }
  0x52   : > { %16882 = vst [vmem:[#allocation16_spill] sm:$0xff] %v13960_v49 }
  0x54   : > { %12343 = vmatmul.mubr.msk.f32.gmra.mxu0 %vm289_vm2, %v13829_v50  ;;  %12348 = vmatmul.mubr.msk.f32.vlgmr.msra.gmra.mxu1 %vm289_vm2, %v906_v51  ;;  %v1325_v51 = vld [vmem:[%s13598_s4 + $0x5] sm:$0xff] }
  0x55   : > { %12350 = vmatprep.mubr.msk.f32.mxu1 %vm289_vm2, %v13833_v52  ;;  %12370 = vmatprep.mubr.msk.f32.mxu0 %vm289_vm2, %v1115_v53  ;;  %v13971_v53 = vld [vmem:[%s13598_s4 + $0x6c] sm:$0xff] }
  0x56   : > { %12392 = vmatpush3.msk.msra.mxu1 %vm332_vm1, %v13700_v24  ;;  %v13943_v24 = vld [vmem:[%s13598_s4 + $0x54] sm:$0xff]  ;;  %16883 = vst [vmem:[#allocation17_spill] sm:$0xff] %v13971_v53 }
  0x57   : > { %12437 = vmatprep.subr.msk.mxu1 %vm332_vm1, %v13840_v54  ;;  %16879 = vst [vmem:[#allocation13_spill] sm:$0xff] %v13943_v24 }
  0x58   : > { %12351 = vmatmul.mubr.msk.f32.gmra.mxu1 %vm289_vm2, %v13846_v55  ;;  %12371 = vmatmul.mubr.msk.f32.vlgmr.msra.gmra.mxu0 %vm289_vm2, %v1116_v56  ;;  %v1326_v56 = vld [vmem:[%s13598_s4 + $0xd] sm:$0xff] }
  0x59   : > { %12415 = vmatpush3.msk.msra.mxu0 %vm332_vm1, %v13719_v29  ;;  %12353 = vmatprep.mubr.msk.f32.mxu1 %vm289_vm2, %v13852_v57  ;;  %v13957_v29 = vld [vmem:[%s13598_s4 + $0x5c] sm:$0xff] }
  0x5a   : > { %12373 = vmatprep.mubr.msk.f32.mxu0 %vm289_vm2, %v13855_v58  ;;  %12460 = vmatprep.subr.msk.mxu0 %vm332_vm1, %v13860_v59  ;;  %16881 = vst [vmem:[#allocation15_spill] sm:$0xff] %v13957_v29  ;;  %v14076_v58 = vld [vmem:[%s13598_s4 + $0x56] sm:$0xff] }
  0x5c   : > { %12354 = vmatmul.mubr.msk.f32.gmra.mxu1 %vm289_vm2, %v13870_v60  ;;  %12374 = vmatmul.mubr.msk.f32.gmra.mxu0 %vm289_vm2, %v13873_v61  ;;  %v14073_v61 = vld [vmem:[%s13598_s4 + $0x65] sm:$0xff] }
  0x5d   : > { %12356 = vmatprep.mubr.msk.f32.mxu1 %vm289_vm2, %v13878_v62  ;;  %12376 = vmatprep.mubr.msk.f32.mxu0 %vm289_vm2, %v13881_v63  ;;  %v14056_v63 = vld [vmem:[%s13598_s4 + $0x46] sm:$0xff]  ;;  %16893 = vst [vmem:[#allocation27_spill] sm:$0xff] %v14073_v61 }
  0x60   : > { %12357 = vmatmul.mubr.msk.f32.gmra.mxu1 %vm289_vm2, %v13894_v0  ;;  %12377 = vmatmul.mubr.msk.f32.gmra.mxu0 %vm289_vm2, %v13897_v1  ;;  %v14053_v1 = vld [vmem:[%s13598_s4 + $0x55] sm:$0xff] }
  0x61   : > { %12359 = vmatprep.mubr.msk.f32.mxu1 %vm289_vm2, %v13900_v2  ;;  %12379 = vmatprep.mubr.msk.f32.mxu0 %vm289_vm2, %v13903_v4  ;;  %v14036_v4 = vld [vmem:[%s13598_s4 + $0x36] sm:$0xff]  ;;  %16891 = vst [vmem:[#allocation25_spill] sm:$0xff] %v14053_v1 }
  0x64   : > { %12360 = vmatmul.mubr.msk.f32.gmra.mxu1 %vm289_vm2, %v13914_v6  ;;  %12380 = vmatmul.mubr.msk.f32.gmra.mxu0 %vm289_vm2, %v13917_v7  ;;  %v14033_v7 = vld [vmem:[%s13598_s4 + $0x45] sm:$0xff] }
  0x65   : > { %12362 = vmatprep.mubr.msk.f32.mxu1 %vm289_vm2, %v13920_v14  ;;  %12382 = vmatprep.mubr.msk.f32.mxu0 %vm289_vm2, %v13923_v15  ;;  %v13991_v15 = vld [vmem:[%s13598_s4 + $0x25] sm:$0xff]  ;;  %16889 = vst [vmem:[#allocation23_spill] sm:$0xff] %v14033_v7 }
  0x66   : > { %16885 = vst [vmem:[#allocation19_spill] sm:$0xff] %v13991_v15 }
  0x68   : > { %12363 = vmatmul.mubr.msk.f32.gmra.mxu1 %vm289_vm2, %v13934_v19  ;;  %12383 = vmatmul.mubr.msk.f32.gmra.mxu0 %vm289_vm2, %v13937_v21  ;;  %v1535_v21 = vld [vmem:[%s13598_s4 + $0x6] sm:$0xff]  ;;  %v10945_v19 = vld [vmem:[%s13603_s7 + $0x30] sm:$0xf] }
  0x69   : > { %12365 = vmatprep.mubr.msk.f32.mxu1 %vm289_vm2, %v13940_v23  ;;  %12385 = vmatprep.mubr.msk.f32.mxu0 %vm289_vm2, %v13943_v24  ;;  %v1327_v24 = vld [vmem:[%s13598_s4 + $0x15] sm:$0xff]  ;;  %v10929_v23 = vld [vmem:[%s13603_s7 + $0x2c] sm:$0xf] }
  0x6c   : > { %12366 = vmatmul.mubr.msk.f32.gmra.mxu1 %vm289_vm2, %v13954_v26  ;;  %12386 = vmatmul.mubr.msk.f32.gmra.mxu0 %vm289_vm2, %v13957_v29  ;;  %v13980_v29 = vld [vmem:[%s13603_s7 + $0x24] sm:$0xf] }
  0x6d   : > { %12388 = vmatprep.mubr.msk.f32.mxu0 %vm289_vm2, %v13960_v49  ;;  %12393 = vmatprep.mubr.msk.f32.mxu1 %vm289_vm2, %v1325_v51  ;;  %v13985_v51 = vld [vmem:[%s13598_s4 + $0x1d] sm:$0xff]  ;;  %v1536_v49 = vld [vmem:[%s13598_s4 + $0xe] sm:$0xff]  ;;  %v14093_v26 = vld [vmem:[%s13598_s4 + $0x66] sm:$0xff] }
  0x6e   : > { %16884 = vst [vmem:[#allocation18_spill] sm:$0xff] %v13985_v51 }
  0x70   : > { %12389 = vmatmul.mubr.msk.f32.gmra.mxu0 %vm289_vm2, %v13971_v53  ;;  %12394 = vmatmul.mubr.msk.f32.vlgmr.msra.gmra.mxu1 %vm289_vm2, %v1326_v56  ;;  %v1537_v53 = vld [vmem:[%s13598_s4 + $0x16] sm:$0xff]  ;;  %v10913_v56 = vld [vmem:[%s13603_s7 + $0x28] sm:$0xf] }
  0x71   : > { %12396 = vmatprep.mubr.msk.f32.mxu1 %vm289_vm2, %v1327_v24  ;;  %12416 = vmatprep.mubr.msk.f32.mxu0 %vm289_vm2, %v1535_v21  ;;  %v14008_v21 = vld [vmem:[%s13598_s4 + $0x1e] sm:$0xff]  ;;  %v14012_v24 = vld [vmem:[%s13598_s4 + $0x35] sm:$0xff] }
  0x72   : > { %12438 = vmatpush3.msk.msra.mxu1 %vm332_vm1, %v13840_v54  ;;  %v14005_v54 = vld [vmem:[%s13598_s4 + $0x2d] sm:$0xff]  ;;  %16887 = vst [vmem:[#allocation21_spill] sm:$0xff] %v14012_v24 }
  0x73   : > { %12483 = vmatprep.subr.msk.mxu1 %vm332_vm1, %v13980_v29  ;;  %16886 = vst [vmem:[#allocation20_spill] sm:$0xff] %v14005_v54 }
  0x74   : > { %12397 = vmatmul.mubr.msk.f32.gmra.mxu1 %vm289_vm2, %v13985_v51  ;;  %12417 = vmatmul.mubr.msk.f32.vlgmr.msra.gmra.mxu0 %vm289_vm2, %v1536_v49  ;;  %v14015_v51 = vld [vmem:[%s13598_s4 + $0x26] sm:$0xff] }
  0x75   : > { %12461 = vmatpush3.msk.msra.mxu0 %vm332_vm1, %v13860_v59  ;;  %12399 = vmatprep.mubr.msk.f32.mxu1 %vm289_vm2, %v13991_v15  ;;  %v14027_v59 = vld [vmem:[%s13598_s4 + $0x3d] sm:$0xff]  ;;  %v14030_v15 = vld [vmem:[%s13598_s4 + $0x2e] sm:$0xff] }
  0x76   : > { %12419 = vmatprep.mubr.msk.f32.mxu0 %vm289_vm2, %v1537_v53  ;;  %12506 = vmatprep.subr.msk.mxu0 %vm332_vm1, %v10913_v56  ;;  %16888 = vst [vmem:[#allocation22_spill] sm:$0xff] %v14027_v59 }
  0x78   : > { %12400 = vmatmul.mubr.msk.f32.gmra.mxu1 %vm289_vm2, %v14005_v54  ;;  %12420 = vmatmul.mubr.msk.f32.gmra.mxu0 %vm289_vm2, %v14008_v21  ;;  %v14050_v54 = vld [vmem:[%s13598_s4 + $0x3e] sm:$0xff] }
  0x79   : > { %12402 = vmatprep.mubr.msk.f32.mxu1 %vm289_vm2, %v14012_v24  ;;  %12422 = vmatprep.mubr.msk.f32.mxu0 %vm289_vm2, %v14015_v51  ;;  %v14047_v24 = vld [vmem:[%s13598_s4 + $0x4d] sm:$0xff] }
  0x7a   : > { %16890 = vst [vmem:[#allocation24_spill] sm:$0xff] %v14047_v24 }
  0x7c   : > { %12403 = vmatmul.mubr.msk.f32.gmra.mxu1 %vm289_vm2, %v14027_v59  ;;  %12423 = vmatmul.mubr.msk.f32.gmra.mxu0 %vm289_vm2, %v14030_v15  ;;  %v14070_v59 = vld [vmem:[%s13598_s4 + $0x4e] sm:$0xff] }
  0x7d   : > { %12405 = vmatprep.mubr.msk.f32.mxu1 %vm289_vm2, %v14033_v7  ;;  %12425 = vmatprep.mubr.msk.f32.mxu0 %vm289_vm2, %v14036_v4  ;;  %v14067_v7 = vld [vmem:[%s13598_s4 + $0x5d] sm:$0xff] }
  0x7e   : > { %16892 = vst [vmem:[#allocation26_spill] sm:$0xff] %v14067_v7 }
  0x80   : > { %12406 = vmatmul.mubr.msk.f32.gmra.mxu1 %vm289_vm2, %v14047_v24  ;;  %12426 = vmatmul.mubr.msk.f32.gmra.mxu0 %vm289_vm2, %v14050_v54  ;;  %v14090_v24 = vld [vmem:[%s13598_s4 + $0x5e] sm:$0xff] }
  0x81   : > { %12408 = vmatprep.mubr.msk.f32.mxu1 %vm289_vm2, %v14053_v1  ;;  %12428 = vmatprep.mubr.msk.f32.mxu0 %vm289_vm2, %v14056_v63  ;;  %v14087_v1 = vld [vmem:[%s13598_s4 + $0x6d] sm:$0xff] }
  0x82   : > { %16894 = vst [vmem:[#allocation28_spill] sm:$0xff] %v14087_v1 }
  0x84   : > { %12409 = vmatmul.mubr.msk.f32.gmra.mxu1 %vm289_vm2, %v14067_v7  ;;  %12429 = vmatmul.mubr.msk.f32.gmra.mxu0 %vm289_vm2, %v14070_v59  ;;  %v1955_v7 = vld [vmem:[%s13598_s4 + $0xf] sm:$0xff] }
  0x85   : > { %12411 = vmatprep.mubr.msk.f32.mxu1 %vm289_vm2, %v14073_v61  ;;  %12431 = vmatprep.mubr.msk.f32.mxu0 %vm289_vm2, %v14076_v58  ;;  %v14103_v61 = vld [vmem:[%s13598_s4 + $0x6e] sm:$0xff] }
  0x88   : > { %12412 = vmatmul.mubr.msk.f32.gmra.mxu1 %vm289_vm2, %v14087_v1  ;;  %12432 = vmatmul.mubr.msk.f32.gmra.mxu0 %vm289_vm2, %v14090_v24  ;;  %v1956_v1 = vld [vmem:[%s13598_s4 + $0x17] sm:$0xff] }
  0x89   : > { %12434 = vmatprep.mubr.msk.f32.mxu0 %vm289_vm2, %v14093_v26  ;;  %12439 = vmatprep.mubr.msk.f32.mxu1 %vm289_vm2, %v1536_v49  ;;  %v14117_v49 = vld [vmem:[%s13598_s4 + $0x1f] sm:$0xff] }
  0x8c   : > { %12435 = vmatmul.mubr.msk.f32.gmra.mxu0 %vm289_vm2, %v14103_v61  ;;  %12440 = vmatmul.mubr.msk.f32.vlgmr.msra.gmra.mxu1 %vm289_vm2, %v1537_v53  ;;  %v14148_v53 = vld [vmem:[%s13598_s4 + $0x3f] sm:$0xff] }
  0x8d   : > { %12442 = vmatprep.mubr.msk.f32.mxu1 %vm289_vm2, %v14008_v21  ;;  %12462 = vmatprep.mubr.msk.f32.mxu0 %vm289_vm2, %v1955_v7  ;;  %v14128_v7 = vld [vmem:[%s13598_s4 + $0x27] sm:$0xff]  ;;  %16898 = vst [vmem:[#allocation32_spill] sm:$0xff] %v14148_v53 }
  0x8e   : > { %12484 = vmatpush3.msk.msra.mxu1 %vm332_vm1, %v13980_v29  ;;  %16895 = vst [vmem:[#allocation29_spill] sm:$0xff] %v14128_v7  ;;  %v14133_v29 = vld [vmem:[%s13598_s4 + $0x2f] sm:$0xff] }
  0x8f   : > { %12529 = vmatprep.subr.msk.mxu1 %vm332_vm1, %v10929_v23  ;;  %16896 = vst [vmem:[#allocation30_spill] sm:$0xff] %v14133_v29 }
  0x90   : > { %12443 = vmatmul.mubr.msk.f32.gmra.mxu1 %vm289_vm2, %v14015_v51  ;;  %12463 = vmatmul.mubr.msk.f32.vlgmr.msra.gmra.mxu0 %vm289_vm2, %v1956_v1  ;;  %v14145_v1 = vld [vmem:[%s13598_s4 + $0x37] sm:$0xff] }
  0x91   : > { %12507 = vmatpush3.msk.msra.mxu0 %vm332_vm1, %v10913_v56  ;;  %12445 = vmatprep.mubr.msk.f32.mxu1 %vm289_vm2, %v14030_v15  ;;  %16897 = vst [vmem:[#allocation31_spill] sm:$0xff] %v14145_v1  ;;  %v14159_v56 = vld [vmem:[%s13598_s4 + $0x47] sm:$0xff] }
  0x92   : > { %12465 = vmatprep.mubr.msk.f32.mxu0 %vm289_vm2, %v14117_v49  ;;  %12552 = vmatprep.subr.msk.mxu0 %vm332_vm1, %v10945_v19  ;;  %16899 = vst [vmem:[#allocation33_spill] sm:$0xff] %v14159_v56 }
  0x94   : > { %12446 = vmatmul.mubr.msk.f32.gmra.mxu1 %vm289_vm2, %v14036_v4  ;;  %12466 = vmatmul.mubr.msk.f32.gmra.mxu0 %vm289_vm2, %v14128_v7  ;;  %v14193_v7 = vld [vmem:[%s13598_s4 + $0x6f] sm:$0xff] }
  0x95   : > { %12448 = vmatprep.mubr.msk.f32.mxu1 %vm289_vm2, %v14050_v54  ;;  %12468 = vmatprep.mubr.msk.f32.mxu0 %vm289_vm2, %v14133_v29  ;;  %v14162_v29 = vld [vmem:[%s13598_s4 + $0x4f] sm:$0xff] }
  0x96   : > { %16900 = vst [vmem:[#allocation34_spill] sm:$0xff] %v14162_v29 }
  0x98   : > { %12449 = vmatmul.mubr.msk.f32.gmra.mxu1 %vm289_vm2, %v14056_v63  ;;  %12469 = vmatmul.mubr.msk.f32.gmra.mxu0 %vm289_vm2, %v14145_v1  ;;  %v14173_v1 = vld [vmem:[%s13598_s4 + $0x57] sm:$0xff] }
  0x99   : > { %12451 = vmatprep.mubr.msk.f32.mxu1 %vm289_vm2, %v14070_v59  ;;  %12471 = vmatprep.mubr.msk.f32.mxu0 %vm289_vm2, %v14148_v53  ;;  %16901 = vst [vmem:[#allocation35_spill] sm:$0xff] %v14173_v1  ;;  %v14176_v53 = vld [vmem:[%s13598_s4 + $0x5f] sm:$0xff] }
  0x9a   : > { %16902 = vst [vmem:[#allocation36_spill] sm:$0xff] %v14176_v53 }
  0x9c   : > { %12452 = vmatmul.mubr.msk.f32.gmra.mxu1 %vm289_vm2, %v14076_v58  ;;  %12472 = vmatmul.mubr.msk.f32.gmra.mxu0 %vm289_vm2, %v14159_v56  ;;  %v14187_v56 = vld [vmem:[%s13598_s4 + $0x76] sm:$0xff] }
  0x9d   : > { %12454 = vmatprep.mubr.msk.f32.mxu1 %vm289_vm2, %v14090_v24  ;;  %12474 = vmatprep.mubr.msk.f32.mxu0 %vm289_vm2, %v14162_v29  ;;  %v14190_v29 = vld [vmem:[%s13598_s4 + $0x67] sm:$0xff] }
  0xa0   : > { %12455 = vmatmul.mubr.msk.f32.gmra.mxu1 %vm289_vm2, %v14093_v26  ;;  %12475 = vmatmul.mubr.msk.f32.gmra.mxu0 %vm289_vm2, %v14173_v1  ;;  %v10961_v1 = vld [vmem:[%s13603_s7 + $0x34] sm:$0xf] }
  0xa1   : > { %12457 = vmatprep.mubr.msk.f32.mxu1 %vm289_vm2, %v14103_v61  ;;  %12477 = vmatprep.mubr.msk.f32.mxu0 %vm289_vm2, %v14176_v53  ;;  %v14204_v53 = vld [vmem:[%s13598_s4 + $0x77] sm:$0xff] }
  0xa4   : > { %12458 = vmatmul.mubr.msk.f32.gmra.mxu1 %vm289_vm2, %v14187_v56  ;;  %12478 = vmatmul.mubr.msk.f32.gmra.mxu0 %vm289_vm2, %v14190_v29 }
  0xa5   : > { %12480 = vmatprep.mubr.msk.f32.mxu0 %vm289_vm2, %v14193_v7  ;;  %12485 = vmatprep.mubr.msk.f32.mxu1 %vm289_vm2, %v13631_v8  ;;  %v10977_v8 = vld [vmem:[%s13603_s7 + $0x38] sm:$0xf] }
  0xa8   : > { %12481 = vmatmul.mubr.msk.f32.gmra.mxu0 %vm289_vm2, %v14204_v53  ;;  %12486 = vmatmul.mubr.msk.f32.vlgmr.msra.gmra.mxu1 %vm289_vm2, %v13642_v10  ;;  %v14278_v10 = vld [vmem:[%s13598_s4 + $0x79] sm:$0xff] }
  0xa9   : > { %12488 = vmatprep.mubr.msk.f32.mxu1 %vm289_vm2, %v13651_v12  ;;  %12508 = vmatprep.mubr.msk.f32.mxu0 %vm289_vm2, %v13693_v22  ;;  %v11009_v12 = vld [vmem:[%s13603_s7 + $0x40] sm:$0xf]  ;;  %v16905_v22 = vld [vmem:[#allocation14_spill] sm:$0xff] }
  0xaa   : > { %12530 = vmatpush3.msk.msra.mxu1 %vm332_vm1, %v10929_v23 }
  0xab   : > { %12575 = vmatprep.subr.msk.mxu1 %vm332_vm1, %v10961_v1 }
  0xac   : > { %12489 = vmatmul.mubr.msk.f32.gmra.mxu1 %vm289_vm2, %v13670_v16  ;;  %12509 = vmatmul.mubr.msk.f32.vlgmr.msra.gmra.mxu0 %vm289_vm2, %v13706_v25  ;;  %v16903_v16 = vld [vmem:[#allocation10_spill] sm:$0xff]  ;;  %v16906_v25 = vld [vmem:[#allocation3_spill] sm:$0xff] }
  0xad   : > { %12553 = vmatpush3.msk.msra.mxu0 %vm332_vm1, %v10945_v19  ;;  %12491 = vmatprep.mubr.msk.f32.mxu1 %vm289_vm2, %v13676_v18  ;;  %v14338_v18 = vld [vmem:[%s13598_s4 + $0x7a] sm:$0xff] }
  0xae   : > { %12511 = vmatprep.mubr.msk.f32.mxu0 %vm289_vm2, %v13711_v27  ;;  %12598 = vmatprep.subr.msk.mxu0 %vm332_vm1, %v10977_v8  ;;  %v2808_v27 = vld [vmem:[%s13598_s4 + $0x7b] sm:$0xff] }
  0xaf   : > { %v263_v19 = vld [vmem:[#allocation2 + $0x18] sm:$0xff] }
  0xb0   : > { %12492 = vmatmul.mubr.msk.f32.gmra.mxu1 %vm289_vm2, %v13689_v20  ;;  %12512 = vmatmul.mubr.msk.f32.gmra.mxu0 %vm289_vm2, %v13728_v30  ;;  %v2807_v20 = vld [vmem:[%s13598_s4 + $0x73] sm:$0xff]  ;;  %v14353_v30 = vld [vmem:[%s13603_s7 + $0x44] sm:$0xf] }
  0xb1   : > { %12494 = vmatprep.mubr.msk.f32.mxu1 %vm289_vm2, %v13615_v3  ;;  %12514 = vmatprep.mubr.msk.f32.mxu0 %vm289_vm2, %v13736_v32  ;;  %v14253_v3 = vld [vmem:[%s13598_s4 + $0x70] sm:$0xff]  ;;  %v14363_v32 = vld [vmem:[%s13603_s7 + $0x48] sm:$0xf] }
  0xb4   : > { %12495 = vmatmul.mubr.msk.f32.gmra.mxu1 %vm289_vm2, %v13621_v5  ;;  %12515 = vmatmul.mubr.msk.f32.gmra.mxu0 %vm289_vm2, %v13752_v34  ;;  %v14264_v5 = vld [vmem:[%s13598_s4 + $0x78] sm:$0xff]  ;;  %v16910_v34 = vld [vmem:[#allocation7_spill] sm:$0xff] }
  0xb5   : > { %12497 = vmatprep.mubr.msk.f32.mxu1 %vm289_vm2, %v13637_v9  ;;  %12517 = vmatprep.mubr.msk.f32.mxu0 %vm289_vm2, %v13758_v36  ;;  %v14267_v9 = vld [vmem:[%s13598_s4 + $0x71] sm:$0xff]  ;;  %v16912_v36 = vld [vmem:[#allocation9_spill] sm:$0xff] }
  0xb8   : > { %12498 = vmatmul.mubr.msk.f32.gmra.mxu1 %vm289_vm2, %v13645_v11  ;;  %12518 = vmatmul.mubr.msk.f32.gmra.mxu0 %vm289_vm2, %v13772_v38  ;;  %v10993_v11 = vld [vmem:[%s13603_s7 + $0x3c] sm:$0xf] }
  0xb9   : > { %12500 = vmatprep.mubr.msk.f32.mxu1 %vm289_vm2, %v13654_v13  ;;  %12520 = vmatprep.mubr.msk.f32.mxu0 %vm289_vm2, %v13778_v40  ;;  %v14327_v13 = vld [vmem:[%s13598_s4 + $0x72] sm:$0xff]  ;;  %v16914_v40 = vld [vmem:[#allocation13_spill] sm:$0xff] }
  0xbc   : > { %12501 = vmatmul.mubr.msk.f32.gmra.mxu1 %vm289_vm2, %v13673_v17  ;;  %12521 = vmatmul.mubr.msk.f32.gmra.mxu0 %vm289_vm2, %v13792_v42  ;;  %v16904_v17 = vld [vmem:[#allocation12_spill] sm:$0xff] }
  0xbd   : > { %12503 = vmatprep.mubr.msk.f32.mxu1 %vm289_vm2, %v14253_v3  ;;  %12523 = vmatprep.mubr.msk.f32.mxu0 %vm289_vm2, %v13798_v44 }
  0xc0   : > { %12504 = vmatmul.mubr.msk.f32.gmra.mxu1 %vm289_vm2, %v14264_v5  ;;  %12524 = vmatmul.mubr.msk.f32.gmra.mxu0 %vm289_vm2, %v13812_v46  ;;  %v16916_v46 = vld [vmem:[#allocation16_spill] sm:$0xff] }
  0xc1   : > { %12526 = vmatprep.mubr.msk.f32.mxu0 %vm289_vm2, %v14267_v9  ;;  %12531 = vmatprep.mubr.msk.f32.mxu1 %vm289_vm2, %v13714_v28  ;;  %v16907_v28 = vld [vmem:[#allocation4_spill] sm:$0xff] }
  0xc4   : > { %12527 = vmatmul.mubr.msk.f32.gmra.mxu0 %vm289_vm2, %v14278_v10  ;;  %12532 = vmatmul.mubr.msk.f32.vlgmr.msra.gmra.mxu1 %vm289_vm2, %v13731_v31  ;;  %v16908_v31 = vld [vmem:[#allocation5_spill] sm:$0xff] }
  0xc5   : > { %12534 = vmatprep.mubr.msk.f32.mxu1 %vm289_vm2, %v13739_v33  ;;  %12554 = vmatprep.mubr.msk.f32.mxu0 %vm289_vm2, %v13833_v52  ;;  %v16909_v33 = vld [vmem:[#allocation6_spill] sm:$0xff] }
  0xc6   : > { %12576 = vmatpush3.msk.msra.mxu1 %vm332_vm1, %v10961_v1  ;;  %v261_v52 = vld [vmem:[#allocation2 + $0x8] sm:$0xff] }
  0xc7   : > { %12621 = vmatprep.subr.msk.mxu1 %vm332_vm1, %v10993_v11 }
  0xc8   : > { %12535 = vmatmul.mubr.msk.f32.gmra.mxu1 %vm289_vm2, %v13755_v35  ;;  %12555 = vmatmul.mubr.msk.f32.vlgmr.msra.gmra.mxu0 %vm289_vm2, %v13846_v55  ;;  %v16911_v35 = vld [vmem:[#allocation8_spill] sm:$0xff] }
  0xc9   : > { %12599 = vmatpush3.msk.msra.mxu0 %vm332_vm1, %v10977_v8  ;;  %12537 = vmatprep.mubr.msk.f32.mxu1 %vm289_vm2, %v13761_v37 }
  0xca   : > { %12557 = vmatprep.mubr.msk.f32.mxu0 %vm289_vm2, %v13852_v57  ;;  %12644 = vmatprep.subr.msk.mxu0 %vm332_vm1, %v11009_v12 }
  0xcc   : > { %12538 = vmatmul.mubr.msk.f32.gmra.mxu1 %vm289_vm2, %v13775_v39  ;;  %12558 = vmatmul.mubr.msk.f32.gmra.mxu0 %vm289_vm2, %v13870_v60  ;;  %v16913_v39 = vld [vmem:[#allocation11_spill] sm:$0xff]  ;;  %v16917_v60 = vld [vmem:[#allocation17_spill] sm:$0xff] }
  0xcd   : > { %12540 = vmatprep.mubr.msk.f32.mxu1 %vm289_vm2, %v13781_v41  ;;  %12560 = vmatprep.mubr.msk.f32.mxu0 %vm289_vm2, %v13878_v62  ;;  %v3018_v62 = vld [vmem:[%s13598_s4 + $0x7c] sm:$0xff] }
  0xd0   : > { %12541 = vmatmul.mubr.msk.f32.gmra.mxu1 %vm289_vm2, %v13795_v43  ;;  %12561 = vmatmul.mubr.msk.f32.gmra.mxu0 %vm289_vm2, %v13894_v0  ;;  %v260_v0 = vld [vmem:[#allocation2] sm:$0xff] }
  0xd1   : > { %12543 = vmatprep.mubr.msk.f32.mxu1 %vm289_vm2, %v13801_v45  ;;  %12563 = vmatprep.mubr.msk.f32.mxu0 %vm289_vm2, %v13900_v2  ;;  %v16915_v45 = vld [vmem:[#allocation15_spill] sm:$0xff] }
  0xd4   : > { %12544 = vmatmul.mubr.msk.f32.gmra.mxu1 %vm289_vm2, %v13815_v47  ;;  %12564 = vmatmul.mubr.msk.f32.gmra.mxu0 %vm289_vm2, %v13914_v6 }
  0xd5   : > { %12546 = vmatprep.mubr.msk.f32.mxu1 %vm289_vm2, %v13818_v48  ;;  %12566 = vmatprep.mubr.msk.f32.mxu0 %vm289_vm2, %v13920_v14 }
  0xd8   : > { %12547 = vmatmul.mubr.msk.f32.gmra.mxu1 %vm289_vm2, %v13829_v50  ;;  %12567 = vmatmul.mubr.msk.f32.gmra.mxu0 %vm289_vm2, %v16903_v16  ;;  %v3017_v50 = vld [vmem:[%s13598_s4 + $0x74] sm:$0xff]  ;;  %v3228_v16 = vld [vmem:[%s13598_s4 + $0x84] sm:$0xff] }
  0xd9   : > { %12549 = vmatprep.mubr.msk.f32.mxu1 %vm289_vm2, %v14327_v13  ;;  %12569 = vmatprep.mubr.msk.f32.mxu0 %vm289_vm2, %v16904_v17  ;;  %v262_v17 = vld [vmem:[#allocation2 + $0x10] sm:$0xff] }
  0xdc   : > { %12550 = vmatmul.mubr.msk.f32.gmra.mxu1 %vm289_vm2, %v14338_v18  ;;  %12570 = vmatmul.mubr.msk.f32.gmra.mxu0 %vm289_vm2, %v16905_v22 }
  0xdd   : > { %12572 = vmatprep.mubr.msk.f32.mxu0 %vm289_vm2, %v2807_v20  ;;  %12577 = vmatprep.mubr.msk.f32.mxu1 %vm289_vm2, %v16906_v25 }
  0xe0   : > { %12573 = vmatmul.mubr.msk.f32.gmra.mxu0 %vm289_vm2, %v2808_v27  ;;  %12578 = vmatmul.mubr.msk.f32.vlgmr.msra.gmra.mxu1 %vm289_vm2, %v16907_v28 }
  0xe1   : > { %12580 = vmatprep.mubr.msk.f32.mxu1 %vm289_vm2, %v16908_v31  ;;  %12600 = vmatprep.mubr.msk.f32.mxu0 %vm289_vm2, %v16907_v28  ;;  %v265_v28 = vld [vmem:[#allocation2 + $0x28] sm:$0xff] }
  0xe2   : > { %12622 = vmatpush3.msk.msra.mxu1 %vm332_vm1, %v10993_v11 }
  0xe3   : > { %12667 = vmatprep.subr.msk.mxu1 %vm332_vm1, %v14353_v30 }
  0xe4   : > { %12581 = vmatmul.mubr.msk.f32.gmra.mxu1 %vm289_vm2, %v16909_v33  ;;  %12601 = vmatmul.mubr.msk.f32.vlgmr.msra.gmra.mxu0 %vm289_vm2, %v16908_v31 }
  0xe5   : > { %12645 = vmatpush3.msk.msra.mxu0 %vm332_vm1, %v11009_v12  ;;  %12583 = vmatprep.mubr.msk.f32.mxu1 %vm289_vm2, %v16910_v34  ;;  %v16918_v12 = vld [vmem:[#allocation18_spill] sm:$0xff] }
  0xe6   : > { %12603 = vmatprep.mubr.msk.f32.mxu0 %vm289_vm2, %v16909_v33  ;;  %12690 = vmatprep.subr.msk.mxu0 %vm332_vm1, %v14363_v32 }
  0xe8   : > { %12584 = vmatmul.mubr.msk.f32.gmra.mxu1 %vm289_vm2, %v16911_v35  ;;  %12604 = vmatmul.mubr.msk.f32.gmra.mxu0 %vm289_vm2, %v16910_v34  ;;  %v16919_v34 = vld [vmem:[#allocation19_spill] sm:$0xff] }
  0xe9   : > { %12586 = vmatprep.mubr.msk.f32.mxu1 %vm289_vm2, %v16912_v36  ;;  %12606 = vmatprep.mubr.msk.f32.mxu0 %vm289_vm2, %v16911_v35  ;;  %v14431_v35 = vld [vmem:[%s13603_s7 + $0x4c] sm:$0xf] }
  0xec   : > { %v12280_v37 = vpop.f32.mrf.mxu0  ;;  %v14384_v38 = vpop.f32.mrf.mxu1  ;;  %12587 = vmatmul.mubr.msk.f32.gmra.mxu1 %vm289_vm2, %v16913_v39  ;;  %12607 = vmatmul.mubr.msk.f32.gmra.mxu0 %vm289_vm2, %v16912_v36 }
  0xed   : > { %12589 = vmatprep.mubr.msk.f32.mxu1 %vm289_vm2, %v16914_v40  ;;  %12609 = vmatprep.mubr.msk.f32.mxu0 %vm289_vm2, %v16913_v39  ;;  %v472_v14 = vadd.f32 %v12280_v37, %v261_v52 }
  0xee   : > { %v402_v41 = vpop.f32.mrf.mxu0  ;;  %v14394_v42 = vpop.f32.mrf.mxu1 }
  0xef   : > { %v471_v8 = vadd.f32 %v402_v41, %v260_v0  ;;  %v264_v41 = vld [vmem:[#allocation2 + $0x20] sm:$0xff] }
  0xf0   : > { %v12283_v43 = vpop.f32.mrf.mxu0  ;;  %v14396_v44 = vpop.f32.mrf.mxu1  ;;  %12590 = vmatmul.mubr.msk.f32.gmra.mxu1 %vm289_vm2, %v16915_v45  ;;  %12610 = vmatmul.mubr.msk.f32.gmra.mxu0 %vm289_vm2, %v16914_v40  ;;  %v16920_v40 = vld [vmem:[#allocation20_spill] sm:$0xff] }
  0xf1   : > { %12592 = vmatprep.mubr.msk.f32.mxu1 %vm289_vm2, %v16916_v46  ;;  %12612 = vmatprep.mubr.msk.f32.mxu0 %vm289_vm2, %v16915_v45  ;;  %v474_v25 = vadd.f32 %v12283_v43, %v263_v19  ;;  %v16922_v19 = vld [vmem:[#allocation22_spill] sm:$0xff] }
  0xf2   : > { %v412_v47 = vpop.f32.mrf.mxu0  ;;  %v14406_v48 = vpop.f32.mrf.mxu1 }
  0xf3   : > { %v473_v36 = vadd.f32 %v412_v47, %v262_v17  ;;  %v14446_v47 = vld [vmem:[%s13603_s7 + $0x50] sm:$0xf] }
  0xf4   : > { %v12286_v55 = vpop.f32.mrf.mxu0  ;;  %v14409_v57 = vpop.f32.mrf.mxu1  ;;  %12593 = vmatmul.mubr.msk.f32.gmra.mxu1 %vm289_vm2, %v16917_v60  ;;  %12613 = vmatmul.mubr.msk.f32.gmra.mxu0 %vm289_vm2, %v16916_v46 }
  0xf5   : > { %12595 = vmatprep.mubr.msk.f32.mxu1 %vm289_vm2, %v3017_v50  ;;  %12615 = vmatprep.mubr.msk.f32.mxu0 %vm289_vm2, %v16917_v60  ;;  %v476_v46 = vadd.f32 %v12286_v55, %v265_v28  ;;  %v267_v60 = vld [vmem:[#allocation2 + $0x38] sm:$0xff] }
  0xf6   : > { %v422_v2 = vpop.f32.mrf.mxu0  ;;  %v14419_v6 = vpop.f32.mrf.mxu1 }
  0xf8   : > { %v12289_v23 = vpop.f32.mrf.mxu0  ;;  %v12303_v1 = vpop.f32.mrf.mxu1  ;;  %12596 = vmatmul.mubr.msk.f32.gmra.mxu1 %vm289_vm2, %v3018_v62  ;;  %12616 = vmatmul.mubr.msk.f32.gmra.mxu0 %vm289_vm2, %v3017_v50 }
  0xf9   : > { %v682_v11 = vadd.f32 %v12303_v1, %v472_v14  ;;  %12618 = vmatprep.mubr.msk.f32.mxu0 %vm289_vm2, %v3018_v62  ;;  %12623 = vmatprep.mubr.msk.f32.mxu1 %vm289_vm2, %v16918_v12  ;;  %v16921_v14 = vld [vmem:[#allocation21_spill] sm:$0xff]  ;;  %v266_v1 = vld [vmem:[#allocation2 + $0x30] sm:$0xff] }
  0xfa   : > { %v432_v20 = vpop.f32.mrf.mxu0  ;;  %v612_v22 = vpop.f32.mrf.mxu1 }
  0xfb   : > { %v681_v27 = vadd.f32 %v612_v22, %v471_v8 }
  0xfc   : > { %v12306_v31 = vpop.f32.mrf.mxu1  ;;  %v12326_v33 = vpop.f32.mrf.mxu0  ;;  %12619 = vmatmul.mubr.msk.f32.gmra.mxu0 %vm289_vm2, %v3228_v16  ;;  %12624 = vmatmul.mubr.msk.f32.vlgmr.msra.gmra.mxu1 %vm289_vm2, %v16919_v34  ;;  %v269_v16 = vld [vmem:[#allocation2 + $0x48] sm:$0xff] }
  0xfd   : > { %v684_v37 = vadd.f32 %v12306_v31, %v474_v25  ;;  %v14433_v39 = vadd.f32 %v12326_v33, %v682_v11  ;;  %12626 = vmatprep.mubr.msk.f32.mxu1 %vm289_vm2, %v16920_v40  ;;  %12646 = vmatprep.mubr.msk.f32.mxu0 %vm289_vm2, %v14008_v21  ;;  %v475_v21 = vadd.f32 %v422_v2, %v264_v41  ;;  %v271_v40 = vld [vmem:[#allocation2 + $0x58] sm:$0xff]  ;;  %v16925_v41 = vld [vmem:[#allocation25_spill] sm:$0xff] }
  0xfe   : > { %v622_v43 = vpop.f32.mrf.mxu1  ;;  %v822_v45 = vpop.f32.mrf.mxu0  ;;  %12668 = vmatpush3.msk.msra.mxu1 %vm332_vm1, %v14353_v30  ;;  %v477_v25 = vadd.f32 %v432_v20, %v266_v1  ;;  %v480_v34 = vadd.f32 %v14384_v38, %v269_v16  ;;  %v270_v38 = vld [vmem:[#allocation2 + $0x50] sm:$0xff]  ;;  %v14506_v16 = vld [vmem:[%s13598_s4 + $0x7d] sm:$0xff] }
  0xff   : > { %v683_v50 = vadd.f32 %v622_v43, %v473_v36  ;;  %v14441_v52 = vadd.f32 %v822_v45, %v681_v27  ;;  %12713 = vmatprep.subr.msk.mxu1 %vm332_vm1, %v14431_v35 }
 0x100   : > { %v12309_v62 = vpop.f32.mrf.mxu1  ;;  %v12329_v0 = vpop.f32.mrf.mxu0  ;;  %12627 = vmatmul.mubr.msk.f32.gmra.mxu1 %vm289_vm2, %v16921_v14  ;;  %12647 = vmatmul.mubr.msk.f32.vlgmr.msra.gmra.mxu0 %vm289_vm2, %v14015_v51  ;;  %v478_v51 = vadd.f32 %v12289_v23, %v267_v60  ;;  %v268_v23 = vld [vmem:[#allocation2 + $0x40] sm:$0xff] }
 0x101   : > { %v686_v30 = vadd.f32 %v12309_v62, %v476_v46  ;;  %v14452_v55 = vadd.f32 %v12329_v0, %v684_v37  ;;  %12691 = vmatpush3.msk.msra.mxu0 %vm332_vm1, %v14363_v32  ;;  %12629 = vmatprep.mubr.msk.f32.mxu1 %vm289_vm2, %v16922_v19  ;;  %v16923_v32 = vld [vmem:[#allocation23_spill] sm:$0xff]  ;;  %v479_v43 = vadd.f32 %v14394_v42, %v268_v23  ;;  %v16926_v46 = vld [vmem:[#allocation26_spill] sm:$0xff] }
 0x102   : > { %v632_v8 = vpop.f32.mrf.mxu1  ;;  %v832_v11 = vpop.f32.mrf.mxu0  ;;  %12649 = vmatprep.mubr.msk.f32.mxu0 %vm289_vm2, %v14030_v15  ;;  %12736 = vmatprep.subr.msk.mxu0 %vm332_vm1, %v14446_v47  ;;  %v16924_v15 = vld [vmem:[#allocation24_spill] sm:$0xff]  ;;  %v482_v62 = vadd.f32 %v14396_v44, %v271_v40  ;;  %v273_v42 = vld [vmem:[#allocation2 + $0x68] sm:$0xff] }
 0x103   : > { %v685_v2 = vadd.f32 %v632_v8, %v475_v21  ;;  %v14462_v12 = vadd.f32 %v832_v11, %v683_v50  ;;  %v16928_v8 = vld [vmem:[#allocation28_spill] sm:$0xff]  ;;  %v272_v11 = vld [vmem:[#allocation2 + $0x60] sm:$0xff] }
 0x104   : > { %v12312_v17 = vpop.f32.mrf.mxu1  ;;  %v12332_v22 = vpop.f32.mrf.mxu0  ;;  %12630 = vmatmul.mubr.msk.f32.gmra.mxu1 %vm289_vm2, %v16923_v32  ;;  %12650 = vmatmul.mubr.msk.f32.gmra.mxu0 %vm289_vm2, %v14036_v4  ;;  %v14503_v44 = vld [vmem:[%s13598_s4 + $0x75] sm:$0xff]  ;;  %v3648_v40 = vld [vmem:[%s13598_s4 + $0x86] sm:$0xff] }
 0x105   : > { %v688_v27 = vadd.f32 %v12312_v17, %v478_v51  ;;  %v14468_v28 = vadd.f32 %v12332_v22, %v686_v30  ;;  %12632 = vmatprep.mubr.msk.f32.mxu1 %vm289_vm2, %v16924_v15  ;;  %12652 = vmatprep.mubr.msk.f32.mxu0 %vm289_vm2, %v14050_v54  ;;  %v16927_v30 = vld [vmem:[#allocation27_spill] sm:$0xff] }
 0x106   : > { %v642_v31 = vpop.f32.mrf.mxu1  ;;  %v842_v33 = vpop.f32.mrf.mxu0 }
 0x107   : > { %v687_v36 = vadd.f32 %v642_v31, %v477_v25  ;;  %v14475_v37 = vadd.f32 %v842_v33, %v685_v2  ;;  %v3647_v31 = vld [vmem:[%s13598_s4 + $0x7e] sm:$0xff] }
 0x108   : > { %v12315_v4 = vpop.f32.mrf.mxu1  ;;  %v12335_v20 = vpop.f32.mrf.mxu0  ;;  %12633 = vmatmul.mubr.msk.f32.gmra.mxu1 %vm289_vm2, %v16925_v41  ;;  %12653 = vmatmul.mubr.msk.f32.gmra.mxu0 %vm289_vm2, %v14056_v63  ;;  %v4055_v41 = vld [vmem:[%s13598_s4 + $0x20] sm:$0xff] }
 0x109   : > { %v690_v54 = vadd.f32 %v12315_v4, %v480_v34  ;;  %v14482_v45 = vadd.f32 %v12335_v20, %v688_v27  ;;  %12635 = vmatprep.mubr.msk.f32.mxu1 %vm289_vm2, %v16926_v46  ;;  %12655 = vmatprep.mubr.msk.f32.mxu0 %vm289_vm2, %v14070_v59  ;;  %v481_v59 = vadd.f32 %v14406_v48, %v270_v38  ;;  %v14547_v38 = vld [vmem:[%s13603_s7 + $0x54] sm:$0xf] }
 0x10a   : > { %v652_v50 = vpop.f32.mrf.mxu1  ;;  %v852_v60 = vpop.f32.mrf.mxu0 }
 0x10b   : > { %v689_v0 = vadd.f32 %v652_v50, %v479_v43  ;;  %v14489_v63 = vadd.f32 %v852_v60, %v687_v36  ;;  %v16930_v60 = vld [vmem:[#allocation30_spill] sm:$0xff] }
 0x10c   : > { %v12318_v14 = vpop.f32.mrf.mxu1  ;;  %v12338_v21 = vpop.f32.mrf.mxu0  ;;  %12636 = vmatmul.mubr.msk.f32.gmra.mxu1 %vm289_vm2, %v16927_v30  ;;  %12656 = vmatmul.mubr.msk.f32.gmra.mxu0 %vm289_vm2, %v14076_v58  ;;  %v484_v58 = vadd.f32 %v14409_v57, %v273_v42  ;;  %v14523_v57 = vld [vmem:[%s13598_s4 + $0x85] sm:$0xff] }
 0x10d   : > { %v692_v19 = vadd.f32 %v12318_v14, %v482_v62  ;;  %v14496_v1 = vadd.f32 %v12338_v21, %v690_v54  ;;  %12638 = vmatprep.mubr.msk.f32.mxu1 %vm289_vm2, %v16928_v8  ;;  %12658 = vmatprep.mubr.msk.f32.mxu0 %vm289_vm2, %v14090_v24  ;;  %v483_v24 = vadd.f32 %v14419_v6, %v272_v11  ;;  %v14565_v21 = vld [vmem:[%s13603_s7 + $0x58] sm:$0xf] }
 0x10e   : > { %v662_v51 = vpop.f32.mrf.mxu1  ;;  %v862_v2 = vpop.f32.mrf.mxu0  ;;  %v4058_v11 = vld [vmem:[%s13598_s4 + $0x38] sm:$0xff] }
 0x10f   : > { %v691_v48 = vadd.f32 %v662_v51, %v481_v59  ;;  %v14509_v17 = vadd.f32 %v862_v2, %v689_v0 }
 0x110   : > { %v12321_v22 = vpop.f32.mrf.mxu1  ;;  %v12341_v32 = vpop.f32.mrf.mxu0  ;;  %12639 = vmatmul.mubr.msk.f32.gmra.mxu1 %vm289_vm2, %v14503_v44  ;;  %12659 = vmatmul.mubr.msk.f32.gmra.mxu0 %vm289_vm2, %v14093_v26 }
 0x111   : > { %v694_v25 = vadd.f32 %v12321_v22, %v484_v58  ;;  %v14516_v27 = vadd.f32 %v12341_v32, %v692_v19  ;;  %12641 = vmatprep.mubr.msk.f32.mxu1 %vm289_vm2, %v14506_v16  ;;  %12661 = vmatprep.mubr.msk.f32.mxu0 %vm289_vm2, %v14103_v61  ;;  %v16931_v19 = vld [vmem:[#allocation31_spill] sm:$0xff]  ;;  %v4059_v58 = vld [vmem:[%s13598_s4 + $0x40] sm:$0xff] }
 0x112   : > { %v672_v15 = vpop.f32.mrf.mxu1  ;;  %v872_v23 = vpop.f32.mrf.mxu0  ;;  %v16933_v32 = vld [vmem:[#allocation33_spill] sm:$0xff] }
 0x113   : > { %v693_v33 = vadd.f32 %v672_v15, %v483_v24  ;;  %v14526_v26 = vadd.f32 %v872_v23, %v691_v48  ;;  %v16934_v15 = vld [vmem:[#allocation34_spill] sm:$0xff] }
 0x114   : > { %v12344_v6 = vpop.f32.mrf.mxu0  ;;  %v12349_v34 = vpop.f32.mrf.mxu1  ;;  %12642 = vmatmul.mubr.msk.f32.gmra.mxu1 %vm289_vm2, %v14523_v57  ;;  %12662 = vmatmul.mubr.msk.f32.gmra.mxu0 %vm289_vm2, %v14187_v56 }
 0x115   : > { %v14532_v36 = vadd.f32 %v12344_v6, %v694_v25  ;;  %v1102_v61 = vadd.f32 %v12349_v34, %v14433_v39  ;;  %12664 = vmatprep.mubr.msk.f32.mxu0 %vm289_vm2, %v3647_v31  ;;  %12669 = vmatprep.mubr.msk.f32.mxu1 %vm289_vm2, %v14117_v49  ;;  %v16929_v39 = vld [vmem:[#allocation29_spill] sm:$0xff] }
 0x116   : > { %v882_v4 = vpop.f32.mrf.mxu0  ;;  %v1032_v20 = vpop.f32.mrf.mxu1 }
 0x117   : > { %v14540_v43 = vadd.f32 %v882_v4, %v693_v33  ;;  %v1101_v54 = vadd.f32 %v1032_v20, %v14441_v52  ;;  %v4056_v52 = vld [vmem:[%s13598_s4 + $0x28] sm:$0xff]  ;;  %v4061_v33 = vld [vmem:[%s13598_s4 + $0x50] sm:$0xff] }
 0x118   : > { %v12352_v56 = vpop.f32.mrf.mxu1  ;;  %v12372_v46 = vpop.f32.mrf.mxu0  ;;  %12665 = vmatmul.mubr.msk.f32.gmra.mxu0 %vm289_vm2, %v3648_v40  ;;  %12670 = vmatmul.mubr.msk.f32.vlgmr.msra.gmra.mxu1 %vm289_vm2, %v16929_v39 }
 0x119   : > { %v1104_v49 = vadd.f32 %v12352_v56, %v14452_v55  ;;  %v14550_v50 = vadd.f32 %v12372_v46, %v1102_v61  ;;  %12672 = vmatprep.mubr.msk.f32.mxu1 %vm289_vm2, %v16930_v60  ;;  %12692 = vmatprep.mubr.msk.f32.mxu0 %vm289_vm2, %v4055_v41  ;;  %v4057_v55 = vld [vmem:[%s13598_s4 + $0x30] sm:$0xff]  ;;  %v16936_v41 = vld [vmem:[#allocation36_spill] sm:$0xff]  ;;  %v4063_v46 = vld [vmem:[%s13598_s4 + $0x60] sm:$0xff] }
 0x11a   : > { %v1042_v62 = vpop.f32.mrf.mxu1  ;;  %v1242_v0 = vpop.f32.mrf.mxu0  ;;  %12714 = vmatpush3.msk.msra.mxu1 %vm332_vm1, %v14431_v35 }
 0x11b   : > { %v1103_v42 = vadd.f32 %v1042_v62, %v14462_v12  ;;  %v14559_v14 = vadd.f32 %v1242_v0, %v1101_v54  ;;  %12759 = vmatprep.subr.msk.mxu1 %vm332_vm1, %v14547_v38  ;;  %v16932_v12 = vld [vmem:[#allocation32_spill] sm:$0xff] }
 0x11c   : > { %v12355_v30 = vpop.f32.mrf.mxu1  ;;  %v12375_v59 = vpop.f32.mrf.mxu0  ;;  %12673 = vmatmul.mubr.msk.f32.gmra.mxu1 %vm289_vm2, %v16931_v19  ;;  %12693 = vmatmul.mubr.msk.f32.vlgmr.msra.gmra.mxu0 %vm289_vm2, %v4056_v52 }
 0x11d   : > { %v1106_v35 = vadd.f32 %v12355_v30, %v14468_v28  ;;  %v14571_v8 = vadd.f32 %v12375_v59, %v1104_v49  ;;  %12737 = vmatpush3.msk.msra.mxu0 %vm332_vm1, %v14446_v47  ;;  %12675 = vmatprep.mubr.msk.f32.mxu1 %vm289_vm2, %v16932_v12 }
 0x11e   : > { %v1052_v51 = vpop.f32.mrf.mxu1  ;;  %v1252_v2 = vpop.f32.mrf.mxu0  ;;  %12695 = vmatprep.mubr.msk.f32.mxu0 %vm289_vm2, %v4057_v55  ;;  %12782 = vmatprep.subr.msk.mxu0 %vm332_vm1, %v14565_v21  ;;  %v14624_v55 = vld [vmem:[%s13598_s4 + $0x7f] sm:$0xff] }
 0x11f   : > { %v1105_v28 = vadd.f32 %v1052_v51, %v14475_v37  ;;  %v14583_v48 = vadd.f32 %v1252_v2, %v1103_v42  ;;  %v4060_v37 = vld [vmem:[%s13598_s4 + $0x48] sm:$0xff] }
 0x120   : > { %v12358_v22 = vpop.f32.mrf.mxu1  ;;  %v12378_v47 = vpop.f32.mrf.mxu0  ;;  %12676 = vmatmul.mubr.msk.f32.gmra.mxu1 %vm289_vm2, %v16933_v32  ;;  %12696 = vmatmul.mubr.msk.f32.gmra.mxu0 %vm289_vm2, %v4058_v11  ;;  %v4067_v11 = vld [vmem:[%s13598_s4 + $0x80] sm:$0xff] }
 0x121   : > { %v1108_v24 = vadd.f32 %v12358_v22, %v14482_v45  ;;  %v14589_v25 = vadd.f32 %v12378_v47, %v1106_v35  ;;  %12678 = vmatprep.mubr.msk.f32.mxu1 %vm289_vm2, %v16934_v15  ;;  %12698 = vmatprep.mubr.msk.f32.mxu0 %vm289_vm2, %v4059_v58  ;;  %v16935_v45 = vld [vmem:[#allocation35_spill] sm:$0xff]  ;;  %v4475_v15 = vld [vmem:[%s13598_s4 + $0x22] sm:$0xff] }
 0x122   : > { %v1062_v23 = vpop.f32.mrf.mxu1  ;;  %v1262_v31 = vpop.f32.mrf.mxu0  ;;  %v4266_v22 = vld [vmem:[%s13598_s4 + $0x29] sm:$0xff] }
 0x123   : > { %v1107_v6 = vadd.f32 %v1062_v23, %v14489_v63  ;;  %v14597_v34 = vadd.f32 %v1262_v31, %v1105_v28  ;;  %v4062_v63 = vld [vmem:[%s13598_s4 + $0x58] sm:$0xff] }
 0x124   : > { %v12361_v61 = vpop.f32.mrf.mxu1  ;;  %v12381_v40 = vpop.f32.mrf.mxu0  ;;  %12679 = vmatmul.mubr.msk.f32.gmra.mxu1 %vm289_vm2, %v16935_v45  ;;  %12699 = vmatmul.mubr.msk.f32.gmra.mxu0 %vm289_vm2, %v4060_v37 }
 0x125   : > { %v1110_v4 = vadd.f32 %v12361_v61, %v14496_v1  ;;  %v14603_v20 = vadd.f32 %v12381_v40, %v1108_v24  ;;  %12681 = vmatprep.mubr.msk.f32.mxu1 %vm289_vm2, %v16936_v41  ;;  %12701 = vmatprep.mubr.msk.f32.mxu0 %vm289_vm2, %v4061_v33  ;;  %v4267_v24 = vld [vmem:[%s13598_s4 + $0x31] sm:$0xff]  ;;  %v4268_v61 = vld [vmem:[%s13598_s4 + $0x39] sm:$0xff] }
 0x126   : > { %v1072_v54 = vpop.f32.mrf.mxu1  ;;  %v1272_v56 = vpop.f32.mrf.mxu0 }
 0x127   : > { %v1109_v39 = vadd.f32 %v1072_v54, %v14509_v17  ;;  %v14611_v49 = vadd.f32 %v1272_v56, %v1107_v6  ;;  %v4064_v17 = vld [vmem:[%s13598_s4 + $0x68] sm:$0xff]  ;;  %v14689_v54 = vld [vmem:[%s13603_s7 + $0x60] sm:$0xf] }
 0x128   : > { %v12364_v60 = vpop.f32.mrf.mxu1  ;;  %v12384_v52 = vpop.f32.mrf.mxu0  ;;  %12682 = vmatmul.mubr.msk.f32.gmra.mxu1 %vm289_vm2, %v14190_v29  ;;  %12702 = vmatmul.mubr.msk.f32.gmra.mxu0 %vm289_vm2, %v4062_v63  ;;  %v14684_v63 = vld [vmem:[%s13598_s4 + $0x32] sm:$0xff] }
 0x129   : > { %v1112_v1 = vadd.f32 %v12364_v60, %v14516_v27  ;;  %v14617_v62 = vadd.f32 %v12384_v52, %v1110_v4  ;;  %12684 = vmatprep.mubr.msk.f32.mxu1 %vm289_vm2, %v14193_v7  ;;  %12704 = vmatprep.mubr.msk.f32.mxu0 %vm289_vm2, %v4063_v46  ;;  %v4269_v4 = vld [vmem:[%s13598_s4 + $0x41] sm:$0xff] }
 0x12a   : > { %v1082_v0 = vpop.f32.mrf.mxu1  ;;  %v1282_v42 = vpop.f32.mrf.mxu0  ;;  %v14702_v60 = vld [vmem:[%s13598_s4 + $0x3a] sm:$0xff] }
 0x12b   : > { %v1111_v29 = vadd.f32 %v1082_v0, %v14526_v26  ;;  %v14627_v30 = vadd.f32 %v1282_v42, %v1109_v39  ;;  %v14640_v26 = vld [vmem:[%s13598_s4 + $0x87] sm:$0xff] }
 0x12c   : > { %v12367_v27 = vpop.f32.mrf.mxu1  ;;  %v12387_v59 = vpop.f32.mrf.mxu0  ;;  %12685 = vmatmul.mubr.msk.f32.gmra.mxu1 %vm289_vm2, %v14204_v53  ;;  %12705 = vmatmul.mubr.msk.f32.gmra.mxu0 %vm289_vm2, %v4064_v17  ;;  %v4265_v53 = vld [vmem:[%s13598_s4 + $0x21] sm:$0xff]  ;;  %v4270_v39 = vld [vmem:[%s13598_s4 + $0x49] sm:$0xff]  ;;  %v4271_v17 = vld [vmem:[%s13598_s4 + $0x51] sm:$0xff] }
 0x12d   : > { %v1114_v7 = vadd.f32 %v12367_v27, %v14532_v36  ;;  %v14633_v19 = vadd.f32 %v12387_v59, %v1112_v1  ;;  %12687 = vmatprep.mubr.msk.f32.mxu1 %vm289_vm2, %v14624_v55  ;;  %12707 = vmatprep.mubr.msk.f32.mxu0 %vm289_vm2, %v14253_v3  ;;  %v14708_v0 = vld [vmem:[%s13598_s4 + $0x42] sm:$0xff] }
 0x12e   : > { %v1092_v35 = vpop.f32.mrf.mxu1  ;;  %v1292_v12 = vpop.f32.mrf.mxu0 }
 0x12f   : > { %v1113_v36 = vadd.f32 %v1092_v35, %v14540_v43  ;;  %v14645_v51 = vadd.f32 %v1292_v12, %v1111_v29  ;;  %v4068_v43 = vld [vmem:[%s13598_s4 + $0x88] sm:$0xff] }
 0x130   : > { %v12390_v2 = vpop.f32.mrf.mxu0  ;;  %v12395_v58 = vpop.f32.mrf.mxu1  ;;  %12688 = vmatmul.mubr.msk.f32.gmra.mxu1 %vm289_vm2, %v14640_v26  ;;  %12708 = vmatmul.mubr.msk.f32.gmra.mxu0 %vm289_vm2, %v14264_v5 }
 0x131   : > { %v14651_v3 = vadd.f32 %v12390_v2, %v1114_v7  ;;  %v1522_v28 = vadd.f32 %v12395_v58, %v14550_v50  ;;  %12710 = vmatprep.mubr.msk.f32.mxu0 %vm289_vm2, %v4067_v11  ;;  %12715 = vmatprep.mubr.msk.f32.mxu1 %vm289_vm2, %v4265_v53  ;;  %v14666_v50 = vld [vmem:[%s13603_s7 + $0x5c] sm:$0xf]  ;;  %v4273_v11 = vld [vmem:[%s13598_s4 + $0x61] sm:$0xff]  ;;  %v14730_v53 = vld [vmem:[%s13598_s4 + $0x52] sm:$0xff] }
 0x132   : > { %v1302_v47 = vpop.f32.mrf.mxu0  ;;  %v1452_v32 = vpop.f32.mrf.mxu1  ;;  %v4272_v7 = vld [vmem:[%s13598_s4 + $0x59] sm:$0xff] }
 0x133   : > { %v14660_v37 = vadd.f32 %v1302_v47, %v1113_v36  ;;  %v1521_v5 = vadd.f32 %v1452_v32, %v14559_v14  ;;  %v14675_v14 = vld [vmem:[%s13598_s4 + $0x2a] sm:$0xff] }
 0x134   : > { %v12398_v23 = vpop.f32.mrf.mxu1  ;;  %v12418_v31 = vpop.f32.mrf.mxu0  ;;  %12711 = vmatmul.mubr.msk.f32.gmra.mxu0 %vm289_vm2, %v4068_v43  ;;  %12716 = vmatmul.mubr.msk.f32.vlgmr.msra.gmra.mxu1 %vm289_vm2, %v4266_v22  ;;  %v14746_v22 = vld [vmem:[%s13598_s4 + $0x5a] sm:$0xff] }
 0x135   : > { %v1524_v33 = vadd.f32 %v12398_v23, %v14571_v8  ;;  %v14669_v6 = vadd.f32 %v12418_v31, %v1522_v28  ;;  %12718 = vmatprep.mubr.msk.f32.mxu1 %vm289_vm2, %v4267_v24  ;;  %12738 = vmatprep.mubr.msk.f32.mxu0 %vm289_vm2, %v4475_v15  ;;  %v14749_v24 = vld [vmem:[%s13598_s4 + $0x62] sm:$0xff] }
 0x136   : > { %v1462_v40 = vpop.f32.mrf.mxu1  ;;  %v1662_v45 = vpop.f32.mrf.mxu0  ;;  %12760 = vmatpush3.msk.msra.mxu1 %vm332_vm1, %v14547_v38 }
 0x137   : > { %v1523_v41 = vadd.f32 %v1462_v40, %v14583_v48  ;;  %v14681_v8 = vadd.f32 %v1662_v45, %v1521_v5  ;;  %12805 = vmatprep.subr.msk.mxu1 %vm332_vm1, %v14666_v50  ;;  %v4277_v45 = vld [vmem:[%s13598_s4 + $0x81] sm:$0xff] }
 0x138   : > { %v12401_v56 = vpop.f32.mrf.mxu1  ;;  %v12421_v46 = vpop.f32.mrf.mxu0  ;;  %12719 = vmatmul.mubr.msk.f32.gmra.mxu1 %vm289_vm2, %v4268_v61  ;;  %12739 = vmatmul.mubr.msk.f32.vlgmr.msra.gmra.mxu0 %vm289_vm2, %v14675_v14 }
 0x139   : > { %v1526_v38 = vadd.f32 %v12401_v56, %v14589_v25  ;;  %v14695_v48 = vadd.f32 %v12421_v46, %v1524_v33  ;;  %12783 = vmatpush3.msk.msra.mxu0 %vm332_vm1, %v14565_v21  ;;  %12721 = vmatprep.mubr.msk.f32.mxu1 %vm289_vm2, %v4269_v4 }
 0x13a   : > { %v1472_v52 = vpop.f32.mrf.mxu1  ;;  %v1672_v1 = vpop.f32.mrf.mxu0  ;;  %12741 = vmatprep.mubr.msk.f32.mxu0 %vm289_vm2, %v14684_v63  ;;  %12828 = vmatprep.subr.msk.mxu0 %vm332_vm1, %v14689_v54 }
 0x13b   : > { %v1525_v21 = vadd.f32 %v1472_v52, %v14597_v34  ;;  %v14713_v25 = vadd.f32 %v1672_v1, %v1523_v41  ;;  %v14726_v34 = vld [vmem:[%s13598_s4 + $0x4a] sm:$0xff]  ;;  %v14783_v52 = vld [vmem:[%s13598_s4 + $0x82] sm:$0xff] }
 0x13c   : > { %v12404_v42 = vpop.f32.mrf.mxu1  ;;  %v12424_v29 = vpop.f32.mrf.mxu0  ;;  %12722 = vmatmul.mubr.msk.f32.gmra.mxu1 %vm289_vm2, %v4270_v39  ;;  %12742 = vmatmul.mubr.msk.f32.gmra.mxu0 %vm289_vm2, %v14702_v60 }
 0x13d   : > { %v1528_v27 = vadd.f32 %v12404_v42, %v14603_v20  ;;  %v14719_v59 = vadd.f32 %v12424_v29, %v1526_v38  ;;  %12724 = vmatprep.mubr.msk.f32.mxu1 %vm289_vm2, %v4271_v17  ;;  %12744 = vmatprep.mubr.msk.f32.mxu0 %vm289_vm2, %v14708_v0 }
 0x13e   : > { %v1482_v35 = vpop.f32.mrf.mxu1  ;;  %v1682_v12 = vpop.f32.mrf.mxu0 }
 0x13f   : > { %v1527_v20 = vadd.f32 %v1482_v35, %v14611_v49  ;;  %v14733_v36 = vadd.f32 %v1682_v12, %v1525_v21  ;;  %v4274_v49 = vld [vmem:[%s13598_s4 + $0x69] sm:$0xff] }
 0x140   : > { %v12407_v2 = vpop.f32.mrf.mxu1  ;;  %v12427_v58 = vpop.f32.mrf.mxu0  ;;  %12725 = vmatmul.mubr.msk.f32.gmra.mxu1 %vm289_vm2, %v4272_v7  ;;  %12745 = vmatmul.mubr.msk.f32.gmra.mxu0 %vm289_vm2, %v14726_v34 }
 0x141   : > { %v1530_v28 = vadd.f32 %v12407_v2, %v14617_v62  ;;  %v14739_v43 = vadd.f32 %v12427_v58, %v1528_v27  ;;  %12727 = vmatprep.mubr.msk.f32.mxu1 %vm289_vm2, %v4273_v11  ;;  %12747 = vmatprep.mubr.msk.f32.mxu0 %vm289_vm2, %v14730_v53  ;;  %v4895_v27 = vld [vmem:[%s13598_s4 + $0x2b] sm:$0xff] }
 0x142   : > { %v1492_v47 = vpop.f32.mrf.mxu1  ;;  %v1692_v32 = vpop.f32.mrf.mxu0 }
 0x143   : > { %v1529_v15 = vadd.f32 %v1492_v47, %v14627_v30  ;;  %v14752_v5 = vadd.f32 %v1692_v32, %v1527_v20  ;;  %v14765_v30 = vld [vmem:[%s13598_s4 + $0x6a] sm:$0xff] }
 0x144   : > { %v12410_v62 = vpop.f32.mrf.mxu1  ;;  %v12430_v23 = vpop.f32.mrf.mxu0  ;;  %12728 = vmatmul.mubr.msk.f32.gmra.mxu1 %vm289_vm2, %v4274_v49  ;;  %12748 = vmatmul.mubr.msk.f32.gmra.mxu0 %vm289_vm2, %v14746_v22 }
 0x145   : > { %v1532_v31 = vadd.f32 %v12410_v62, %v14633_v19  ;;  %v14758_v33 = vadd.f32 %v12430_v23, %v1530_v28  ;;  %12730 = vmatprep.mubr.msk.f32.mxu1 %vm289_vm2, %v14267_v9  ;;  %12750 = vmatprep.mubr.msk.f32.mxu0 %vm289_vm2, %v14749_v24  ;;  %v14828_v28 = vld [vmem:[%s13603_s7 + $0x68] sm:$0xf] }
 0x146   : > { %v1502_v61 = vpop.f32.mrf.mxu1  ;;  %v1702_v40 = vpop.f32.mrf.mxu0 }
 0x147   : > { %v1531_v4 = vadd.f32 %v1502_v61, %v14645_v51  ;;  %v14769_v41 = vadd.f32 %v1702_v40, %v1529_v15  ;;  %v4278_v51 = vld [vmem:[%s13598_s4 + $0x89] sm:$0xff] }
 0x148   : > { %v12413_v19 = vpop.f32.mrf.mxu1  ;;  %v12433_v56 = vpop.f32.mrf.mxu0  ;;  %12731 = vmatmul.mubr.msk.f32.gmra.mxu1 %vm289_vm2, %v14278_v10  ;;  %12751 = vmatmul.mubr.msk.f32.gmra.mxu0 %vm289_vm2, %v14765_v30 }
 0x149   : > { %v1534_v9 = vadd.f32 %v12413_v19, %v14651_v3  ;;  %v14776_v46 = vadd.f32 %v12433_v56, %v1532_v31  ;;  %12733 = vmatprep.mubr.msk.f32.mxu1 %vm289_vm2, %v4277_v45  ;;  %12753 = vmatprep.mubr.msk.f32.mxu0 %vm289_vm2, %v14327_v13  ;;  %v4901_v45 = vld [vmem:[%s13598_s4 + $0x5b] sm:$0xff] }
 0x14a   : > { %v1512_v38 = vpop.f32.mrf.mxu1  ;;  %v1712_v39 = vpop.f32.mrf.mxu0 }
 0x14b   : > { %v1533_v10 = vadd.f32 %v1512_v38, %v14660_v37  ;;  %v14786_v1 = vadd.f32 %v1712_v39, %v1531_v4  ;;  %v14799_v37 = vld [vmem:[%s13598_s4 + $0x8a] sm:$0xff]  ;;  %v14876_v39 = vld [vmem:[%s13598_s4 + $0x7a] sm:$0xff] }
 0x14c   : > { %v12436_v17 = vpop.f32.mrf.mxu0  ;;  %v12441_v3 = vpop.f32.mrf.mxu1  ;;  %12734 = vmatmul.mubr.msk.f32.gmra.mxu1 %vm289_vm2, %v4278_v51  ;;  %12754 = vmatmul.mubr.msk.f32.gmra.mxu0 %vm289_vm2, %v14338_v18 }
 0x14d   : > { %v14791_v21 = vadd.f32 %v12436_v17, %v1534_v9  ;;  %v1942_v13 = vadd.f32 %v12441_v3, %v14669_v6  ;;  %12756 = vmatprep.mubr.msk.f32.mxu0 %vm289_vm2, %v14783_v52  ;;  %12761 = vmatprep.mubr.msk.f32.mxu1 %vm289_vm2, %v14675_v14  ;;  %v14810_v6 = vld [vmem:[%s13603_s7 + $0x64] sm:$0xf]  ;;  %v14872_v9 = vld [vmem:[%s13598_s4 + $0x72] sm:$0xff] }
 0x14e   : > { %v1722_v42 = vpop.f32.mrf.mxu0  ;;  %v1872_v29 = vpop.f32.mrf.mxu1 }
 0x14f   : > { %v14802_v7 = vadd.f32 %v1722_v42, %v1533_v10  ;;  %v1941_v18 = vadd.f32 %v1872_v29, %v14681_v8  ;;  %v4896_v8 = vld [vmem:[%s13598_s4 + $0x33] sm:$0xff] }
 0x150   : > { %v12444_v35 = vpop.f32.mrf.mxu1  ;;  %v12464_v12 = vpop.f32.mrf.mxu0  ;;  %12757 = vmatmul.mubr.msk.f32.gmra.mxu0 %vm289_vm2, %v14799_v37  ;;  %12762 = vmatmul.mubr.msk.f32.vlgmr.msra.gmra.mxu1 %vm289_vm2, %v14684_v63 }
 0x151   : > { %v1944_v14 = vadd.f32 %v12444_v35, %v14695_v48  ;;  %v14813_v11 = vadd.f32 %v12464_v12, %v1942_v13  ;;  %12764 = vmatprep.mubr.msk.f32.mxu1 %vm289_vm2, %v14702_v60  ;;  %12784 = vmatprep.mubr.msk.f32.mxu0 %vm289_vm2, %v4895_v27  ;;  %v4897_v48 = vld [vmem:[%s13598_s4 + $0x3b] sm:$0xff] }
 0x152   : > { %v1882_v20 = vpop.f32.mrf.mxu1  ;;  %v2082_v2 = vpop.f32.mrf.mxu0  ;;  %12806 = vmatpush3.msk.msra.mxu1 %vm332_vm1, %v14666_v50  ;;  %v4905_v27 = vld [vmem:[%s13598_s4 + $0x7b] sm:$0xff] }
 0x153   : > { %v1943_v63 = vadd.f32 %v1882_v20, %v14713_v25  ;;  %v14822_v58 = vadd.f32 %v2082_v2, %v1941_v18  ;;  %12851 = vmatprep.subr.msk.mxu1 %vm332_vm1, %v14810_v6  ;;  %v4898_v25 = vld [vmem:[%s13598_s4 + $0x43] sm:$0xff]  ;;  %v14906_v20 = vld [vmem:[%s13598_s4 + $0x92] sm:$0xff] }
 0x154   : > { %v12447_v60 = vpop.f32.mrf.mxu1  ;;  %v12467_v49 = vpop.f32.mrf.mxu0  ;;  %12765 = vmatmul.mubr.msk.f32.gmra.mxu1 %vm289_vm2, %v14708_v0  ;;  %12785 = vmatmul.mubr.msk.f32.vlgmr.msra.gmra.mxu0 %vm289_vm2, %v4896_v8  ;;  %v4899_v0 = vld [vmem:[%s13598_s4 + $0x4b] sm:$0xff] }
 0x155   : > { %v1946_v50 = vadd.f32 %v12447_v60, %v14719_v59  ;;  %v14834_v47 = vadd.f32 %v12467_v49, %v1944_v14  ;;  %12829 = vmatpush3.msk.msra.mxu0 %vm332_vm1, %v14689_v54  ;;  %12767 = vmatprep.mubr.msk.f32.mxu1 %vm289_vm2, %v14726_v34 }
 0x156   : > { %v1892_v32 = vpop.f32.mrf.mxu1  ;;  %v2092_v15 = vpop.f32.mrf.mxu0  ;;  %12787 = vmatprep.mubr.msk.f32.mxu0 %vm289_vm2, %v4897_v48  ;;  %12874 = vmatprep.subr.msk.mxu0 %vm332_vm1, %v14828_v28  ;;  %v4907_v48 = vld [vmem:[%s13598_s4 + $0x8b] sm:$0xff] }
 0x157   : > { %v1945_v59 = vadd.f32 %v1892_v32, %v14733_v36  ;;  %v14846_v62 = vadd.f32 %v2092_v15, %v1943_v63  ;;  %v4900_v36 = vld [vmem:[%s13598_s4 + $0x53] sm:$0xff] }
 0x158   : > { %v12450_v23 = vpop.f32.mrf.mxu1  ;;  %v12470_v54 = vpop.f32.mrf.mxu0  ;;  %12768 = vmatmul.mubr.msk.f32.gmra.mxu1 %vm289_vm2, %v14730_v53  ;;  %12788 = vmatmul.mubr.msk.f32.gmra.mxu0 %vm289_vm2, %v4898_v25  ;;  %v4908_v32 = vld [vmem:[%s13598_s4 + $0x93] sm:$0xff] }
 0x159   : > { %v1948_v34 = vadd.f32 %v12450_v23, %v14739_v43  ;;  %v14852_v31 = vadd.f32 %v12470_v54, %v1946_v50  ;;  %12770 = vmatprep.mubr.msk.f32.mxu1 %vm289_vm2, %v14746_v22  ;;  %12790 = vmatprep.mubr.msk.f32.mxu0 %vm289_vm2, %v4899_v0  ;;  %v5315_v23 = vld [vmem:[%s13598_s4 + $0x2d] sm:$0xff] }
 0x15a   : > { %v1902_v61 = vpop.f32.mrf.mxu1  ;;  %v2102_v40 = vpop.f32.mrf.mxu0 }
 0x15b   : > { %v1947_v53 = vadd.f32 %v1902_v61, %v14752_v5  ;;  %v14860_v4 = vadd.f32 %v2102_v40, %v1945_v59  ;;  %v4902_v5 = vld [vmem:[%s13598_s4 + $0x63] sm:$0xff]  ;;  %v14934_v61 = vld [vmem:[%s13603_s7 + $0x6c] sm:$0xf] }
 0x15c   : > { %v12453_v43 = vpop.f32.mrf.mxu1  ;;  %v12473_v19 = vpop.f32.mrf.mxu0  ;;  %12771 = vmatmul.mubr.msk.f32.gmra.mxu1 %vm289_vm2, %v14749_v24  ;;  %12791 = vmatmul.mubr.msk.f32.gmra.mxu0 %vm289_vm2, %v4900_v36  ;;  %v4903_v24 = vld [vmem:[%s13598_s4 + $0x6b] sm:$0xff]  ;;  %v14925_v59 = vld [vmem:[%s13598_s4 + $0x3c] sm:$0xff] }
 0x15d   : > { %v1950_v22 = vadd.f32 %v12453_v43, %v14758_v33  ;;  %v14866_v56 = vadd.f32 %v12473_v19, %v1948_v34  ;;  %12773 = vmatprep.mubr.msk.f32.mxu1 %vm289_vm2, %v14765_v30  ;;  %12793 = vmatprep.mubr.msk.f32.mxu0 %vm289_vm2, %v4901_v45 }
 0x15e   : > { %v1912_v51 = vpop.f32.mrf.mxu1  ;;  %v2112_v38 = vpop.f32.mrf.mxu0 }
 0x15f   : > { %v1949_v10 = vadd.f32 %v1912_v51, %v14769_v41  ;;  %v14880_v33 = vadd.f32 %v2112_v38, %v1947_v53  ;;  %v4904_v41 = vld [vmem:[%s13598_s4 + $0x73] sm:$0xff]  ;;  %v5317_v51 = vld [vmem:[%s13598_s4 + $0x3d] sm:$0xff] }
 0x160   : > { %v12456_v17 = vpop.f32.mrf.mxu1  ;;  %v12476_v3 = vpop.f32.mrf.mxu0  ;;  %12774 = vmatmul.mubr.msk.f32.gmra.mxu1 %vm289_vm2, %v14872_v9  ;;  %12794 = vmatmul.mubr.msk.f32.gmra.mxu0 %vm289_vm2, %v4902_v5  ;;  %v5316_v53 = vld [vmem:[%s13598_s4 + $0x35] sm:$0xff]  ;;  %v14958_v38 = vld [vmem:[%s13603_s7 + $0x70] sm:$0xf] }
 0x161   : > { %v1952_v30 = vadd.f32 %v12456_v17, %v14776_v46  ;;  %v14886_v13 = vadd.f32 %v12476_v3, %v1950_v22  ;;  %12776 = vmatprep.mubr.msk.f32.mxu1 %vm289_vm2, %v14876_v39  ;;  %12796 = vmatprep.mubr.msk.f32.mxu0 %vm289_vm2, %v4903_v24  ;;  %v14949_v22 = vld [vmem:[%s13598_s4 + $0x4c] sm:$0xff]  ;;  %v14971_v17 = vld [vmem:[%s13598_s4 + $0x54] sm:$0xff] }
 0x162   : > { %v1922_v42 = vpop.f32.mrf.mxu1  ;;  %v2122_v29 = vpop.f32.mrf.mxu0  ;;  %v5318_v3 = vld [vmem:[%s13598_s4 + $0x45] sm:$0xff] }
 0x163   : > { %v1951_v18 = vadd.f32 %v1922_v42, %v14786_v1  ;;  %v14894_v35 = vadd.f32 %v2122_v29, %v1949_v10  ;;  %v4906_v1 = vld [vmem:[%s13598_s4 + $0x83] sm:$0xff] }
 0x164   : > { %v12459_v46 = vpop.f32.mrf.mxu1  ;;  %v12479_v12 = vpop.f32.mrf.mxu0  ;;  %12777 = vmatmul.mubr.msk.f32.gmra.mxu1 %vm289_vm2, %v14783_v52  ;;  %12797 = vmatmul.mubr.msk.f32.gmra.mxu0 %vm289_vm2, %v4904_v41  ;;  %v5105_v52 = vld [vmem:[%s13598_s4 + $0x2c] sm:$0xff]  ;;  %v14976_v42 = vld [vmem:[%s13598_s4 + $0x5c] sm:$0xff] }
 0x165   : > { %v1954_v14 = vadd.f32 %v12459_v46, %v14791_v21  ;;  %v14900_v8 = vadd.f32 %v12479_v12, %v1952_v30  ;;  %12779 = vmatprep.mubr.msk.f32.mxu1 %vm289_vm2, %v14799_v37  ;;  %12799 = vmatprep.mubr.msk.f32.mxu0 %vm289_vm2, %v4905_v27 }
 0x166   : > { %v1932_v2 = vpop.f32.mrf.mxu1  ;;  %v2132_v63 = vpop.f32.mrf.mxu0 }
 0x167   : > { %v1953_v21 = vadd.f32 %v1932_v2, %v14802_v7  ;;  %v14912_v60 = vadd.f32 %v2132_v63, %v1951_v18  ;;  %v5106_v7 = vld [vmem:[%s13598_s4 + $0x34] sm:$0xff]  ;;  %v14998_v63 = vld [vmem:[%s13598_s4 + $0x6c] sm:$0xff] }
 0x168   : > { %v12482_v49 = vpop.f32.mrf.mxu0  ;;  %v12487_v50 = vpop.f32.mrf.mxu1  ;;  %12780 = vmatmul.mubr.msk.f32.gmra.mxu1 %vm289_vm2, %v14906_v20  ;;  %12800 = vmatmul.mubr.msk.f32.gmra.mxu0 %vm289_vm2, %v4906_v1 }
 0x169   : > { %v14917_v37 = vadd.f32 %v12482_v49, %v1954_v14  ;;  %v2362_v25 = vadd.f32 %v12487_v50, %v14813_v11  ;;  %12802 = vmatprep.mubr.msk.f32.mxu0 %vm289_vm2, %v4907_v48  ;;  %12807 = vmatprep.mubr.msk.f32.mxu1 %vm289_vm2, %v5105_v52  ;;  %v14994_v14 = vld [vmem:[%s13598_s4 + $0x64] sm:$0xff] }
 0x16a   : > { %v2142_v15 = vpop.f32.mrf.mxu0  ;;  %v2292_v0 = vpop.f32.mrf.mxu1  ;;  %v5321_v48 = vld [vmem:[%s13598_s4 + $0x5d] sm:$0xff] }
 0x16b   : > { %v14928_v54 = vadd.f32 %v2142_v15, %v1953_v21  ;;  %v2361_v34 = vadd.f32 %v2292_v0, %v14822_v58  ;;  %v14943_v58 = vld [vmem:[%s13598_s4 + $0x44] sm:$0xff]  ;;  %v15018_v0 = vld [vmem:[%s13598_s4 + $0x7c] sm:$0xff] }
 0x16c   : > { %v12490_v36 = vpop.f32.mrf.mxu1  ;;  %v12510_v11 = vpop.f32.mrf.mxu0  ;;  %12803 = vmatmul.mubr.msk.f32.gmra.mxu0 %vm289_vm2, %v4908_v32  ;;  %12808 = vmatmul.mubr.msk.f32.vlgmr.msra.gmra.mxu1 %vm289_vm2, %v5106_v7  ;;  %v15014_v32 = vld [vmem:[%s13598_s4 + $0x74] sm:$0xff] }
 0x16d   : > { %v2364_v40 = vadd.f32 %v12490_v36, %v14834_v47  ;;  %v14937_v45 = vadd.f32 %v12510_v11, %v2362_v25  ;;  %12810 = vmatprep.mubr.msk.f32.mxu1 %vm289_vm2, %v14925_v59  ;;  %12830 = vmatprep.mubr.msk.f32.mxu0 %vm289_vm2, %v5315_v23  ;;  %v5323_v23 = vld [vmem:[%s13598_s4 + $0x6d] sm:$0xff] }
 0x16e   : > { %v2302_v43 = vpop.f32.mrf.mxu1  ;;  %v2502_v19 = vpop.f32.mrf.mxu0  ;;  %12852 = vmatpush3.msk.msra.mxu1 %vm332_vm1, %v14810_v6 }
 0x16f   : > { %v2363_v47 = vadd.f32 %v2302_v43, %v14846_v62  ;;  %v14952_v5 = vadd.f32 %v2502_v19, %v2361_v34  ;;  %12897 = vmatprep.subr.msk.mxu1 %vm332_vm1, %v14934_v61 }
 0x170   : > { %v12493_v24 = vpop.f32.mrf.mxu1  ;;  %v12513_v10 = vpop.f32.mrf.mxu0  ;;  %12811 = vmatmul.mubr.msk.f32.gmra.mxu1 %vm289_vm2, %v14943_v58  ;;  %12831 = vmatmul.mubr.msk.f32.vlgmr.msra.gmra.mxu0 %vm289_vm2, %v5316_v53 }
 0x171   : > { %v2366_v6 = vadd.f32 %v12493_v24, %v14852_v31  ;;  %v14964_v62 = vadd.f32 %v12513_v10, %v2364_v40  ;;  %12875 = vmatpush3.msk.msra.mxu0 %vm332_vm1, %v14828_v28  ;;  %12813 = vmatprep.mubr.msk.f32.mxu1 %vm289_vm2, %v14949_v22  ;;  %v5319_v31 = vld [vmem:[%s13598_s4 + $0x4d] sm:$0xff] }
 0x172   : > { %v2312_v30 = vpop.f32.mrf.mxu1  ;;  %v2512_v41 = vpop.f32.mrf.mxu0  ;;  %12833 = vmatprep.mubr.msk.f32.mxu0 %vm289_vm2, %v5317_v51  ;;  %12920 = vmatprep.subr.msk.mxu0 %vm332_vm1, %v14958_v38 }
 0x173   : > { %v2365_v28 = vadd.f32 %v2312_v30, %v14860_v4  ;;  %v14982_v29 = vadd.f32 %v2512_v41, %v2363_v47  ;;  %v5320_v4 = vld [vmem:[%s13598_s4 + $0x55] sm:$0xff]  ;;  %v15037_v47 = vld [vmem:[%s13598_s4 + $0x8c] sm:$0xff] }
 0x174   : > { %v12496_v27 = vpop.f32.mrf.mxu1  ;;  %v12516_v18 = vpop.f32.mrf.mxu0  ;;  %12814 = vmatmul.mubr.msk.f32.gmra.mxu1 %vm289_vm2, %v14971_v17  ;;  %12834 = vmatmul.mubr.msk.f32.gmra.mxu0 %vm289_vm2, %v5318_v3 }
 0x175   : > { %v2368_v46 = vadd.f32 %v12496_v27, %v14866_v56  ;;  %v14988_v12 = vadd.f32 %v12516_v18, %v2366_v6  ;;  %12816 = vmatprep.mubr.msk.f32.mxu1 %vm289_vm2, %v14976_v42  ;;  %12836 = vmatprep.mubr.msk.f32.mxu0 %vm289_vm2, %v5319_v31  ;;  %v5327_v31 = vld [vmem:[%s13598_s4 + $0x8d] sm:$0xff] }
 0x176   : > { %v2322_v1 = vpop.f32.mrf.mxu1  ;;  %v2522_v2 = vpop.f32.mrf.mxu0 }
 0x177   : > { %v2367_v56 = vadd.f32 %v2322_v1, %v14880_v33  ;;  %v15002_v52 = vadd.f32 %v2522_v2, %v2365_v28  ;;  %v5322_v33 = vld [vmem:[%s13598_s4 + $0x65] sm:$0xff]  ;;  %v5525_v28 = vld [vmem:[%s13598_s4 + $0x2e] sm:$0xff] }
 0x178   : > { %v12499_v21 = vpop.f32.mrf.mxu1  ;;  %v12519_v49 = vpop.f32.mrf.mxu0  ;;  %12817 = vmatmul.mubr.msk.f32.gmra.mxu1 %vm289_vm2, %v14994_v14  ;;  %12837 = vmatmul.mubr.msk.f32.gmra.mxu0 %vm289_vm2, %v5320_v4  ;;  %v5526_v4 = vld [vmem:[%s13598_s4 + $0x36] sm:$0xff] }
 0x179   : > { %v2370_v50 = vadd.f32 %v12499_v21, %v14886_v13  ;;  %v15008_v25 = vadd.f32 %v12519_v49, %v2368_v46  ;;  %12819 = vmatprep.mubr.msk.f32.mxu1 %vm289_vm2, %v14998_v63  ;;  %12839 = vmatprep.mubr.msk.f32.mxu0 %vm289_vm2, %v5321_v48  ;;  %v15073_v48 = vld [vmem:[%s13598_s4 + $0x3e] sm:$0xff] }
 0x17a   : > { %v2332_v7 = vpop.f32.mrf.mxu1  ;;  %v2532_v15 = vpop.f32.mrf.mxu0 }
 0x17b   : > { %v2369_v34 = vadd.f32 %v2332_v7, %v14894_v35  ;;  %v15022_v13 = vadd.f32 %v2532_v15, %v2367_v56  ;;  %v15034_v35 = vld [vmem:[%s13598_s4 + $0x84] sm:$0xff]  ;;  %v5735_v56 = vld [vmem:[%s13598_s4 + $0x2f] sm:$0xff]  ;;  %v5736_v15 = vld [vmem:[%s13598_s4 + $0x37] sm:$0xff] }
 0x17c   : > { %v12502_v36 = vpop.f32.mrf.mxu1  ;;  %v12522_v11 = vpop.f32.mrf.mxu0  ;;  %12820 = vmatmul.mubr.msk.f32.gmra.mxu1 %vm289_vm2, %v15014_v32  ;;  %12840 = vmatmul.mubr.msk.f32.gmra.mxu0 %vm289_vm2, %v5322_v33 }
 0x17d   : > { %v2372_v40 = vadd.f32 %v12502_v36, %v14900_v8  ;;  %v15028_v53 = vadd.f32 %v12522_v11, %v2370_v50  ;;  %12822 = vmatprep.mubr.msk.f32.mxu1 %vm289_vm2, %v15018_v0  ;;  %12842 = vmatprep.mubr.msk.f32.mxu0 %vm289_vm2, %v5323_v23  ;;  %v15082_v50 = vld [vmem:[%s13603_s7 + $0x74] sm:$0xf] }
 0x17e   : > { %v2342_v43 = vpop.f32.mrf.mxu1  ;;  %v2542_v19 = vpop.f32.mrf.mxu0  ;;  %v15097_v36 = vld [vmem:[%s13598_s4 + $0x4e] sm:$0xff] }
 0x17f   : > { %v2371_v51 = vadd.f32 %v2342_v43, %v14912_v60  ;;  %v15040_v24 = vadd.f32 %v2542_v19, %v2369_v34  ;;  %v15054_v60 = vld [vmem:[%s13598_s4 + $0x94] sm:$0xff] }
 0x180   : > { %v12505_v8 = vpop.f32.mrf.mxu1  ;;  %v12525_v10 = vpop.f32.mrf.mxu0  ;;  %12823 = vmatmul.mubr.msk.f32.gmra.mxu1 %vm289_vm2, %v15034_v35  ;;  %12843 = vmatmul.mubr.msk.f32.gmra.mxu0 %vm289_vm2, %v14503_v44  ;;  %v15106_v43 = vld [vmem:[%s13603_s7 + $0x78] sm:$0xf] }
 0x181   : > { %v2374_v6 = vadd.f32 %v12505_v8, %v14917_v37  ;;  %v15047_v3 = vadd.f32 %v12525_v10, %v2372_v40  ;;  %12825 = vmatprep.mubr.msk.f32.mxu1 %vm289_vm2, %v15037_v47  ;;  %12845 = vmatprep.mubr.msk.f32.mxu0 %vm289_vm2, %v14506_v16  ;;  %v5737_v40 = vld [vmem:[%s13598_s4 + $0x3f] sm:$0xff]  ;;  %v15119_v8 = vld [vmem:[%s13598_s4 + $0x56] sm:$0xff]  ;;  %v5738_v10 = vld [vmem:[%s13598_s4 + $0x47] sm:$0xff] }
 0x182   : > { %v2352_v30 = vpop.f32.mrf.mxu1  ;;  %v2552_v41 = vpop.f32.mrf.mxu0 }
 0x183   : > { %v2373_v44 = vadd.f32 %v2352_v30, %v14928_v54  ;;  %v15059_v37 = vadd.f32 %v2552_v41, %v2371_v51  ;;  %v5328_v54 = vld [vmem:[%s13598_s4 + $0x95] sm:$0xff]  ;;  %v15124_v41 = vld [vmem:[%s13598_s4 + $0x5e] sm:$0xff] }
 0x184   : > { %v12528_v27 = vpop.f32.mrf.mxu0  ;;  %v12533_v18 = vpop.f32.mrf.mxu1  ;;  %12826 = vmatmul.mubr.msk.f32.gmra.mxu1 %vm289_vm2, %v15054_v60  ;;  %12846 = vmatmul.mubr.msk.f32.gmra.mxu0 %vm289_vm2, %v14523_v57 }
 0x185   : > { %v15065_v16 = vadd.f32 %v12528_v27, %v2374_v6  ;;  %v2782_v46 = vadd.f32 %v12533_v18, %v14937_v45  ;;  %12848 = vmatprep.mubr.msk.f32.mxu0 %vm289_vm2, %v5327_v31  ;;  %12853 = vmatprep.mubr.msk.f32.mxu1 %vm289_vm2, %v5525_v28 }
 0x186   : > { %v2562_v1 = vpop.f32.mrf.mxu0  ;;  %v2712_v2 = vpop.f32.mrf.mxu1 }
 0x187   : > { %v15076_v21 = vadd.f32 %v2562_v1, %v2373_v44  ;;  %v2781_v57 = vadd.f32 %v2712_v2, %v14952_v5  ;;  %v15091_v5 = vld [vmem:[%s13598_s4 + $0x46] sm:$0xff]  ;;  %v15146_v1 = vld [vmem:[%s13598_s4 + $0x6e] sm:$0xff] }
 0x188   : > { %v12536_v49 = vpop.f32.mrf.mxu1  ;;  %v12556_v45 = vpop.f32.mrf.mxu0  ;;  %12849 = vmatmul.mubr.msk.f32.gmra.mxu0 %vm289_vm2, %v5328_v54  ;;  %12854 = vmatmul.mubr.msk.f32.vlgmr.msra.gmra.mxu1 %vm289_vm2, %v5526_v4  ;;  %v5741_v2 = vld [vmem:[%s13598_s4 + $0x5f] sm:$0xff] }
 0x189   : > { %v2784_v33 = vadd.f32 %v12536_v49, %v14964_v62  ;;  %v15085_v7 = vadd.f32 %v12556_v45, %v2782_v46  ;;  %12856 = vmatprep.mubr.msk.f32.mxu1 %vm289_vm2, %v15073_v48  ;;  %12876 = vmatprep.mubr.msk.f32.mxu0 %vm289_vm2, %v5735_v56  ;;  %v15142_v46 = vld [vmem:[%s13598_s4 + $0x66] sm:$0xff] }
 0x18a   : > { %v2722_v23 = vpop.f32.mrf.mxu1  ;;  %v2922_v34 = vpop.f32.mrf.mxu0  ;;  %12898 = vmatpush3.msk.msra.mxu1 %vm332_vm1, %v14934_v61 }
 0x18b   : > { %v2783_v62 = vadd.f32 %v2722_v23, %v14982_v29  ;;  %v15100_v11 = vadd.f32 %v2922_v34, %v2781_v57  ;;  %12943 = vmatprep.subr.msk.mxu1 %vm332_vm1, %v15082_v50 }
 0x18c   : > { %v12539_v19 = vpop.f32.mrf.mxu1  ;;  %v12559_v51 = vpop.f32.mrf.mxu0  ;;  %12857 = vmatmul.mubr.msk.f32.gmra.mxu1 %vm289_vm2, %v15091_v5  ;;  %12877 = vmatmul.mubr.msk.f32.vlgmr.msra.gmra.mxu0 %vm289_vm2, %v5736_v15  ;;  %v15162_v15 = vld [vmem:[%s13598_s4 + $0x76] sm:$0xff] }
 0x18d   : > { %v2786_v61 = vadd.f32 %v12539_v19, %v14988_v12  ;;  %v15112_v29 = vadd.f32 %v12559_v51, %v2784_v33  ;;  %12921 = vmatpush3.msk.msra.mxu0 %vm332_vm1, %v14958_v38  ;;  %12859 = vmatprep.mubr.msk.f32.mxu1 %vm289_vm2, %v15097_v36  ;;  %v5739_v12 = vld [vmem:[%s13598_s4 + $0x4f] sm:$0xff] }
 0x18e   : > { %v2732_v6 = vpop.f32.mrf.mxu1  ;;  %v2932_v30 = vpop.f32.mrf.mxu0  ;;  %12879 = vmatprep.mubr.msk.f32.mxu0 %vm289_vm2, %v5737_v40  ;;  %12966 = vmatprep.subr.msk.mxu0 %vm332_vm1, %v15106_v43  ;;  %v5743_v40 = vld [vmem:[%s13598_s4 + $0x6f] sm:$0xff] }
 0x18f   : > { %v2785_v38 = vadd.f32 %v2732_v6, %v15002_v52  ;;  %v15130_v31 = vadd.f32 %v2932_v30, %v2783_v62  ;;  %v5740_v52 = vld [vmem:[%s13598_s4 + $0x57] sm:$0xff] }
 0x190   : > { %v12542_v28 = vpop.f32.mrf.mxu1  ;;  %v12562_v44 = vpop.f32.mrf.mxu0  ;;  %12860 = vmatmul.mubr.msk.f32.gmra.mxu1 %vm289_vm2, %v15119_v8  ;;  %12880 = vmatmul.mubr.msk.f32.gmra.mxu0 %vm289_vm2, %v5738_v10  ;;  %v15166_v62 = vld [vmem:[%s13598_s4 + $0x7e] sm:$0xff] }
 0x191   : > { %v2788_v27 = vadd.f32 %v12542_v28, %v15008_v25  ;;  %v15136_v18 = vadd.f32 %v12562_v44, %v2786_v61  ;;  %12862 = vmatprep.mubr.msk.f32.mxu1 %vm289_vm2, %v15124_v41  ;;  %12882 = vmatprep.mubr.msk.f32.mxu0 %vm289_vm2, %v5739_v12  ;;  %v5744_v30 = vld [vmem:[%s13598_s4 + $0x77] sm:$0xff]  ;;  %v15186_v28 = vld [vmem:[%s13598_s4 + $0x8e] sm:$0xff] }
 0x192   : > { %v2742_v54 = vpop.f32.mrf.mxu1  ;;  %v2942_v4 = vpop.f32.mrf.mxu0 }
 0x193   : > { %v2787_v25 = vadd.f32 %v2742_v54, %v15022_v13  ;;  %v15150_v56 = vadd.f32 %v2942_v4, %v2785_v38  ;;  %v5742_v13 = vld [vmem:[%s13598_s4 + $0x67] sm:$0xff] }
 0x194   : > { %v12545_v57 = vpop.f32.mrf.mxu1  ;;  %v12565_v49 = vpop.f32.mrf.mxu0  ;;  %12863 = vmatmul.mubr.msk.f32.gmra.mxu1 %vm289_vm2, %v15142_v46  ;;  %12883 = vmatmul.mubr.msk.f32.gmra.mxu0 %vm289_vm2, %v5740_v52 }
 0x195   : > { %v2790_v45 = vadd.f32 %v12545_v57, %v15028_v53  ;;  %v15156_v33 = vadd.f32 %v12565_v49, %v2788_v27  ;;  %12865 = vmatprep.mubr.msk.f32.mxu1 %vm289_vm2, %v15146_v1  ;;  %12885 = vmatprep.mubr.msk.f32.mxu0 %vm289_vm2, %v5741_v2  ;;  %v5747_v57 = vld [vmem:[%s13598_s4 + $0x8f] sm:$0xff] }
 0x196   : > { %v2752_v23 = vpop.f32.mrf.mxu1  ;;  %v2952_v34 = vpop.f32.mrf.mxu0  ;;  %v5945_v49 = vld [vmem:[%s13598_s4 + $0x30] sm:$0xff] }
 0x197   : > { %v2789_v53 = vadd.f32 %v2752_v23, %v15040_v24  ;;  %v15170_v19 = vadd.f32 %v2952_v34, %v2787_v25  ;;  %v15182_v24 = vld [vmem:[%s13598_s4 + $0x86] sm:$0xff] }
 0x198   : > { %v12548_v51 = vpop.f32.mrf.mxu1  ;;  %v12568_v61 = vpop.f32.mrf.mxu0  ;;  %12866 = vmatmul.mubr.msk.f32.gmra.mxu1 %vm289_vm2, %v15162_v15  ;;  %12886 = vmatmul.mubr.msk.f32.gmra.mxu0 %vm289_vm2, %v5742_v13 }
 0x199   : > { %v2792_v10 = vadd.f32 %v12548_v51, %v15047_v3  ;;  %v15176_v6 = vadd.f32 %v12568_v61, %v2790_v45  ;;  %12868 = vmatprep.mubr.msk.f32.mxu1 %vm289_vm2, %v15166_v62  ;;  %12888 = vmatprep.mubr.msk.f32.mxu0 %vm289_vm2, %v5743_v40  ;;  %v5946_v40 = vld [vmem:[%s13598_s4 + $0x38] sm:$0xff]  ;;  %v5947_v61 = vld [vmem:[%s13598_s4 + $0x40] sm:$0xff] }
 0x19a   : > { %v2762_v12 = vpop.f32.mrf.mxu1  ;;  %v2962_v38 = vpop.f32.mrf.mxu0 }
 0x19b   : > { %v2791_v44 = vadd.f32 %v2762_v12, %v15059_v37  ;;  %v15189_v3 = vadd.f32 %v2962_v38, %v2789_v53  ;;  %v15202_v37 = vld [vmem:[%s13598_s4 + $0x96] sm:$0xff] }
 0x19c   : > { %v12551_v27 = vpop.f32.mrf.mxu1  ;;  %v12571_v52 = vpop.f32.mrf.mxu0  ;;  %12869 = vmatmul.mubr.msk.f32.gmra.mxu1 %vm289_vm2, %v15182_v24  ;;  %12889 = vmatmul.mubr.msk.f32.gmra.mxu0 %vm289_vm2, %v5744_v30 }
 0x19d   : > { %v2794_v54 = vadd.f32 %v12551_v27, %v15065_v16  ;;  %v15195_v4 = vadd.f32 %v12571_v52, %v2792_v10  ;;  %12871 = vmatprep.mubr.msk.f32.mxu1 %vm289_vm2, %v15186_v28  ;;  %12891 = vmatprep.mubr.msk.f32.mxu0 %vm289_vm2, %v14624_v55  ;;  %v5948_v27 = vld [vmem:[%s13598_s4 + $0x48] sm:$0xff] }
 0x19e   : > { %v2772_v2 = vpop.f32.mrf.mxu1  ;;  %v2972_v25 = vpop.f32.mrf.mxu0 }
 0x19f   : > { %v2793_v45 = vadd.f32 %v2772_v2, %v15076_v21  ;;  %v15207_v16 = vadd.f32 %v2972_v25, %v2791_v44  ;;  %v5748_v21 = vld [vmem:[%s13598_s4 + $0x97] sm:$0xff] }
 0x1a0   : > { %v12574_v13 = vpop.f32.mrf.mxu0  ;;  %v12579_v23 = vpop.f32.mrf.mxu1  ;;  %12872 = vmatmul.mubr.msk.f32.gmra.mxu1 %vm289_vm2, %v15202_v37  ;;  %12892 = vmatmul.mubr.msk.f32.gmra.mxu0 %vm289_vm2, %v14640_v26 }
 0x1a1   : > { %v15213_v55 = vadd.f32 %v12574_v13, %v2794_v54  ;;  %v3202_v34 = vadd.f32 %v12579_v23, %v15085_v7  ;;  %12894 = vmatprep.mubr.msk.f32.mxu0 %vm289_vm2, %v5747_v57  ;;  %12899 = vmatprep.mubr.msk.f32.mxu1 %vm289_vm2, %v5945_v49  ;;  %v15227_v7 = vld [vmem:[%s13603_s7 + $0x7c] sm:$0xf]  ;;  %v5949_v54 = vld [vmem:[%s13598_s4 + $0x50] sm:$0xff] }
 0x1a2   : > { %v2982_v53 = vpop.f32.mrf.mxu0  ;;  %v3132_v51 = vpop.f32.mrf.mxu1 }
 0x1a3   : > { %v15221_v10 = vadd.f32 %v2982_v53, %v2793_v45  ;;  %v3201_v26 = vadd.f32 %v3132_v51, %v15100_v11 }
 0x1a4   : > { %v12582_v30 = vpop.f32.mrf.mxu1  ;;  %v12602_v12 = vpop.f32.mrf.mxu0  ;;  %12895 = vmatmul.mubr.msk.f32.gmra.mxu0 %vm289_vm2, %v5748_v21  ;;  %12900 = vmatmul.mubr.msk.f32.vlgmr.msra.gmra.mxu1 %vm289_vm2, %v5946_v40 }
 0x1a5   : > { %v3204_v38 = vadd.f32 %v12582_v30, %v15112_v29  ;;  %v15230_v44 = vadd.f32 %v12602_v12, %v3202_v34  ;;  %12902 = vmatprep.mubr.msk.f32.mxu1 %vm289_vm2, %v5947_v61  ;;  %12922 = vmatprep.mubr.msk.f32.mxu0 %vm289_vm2, %v5946_v40  ;;  %v15244_v29 = vld [vmem:[%s13603_s7 + $0x80] sm:$0xf]  ;;  %v5953_v30 = vld [vmem:[%s13598_s4 + $0x70] sm:$0xff] }
 0x1a6   : > { %v3142_v52 = vpop.f32.mrf.mxu1  ;;  %v3342_v11 = vpop.f32.mrf.mxu0  ;;  %12944 = vmatpush3.msk.msra.mxu1 %vm332_vm1, %v15082_v50  ;;  %v5951_v34 = vld [vmem:[%s13598_s4 + $0x60] sm:$0xff] }
 0x1a7   : > { %v3203_v2 = vadd.f32 %v3142_v52, %v15130_v31  ;;  %v15239_v25 = vadd.f32 %v3342_v11, %v3201_v26  ;;  %12989 = vmatprep.subr.msk.mxu1 %vm332_vm1, %v15227_v7  ;;  %v5950_v31 = vld [vmem:[%s13598_s4 + $0x58] sm:$0xff] }
 0x1a8   : > { %v12585_v57 = vpop.f32.mrf.mxu1  ;;  %v12605_v49 = vpop.f32.mrf.mxu0  ;;  %12903 = vmatmul.mubr.msk.f32.gmra.mxu1 %vm289_vm2, %v5948_v27  ;;  %12923 = vmatmul.mubr.msk.f32.vlgmr.msra.gmra.mxu0 %vm289_vm2, %v5947_v61  ;;  %v5952_v61 = vld [vmem:[%s13598_s4 + $0x68] sm:$0xff] }
 0x1a9   : > { %v3206_v45 = vadd.f32 %v12585_v57, %v15136_v18  ;;  %v15249_v50 = vadd.f32 %v12605_v49, %v3204_v38  ;;  %12967 = vmatpush3.msk.msra.mxu0 %vm332_vm1, %v15106_v43  ;;  %12905 = vmatprep.mubr.msk.f32.mxu1 %vm289_vm2, %v5949_v54  ;;  %v5955_v57 = vld [vmem:[%s13598_s4 + $0x80] sm:$0xff] }
 0x1aa   : > { %v3152_v13 = vpop.f32.mrf.mxu1  ;;  %v3352_v23 = vpop.f32.mrf.mxu0  ;;  %12925 = vmatprep.mubr.msk.f32.mxu0 %vm289_vm2, %v5948_v27  ;;  %13012 = vmatprep.subr.msk.mxu0 %vm332_vm1, %v15244_v29 }
 0x1ab   : > { %v3205_v18 = vadd.f32 %v3152_v13, %v15150_v56  ;;  %v15260_v21 = vadd.f32 %v3352_v23, %v3203_v2 }
 0x1ac   : > { %v12588_v40 = vpop.f32.mrf.mxu1  ;;  %v12608_v53 = vpop.f32.mrf.mxu0  ;;  %12906 = vmatmul.mubr.msk.f32.gmra.mxu1 %vm289_vm2, %v5950_v31  ;;  %12926 = vmatmul.mubr.msk.f32.gmra.mxu0 %vm289_vm2, %v5949_v54  ;;  %v5954_v54 = vld [vmem:[%s13598_s4 + $0x78] sm:$0xff] }
 0x1ad   : > { %v3208_v43 = vadd.f32 %v12588_v40, %v15156_v33  ;;  %v15265_v51 = vadd.f32 %v12608_v53, %v3206_v45  ;;  %12908 = vmatprep.mubr.msk.f32.mxu1 %vm289_vm2, %v5951_v34  ;;  %12928 = vmatprep.mubr.msk.f32.mxu0 %vm289_vm2, %v5950_v31  ;;  %v5957_v40 = vld [vmem:[%s13598_s4 + $0x90] sm:$0xff] }
 0x1ae   : > { %v3162_v26 = vpop.f32.mrf.mxu1  ;;  %v3362_v56 = vpop.f32.mrf.mxu0 }
 0x1af   : > { %v3207_v12 = vadd.f32 %v3162_v26, %v15170_v19  ;;  %v15272_v38 = vadd.f32 %v3362_v56, %v3205_v18 }
 0x1b0   : > { %v12591_v27 = vpop.f32.mrf.mxu1  ;;  %v12611_v52 = vpop.f32.mrf.mxu0  ;;  %12909 = vmatmul.mubr.msk.f32.gmra.mxu1 %vm289_vm2, %v5952_v61  ;;  %12929 = vmatmul.mubr.msk.f32.gmra.mxu0 %vm289_vm2, %v5951_v34  ;;  %v5956_v34 = vld [vmem:[%s13598_s4 + $0x88] sm:$0xff] }
 0x1b1   : > { %v3210_v33 = vadd.f32 %v12591_v27, %v15176_v6  ;;  %v15277_v11 = vadd.f32 %v12611_v52, %v3208_v43  ;;  %12911 = vmatprep.mubr.msk.f32.mxu1 %vm289_vm2, %v5953_v30  ;;  %12931 = vmatprep.mubr.msk.f32.mxu0 %vm289_vm2, %v5952_v61  ;;  %v6365_v27 = vld [vmem:[%s13598_s4 + $0x39] sm:$0xff] }
 0x1b2   : > { %v3172_v2 = vpop.f32.mrf.mxu1  ;;  %v3372_v19 = vpop.f32.mrf.mxu0 }
 0x1b3   : > { %v3209_v49 = vadd.f32 %v3172_v2, %v15189_v3  ;;  %v15284_v45 = vadd.f32 %v3372_v19, %v3207_v12 }
 0x1b4   : > { %v12594_v31 = vpop.f32.mrf.mxu1  ;;  %v12614_v13 = vpop.f32.mrf.mxu0  ;;  %12912 = vmatmul.mubr.msk.f32.gmra.mxu1 %vm289_vm2, %v5954_v54  ;;  %12932 = vmatmul.mubr.msk.f32.gmra.mxu0 %vm289_vm2, %v5953_v30  ;;  %v5958_v30 = vld [vmem:[%s13598_s4 + $0x98] sm:$0xff] }
 0x1b5   : > { %v3212_v6 = vadd.f32 %v12594_v31, %v15195_v4  ;;  %v15289_v23 = vadd.f32 %v12614_v13, %v3210_v33  ;;  %12914 = vmatprep.mubr.msk.f32.mxu1 %vm289_vm2, %v5955_v57  ;;  %12934 = vmatprep.mubr.msk.f32.mxu0 %vm289_vm2, %v5954_v54  ;;  %v15320_v13 = vld [vmem:[%s13598_s4 + $0x49] sm:$0xff] }
 0x1b6   : > { %v3182_v18 = vpop.f32.mrf.mxu1  ;;  %v3382_v3 = vpop.f32.mrf.mxu0 }
 0x1b7   : > { %v3211_v53 = vadd.f32 %v3182_v18, %v15207_v16  ;;  %v15296_v43 = vadd.f32 %v3382_v3, %v3209_v49  ;;  %v6366_v49 = vld [vmem:[%s13598_s4 + $0x41] sm:$0xff] }
 0x1b8   : > { %v12597_v61 = vpop.f32.mrf.mxu1  ;;  %v12617_v26 = vpop.f32.mrf.mxu0  ;;  %12915 = vmatmul.mubr.msk.f32.gmra.mxu1 %vm289_vm2, %v5956_v34  ;;  %12935 = vmatmul.mubr.msk.f32.gmra.mxu0 %vm289_vm2, %v5955_v57  ;;  %v6168_v57 = vld [vmem:[%s13598_s4 + $0xa0] sm:$0xff] }
 0x1b9   : > { %v3214_v4 = vadd.f32 %v12597_v61, %v15213_v55  ;;  %v15301_v56 = vadd.f32 %v12617_v26, %v3212_v6  ;;  %12917 = vmatprep.mubr.msk.f32.mxu1 %vm289_vm2, %v5957_v40  ;;  %12937 = vmatprep.mubr.msk.f32.mxu0 %vm289_vm2, %v5956_v34  ;;  %v6575_v6 = vld [vmem:[%s13598_s4 + $0x3a] sm:$0xff]  ;;  %v6576_v26 = vld [vmem:[%s13598_s4 + $0x42] sm:$0xff] }
 0x1ba   : > { %v3192_v16 = vpop.f32.mrf.mxu1  ;;  %v3392_v12 = vpop.f32.mrf.mxu0 }
 0x1bb   : > { %v3213_v52 = vadd.f32 %v3192_v16, %v15221_v10  ;;  %v15308_v33 = vadd.f32 %v3392_v12, %v3211_v53  ;;  %v15344_v16 = vld [vmem:[%s13598_s4 + $0x59] sm:$0xff] }
 0x1bc   : > { %v12620_v54 = vpop.f32.mrf.mxu0  ;;  %v12625_v55 = vpop.f32.mrf.mxu1  ;;  %12918 = vmatmul.mubr.msk.f32.gmra.mxu1 %vm289_vm2, %v5958_v30  ;;  %12938 = vmatmul.mubr.msk.f32.gmra.mxu0 %vm289_vm2, %v5957_v40  ;;  %v15329_v40 = vld [vmem:[%s13603_s7 + $0x84] sm:$0xf] }
 0x1bd   : > { %v15312_v2 = vadd.f32 %v12620_v54, %v3214_v4  ;;  %v3622_v19 = vadd.f32 %v12625_v55, %v15230_v44  ;;  %12940 = vmatprep.mubr.msk.f32.mxu0 %vm289_vm2, %v5958_v30  ;;  %12945 = vmatprep.mubr.msk.f32.mxu1 %vm289_vm2, %v6365_v27  ;;  %v6577_v27 = vld [vmem:[%s13598_s4 + $0x4a] sm:$0xff] }
 0x1be   : > { %v3402_v10 = vpop.f32.mrf.mxu0  ;;  %v3552_v31 = vpop.f32.mrf.mxu1 }
 0x1bf   : > { %v15323_v34 = vadd.f32 %v3402_v10, %v3213_v52  ;;  %v3621_v18 = vadd.f32 %v3552_v31, %v15239_v25  ;;  %v15338_v25 = vld [vmem:[%s13598_s4 + $0x51] sm:$0xff]  ;;  %v15353_v52 = vld [vmem:[%s13603_s7 + $0x88] sm:$0xf] }
 0x1c0   : > { %v12628_v3 = vpop.f32.mrf.mxu1  ;;  %v12648_v44 = vpop.f32.mrf.mxu0  ;;  %12941 = vmatmul.mubr.msk.f32.gmra.mxu0 %vm289_vm2, %v6168_v57  ;;  %12946 = vmatmul.mubr.msk.f32.vlgmr.msra.gmra.mxu1 %vm289_vm2, %v6366_v49  ;;  %v6578_v57 = vld [vmem:[%s13598_s4 + $0x52] sm:$0xff]  ;;  %v15371_v31 = vld [vmem:[%s13598_s4 + $0x69] sm:$0xff] }
 0x1c1   : > { %v3624_v53 = vadd.f32 %v12628_v3, %v15249_v50  ;;  %v15332_v61 = vadd.f32 %v12648_v44, %v3622_v19  ;;  %12948 = vmatprep.mubr.msk.f32.mxu1 %vm289_vm2, %v15320_v13  ;;  %12968 = vmatprep.mubr.msk.f32.mxu0 %vm289_vm2, %v6575_v6  ;;  %v15366_v19 = vld [vmem:[%s13598_s4 + $0x61] sm:$0xff] }
 0x1c2   : > { %v3562_v4 = vpop.f32.mrf.mxu1  ;;  %v3762_v30 = vpop.f32.mrf.mxu0  ;;  %12990 = vmatpush3.msk.msra.mxu1 %vm332_vm1, %v15227_v7 }
 0x1c3   : > { %v3623_v50 = vadd.f32 %v3562_v4, %v15260_v21  ;;  %v15347_v12 = vadd.f32 %v3762_v30, %v3621_v18  ;;  %13035 = vmatprep.subr.msk.mxu1 %vm332_vm1, %v15329_v40 }
 0x1c4   : > { %v12631_v54 = vpop.f32.mrf.mxu1  ;;  %v12651_v55 = vpop.f32.mrf.mxu0  ;;  %12949 = vmatmul.mubr.msk.f32.gmra.mxu1 %vm289_vm2, %v15338_v25  ;;  %12969 = vmatmul.mubr.msk.f32.vlgmr.msra.gmra.mxu0 %vm289_vm2, %v6576_v26  ;;  %v15389_v26 = vld [vmem:[%s13598_s4 + $0x71] sm:$0xff] }
 0x1c5   : > { %v3626_v7 = vadd.f32 %v12631_v54, %v15265_v51  ;;  %v15359_v21 = vadd.f32 %v12651_v55, %v3624_v53  ;;  %13013 = vmatpush3.msk.msra.mxu0 %vm332_vm1, %v15244_v29  ;;  %12951 = vmatprep.mubr.msk.f32.mxu1 %vm289_vm2, %v15344_v16  ;;  %v6579_v51 = vld [vmem:[%s13598_s4 + $0x5a] sm:$0xff] }
 0x1c6   : > { %v3572_v49 = vpop.f32.mrf.mxu1  ;;  %v3772_v10 = vpop.f32.mrf.mxu0  ;;  %12971 = vmatprep.mubr.msk.f32.mxu0 %vm289_vm2, %v6577_v27  ;;  %13058 = vmatprep.subr.msk.mxu0 %vm332_vm1, %v15353_v52  ;;  %v6581_v27 = vld [vmem:[%s13598_s4 + $0x6a] sm:$0xff] }
 0x1c7   : > { %v3625_v29 = vadd.f32 %v3572_v49, %v15272_v38  ;;  %v15377_v6 = vadd.f32 %v3772_v10, %v3623_v50  ;;  %v6580_v38 = vld [vmem:[%s13598_s4 + $0x62] sm:$0xff]  ;;  %v15393_v50 = vld [vmem:[%s13598_s4 + $0x79] sm:$0xff] }
 0x1c8   : > { %v12634_v18 = vpop.f32.mrf.mxu1  ;;  %v12654_v3 = vpop.f32.mrf.mxu0  ;;  %12952 = vmatmul.mubr.msk.f32.gmra.mxu1 %vm289_vm2, %v15366_v19  ;;  %12972 = vmatmul.mubr.msk.f32.gmra.mxu0 %vm289_vm2, %v6578_v57 }
 0x1c9   : > { %v3628_v44 = vadd.f32 %v12634_v18, %v15277_v11  ;;  %v15383_v53 = vadd.f32 %v12654_v3, %v3626_v7  ;;  %12954 = vmatprep.mubr.msk.f32.mxu1 %vm289_vm2, %v15371_v31  ;;  %12974 = vmatprep.mubr.msk.f32.mxu0 %vm289_vm2, %v6579_v51 }
 0x1ca   : > { %v3582_v4 = vpop.f32.mrf.mxu1  ;;  %v3782_v30 = vpop.f32.mrf.mxu0 }
 0x1cb   : > { %v3627_v54 = vadd.f32 %v3582_v4, %v15284_v45  ;;  %v15397_v11 = vadd.f32 %v3782_v30, %v3625_v29  ;;  %v15409_v45 = vld [vmem:[%s13598_s4 + $0x81] sm:$0xff]  ;;  %v15412_v29 = vld [vmem:[%s13598_s4 + $0x89] sm:$0xff] }
 0x1cc   : > { %v12637_v55 = vpop.f32.mrf.mxu1  ;;  %v12657_v7 = vpop.f32.mrf.mxu0  ;;  %12955 = vmatmul.mubr.msk.f32.gmra.mxu1 %vm289_vm2, %v15389_v26  ;;  %12975 = vmatmul.mubr.msk.f32.gmra.mxu0 %vm289_vm2, %v6580_v38  ;;  %v6584_v30 = vld [vmem:[%s13598_s4 + $0x82] sm:$0xff] }
 0x1cd   : > { %v3630_v57 = vadd.f32 %v12637_v55, %v15289_v23  ;;  %v15403_v49 = vadd.f32 %v12657_v7, %v3628_v44  ;;  %12957 = vmatprep.mubr.msk.f32.mxu1 %vm289_vm2, %v15393_v50  ;;  %12977 = vmatprep.mubr.msk.f32.mxu0 %vm289_vm2, %v6581_v27  ;;  %v15433_v55 = vld [vmem:[%s13598_s4 + $0x99] sm:$0xff] }
 0x1ce   : > { %v3592_v10 = vpop.f32.mrf.mxu1  ;;  %v3792_v51 = vpop.f32.mrf.mxu0 }
 0x1cf   : > { %v3629_v18 = vadd.f32 %v3592_v10, %v15296_v43  ;;  %v15415_v23 = vadd.f32 %v3792_v51, %v3627_v54  ;;  %v15429_v43 = vld [vmem:[%s13598_s4 + $0x91] sm:$0xff] }
 0x1d0   : > { %v12640_v3 = vpop.f32.mrf.mxu1  ;;  %v12660_v44 = vpop.f32.mrf.mxu0  ;;  %12958 = vmatmul.mubr.msk.f32.gmra.mxu1 %vm289_vm2, %v15409_v45  ;;  %12978 = vmatmul.mubr.msk.f32.gmra.mxu0 %vm289_vm2, %v14872_v9  ;;  %v6585_v9 = vld [vmem:[%s13598_s4 + $0x8a] sm:$0xff] }
 0x1d1   : > { %v3632_v38 = vadd.f32 %v12640_v3, %v15301_v56  ;;  %v15422_v4 = vadd.f32 %v12660_v44, %v3630_v57  ;;  %12960 = vmatprep.mubr.msk.f32.mxu1 %vm289_vm2, %v15412_v29  ;;  %12980 = vmatprep.mubr.msk.f32.mxu0 %vm289_vm2, %v14876_v39  ;;  %v6587_v44 = vld [vmem:[%s13598_s4 + $0x9a] sm:$0xff] }
 0x1d2   : > { %v3602_v27 = vpop.f32.mrf.mxu1  ;;  %v3802_v54 = vpop.f32.mrf.mxu0 }
 0x1d3   : > { %v3631_v56 = vadd.f32 %v3602_v27, %v15308_v33  ;;  %v15437_v7 = vadd.f32 %v3802_v54, %v3629_v18  ;;  %v15449_v33 = vld [vmem:[%s13598_s4 + $0xa1] sm:$0xff] }
 0x1d4   : > { %v12643_v57 = vpop.f32.mrf.mxu1  ;;  %v12663_v10 = vpop.f32.mrf.mxu0  ;;  %12961 = vmatmul.mubr.msk.f32.gmra.mxu1 %vm289_vm2, %v15429_v43  ;;  %12981 = vmatmul.mubr.msk.f32.gmra.mxu0 %vm289_vm2, %v6584_v30  ;;  %16937 = vst [vmem:[#allocation10_spill] sm:$0xff] %v15449_v33  ;;  %v6785_v27 = vld [vmem:[%s13598_s4 + $0x3b] sm:$0xff] }
 0x1d5   : > { %v3634_v39 = vadd.f32 %v12643_v57, %v15312_v2  ;;  %v15443_v51 = vadd.f32 %v12663_v10, %v3632_v38  ;;  %12963 = vmatprep.mubr.msk.f32.mxu1 %vm289_vm2, %v15433_v55  ;;  %12983 = vmatprep.mubr.msk.f32.mxu0 %vm289_vm2, %v6585_v9 }
 0x1d6   : > { %v3612_v18 = vpop.f32.mrf.mxu1  ;;  %v3812_v3 = vpop.f32.mrf.mxu0 }
 0x1d7   : > { %v3633_v30 = vadd.f32 %v3612_v18, %v15323_v34  ;;  %v15454_v54 = vadd.f32 %v3812_v3, %v3631_v56  ;;  %v6588_v34 = vld [vmem:[%s13598_s4 + $0xa2] sm:$0xff]  ;;  %v15468_v3 = vld [vmem:[%s13598_s4 + $0x4b] sm:$0xff] }
 0x1d8   : > { %v12666_v2 = vpop.f32.mrf.mxu0  ;;  %v12671_v38 = vpop.f32.mrf.mxu1  ;;  %12964 = vmatmul.mubr.msk.f32.gmra.mxu1 %vm289_vm2, %v15449_v33  ;;  %12984 = vmatmul.mubr.msk.f32.gmra.mxu0 %vm289_vm2, %v14906_v20  ;;  %v6786_v56 = vld [vmem:[%s13598_s4 + $0x43] sm:$0xff] }
 0x1d9   : > { %v15460_v9 = vadd.f32 %v12666_v2, %v3634_v39  ;;  %v4042_v57 = vadd.f32 %v12671_v38, %v15332_v61  ;;  %12986 = vmatprep.mubr.msk.f32.mxu0 %vm289_vm2, %v6587_v44  ;;  %12991 = vmatprep.mubr.msk.f32.mxu1 %vm289_vm2, %v6785_v27  ;;  %v15476_v61 = vld [vmem:[%s13603_s7 + $0x8c] sm:$0xf] }
 0x1da   : > { %v3822_v10 = vpop.f32.mrf.mxu0  ;;  %v3972_v18 = vpop.f32.mrf.mxu1 }
 0x1db   : > { %v15470_v33 = vadd.f32 %v3822_v10, %v3633_v30  ;;  %v4041_v20 = vadd.f32 %v3972_v18, %v15347_v12  ;;  %v15486_v12 = vld [vmem:[%s13598_s4 + $0x53] sm:$0xff] }
 0x1dc   : > { %v12674_v39 = vpop.f32.mrf.mxu1  ;;  %v12694_v2 = vpop.f32.mrf.mxu0  ;;  %12987 = vmatmul.mubr.msk.f32.gmra.mxu0 %vm289_vm2, %v6588_v34  ;;  %12992 = vmatmul.mubr.msk.f32.vlgmr.msra.gmra.mxu1 %vm289_vm2, %v6786_v56  ;;  %v15491_v34 = vld [vmem:[%s13598_s4 + $0x5b] sm:$0xff]  ;;  %v15499_v56 = vld [vmem:[%s13603_s7 + $0x90] sm:$0xf] }
 0x1dd   : > { %v4044_v44 = vadd.f32 %v12674_v39, %v15359_v21  ;;  %v15479_v27 = vadd.f32 %v12694_v2, %v4042_v57  ;;  %12994 = vmatprep.mubr.msk.f32.mxu1 %vm289_vm2, %v15468_v3  ;;  %13014 = vmatprep.mubr.msk.f32.mxu0 %vm289_vm2, %v14925_v59 }
 0x1de   : > { %v3982_v30 = vpop.f32.mrf.mxu1  ;;  %v4182_v38 = vpop.f32.mrf.mxu0  ;;  %13036 = vmatpush3.msk.msra.mxu1 %vm332_vm1, %v15329_v40 }
 0x1df   : > { %v4043_v21 = vadd.f32 %v3982_v30, %v15377_v6  ;;  %v15494_v57 = vadd.f32 %v4182_v38, %v4041_v20  ;;  %13081 = vmatprep.subr.msk.mxu1 %vm332_vm1, %v15476_v61  ;;  %v15513_v6 = vld [vmem:[%s13598_s4 + $0x63] sm:$0xff] }
 0x1e0   : > { %v12677_v59 = vpop.f32.mrf.mxu1  ;;  %v12697_v10 = vpop.f32.mrf.mxu0  ;;  %12995 = vmatmul.mubr.msk.f32.gmra.mxu1 %vm289_vm2, %v15486_v12  ;;  %13015 = vmatmul.mubr.msk.f32.vlgmr.msra.gmra.mxu0 %vm289_vm2, %v14943_v58  ;;  %v15518_v58 = vld [vmem:[%s13598_s4 + $0x6b] sm:$0xff] }
 0x1e1   : > { %v4046_v40 = vadd.f32 %v12677_v59, %v15383_v53  ;;  %v15506_v18 = vadd.f32 %v12697_v10, %v4044_v44  ;;  %13059 = vmatpush3.msk.msra.mxu0 %vm332_vm1, %v15353_v52  ;;  %12997 = vmatprep.mubr.msk.f32.mxu1 %vm289_vm2, %v15491_v34  ;;  %v15540_v59 = vld [vmem:[%s13598_s4 + $0x7b] sm:$0xff] }
 0x1e2   : > { %v3992_v20 = vpop.f32.mrf.mxu1  ;;  %v4192_v39 = vpop.f32.mrf.mxu0  ;;  %13017 = vmatprep.mubr.msk.f32.mxu0 %vm289_vm2, %v14949_v22  ;;  %13104 = vmatprep.subr.msk.mxu0 %vm332_vm1, %v15499_v56 }
 0x1e3   : > { %v4045_v53 = vadd.f32 %v3992_v20, %v15397_v11  ;;  %v15523_v52 = vadd.f32 %v4192_v39, %v4043_v21  ;;  %v15537_v11 = vld [vmem:[%s13598_s4 + $0x73] sm:$0xff] }
 0x1e4   : > { %v12680_v2 = vpop.f32.mrf.mxu1  ;;  %v12700_v44 = vpop.f32.mrf.mxu0  ;;  %12998 = vmatmul.mubr.msk.f32.gmra.mxu1 %vm289_vm2, %v15513_v6  ;;  %13018 = vmatmul.mubr.msk.f32.gmra.mxu0 %vm289_vm2, %v14971_v17 }
 0x1e5   : > { %v4048_v22 = vadd.f32 %v12680_v2, %v15403_v49  ;;  %v15530_v30 = vadd.f32 %v12700_v44, %v4046_v40  ;;  %13000 = vmatprep.mubr.msk.f32.mxu1 %vm289_vm2, %v15518_v58  ;;  %13020 = vmatprep.mubr.msk.f32.mxu0 %vm289_vm2, %v14976_v42  ;;  %v15560_v2 = vld [vmem:[%s13598_s4 + $0x8b] sm:$0xff] }
 0x1e6   : > { %v4002_v38 = vpop.f32.mrf.mxu1  ;;  %v4202_v21 = vpop.f32.mrf.mxu0 }
 0x1e7   : > { %v4047_v17 = vadd.f32 %v4002_v38, %v15415_v23  ;;  %v15543_v10 = vadd.f32 %v4202_v21, %v4045_v53  ;;  %v15557_v23 = vld [vmem:[%s13598_s4 + $0x83] sm:$0xff] }
 0x1e8   : > { %v12683_v49 = vpop.f32.mrf.mxu1  ;;  %v12703_v40 = vpop.f32.mrf.mxu0  ;;  %13001 = vmatmul.mubr.msk.f32.gmra.mxu1 %vm289_vm2, %v15537_v11  ;;  %13021 = vmatmul.mubr.msk.f32.gmra.mxu0 %vm289_vm2, %v14994_v14 }
 0x1e9   : > { %v4050_v42 = vadd.f32 %v12683_v49, %v15422_v4  ;;  %v15550_v20 = vadd.f32 %v12703_v40, %v4048_v22  ;;  %13003 = vmatprep.mubr.msk.f32.mxu1 %vm289_vm2, %v15540_v59  ;;  %13023 = vmatprep.mubr.msk.f32.mxu0 %vm289_vm2, %v14998_v63  ;;  %v15580_v49 = vld [vmem:[%s13598_s4 + $0x9b] sm:$0xff] }
 0x1ea   : > { %v4012_v39 = vpop.f32.mrf.mxu1  ;;  %v4212_v53 = vpop.f32.mrf.mxu0 }
 0x1eb   : > { %v4049_v14 = vadd.f32 %v4012_v39, %v15437_v7  ;;  %v15563_v44 = vadd.f32 %v4212_v53, %v4047_v17  ;;  %v15577_v7 = vld [vmem:[%s13598_s4 + $0x93] sm:$0xff] }
 0x1ec   : > { %v12686_v4 = vpop.f32.mrf.mxu1  ;;  %v12706_v22 = vpop.f32.mrf.mxu0  ;;  %13004 = vmatmul.mubr.msk.f32.gmra.mxu1 %vm289_vm2, %v15557_v23  ;;  %13024 = vmatmul.mubr.msk.f32.gmra.mxu0 %vm289_vm2, %v15014_v32 }
 0x1ed   : > { %v4052_v63 = vadd.f32 %v12686_v4, %v15443_v51  ;;  %v15570_v38 = vadd.f32 %v12706_v22, %v4050_v42  ;;  %13006 = vmatprep.mubr.msk.f32.mxu1 %vm289_vm2, %v15560_v2  ;;  %13026 = vmatprep.mubr.msk.f32.mxu0 %vm289_vm2, %v15018_v0  ;;  %v7007_v4 = vld [vmem:[%s13598_s4 + $0x9c] sm:$0xff] }
 0x1ee   : > { %v4022_v21 = vpop.f32.mrf.mxu1  ;;  %v4222_v17 = vpop.f32.mrf.mxu0  ;;  %v7205_v22 = vld [vmem:[%s13598_s4 + $0x3d] sm:$0xff] }
 0x1ef   : > { %v4051_v32 = vadd.f32 %v4022_v21, %v15454_v54  ;;  %v15583_v51 = vadd.f32 %v4222_v17, %v4049_v14  ;;  %v15597_v54 = vld [vmem:[%s13598_s4 + $0xa3] sm:$0xff] }
 0x1f0   : > { %v12689_v40 = vpop.f32.mrf.mxu1  ;;  %v12709_v42 = vpop.f32.mrf.mxu0  ;;  %13007 = vmatmul.mubr.msk.f32.gmra.mxu1 %vm289_vm2, %v15577_v7  ;;  %13027 = vmatmul.mubr.msk.f32.gmra.mxu0 %vm289_vm2, %v15034_v35  ;;  %16938 = vst [vmem:[#allocation12_spill] sm:$0xff] %v15597_v54 }
 0x1f1   : > { %v4054_v0 = vadd.f32 %v12689_v40, %v15460_v9  ;;  %v15590_v39 = vadd.f32 %v12709_v42, %v4052_v63  ;;  %13009 = vmatprep.mubr.msk.f32.mxu1 %vm289_vm2, %v15580_v49  ;;  %13029 = vmatprep.mubr.msk.f32.mxu0 %vm289_vm2, %v15037_v47 }
 0x1f2   : > { %v4032_v53 = vpop.f32.mrf.mxu1  ;;  %v4232_v14 = vpop.f32.mrf.mxu0 }
 0x1f3   : > { %v4053_v35 = vadd.f32 %v4032_v53, %v15470_v33  ;;  %v15602_v9 = vadd.f32 %v4232_v14, %v4051_v32  ;;  %v7008_v33 = vld [vmem:[%s13598_s4 + $0xa4] sm:$0xff]  ;;  %v7207_v53 = vld [vmem:[%s13598_s4 + $0x4d] sm:$0xff] }
 0x1f4   : > { %v12712_v63 = vpop.f32.mrf.mxu0  ;;  %v12717_v21 = vpop.f32.mrf.mxu1  ;;  %13010 = vmatmul.mubr.msk.f32.gmra.mxu1 %vm289_vm2, %v15597_v54  ;;  %13030 = vmatmul.mubr.msk.f32.gmra.mxu0 %vm289_vm2, %v15054_v60  ;;  %v7206_v32 = vld [vmem:[%s13598_s4 + $0x45] sm:$0xff] }
 0x1f5   : > { %v15608_v47 = vadd.f32 %v12712_v63, %v4054_v0  ;;  %v4462_v17 = vadd.f32 %v12717_v21, %v15479_v27  ;;  %13032 = vmatprep.mubr.msk.f32.mxu0 %vm289_vm2, %v7007_v4  ;;  %13037 = vmatprep.mubr.msk.f32.mxu1 %vm289_vm2, %v7205_v22  ;;  %v15622_v27 = vld [vmem:[%s13603_s7 + $0x94] sm:$0xf]  ;;  %v7209_v21 = vld [vmem:[%s13598_s4 + $0x5d] sm:$0xff] }
 0x1f6   : > { %v4242_v40 = vpop.f32.mrf.mxu0  ;;  %v4392_v42 = vpop.f32.mrf.mxu1 }
 0x1f7   : > { %v15616_v14 = vadd.f32 %v4242_v40, %v4053_v35  ;;  %v4461_v60 = vadd.f32 %v4392_v42, %v15494_v57  ;;  %v7208_v35 = vld [vmem:[%s13598_s4 + $0x55] sm:$0xff] }
 0x1f8   : > { %v12720_v54 = vpop.f32.mrf.mxu1  ;;  %v12740_v0 = vpop.f32.mrf.mxu0  ;;  %13033 = vmatmul.mubr.msk.f32.gmra.mxu0 %vm289_vm2, %v7008_v33  ;;  %13038 = vmatmul.mubr.msk.f32.vlgmr.msra.gmra.mxu1 %vm289_vm2, %v7206_v32 }
 0x1f9   : > { %v4464_v4 = vadd.f32 %v12720_v54, %v15506_v18  ;;  %v15625_v22 = vadd.f32 %v12740_v0, %v4462_v17  ;;  %13040 = vmatprep.mubr.msk.f32.mxu1 %vm289_vm2, %v7207_v53  ;;  %13060 = vmatprep.mubr.msk.f32.mxu0 %vm289_vm2, %v15073_v48  ;;  %v15640_v18 = vld [vmem:[%s13603_s7 + $0x98] sm:$0xf]  ;;  %v7211_v53 = vld [vmem:[%s13598_s4 + $0x6d] sm:$0xff] }
 0x1fa   : > { %v4402_v57 = vpop.f32.mrf.mxu1  ;;  %v4602_v63 = vpop.f32.mrf.mxu0  ;;  %13082 = vmatpush3.msk.msra.mxu1 %vm332_vm1, %v15476_v61 }
 0x1fb   : > { %v4463_v33 = vadd.f32 %v4402_v57, %v15523_v52  ;;  %v15635_v32 = vadd.f32 %v4602_v63, %v4461_v60  ;;  %13127 = vmatprep.subr.msk.mxu1 %vm332_vm1, %v15622_v27  ;;  %v7210_v52 = vld [vmem:[%s13598_s4 + $0x65] sm:$0xff]  ;;  %v7213_v57 = vld [vmem:[%s13598_s4 + $0x7d] sm:$0xff] }
 0x1fc   : > { %v12723_v54 = vpop.f32.mrf.mxu1  ;;  %v12743_v48 = vpop.f32.mrf.mxu0  ;;  %13041 = vmatmul.mubr.msk.f32.gmra.mxu1 %vm289_vm2, %v7208_v35  ;;  %13061 = vmatmul.mubr.msk.f32.vlgmr.msra.gmra.mxu0 %vm289_vm2, %v15091_v5 }
 0x1fd   : > { %v4466_v61 = vadd.f32 %v12723_v54, %v15530_v30  ;;  %v15646_v17 = vadd.f32 %v12743_v48, %v4464_v4  ;;  %13105 = vmatpush3.msk.msra.mxu0 %vm332_vm1, %v15499_v56  ;;  %13043 = vmatprep.mubr.msk.f32.mxu1 %vm289_vm2, %v7209_v21 }
 0x1fe   : > { %v4412_v40 = vpop.f32.mrf.mxu1  ;;  %v4612_v42 = vpop.f32.mrf.mxu0  ;;  %13063 = vmatprep.mubr.msk.f32.mxu0 %vm289_vm2, %v15097_v36  ;;  %13150 = vmatprep.subr.msk.mxu0 %vm332_vm1, %v15640_v18  ;;  %v7212_v36 = vld [vmem:[%s13598_s4 + $0x75] sm:$0xff] }
 0x1ff   : > { %v4465_v5 = vadd.f32 %v4412_v40, %v15543_v10  ;;  %v15658_v30 = vadd.f32 %v4612_v42, %v4463_v33 }
 0x200   : > { %v12726_v60 = vpop.f32.mrf.mxu1  ;;  %v12746_v56 = vpop.f32.mrf.mxu0  ;;  %13044 = vmatmul.mubr.msk.f32.gmra.mxu1 %vm289_vm2, %v7210_v52  ;;  %13064 = vmatmul.mubr.msk.f32.gmra.mxu0 %vm289_vm2, %v15119_v8 }
 0x201   : > { %v4468_v0 = vadd.f32 %v12726_v60, %v15550_v20  ;;  %v15664_v4 = vadd.f32 %v12746_v56, %v4466_v61  ;;  %13046 = vmatprep.mubr.msk.f32.mxu1 %vm289_vm2, %v7211_v53  ;;  %13066 = vmatprep.mubr.msk.f32.mxu0 %vm289_vm2, %v15124_v41  ;;  %v7214_v41 = vld [vmem:[%s13598_s4 + $0x85] sm:$0xff]  ;;  %v7215_v61 = vld [vmem:[%s13598_s4 + $0x8d] sm:$0xff]  ;;  %v7217_v60 = vld [vmem:[%s13598_s4 + $0x9d] sm:$0xff] }
 0x202   : > { %v4422_v10 = vpop.f32.mrf.mxu1  ;;  %v4622_v35 = vpop.f32.mrf.mxu0 }
 0x203   : > { %v4467_v63 = vadd.f32 %v4422_v10, %v15563_v44  ;;  %v15672_v21 = vadd.f32 %v4622_v35, %v4465_v5 }
 0x204   : > { %v12729_v8 = vpop.f32.mrf.mxu1  ;;  %v12749_v33 = vpop.f32.mrf.mxu0  ;;  %13047 = vmatmul.mubr.msk.f32.gmra.mxu1 %vm289_vm2, %v7212_v36  ;;  %13067 = vmatmul.mubr.msk.f32.gmra.mxu0 %vm289_vm2, %v15142_v46 }
 0x205   : > { %v4470_v20 = vadd.f32 %v12729_v8, %v15570_v38  ;;  %v15678_v54 = vadd.f32 %v12749_v33, %v4468_v0  ;;  %13049 = vmatprep.mubr.msk.f32.mxu1 %vm289_vm2, %v7213_v57  ;;  %13069 = vmatprep.mubr.msk.f32.mxu0 %vm289_vm2, %v15146_v1  ;;  %v7216_v1 = vld [vmem:[%s13598_s4 + $0x95] sm:$0xff]  ;;  %v15713_v57 = vld [vmem:[%s13598_s4 + $0x9e] sm:$0xff] }
 0x206   : > { %v4432_v44 = vpop.f32.mrf.mxu1  ;;  %v4632_v48 = vpop.f32.mrf.mxu0 }
 0x207   : > { %v4469_v52 = vadd.f32 %v4432_v44, %v15583_v51  ;;  %v15686_v40 = vadd.f32 %v4632_v48, %v4467_v63  ;;  %v7625_v63 = vld [vmem:[%s13598_s4 + $0x46] sm:$0xff] }
 0x208   : > { %v12732_v46 = vpop.f32.mrf.mxu1  ;;  %v12752_v42 = vpop.f32.mrf.mxu0  ;;  %13050 = vmatmul.mubr.msk.f32.gmra.mxu1 %vm289_vm2, %v7214_v41  ;;  %13070 = vmatmul.mubr.msk.f32.gmra.mxu0 %vm289_vm2, %v15162_v15  ;;  %v7626_v41 = vld [vmem:[%s13598_s4 + $0x4e] sm:$0xff] }
 0x209   : > { %v4472_v38 = vadd.f32 %v12732_v46, %v15590_v39  ;;  %v15692_v53 = vadd.f32 %v12752_v42, %v4470_v20  ;;  %13052 = vmatprep.mubr.msk.f32.mxu1 %vm289_vm2, %v7215_v61  ;;  %13072 = vmatprep.mubr.msk.f32.mxu0 %vm289_vm2, %v15166_v62  ;;  %v15733_v61 = vld [vmem:[%s13598_s4 + $0x56] sm:$0xff] }
 0x20a   : > { %v4442_v51 = vpop.f32.mrf.mxu1  ;;  %v4642_v5 = vpop.f32.mrf.mxu0 }
 0x20b   : > { %v4471_v56 = vadd.f32 %v4442_v51, %v15602_v9  ;;  %v15700_v0 = vadd.f32 %v4642_v5, %v4469_v52  ;;  %v7218_v9 = vld [vmem:[%s13598_s4 + $0xa5] sm:$0xff]  ;;  %v7836_v5 = vld [vmem:[%s13598_s4 + $0x4f] sm:$0xff] }
 0x20c   : > { %v12735_v15 = vpop.f32.mrf.mxu1  ;;  %v12755_v39 = vpop.f32.mrf.mxu0  ;;  %13053 = vmatmul.mubr.msk.f32.gmra.mxu1 %vm289_vm2, %v7216_v1  ;;  %13073 = vmatmul.mubr.msk.f32.gmra.mxu0 %vm289_vm2, %v15182_v24 }
 0x20d   : > { %v4474_v36 = vadd.f32 %v12735_v15, %v15608_v47  ;;  %v15706_v62 = vadd.f32 %v12755_v39, %v4472_v38  ;;  %13055 = vmatprep.mubr.msk.f32.mxu1 %vm289_vm2, %v7217_v60  ;;  %13075 = vmatprep.mubr.msk.f32.mxu0 %vm289_vm2, %v15186_v28  ;;  %v15743_v38 = vld [vmem:[%s13603_s7 + $0x9c] sm:$0xf]  ;;  %v15758_v15 = vld [vmem:[%s13598_s4 + $0x66] sm:$0xff] }
 0x20e   : > { %v4452_v10 = vpop.f32.mrf.mxu1  ;;  %v4652_v35 = vpop.f32.mrf.mxu0 }
 0x20f   : > { %v4473_v24 = vadd.f32 %v4452_v10, %v15616_v14  ;;  %v15717_v47 = vadd.f32 %v4652_v35, %v4471_v56  ;;  %v15729_v14 = vld [vmem:[%s13598_s4 + $0xa6] sm:$0xff] }
 0x210   : > { %v12758_v8 = vpop.f32.mrf.mxu0  ;;  %v12763_v33 = vpop.f32.mrf.mxu1  ;;  %13056 = vmatmul.mubr.msk.f32.gmra.mxu1 %vm289_vm2, %v7218_v9  ;;  %13076 = vmatmul.mubr.msk.f32.gmra.mxu0 %vm289_vm2, %v15202_v37  ;;  %v7835_v37 = vld [vmem:[%s13598_s4 + $0x47] sm:$0xff]  ;;  %v15767_v9 = vld [vmem:[%s13603_s7 + $0xa0] sm:$0xf] }
 0x211   : > { %v15722_v28 = vadd.f32 %v12758_v8, %v4474_v36  ;;  %v4882_v20 = vadd.f32 %v12763_v33, %v15625_v22  ;;  %13078 = vmatprep.mubr.msk.f32.mxu0 %vm289_vm2, %v15713_v57  ;;  %13083 = vmatprep.mubr.msk.f32.mxu1 %vm289_vm2, %v7625_v63  ;;  %v7837_v36 = vld [vmem:[%s13598_s4 + $0x57] sm:$0xff]  ;;  %v15780_v63 = vld [vmem:[%s13598_s4 + $0x6e] sm:$0xff] }
 0x212   : > { %v4662_v44 = vpop.f32.mrf.mxu0  ;;  %v4812_v48 = vpop.f32.mrf.mxu1 }
 0x213   : > { %v15736_v52 = vadd.f32 %v4662_v44, %v4473_v24  ;;  %v4881_v22 = vadd.f32 %v4812_v48, %v15635_v32  ;;  %v15752_v32 = vld [vmem:[%s13598_s4 + $0x5e] sm:$0xff] }
 0x214   : > { %v12766_v46 = vpop.f32.mrf.mxu1  ;;  %v12786_v42 = vpop.f32.mrf.mxu0  ;;  %13079 = vmatmul.mubr.msk.f32.gmra.mxu0 %vm289_vm2, %v15729_v14  ;;  %13084 = vmatmul.mubr.msk.f32.vlgmr.msra.gmra.mxu1 %vm289_vm2, %v7626_v41  ;;  %v7838_v24 = vld [vmem:[%s13598_s4 + $0x5f] sm:$0xff] }
 0x215   : > { %v4884_v1 = vadd.f32 %v12766_v46, %v15646_v17  ;;  %v15746_v51 = vadd.f32 %v12786_v42, %v4882_v20  ;;  %13086 = vmatprep.mubr.msk.f32.mxu1 %vm289_vm2, %v15733_v61  ;;  %13106 = vmatprep.mubr.msk.f32.mxu0 %vm289_vm2, %v7835_v37  ;;  %v15785_v20 = vld [vmem:[%s13598_s4 + $0x76] sm:$0xff]  ;;  %v15803_v46 = vld [vmem:[%s13598_s4 + $0x7e] sm:$0xff] }
 0x216   : > { %v4822_v60 = vpop.f32.mrf.mxu1  ;;  %v5022_v56 = vpop.f32.mrf.mxu0  ;;  %13128 = vmatpush3.msk.msra.mxu1 %vm332_vm1, %v15622_v27 }
 0x217   : > { %v4883_v17 = vadd.f32 %v4822_v60, %v15658_v30  ;;  %v15761_v39 = vadd.f32 %v5022_v56, %v4881_v22  ;;  %13173 = vmatprep.subr.msk.mxu1 %vm332_vm1, %v15743_v38  ;;  %v7841_v60 = vld [vmem:[%s13598_s4 + $0x77] sm:$0xff] }
 0x218   : > { %v12769_v10 = vpop.f32.mrf.mxu1  ;;  %v12789_v35 = vpop.f32.mrf.mxu0  ;;  %13087 = vmatmul.mubr.msk.f32.gmra.mxu1 %vm289_vm2, %v15752_v32  ;;  %13107 = vmatmul.mubr.msk.f32.vlgmr.msra.gmra.mxu0 %vm289_vm2, %v7836_v5  ;;  %v15807_v5 = vld [vmem:[%s13598_s4 + $0x86] sm:$0xff] }
 0x219   : > { %v4886_v27 = vadd.f32 %v12769_v10, %v15664_v4  ;;  %v15773_v30 = vadd.f32 %v12789_v35, %v4884_v1  ;;  %13151 = vmatpush3.msk.msra.mxu0 %vm332_vm1, %v15640_v18  ;;  %13089 = vmatprep.mubr.msk.f32.mxu1 %vm289_vm2, %v15758_v15  ;;  %v7839_v4 = vld [vmem:[%s13598_s4 + $0x67] sm:$0xff] }
 0x21a   : > { %v4832_v8 = vpop.f32.mrf.mxu1  ;;  %v5032_v33 = vpop.f32.mrf.mxu0  ;;  %13109 = vmatprep.mubr.msk.f32.mxu0 %vm289_vm2, %v7837_v36  ;;  %13196 = vmatprep.subr.msk.mxu0 %vm332_vm1, %v15767_v9 }
 0x21b   : > { %v4885_v18 = vadd.f32 %v4832_v8, %v15672_v21  ;;  %v15791_v41 = vadd.f32 %v5032_v33, %v4883_v17  ;;  %v7840_v21 = vld [vmem:[%s13598_s4 + $0x6f] sm:$0xff] }
 0x21c   : > { %v12772_v44 = vpop.f32.mrf.mxu1  ;;  %v12792_v48 = vpop.f32.mrf.mxu0  ;;  %13090 = vmatmul.mubr.msk.f32.gmra.mxu1 %vm289_vm2, %v15780_v63  ;;  %13110 = vmatmul.mubr.msk.f32.gmra.mxu0 %vm289_vm2, %v7838_v24  ;;  %v15827_v33 = vld [vmem:[%s13598_s4 + $0x96] sm:$0xff] }
 0x21d   : > { %v4888_v37 = vadd.f32 %v12772_v44, %v15678_v54  ;;  %v15797_v22 = vadd.f32 %v12792_v48, %v4886_v27  ;;  %13092 = vmatprep.mubr.msk.f32.mxu1 %vm289_vm2, %v15785_v20  ;;  %13112 = vmatprep.mubr.msk.f32.mxu0 %vm289_vm2, %v7839_v4  ;;  %v15823_v27 = vld [vmem:[%s13598_s4 + $0x8e] sm:$0xff] }
 0x21e   : > { %v4842_v42 = vpop.f32.mrf.mxu1  ;;  %v5042_v1 = vpop.f32.mrf.mxu0  ;;  %v7843_v4 = vld [vmem:[%s13598_s4 + $0x87] sm:$0xff] }
 0x21f   : > { %v4887_v54 = vadd.f32 %v4842_v42, %v15686_v40  ;;  %v15811_v56 = vadd.f32 %v5042_v1, %v4885_v18  ;;  %v7842_v40 = vld [vmem:[%s13598_s4 + $0x7f] sm:$0xff] }
 0x220   : > { %v12775_v17 = vpop.f32.mrf.mxu1  ;;  %v12795_v36 = vpop.f32.mrf.mxu0  ;;  %13093 = vmatmul.mubr.msk.f32.gmra.mxu1 %vm289_vm2, %v15803_v46  ;;  %13113 = vmatmul.mubr.msk.f32.gmra.mxu0 %vm289_vm2, %v7840_v21 }
 0x221   : > { %v4890_v10 = vadd.f32 %v12775_v17, %v15692_v53  ;;  %v15817_v35 = vadd.f32 %v12795_v36, %v4888_v37  ;;  %13095 = vmatprep.mubr.msk.f32.mxu1 %vm289_vm2, %v15807_v5  ;;  %13115 = vmatprep.mubr.msk.f32.mxu0 %vm289_vm2, %v7841_v60  ;;  %v7845_v60 = vld [vmem:[%s13598_s4 + $0x97] sm:$0xff] }
 0x222   : > { %v4852_v24 = vpop.f32.mrf.mxu1  ;;  %v5052_v8 = vpop.f32.mrf.mxu0 }
 0x223   : > { %v4889_v18 = vadd.f32 %v4852_v24, %v15700_v0  ;;  %v15831_v53 = vadd.f32 %v5052_v8, %v4887_v54  ;;  %v7844_v0 = vld [vmem:[%s13598_s4 + $0x8f] sm:$0xff] }
 0x224   : > { %v12778_v44 = vpop.f32.mrf.mxu1  ;;  %v12798_v48 = vpop.f32.mrf.mxu0  ;;  %13096 = vmatmul.mubr.msk.f32.gmra.mxu1 %vm289_vm2, %v15823_v27  ;;  %13116 = vmatmul.mubr.msk.f32.gmra.mxu0 %vm289_vm2, %v7842_v40  ;;  %v15857_v24 = vld [vmem:[%s13598_s4 + $0xae] sm:$0xff] }
 0x225   : > { %v4892_v37 = vadd.f32 %v12778_v44, %v15706_v62  ;;  %v15837_v21 = vadd.f32 %v12798_v48, %v4890_v10  ;;  %13098 = vmatprep.mubr.msk.f32.mxu1 %vm289_vm2, %v15827_v33  ;;  %13118 = vmatprep.mubr.msk.f32.mxu0 %vm289_vm2, %v7843_v4 }
 0x226   : > { %v4862_v42 = vpop.f32.mrf.mxu1  ;;  %v5062_v1 = vpop.f32.mrf.mxu0 }
 0x227   : > { %v4891_v54 = vadd.f32 %v4862_v42, %v15717_v47  ;;  %v15845_v17 = vadd.f32 %v5062_v1, %v4889_v18  ;;  %v7846_v47 = vld [vmem:[%s13598_s4 + $0x9f] sm:$0xff]  ;;  %v7847_v18 = vld [vmem:[%s13598_s4 + $0xa7] sm:$0xff]  ;;  %v7848_v42 = vld [vmem:[%s13598_s4 + $0xaf] sm:$0xff] }
 0x228   : > { %v12781_v62 = vpop.f32.mrf.mxu1  ;;  %v12801_v36 = vpop.f32.mrf.mxu0  ;;  %13099 = vmatmul.mubr.msk.f32.gmra.mxu1 %vm289_vm2, %v15713_v57  ;;  %13119 = vmatmul.mubr.msk.f32.gmra.mxu0 %vm289_vm2, %v7844_v0  ;;  %v8045_v57 = vld [vmem:[%s13598_s4 + $0x48] sm:$0xff] }
 0x229   : > { %v4894_v10 = vadd.f32 %v12781_v62, %v15722_v28  ;;  %v15851_v40 = vadd.f32 %v12801_v36, %v4892_v37  ;;  %13101 = vmatprep.mubr.msk.f32.mxu1 %vm289_vm2, %v15729_v14  ;;  %13121 = vmatprep.mubr.msk.f32.mxu0 %vm289_vm2, %v7845_v60 }
 0x22a   : > { %v4872_v8 = vpop.f32.mrf.mxu1  ;;  %v5072_v4 = vpop.f32.mrf.mxu0 }
 0x22b   : > { %v4893_v44 = vadd.f32 %v4872_v8, %v15736_v52  ;;  %v15863_v28 = vadd.f32 %v5072_v4, %v4891_v54  ;;  %v8046_v52 = vld [vmem:[%s13598_s4 + $0x50] sm:$0xff]  ;;  %v15876_v54 = vld [vmem:[%s13598_s4 + $0x58] sm:$0xff] }
 0x22c   : > { %v12804_v48 = vpop.f32.mrf.mxu0  ;;  %v12809_v37 = vpop.f32.mrf.mxu1  ;;  %13102 = vmatmul.mubr.msk.f32.gmra.mxu1 %vm289_vm2, %v15857_v24  ;;  %13122 = vmatmul.mubr.msk.f32.gmra.mxu0 %vm289_vm2, %v7846_v47 }
 0x22d   : > { %v15868_v14 = vadd.f32 %v12804_v48, %v4894_v10  ;;  %v5302_v0 = vadd.f32 %v12809_v37, %v15746_v51  ;;  %13124 = vmatprep.mubr.msk.f32.mxu0 %vm289_vm2, %v7847_v18  ;;  %13129 = vmatprep.mubr.msk.f32.mxu1 %vm289_vm2, %v8045_v57  ;;  %v15884_v51 = vld [vmem:[%s13603_s7 + $0xa4] sm:$0xf]  ;;  %v15907_v37 = vld [vmem:[%s13603_s7 + $0xa8] sm:$0xf] }
 0x22e   : > { %v5082_v1 = vpop.f32.mrf.mxu0  ;;  %v5232_v60 = vpop.f32.mrf.mxu1 }
 0x22f   : > { %v15878_v62 = vadd.f32 %v5082_v1, %v4893_v44  ;;  %v5301_v36 = vadd.f32 %v5232_v60, %v15761_v39  ;;  %v15894_v39 = vld [vmem:[%s13598_s4 + $0x60] sm:$0xff]  ;;  %v15899_v44 = vld [vmem:[%s13598_s4 + $0x68] sm:$0xff] }
 0x230   : > { %v12812_v10 = vpop.f32.mrf.mxu1  ;;  %v12832_v47 = vpop.f32.mrf.mxu0  ;;  %13125 = vmatmul.mubr.msk.f32.gmra.mxu0 %vm289_vm2, %v7848_v42  ;;  %13130 = vmatmul.mubr.msk.f32.vlgmr.msra.gmra.mxu1 %vm289_vm2, %v8046_v52 }
 0x231   : > { %v5304_v8 = vadd.f32 %v12812_v10, %v15773_v30  ;;  %v15887_v4 = vadd.f32 %v12832_v47, %v5302_v0  ;;  %13132 = vmatprep.mubr.msk.f32.mxu1 %vm289_vm2, %v15876_v54  ;;  %13152 = vmatprep.mubr.msk.f32.mxu0 %vm289_vm2, %v15320_v13 }
 0x232   : > { %v5242_v18 = vpop.f32.mrf.mxu1  ;;  %v5442_v57 = vpop.f32.mrf.mxu0  ;;  %13174 = vmatpush3.msk.msra.mxu1 %vm332_vm1, %v15743_v38 }
 0x233   : > { %v5303_v30 = vadd.f32 %v5242_v18, %v15791_v41  ;;  %v15902_v48 = vadd.f32 %v5442_v57, %v5301_v36  ;;  %13219 = vmatprep.subr.msk.mxu1 %vm332_vm1, %v15884_v51  ;;  %v15921_v41 = vld [vmem:[%s13598_s4 + $0x70] sm:$0xff]  ;;  %v15948_v18 = vld [vmem:[%s13598_s4 + $0x88] sm:$0xff] }
 0x234   : > { %v12815_v13 = vpop.f32.mrf.mxu1  ;;  %v12835_v0 = vpop.f32.mrf.mxu0  ;;  %13133 = vmatmul.mubr.msk.f32.gmra.mxu1 %vm289_vm2, %v15894_v39  ;;  %13153 = vmatmul.mubr.msk.f32.vlgmr.msra.gmra.mxu0 %vm289_vm2, %v15338_v25  ;;  %v15926_v25 = vld [vmem:[%s13598_s4 + $0x78] sm:$0xff] }
 0x235   : > { %v5306_v38 = vadd.f32 %v12815_v13, %v15797_v22  ;;  %v15914_v42 = vadd.f32 %v12835_v0, %v5304_v8  ;;  %13197 = vmatpush3.msk.msra.mxu0 %vm332_vm1, %v15767_v9  ;;  %13135 = vmatprep.mubr.msk.f32.mxu1 %vm289_vm2, %v15899_v44 }
 0x236   : > { %v5252_v52 = vpop.f32.mrf.mxu1  ;;  %v5452_v1 = vpop.f32.mrf.mxu0  ;;  %13155 = vmatprep.mubr.msk.f32.mxu0 %vm289_vm2, %v15344_v16  ;;  %13242 = vmatprep.subr.msk.mxu0 %vm332_vm1, %v15907_v37 }
 0x237   : > { %v5305_v22 = vadd.f32 %v5252_v52, %v15811_v56  ;;  %v15931_v9 = vadd.f32 %v5452_v1, %v5303_v30  ;;  %v15945_v56 = vld [vmem:[%s13598_s4 + $0x80] sm:$0xff]  ;;  %v15968_v52 = vld [vmem:[%s13598_s4 + $0x98] sm:$0xff] }
 0x238   : > { %v12818_v60 = vpop.f32.mrf.mxu1  ;;  %v12838_v36 = vpop.f32.mrf.mxu0  ;;  %13136 = vmatmul.mubr.msk.f32.gmra.mxu1 %vm289_vm2, %v15921_v41  ;;  %13156 = vmatmul.mubr.msk.f32.gmra.mxu0 %vm289_vm2, %v15366_v19 }
 0x239   : > { %v5308_v16 = vadd.f32 %v12818_v60, %v15817_v35  ;;  %v15938_v10 = vadd.f32 %v12838_v36, %v5306_v38  ;;  %13138 = vmatprep.mubr.msk.f32.mxu1 %vm289_vm2, %v15926_v25  ;;  %13158 = vmatprep.mubr.msk.f32.mxu0 %vm289_vm2, %v15371_v31 }
 0x23a   : > { %v5262_v47 = vpop.f32.mrf.mxu1  ;;  %v5462_v8 = vpop.f32.mrf.mxu0 }
 0x23b   : > { %v5307_v19 = vadd.f32 %v5262_v47, %v15831_v53  ;;  %v15951_v57 = vadd.f32 %v5462_v8, %v5305_v22  ;;  %v15965_v53 = vld [vmem:[%s13598_s4 + $0x90] sm:$0xff]  ;;  %v15988_v47 = vld [vmem:[%s13598_s4 + $0xa8] sm:$0xff] }
 0x23c   : > { %v12821_v35 = vpop.f32.mrf.mxu1  ;;  %v12841_v30 = vpop.f32.mrf.mxu0  ;;  %13139 = vmatmul.mubr.msk.f32.gmra.mxu1 %vm289_vm2, %v15945_v56  ;;  %13159 = vmatmul.mubr.msk.f32.gmra.mxu0 %vm289_vm2, %v15389_v26 }
 0x23d   : > { %v5310_v31 = vadd.f32 %v12821_v35, %v15837_v21  ;;  %v15958_v13 = vadd.f32 %v12841_v30, %v5308_v16  ;;  %13141 = vmatprep.mubr.msk.f32.mxu1 %vm289_vm2, %v15948_v18  ;;  %13161 = vmatprep.mubr.msk.f32.mxu0 %vm289_vm2, %v15393_v50 }
 0x23e   : > { %v5272_v0 = vpop.f32.mrf.mxu1  ;;  %v5472_v38 = vpop.f32.mrf.mxu0 }
 0x23f   : > { %v5309_v26 = vadd.f32 %v5272_v0, %v15845_v17  ;;  %v15971_v1 = vadd.f32 %v5472_v38, %v5307_v19  ;;  %v15985_v17 = vld [vmem:[%s13598_s4 + $0xa0] sm:$0xff]  ;;  %v8267_v0 = vld [vmem:[%s13598_s4 + $0xa9] sm:$0xff] }
 0x240   : > { %v12824_v21 = vpop.f32.mrf.mxu1  ;;  %v12844_v22 = vpop.f32.mrf.mxu0  ;;  %13142 = vmatmul.mubr.msk.f32.gmra.mxu1 %vm289_vm2, %v15965_v53  ;;  %13162 = vmatmul.mubr.msk.f32.gmra.mxu0 %vm289_vm2, %v15409_v45  ;;  %v8465_v38 = vld [vmem:[%s13598_s4 + $0x4a] sm:$0xff] }
 0x241   : > { %v5312_v50 = vadd.f32 %v12824_v21, %v15851_v40  ;;  %v15978_v60 = vadd.f32 %v12844_v22, %v5310_v31  ;;  %13144 = vmatprep.mubr.msk.f32.mxu1 %vm289_vm2, %v15968_v52  ;;  %13164 = vmatprep.mubr.msk.f32.mxu0 %vm289_vm2, %v15412_v29  ;;  %v16939_v22 = vld [vmem:[#allocation10_spill] sm:$0xff] }
 0x242   : > { %v5282_v36 = vpop.f32.mrf.mxu1  ;;  %v5482_v16 = vpop.f32.mrf.mxu0 }
 0x243   : > { %v5311_v45 = vadd.f32 %v5282_v36, %v15863_v28  ;;  %v15991_v40 = vadd.f32 %v5482_v16, %v5309_v26  ;;  %v16005_v28 = vld [vmem:[%s13598_s4 + $0xb0] sm:$0xff] }
 0x244   : > { %v12827_v8 = vpop.f32.mrf.mxu1  ;;  %v12847_v19 = vpop.f32.mrf.mxu0  ;;  %13145 = vmatmul.mubr.msk.f32.gmra.mxu1 %vm289_vm2, %v15985_v17  ;;  %13165 = vmatmul.mubr.msk.f32.gmra.mxu0 %vm289_vm2, %v15429_v43  ;;  %v8466_v36 = vld [vmem:[%s13598_s4 + $0x52] sm:$0xff] }
 0x245   : > { %v5314_v29 = vadd.f32 %v12827_v8, %v15868_v14  ;;  %v15998_v35 = vadd.f32 %v12847_v19, %v5312_v50  ;;  %13147 = vmatprep.mubr.msk.f32.mxu1 %vm289_vm2, %v15988_v47  ;;  %13167 = vmatprep.mubr.msk.f32.mxu0 %vm289_vm2, %v15433_v55  ;;  %v16024_v8 = vld [vmem:[%s13598_s4 + $0x5a] sm:$0xff] }
 0x246   : > { %v5292_v30 = vpop.f32.mrf.mxu1  ;;  %v5492_v31 = vpop.f32.mrf.mxu0 }
 0x247   : > { %v5313_v43 = vadd.f32 %v5292_v30, %v15878_v62  ;;  %v16010_v14 = vadd.f32 %v5492_v31, %v5311_v45  ;;  %v8268_v62 = vld [vmem:[%s13598_s4 + $0xb1] sm:$0xff] }
 0x248   : > { %v12850_v26 = vpop.f32.mrf.mxu0  ;;  %v12855_v21 = vpop.f32.mrf.mxu1  ;;  %13148 = vmatmul.mubr.msk.f32.gmra.mxu1 %vm289_vm2, %v16005_v28  ;;  %13168 = vmatmul.mubr.msk.f32.gmra.mxu0 %vm289_vm2, %v16939_v22 }
 0x249   : > { %v16016_v55 = vadd.f32 %v12850_v26, %v5314_v29  ;;  %v5722_v50 = vadd.f32 %v12855_v21, %v15887_v4  ;;  %13170 = vmatprep.mubr.msk.f32.mxu0 %vm289_vm2, %v8267_v0  ;;  %13175 = vmatprep.mubr.msk.f32.mxu1 %vm289_vm2, %v8465_v38  ;;  %v16032_v4 = vld [vmem:[%s13603_s7 + $0xac] sm:$0xf] }
 0x24a   : > { %v5502_v16 = vpop.f32.mrf.mxu0  ;;  %v5652_v45 = vpop.f32.mrf.mxu1  ;;  %v16047_v21 = vld [vmem:[%s13598_s4 + $0x6a] sm:$0xff] }
 0x24b   : > { %v16026_v19 = vadd.f32 %v5502_v16, %v5313_v43  ;;  %v5721_v30 = vadd.f32 %v5652_v45, %v15902_v48  ;;  %v16042_v48 = vld [vmem:[%s13598_s4 + $0x62] sm:$0xff] }
 0x24c   : > { %v12858_v29 = vpop.f32.mrf.mxu1  ;;  %v12878_v31 = vpop.f32.mrf.mxu0  ;;  %13171 = vmatmul.mubr.msk.f32.gmra.mxu0 %vm289_vm2, %v8268_v62  ;;  %13176 = vmatmul.mubr.msk.f32.vlgmr.msra.gmra.mxu1 %vm289_vm2, %v8466_v36 }
 0x24d   : > { %v5724_v0 = vadd.f32 %v12858_v29, %v15914_v42  ;;  %v16035_v38 = vadd.f32 %v12878_v31, %v5722_v50  ;;  %13178 = vmatprep.mubr.msk.f32.mxu1 %vm289_vm2, %v16024_v8  ;;  %13198 = vmatprep.mubr.msk.f32.mxu0 %vm289_vm2, %v15468_v3  ;;  %v16055_v50 = vld [vmem:[%s13603_s7 + $0xb0] sm:$0xf] }
 0x24e   : > { %v5662_v43 = vpop.f32.mrf.mxu1  ;;  %v5862_v26 = vpop.f32.mrf.mxu0  ;;  %13220 = vmatpush3.msk.msra.mxu1 %vm332_vm1, %v15884_v51 }
 0x24f   : > { %v5723_v42 = vadd.f32 %v5662_v43, %v15931_v9  ;;  %v16050_v22 = vadd.f32 %v5862_v26, %v5721_v30  ;;  %13265 = vmatprep.subr.msk.mxu1 %vm332_vm1, %v16032_v4  ;;  %v16069_v9 = vld [vmem:[%s13598_s4 + $0x72] sm:$0xff]  ;;  %v16096_v26 = vld [vmem:[%s13598_s4 + $0x8a] sm:$0xff] }
 0x250   : > { %v12861_v3 = vpop.f32.mrf.mxu1  ;;  %v12881_v62 = vpop.f32.mrf.mxu0  ;;  %13179 = vmatmul.mubr.msk.f32.gmra.mxu1 %vm289_vm2, %v16042_v48  ;;  %13199 = vmatmul.mubr.msk.f32.vlgmr.msra.gmra.mxu0 %vm289_vm2, %v15486_v12  ;;  %v16074_v12 = vld [vmem:[%s13598_s4 + $0x7a] sm:$0xff] }
 0x251   : > { %v5726_v51 = vadd.f32 %v12861_v3, %v15938_v10  ;;  %v16062_v36 = vadd.f32 %v12881_v62, %v5724_v0  ;;  %13243 = vmatpush3.msk.msra.mxu0 %vm332_vm1, %v15907_v37  ;;  %13181 = vmatprep.mubr.msk.f32.mxu1 %vm289_vm2, %v16047_v21 }
 0x252   : > { %v5672_v16 = vpop.f32.mrf.mxu1  ;;  %v5872_v45 = vpop.f32.mrf.mxu0  ;;  %13201 = vmatprep.mubr.msk.f32.mxu0 %vm289_vm2, %v15491_v34  ;;  %13288 = vmatprep.subr.msk.mxu0 %vm332_vm1, %v16055_v50 }
 0x253   : > { %v5725_v10 = vadd.f32 %v5672_v16, %v15951_v57  ;;  %v16079_v37 = vadd.f32 %v5872_v45, %v5723_v42  ;;  %v16093_v57 = vld [vmem:[%s13598_s4 + $0x82] sm:$0xff]  ;;  %v16116_v45 = vld [vmem:[%s13598_s4 + $0x9a] sm:$0xff] }
 0x254   : > { %v12864_v30 = vpop.f32.mrf.mxu1  ;;  %v12884_v29 = vpop.f32.mrf.mxu0  ;;  %13182 = vmatmul.mubr.msk.f32.gmra.mxu1 %vm289_vm2, %v16069_v9  ;;  %13202 = vmatmul.mubr.msk.f32.gmra.mxu0 %vm289_vm2, %v15513_v6 }
 0x255   : > { %v5728_v34 = vadd.f32 %v12864_v30, %v15958_v13  ;;  %v16086_v31 = vadd.f32 %v12884_v29, %v5726_v51  ;;  %13184 = vmatprep.mubr.msk.f32.mxu1 %vm289_vm2, %v16074_v12  ;;  %13204 = vmatprep.mubr.msk.f32.mxu0 %vm289_vm2, %v15518_v58 }
 0x256   : > { %v5682_v0 = vpop.f32.mrf.mxu1  ;;  %v5882_v43 = vpop.f32.mrf.mxu0 }
 0x257   : > { %v5727_v6 = vadd.f32 %v5682_v0, %v15971_v1  ;;  %v16099_v42 = vadd.f32 %v5882_v43, %v5725_v10  ;;  %v16113_v1 = vld [vmem:[%s13598_s4 + $0x92] sm:$0xff]  ;;  %v16136_v43 = vld [vmem:[%s13598_s4 + $0xaa] sm:$0xff] }
 0x258   : > { %v12867_v13 = vpop.f32.mrf.mxu1  ;;  %v12887_v3 = vpop.f32.mrf.mxu0  ;;  %13185 = vmatmul.mubr.msk.f32.gmra.mxu1 %vm289_vm2, %v16093_v57  ;;  %13205 = vmatmul.mubr.msk.f32.gmra.mxu0 %vm289_vm2, %v15537_v11 }
 0x259   : > { %v5730_v58 = vadd.f32 %v12867_v13, %v15978_v60  ;;  %v16106_v62 = vadd.f32 %v12887_v3, %v5728_v34  ;;  %13187 = vmatprep.mubr.msk.f32.mxu1 %vm289_vm2, %v16096_v26  ;;  %13207 = vmatprep.mubr.msk.f32.mxu0 %vm289_vm2, %v15540_v59 }
 0x25a   : > { %v5692_v51 = vpop.f32.mrf.mxu1  ;;  %v5892_v16 = vpop.f32.mrf.mxu0 }
 0x25b   : > { %v5729_v11 = vadd.f32 %v5692_v51, %v15991_v40  ;;  %v16119_v10 = vadd.f32 %v5892_v16, %v5727_v6  ;;  %v16133_v40 = vld [vmem:[%s13598_s4 + $0xa2] sm:$0xff]  ;;  %v8687_v16 = vld [vmem:[%s13598_s4 + $0xab] sm:$0xff] }
 0x25c   : > { %v12870_v60 = vpop.f32.mrf.mxu1  ;;  %v12890_v30 = vpop.f32.mrf.mxu0  ;;  %13188 = vmatmul.mubr.msk.f32.gmra.mxu1 %vm289_vm2, %v16113_v1  ;;  %13208 = vmatmul.mubr.msk.f32.gmra.mxu0 %vm289_vm2, %v15557_v23 }
 0x25d   : > { %v5732_v59 = vadd.f32 %v12870_v60, %v15998_v35  ;;  %v16126_v29 = vadd.f32 %v12890_v30, %v5730_v58  ;;  %13190 = vmatprep.mubr.msk.f32.mxu1 %vm289_vm2, %v16116_v45  ;;  %13210 = vmatprep.mubr.msk.f32.mxu0 %vm289_vm2, %v15560_v2 }
 0x25e   : > { %v5702_v34 = vpop.f32.mrf.mxu1  ;;  %v5902_v0 = vpop.f32.mrf.mxu0 }
 0x25f   : > { %v5731_v23 = vadd.f32 %v5702_v34, %v16010_v14  ;;  %v16139_v35 = vadd.f32 %v5902_v0, %v5729_v11  ;;  %v16153_v14 = vld [vmem:[%s13598_s4 + $0xb2] sm:$0xff] }
 0x260   : > { %v12873_v6 = vpop.f32.mrf.mxu1  ;;  %v12893_v13 = vpop.f32.mrf.mxu0  ;;  %13191 = vmatmul.mubr.msk.f32.gmra.mxu1 %vm289_vm2, %v16133_v40  ;;  %13211 = vmatmul.mubr.msk.f32.gmra.mxu0 %vm289_vm2, %v15577_v7  ;;  %v8885_v11 = vld [vmem:[%s13598_s4 + $0x4c] sm:$0xff]  ;;  %v8886_v0 = vld [vmem:[%s13598_s4 + $0x54] sm:$0xff] }
 0x261   : > { %v5734_v2 = vadd.f32 %v12873_v6, %v16016_v55  ;;  %v16146_v3 = vadd.f32 %v12893_v13, %v5732_v59  ;;  %13193 = vmatprep.mubr.msk.f32.mxu1 %vm289_vm2, %v16136_v43  ;;  %13213 = vmatprep.mubr.msk.f32.mxu0 %vm289_vm2, %v15580_v49  ;;  %v16940_v59 = vld [vmem:[#allocation12_spill] sm:$0xff] }
 0x262   : > { %v5712_v58 = vpop.f32.mrf.mxu1  ;;  %v5912_v51 = vpop.f32.mrf.mxu0  ;;  %v8887_v13 = vld [vmem:[%s13598_s4 + $0x5c] sm:$0xff] }
 0x263   : > { %v5733_v7 = vadd.f32 %v5712_v58, %v16026_v19  ;;  %v16158_v55 = vadd.f32 %v5912_v51, %v5731_v23  ;;  %v8688_v19 = vld [vmem:[%s13598_s4 + $0xb3] sm:$0xff] }
 0x264   : > { %v12896_v60 = vpop.f32.mrf.mxu0  ;;  %v12901_v30 = vpop.f32.mrf.mxu1  ;;  %13194 = vmatmul.mubr.msk.f32.gmra.mxu1 %vm289_vm2, %v16153_v14  ;;  %13214 = vmatmul.mubr.msk.f32.gmra.mxu0 %vm289_vm2, %v16940_v59 }
 0x265   : > { %v16164_v49 = vadd.f32 %v12896_v60, %v5734_v2  ;;  %v6142_v34 = vadd.f32 %v12901_v30, %v16035_v38  ;;  %13216 = vmatprep.mubr.msk.f32.mxu0 %vm289_vm2, %v8687_v16  ;;  %13221 = vmatprep.mubr.msk.f32.mxu1 %vm289_vm2, %v8885_v11  ;;  %v16178_v38 = vld [vmem:[%s13603_s7 + $0xb4] sm:$0xf]  ;;  %v8889_v30 = vld [vmem:[%s13598_s4 + $0x6c] sm:$0xff] }
 0x266   : > { %v5922_v23 = vpop.f32.mrf.mxu0  ;;  %v6072_v6 = vpop.f32.mrf.mxu1 }
 0x267   : > { %v16172_v58 = vadd.f32 %v5922_v23, %v5733_v7  ;;  %v6141_v51 = vadd.f32 %v6072_v6, %v16050_v22  ;;  %v8888_v7 = vld [vmem:[%s13598_s4 + $0x64] sm:$0xff] }
 0x268   : > { %v12904_v59 = vpop.f32.mrf.mxu1  ;;  %v12924_v2 = vpop.f32.mrf.mxu0  ;;  %13217 = vmatmul.mubr.msk.f32.gmra.mxu0 %vm289_vm2, %v8688_v19  ;;  %13222 = vmatmul.mubr.msk.f32.vlgmr.msra.gmra.mxu1 %vm289_vm2, %v8886_v0 }
 0x269   : > { %v6144_v16 = vadd.f32 %v12904_v59, %v16062_v36  ;;  %v16181_v11 = vadd.f32 %v12924_v2, %v6142_v34  ;;  %13224 = vmatprep.mubr.msk.f32.mxu1 %vm289_vm2, %v8887_v13  ;;  %13244 = vmatprep.mubr.msk.f32.mxu0 %vm289_vm2, %v8886_v0  ;;  %v16195_v36 = vld [vmem:[%s13603_s7 + $0xb8] sm:$0xf]  ;;  %v8891_v2 = vld [vmem:[%s13598_s4 + $0x7c] sm:$0xff] }
 0x26a   : > { %v6082_v60 = vpop.f32.mrf.mxu1  ;;  %v6282_v22 = vpop.f32.mrf.mxu0  ;;  %13266 = vmatpush3.msk.msra.mxu1 %vm332_vm1, %v16032_v4 }
 0x26b   : > { %v6143_v19 = vadd.f32 %v6082_v60, %v16079_v37  ;;  %v16190_v23 = vadd.f32 %v6282_v22, %v6141_v51  ;;  %13311 = vmatprep.subr.msk.mxu1 %vm332_vm1, %v16178_v38  ;;  %v8890_v37 = vld [vmem:[%s13598_s4 + $0x74] sm:$0xff] }
 0x26c   : > { %v12907_v34 = vpop.f32.mrf.mxu1  ;;  %v12927_v0 = vpop.f32.mrf.mxu0  ;;  %13225 = vmatmul.mubr.msk.f32.gmra.mxu1 %vm289_vm2, %v8888_v7  ;;  %13245 = vmatmul.mubr.msk.f32.vlgmr.msra.gmra.mxu0 %vm289_vm2, %v8887_v13 }
 0x26d   : > { %v6146_v6 = vadd.f32 %v12907_v34, %v16086_v31  ;;  %v16200_v4 = vadd.f32 %v12927_v0, %v6144_v16  ;;  %13289 = vmatpush3.msk.msra.mxu0 %vm332_vm1, %v16055_v50  ;;  %13227 = vmatprep.mubr.msk.f32.mxu1 %vm289_vm2, %v8889_v30 }
 0x26e   : > { %v6092_v51 = vpop.f32.mrf.mxu1  ;;  %v6292_v59 = vpop.f32.mrf.mxu0  ;;  %13247 = vmatprep.mubr.msk.f32.mxu0 %vm289_vm2, %v8888_v7  ;;  %13334 = vmatprep.subr.msk.mxu0 %vm332_vm1, %v16195_v36  ;;  %v8892_v7 = vld [vmem:[%s13598_s4 + $0x84] sm:$0xff] }
 0x26f   : > { %v6145_v31 = vadd.f32 %v6092_v51, %v16099_v42  ;;  %v16211_v13 = vadd.f32 %v6292_v59, %v6143_v19  ;;  %v8893_v19 = vld [vmem:[%s13598_s4 + $0x8c] sm:$0xff] }
 0x270   : > { %v12910_v16 = vpop.f32.mrf.mxu1  ;;  %v12930_v60 = vpop.f32.mrf.mxu0  ;;  %13228 = vmatmul.mubr.msk.f32.gmra.mxu1 %vm289_vm2, %v8890_v37  ;;  %13248 = vmatmul.mubr.msk.f32.gmra.mxu0 %vm289_vm2, %v8889_v30 }
 0x271   : > { %v6148_v50 = vadd.f32 %v12910_v16, %v16106_v62  ;;  %v16216_v22 = vadd.f32 %v12930_v60, %v6146_v6  ;;  %13230 = vmatprep.mubr.msk.f32.mxu1 %vm289_vm2, %v8891_v2  ;;  %13250 = vmatprep.mubr.msk.f32.mxu0 %vm289_vm2, %v8890_v37  ;;  %v8894_v37 = vld [vmem:[%s13598_s4 + $0x94] sm:$0xff] }
 0x272   : > { %v6102_v34 = vpop.f32.mrf.mxu1  ;;  %v6302_v42 = vpop.f32.mrf.mxu0 }
 0x273   : > { %v6147_v0 = vadd.f32 %v6102_v34, %v16119_v10  ;;  %v16223_v51 = vadd.f32 %v6302_v42, %v6145_v31  ;;  %v8895_v31 = vld [vmem:[%s13598_s4 + $0x9c] sm:$0xff] }
 0x274   : > { %v12913_v59 = vpop.f32.mrf.mxu1  ;;  %v12933_v30 = vpop.f32.mrf.mxu0  ;;  %13231 = vmatmul.mubr.msk.f32.gmra.mxu1 %vm289_vm2, %v8892_v7  ;;  %13251 = vmatmul.mubr.msk.f32.gmra.mxu0 %vm289_vm2, %v8891_v2 }
 0x275   : > { %v6150_v62 = vadd.f32 %v12913_v59, %v16126_v29  ;;  %v16228_v6 = vadd.f32 %v12933_v30, %v6148_v50  ;;  %13233 = vmatprep.mubr.msk.f32.mxu1 %vm289_vm2, %v8893_v19  ;;  %13253 = vmatprep.mubr.msk.f32.mxu0 %vm289_vm2, %v8892_v7  ;;  %v8896_v7 = vld [vmem:[%s13598_s4 + $0xa4] sm:$0xff] }
 0x276   : > { %v6112_v16 = vpop.f32.mrf.mxu1  ;;  %v6312_v10 = vpop.f32.mrf.mxu0 }
 0x277   : > { %v6149_v60 = vadd.f32 %v6112_v16, %v16139_v35  ;;  %v16235_v34 = vadd.f32 %v6312_v10, %v6147_v0  ;;  %v8897_v0 = vld [vmem:[%s13598_s4 + $0xac] sm:$0xff] }
 0x278   : > { %v12916_v42 = vpop.f32.mrf.mxu1  ;;  %v12936_v2 = vpop.f32.mrf.mxu0  ;;  %13234 = vmatmul.mubr.msk.f32.gmra.mxu1 %vm289_vm2, %v8894_v37  ;;  %13254 = vmatmul.mubr.msk.f32.gmra.mxu0 %vm289_vm2, %v8893_v19 }
 0x279   : > { %v6152_v29 = vadd.f32 %v12916_v42, %v16146_v3  ;;  %v16240_v50 = vadd.f32 %v12936_v2, %v6150_v62  ;;  %13236 = vmatprep.mubr.msk.f32.mxu1 %vm289_vm2, %v8895_v31  ;;  %13256 = vmatprep.mubr.msk.f32.mxu0 %vm289_vm2, %v8894_v37  ;;  %v8898_v37 = vld [vmem:[%s13598_s4 + $0xb4] sm:$0xff] }
 0x27a   : > { %v6122_v59 = vpop.f32.mrf.mxu1  ;;  %v6322_v35 = vpop.f32.mrf.mxu0  ;;  %v9305_v42 = vld [vmem:[%s13598_s4 + $0x55] sm:$0xff] }
 0x27b   : > { %v6151_v30 = vadd.f32 %v6122_v59, %v16158_v55  ;;  %v16247_v16 = vadd.f32 %v6322_v35, %v6149_v60 }
 0x27c   : > { %v12919_v10 = vpop.f32.mrf.mxu1  ;;  %v12939_v19 = vpop.f32.mrf.mxu0  ;;  %13237 = vmatmul.mubr.msk.f32.gmra.mxu1 %vm289_vm2, %v8896_v7  ;;  %13257 = vmatmul.mubr.msk.f32.gmra.mxu0 %vm289_vm2, %v8895_v31 }
 0x27d   : > { %v6154_v3 = vadd.f32 %v12919_v10, %v16164_v49  ;;  %v16252_v62 = vadd.f32 %v12939_v19, %v6152_v29  ;;  %13239 = vmatprep.mubr.msk.f32.mxu1 %vm289_vm2, %v8897_v0  ;;  %13259 = vmatprep.mubr.msk.f32.mxu0 %vm289_vm2, %v8896_v7  ;;  %v9108_v7 = vld [vmem:[%s13598_s4 + $0xbc] sm:$0xff]  ;;  %v9307_v19 = vld [vmem:[%s13598_s4 + $0x65] sm:$0xff] }
 0x27e   : > { %v6132_v55 = vpop.f32.mrf.mxu1  ;;  %v6332_v60 = vpop.f32.mrf.mxu0 }
 0x27f   : > { %v6153_v2 = vadd.f32 %v6132_v55, %v16172_v58  ;;  %v16259_v59 = vadd.f32 %v6332_v60, %v6151_v30  ;;  %v9306_v58 = vld [vmem:[%s13598_s4 + $0x5d] sm:$0xff] }
 0x280   : > { %v12942_v31 = vpop.f32.mrf.mxu0  ;;  %v12947_v35 = vpop.f32.mrf.mxu1  ;;  %13240 = vmatmul.mubr.msk.f32.gmra.mxu1 %vm289_vm2, %v8898_v37  ;;  %13260 = vmatmul.mubr.msk.f32.gmra.mxu0 %vm289_vm2, %v8897_v0 }
 0x281   : > { %v16263_v49 = vadd.f32 %v12942_v31, %v6154_v3  ;;  %v6562_v29 = vadd.f32 %v12947_v35, %v16181_v11  ;;  %13262 = vmatprep.mubr.msk.f32.mxu0 %vm289_vm2, %v8898_v37  ;;  %13267 = vmatprep.mubr.msk.f32.mxu1 %vm289_vm2, %v9305_v42  ;;  %v16277_v11 = vld [vmem:[%s13603_s7 + $0xbc] sm:$0xf] }
 0x282   : > { %v6342_v30 = vpop.f32.mrf.mxu0  ;;  %v6492_v10 = vpop.f32.mrf.mxu1  ;;  %v9309_v35 = vld [vmem:[%s13598_s4 + $0x75] sm:$0xff] }
 0x283   : > { %v16271_v55 = vadd.f32 %v6342_v30, %v6153_v2  ;;  %v6561_v0 = vadd.f32 %v6492_v10, %v16190_v23  ;;  %v9308_v2 = vld [vmem:[%s13598_s4 + $0x6d] sm:$0xff] }
 0x284   : > { %v12950_v60 = vpop.f32.mrf.mxu1  ;;  %v12970_v3 = vpop.f32.mrf.mxu0  ;;  %13263 = vmatmul.mubr.msk.f32.gmra.mxu0 %vm289_vm2, %v9108_v7  ;;  %13268 = vmatmul.mubr.msk.f32.vlgmr.msra.gmra.mxu1 %vm289_vm2, %v9306_v58 }
 0x285   : > { %v6564_v37 = vadd.f32 %v12950_v60, %v16200_v4  ;;  %v16280_v42 = vadd.f32 %v12970_v3, %v6562_v29  ;;  %13270 = vmatprep.mubr.msk.f32.mxu1 %vm289_vm2, %v9307_v19  ;;  %13290 = vmatprep.mubr.msk.f32.mxu0 %vm289_vm2, %v15733_v61  ;;  %v16295_v4 = vld [vmem:[%s13603_s7 + $0xc0] sm:$0xf] }
 0x286   : > { %v6502_v23 = vpop.f32.mrf.mxu1  ;;  %v6702_v31 = vpop.f32.mrf.mxu0  ;;  %13312 = vmatpush3.msk.msra.mxu1 %vm332_vm1, %v16178_v38 }
 0x287   : > { %v6563_v7 = vadd.f32 %v6502_v23, %v16211_v13  ;;  %v16290_v58 = vadd.f32 %v6702_v31, %v6561_v0  ;;  %13357 = vmatprep.subr.msk.mxu1 %vm332_vm1, %v16277_v11  ;;  %v9310_v13 = vld [vmem:[%s13598_s4 + $0x7d] sm:$0xff]  ;;  %v9311_v0 = vld [vmem:[%s13598_s4 + $0x85] sm:$0xff]  ;;  %v9313_v23 = vld [vmem:[%s13598_s4 + $0x95] sm:$0xff] }
 0x288   : > { %v12953_v29 = vpop.f32.mrf.mxu1  ;;  %v12973_v61 = vpop.f32.mrf.mxu0  ;;  %13271 = vmatmul.mubr.msk.f32.gmra.mxu1 %vm289_vm2, %v9308_v2  ;;  %13291 = vmatmul.mubr.msk.f32.vlgmr.msra.gmra.mxu0 %vm289_vm2, %v15752_v32 }
 0x289   : > { %v6566_v38 = vadd.f32 %v12953_v29, %v16216_v22  ;;  %v16301_v30 = vadd.f32 %v12973_v61, %v6564_v37  ;;  %13335 = vmatpush3.msk.msra.mxu0 %vm332_vm1, %v16195_v36  ;;  %13273 = vmatprep.mubr.msk.f32.mxu1 %vm289_vm2, %v9309_v35 }
 0x28a   : > { %v6512_v10 = vpop.f32.mrf.mxu1  ;;  %v6712_v19 = vpop.f32.mrf.mxu0  ;;  %13293 = vmatprep.mubr.msk.f32.mxu0 %vm289_vm2, %v15758_v15  ;;  %13380 = vmatprep.subr.msk.mxu0 %vm332_vm1, %v16295_v4  ;;  %v9312_v15 = vld [vmem:[%s13598_s4 + $0x8d] sm:$0xff] }
 0x28b   : > { %v6565_v32 = vadd.f32 %v6512_v10, %v16223_v51  ;;  %v16313_v22 = vadd.f32 %v6712_v19, %v6563_v7 }
 0x28c   : > { %v12956_v60 = vpop.f32.mrf.mxu1  ;;  %v12976_v36 = vpop.f32.mrf.mxu0  ;;  %13274 = vmatmul.mubr.msk.f32.gmra.mxu1 %vm289_vm2, %v9310_v13  ;;  %13294 = vmatmul.mubr.msk.f32.gmra.mxu0 %vm289_vm2, %v15780_v63 }
 0x28d   : > { %v6568_v3 = vadd.f32 %v12956_v60, %v16228_v6  ;;  %v16319_v37 = vadd.f32 %v12976_v36, %v6566_v38  ;;  %13276 = vmatprep.mubr.msk.f32.mxu1 %vm289_vm2, %v9311_v0  ;;  %13296 = vmatprep.mubr.msk.f32.mxu0 %vm289_vm2, %v15785_v20  ;;  %v9314_v20 = vld [vmem:[%s13598_s4 + $0x9d] sm:$0xff]  ;;  %v9315_v38 = vld [vmem:[%s13598_s4 + $0xa5] sm:$0xff]  ;;  %v9316_v0 = vld [vmem:[%s13598_s4 + $0xad] sm:$0xff] }
 0x28e   : > { %v6522_v51 = vpop.f32.mrf.mxu1  ;;  %v6722_v2 = vpop.f32.mrf.mxu0  ;;  %v9317_v36 = vld [vmem:[%s13598_s4 + $0xb5] sm:$0xff] }
 0x28f   : > { %v6567_v31 = vadd.f32 %v6522_v51, %v16235_v34  ;;  %v16327_v35 = vadd.f32 %v6722_v2, %v6565_v32 }
 0x290   : > { %v12959_v63 = vpop.f32.mrf.mxu1  ;;  %v12979_v7 = vpop.f32.mrf.mxu0  ;;  %13277 = vmatmul.mubr.msk.f32.gmra.mxu1 %vm289_vm2, %v9312_v15  ;;  %13297 = vmatmul.mubr.msk.f32.gmra.mxu0 %vm289_vm2, %v15803_v46 }
 0x291   : > { %v6570_v6 = vadd.f32 %v12959_v63, %v16240_v50  ;;  %v16333_v29 = vadd.f32 %v12979_v7, %v6568_v3  ;;  %13279 = vmatprep.mubr.msk.f32.mxu1 %vm289_vm2, %v9313_v23  ;;  %13299 = vmatprep.mubr.msk.f32.mxu0 %vm289_vm2, %v15807_v5  ;;  %v9525_v3 = vld [vmem:[%s13598_s4 + $0xa6] sm:$0xff]  ;;  %v9318_v23 = vld [vmem:[%s13598_s4 + $0xbd] sm:$0xff] }
 0x292   : > { %v6532_v34 = vpop.f32.mrf.mxu1  ;;  %v6732_v61 = vpop.f32.mrf.mxu0  ;;  %v9527_v63 = vld [vmem:[%s13598_s4 + $0xb6] sm:$0xff] }
 0x293   : > { %v6569_v13 = vadd.f32 %v6532_v34, %v16247_v16  ;;  %v16341_v46 = vadd.f32 %v6732_v61, %v6567_v31  ;;  %v9524_v16 = vld [vmem:[%s13598_s4 + $0x9e] sm:$0xff] }
 0x294   : > { %v12962_v50 = vpop.f32.mrf.mxu1  ;;  %v12982_v10 = vpop.f32.mrf.mxu0  ;;  %13280 = vmatmul.mubr.msk.f32.gmra.mxu1 %vm289_vm2, %v9314_v20  ;;  %13300 = vmatmul.mubr.msk.f32.gmra.mxu0 %vm289_vm2, %v15823_v27  ;;  %v9725_v7 = vld [vmem:[%s13598_s4 + $0x57] sm:$0xff] }
 0x295   : > { %v6572_v5 = vadd.f32 %v12962_v50, %v16252_v62  ;;  %v16347_v19 = vadd.f32 %v12982_v10, %v6570_v6  ;;  %13282 = vmatprep.mubr.msk.f32.mxu1 %vm289_vm2, %v9315_v38  ;;  %13302 = vmatprep.mubr.msk.f32.mxu0 %vm289_vm2, %v15827_v33 }
 0x296   : > { %v6542_v32 = vpop.f32.mrf.mxu1  ;;  %v6742_v60 = vpop.f32.mrf.mxu0 }
 0x297   : > { %v6571_v27 = vadd.f32 %v6542_v32, %v16259_v59  ;;  %v16357_v15 = vadd.f32 %v6742_v60, %v6569_v13  ;;  %v9528_v13 = vld [vmem:[%s13598_s4 + $0xbe] sm:$0xff] }
 0x298   : > { %v12965_v62 = vpop.f32.mrf.mxu1  ;;  %v12985_v51 = vpop.f32.mrf.mxu0  ;;  %13283 = vmatmul.mubr.msk.f32.gmra.mxu1 %vm289_vm2, %v9316_v0  ;;  %13303 = vmatmul.mubr.msk.f32.gmra.mxu0 %vm289_vm2, %v9524_v16 }
 0x299   : > { %v6574_v33 = vadd.f32 %v12965_v62, %v16263_v49  ;;  %v16362_v2 = vadd.f32 %v12985_v51, %v6572_v5  ;;  %13285 = vmatprep.mubr.msk.f32.mxu1 %vm289_vm2, %v9317_v36  ;;  %13305 = vmatprep.mubr.msk.f32.mxu0 %vm289_vm2, %v9525_v3  ;;  %v9727_v5 = vld [vmem:[%s13598_s4 + $0x67] sm:$0xff]  ;;  %v9728_v36 = vld [vmem:[%s13598_s4 + $0x6f] sm:$0xff] }
 0x29a   : > { %v6552_v59 = vpop.f32.mrf.mxu1  ;;  %v6752_v31 = vpop.f32.mrf.mxu0 }
 0x29b   : > { %v6573_v6 = vadd.f32 %v6552_v59, %v16271_v55  ;;  %v16370_v20 = vadd.f32 %v6752_v31, %v6571_v27  ;;  %v9726_v55 = vld [vmem:[%s13598_s4 + $0x5f] sm:$0xff]  ;;  %v9731_v31 = vld [vmem:[%s13598_s4 + $0x87] sm:$0xff] }
 0x29c   : > { %v12988_v34 = vpop.f32.mrf.mxu0  ;;  %v12993_v49 = vpop.f32.mrf.mxu1  ;;  %13286 = vmatmul.mubr.msk.f32.gmra.mxu1 %vm289_vm2, %v9318_v23  ;;  %13306 = vmatmul.mubr.msk.f32.gmra.mxu0 %vm289_vm2, %v15857_v24 }
 0x29d   : > { %v16375_v61 = vadd.f32 %v12988_v34, %v6574_v33  ;;  %v6982_v38 = vadd.f32 %v12993_v49, %v16280_v42  ;;  %13308 = vmatprep.mubr.msk.f32.mxu0 %vm289_vm2, %v9527_v63  ;;  %13313 = vmatprep.mubr.msk.f32.mxu1 %vm289_vm2, %v9725_v7  ;;  %v9733_v49 = vld [vmem:[%s13598_s4 + $0x97] sm:$0xff] }
 0x29e   : > { %v6762_v50 = vpop.f32.mrf.mxu0  ;;  %v6912_v10 = vpop.f32.mrf.mxu1 }
 0x29f   : > { %v16383_v0 = vadd.f32 %v6762_v50, %v6573_v6  ;;  %v6981_v16 = vadd.f32 %v6912_v10, %v16290_v58  ;;  %v9729_v58 = vld [vmem:[%s13598_s4 + $0x77] sm:$0xff] }
 0x2a0   : > { %v12996_v24 = vpop.f32.mrf.mxu1  ;;  %v13016_v32 = vpop.f32.mrf.mxu0  ;;  %13309 = vmatmul.mubr.msk.f32.gmra.mxu0 %vm289_vm2, %v9528_v13  ;;  %13314 = vmatmul.mubr.msk.f32.vlgmr.msra.gmra.mxu1 %vm289_vm2, %v9726_v55 }
 0x2a1   : > { %v6984_v42 = vadd.f32 %v12996_v24, %v16301_v30  ;;  %v16389_v60 = vadd.f32 %v13016_v32, %v6982_v38  ;;  %13316 = vmatprep.mubr.msk.f32.mxu1 %vm289_vm2, %v9727_v5  ;;  %13336 = vmatprep.mubr.msk.f32.mxu0 %vm289_vm2, %v15876_v54  ;;  %v9735_v5 = vld [vmem:[%s13598_s4 + $0xa7] sm:$0xff] }
 0x2a2   : > { %v6922_v3 = vpop.f32.mrf.mxu1  ;;  %v7122_v27 = vpop.f32.mrf.mxu0  ;;  %13358 = vmatpush3.msk.msra.mxu1 %vm332_vm1, %v16277_v11  ;;  %v9730_v11 = vld [vmem:[%s13598_s4 + $0x7f] sm:$0xff] }
 0x2a3   : > { %v6983_v62 = vadd.f32 %v6922_v3, %v16313_v22  ;;  %v16399_v51 = vadd.f32 %v7122_v27, %v6981_v16  ;;  %v9737_v3 = vld [vmem:[%s13598_s4 + $0xb7] sm:$0xff] }
 0x2a4   : > { %v12999_v30 = vpop.f32.mrf.mxu1  ;;  %v13019_v33 = vpop.f32.mrf.mxu0  ;;  %13317 = vmatmul.mubr.msk.f32.gmra.mxu1 %vm289_vm2, %v9728_v36  ;;  %13337 = vmatmul.mubr.msk.f32.vlgmr.msra.gmra.mxu0 %vm289_vm2, %v15894_v39 }
 0x2a5   : > { %v6986_v54 = vadd.f32 %v12999_v30, %v16319_v37  ;;  %v16405_v23 = vadd.f32 %v13019_v33, %v6984_v42  ;;  %13381 = vmatpush3.msk.msra.mxu0 %vm332_vm1, %v16295_v4  ;;  %13319 = vmatprep.mubr.msk.f32.mxu1 %vm289_vm2, %v9729_v58 }
 0x2a6   : > { %v6932_v22 = vpop.f32.mrf.mxu1  ;;  %v7132_v59 = vpop.f32.mrf.mxu0  ;;  %13339 = vmatprep.mubr.msk.f32.mxu0 %vm289_vm2, %v15899_v44  ;;  %v9732_v44 = vld [vmem:[%s13598_s4 + $0x8f] sm:$0xff] }
 0x2a7   : > { %v6985_v39 = vadd.f32 %v6932_v22, %v16327_v35  ;;  %v16415_v63 = vadd.f32 %v7132_v59, %v6983_v62 }
 0x2a8   : > { %v13002_v37 = vpop.f32.mrf.mxu1  ;;  %v13022_v7 = vpop.f32.mrf.mxu0  ;;  %13320 = vmatmul.mubr.msk.f32.gmra.mxu1 %vm289_vm2, %v9730_v11  ;;  %13340 = vmatmul.mubr.msk.f32.gmra.mxu0 %vm289_vm2, %v15921_v41  ;;  %v10145_v11 = vld [vmem:[%s13598_s4 + $0x59] sm:$0xff] }
 0x2a9   : > { %v6988_v4 = vadd.f32 %v13002_v37, %v16333_v29  ;;  %v16421_v6 = vadd.f32 %v13022_v7, %v6986_v54  ;;  %13322 = vmatprep.mubr.msk.f32.mxu1 %vm289_vm2, %v9731_v31  ;;  %13342 = vmatprep.mubr.msk.f32.mxu0 %vm289_vm2, %v15926_v25  ;;  %v9734_v25 = vld [vmem:[%s13598_s4 + $0x9f] sm:$0xff] }
 0x2aa   : > { %v6942_v35 = vpop.f32.mrf.mxu1  ;;  %v7142_v34 = vpop.f32.mrf.mxu0  ;;  %v9947_v54 = vld [vmem:[%s13598_s4 + $0xb8] sm:$0xff] }
 0x2ab   : > { %v6987_v38 = vadd.f32 %v6942_v35, %v16341_v46  ;;  %v16429_v13 = vadd.f32 %v7142_v34, %v6985_v39  ;;  %v9948_v39 = vld [vmem:[%s13598_s4 + $0xc0] sm:$0xff] }
 0x2ac   : > { %v13005_v41 = vpop.f32.mrf.mxu1  ;;  %v13025_v55 = vpop.f32.mrf.mxu0  ;;  %13323 = vmatmul.mubr.msk.f32.gmra.mxu1 %vm289_vm2, %v9732_v44  ;;  %13343 = vmatmul.mubr.msk.f32.gmra.mxu0 %vm289_vm2, %v15945_v56 }
 0x2ad   : > { %v6990_v29 = vadd.f32 %v13005_v41, %v16347_v19  ;;  %v16435_v50 = vadd.f32 %v13025_v55, %v6988_v4  ;;  %13325 = vmatprep.mubr.msk.f32.mxu1 %vm289_vm2, %v9733_v49  ;;  %13345 = vmatprep.mubr.msk.f32.mxu0 %vm289_vm2, %v15948_v18  ;;  %v9736_v18 = vld [vmem:[%s13598_s4 + $0xaf] sm:$0xff]  ;;  %v10149_v55 = vld [vmem:[%s13598_s4 + $0x79] sm:$0xff] }
 0x2ae   : > { %v6952_v46 = vpop.f32.mrf.mxu1  ;;  %v7152_v10 = vpop.f32.mrf.mxu0  ;;  %v10147_v4 = vld [vmem:[%s13598_s4 + $0x69] sm:$0xff] }
 0x2af   : > { %v6989_v16 = vadd.f32 %v6952_v46, %v16357_v15  ;;  %v16443_v24 = vadd.f32 %v7152_v10, %v6987_v38  ;;  %v10148_v38 = vld [vmem:[%s13598_s4 + $0x71] sm:$0xff] }
 0x2b0   : > { %v13008_v56 = vpop.f32.mrf.mxu1  ;;  %v13028_v32 = vpop.f32.mrf.mxu0  ;;  %13326 = vmatmul.mubr.msk.f32.gmra.mxu1 %vm289_vm2, %v9734_v25  ;;  %13346 = vmatmul.mubr.msk.f32.gmra.mxu0 %vm289_vm2, %v15965_v53 }
 0x2b1   : > { %v6992_v19 = vadd.f32 %v13008_v56, %v16362_v2  ;;  %v16449_v42 = vadd.f32 %v13028_v32, %v6990_v29  ;;  %13328 = vmatprep.mubr.msk.f32.mxu1 %vm289_vm2, %v9735_v5  ;;  %13348 = vmatprep.mubr.msk.f32.mxu0 %vm289_vm2, %v15968_v52  ;;  %v10151_v56 = vld [vmem:[%s13598_s4 + $0x89] sm:$0xff] }
 0x2b2   : > { %v6962_v15 = vpop.f32.mrf.mxu1  ;;  %v7162_v36 = vpop.f32.mrf.mxu0 }
 0x2b3   : > { %v6991_v27 = vadd.f32 %v6962_v15, %v16370_v20  ;;  %v16457_v58 = vadd.f32 %v7162_v36, %v6989_v16  ;;  %v9738_v20 = vld [vmem:[%s13598_s4 + $0xbf] sm:$0xff] }
 0x2b4   : > { %v13011_v53 = vpop.f32.mrf.mxu1  ;;  %v13031_v2 = vpop.f32.mrf.mxu0  ;;  %13329 = vmatmul.mubr.msk.f32.gmra.mxu1 %vm289_vm2, %v9736_v18  ;;  %13349 = vmatmul.mubr.msk.f32.gmra.mxu0 %vm289_vm2, %v15985_v17 }
 0x2b5   : > { %v6994_v62 = vadd.f32 %v13011_v53, %v16375_v61  ;;  %v16463_v52 = vadd.f32 %v13031_v2, %v6992_v19  ;;  %13331 = vmatprep.mubr.msk.f32.mxu1 %vm289_vm2, %v9737_v3  ;;  %13351 = vmatprep.mubr.msk.f32.mxu0 %vm289_vm2, %v15988_v47  ;;  %v10153_v3 = vld [vmem:[%s13598_s4 + $0x99] sm:$0xff] }
 0x2b6   : > { %v6972_v30 = vpop.f32.mrf.mxu1  ;;  %v7172_v33 = vpop.f32.mrf.mxu0 }
 0x2b7   : > { %v6993_v22 = vadd.f32 %v6972_v30, %v16383_v0  ;;  %v16472_v17 = vadd.f32 %v7172_v33, %v6991_v27  ;;  %v10146_v0 = vld [vmem:[%s13598_s4 + $0x61] sm:$0xff]  ;;  %v10155_v30 = vld [vmem:[%s13598_s4 + $0xa9] sm:$0xff] }
 0x2b8   : > { %v13034_v61 = vpop.f32.mrf.mxu0  ;;  %v13039_v59 = vpop.f32.mrf.mxu1  ;;  %13332 = vmatmul.mubr.msk.f32.gmra.mxu1 %vm289_vm2, %v9738_v20  ;;  %13352 = vmatmul.mubr.msk.f32.gmra.mxu0 %vm289_vm2, %v16005_v28 }
 0x2b9   : > { %v16477_v47 = vadd.f32 %v13034_v61, %v6994_v62  ;;  %v7402_v31 = vadd.f32 %v13039_v59, %v16389_v60  ;;  %13354 = vmatprep.mubr.msk.f32.mxu0 %vm289_vm2, %v9947_v54  ;;  %13359 = vmatprep.mubr.msk.f32.mxu1 %vm289_vm2, %v10145_v11  ;;  %v10157_v59 = vld [vmem:[%s13598_s4 + $0xb9] sm:$0xff] }
 0x2ba   : > { %v7182_v37 = vpop.f32.mrf.mxu0  ;;  %v7332_v7 = vpop.f32.mrf.mxu1 }
 0x2bb   : > { %v16485_v44 = vadd.f32 %v7182_v37, %v6993_v22  ;;  %v7401_v35 = vadd.f32 %v7332_v7, %v16399_v51 }
 0x2bc   : > { %v13042_v28 = vpop.f32.mrf.mxu1  ;;  %v13062_v34 = vpop.f32.mrf.mxu0  ;;  %13355 = vmatmul.mubr.msk.f32.gmra.mxu0 %vm289_vm2, %v9948_v39  ;;  %13360 = vmatmul.mubr.msk.f32.vlgmr.msra.gmra.mxu1 %vm289_vm2, %v10146_v0 }
 0x2bd   : > { %v7404_v60 = vadd.f32 %v13042_v28, %v16405_v23  ;;  %v16491_v49 = vadd.f32 %v13062_v34, %v7402_v31  ;;  %13362 = vmatprep.mubr.msk.f32.mxu1 %vm289_vm2, %v10147_v4  ;;  %13382 = vmatprep.mubr.msk.f32.mxu0 %vm289_vm2, %v16024_v8  ;;  %v10150_v8 = vld [vmem:[%s13598_s4 + $0x81] sm:$0xff] }
 0x2be   : > { %v7342_v41 = vpop.f32.mrf.mxu1  ;;  %v7542_v51 = vpop.f32.mrf.mxu0  ;;  %v10367_v4 = vld [vmem:[%s13598_s4 + $0xba] sm:$0xff] }
 0x2bf   : > { %v7403_v29 = vadd.f32 %v7342_v41, %v16415_v63  ;;  %v16499_v25 = vadd.f32 %v7542_v51, %v7401_v35 }
 0x2c0   : > { %v13045_v46 = vpop.f32.mrf.mxu1  ;;  %v13065_v10 = vpop.f32.mrf.mxu0  ;;  %13363 = vmatmul.mubr.msk.f32.gmra.mxu1 %vm289_vm2, %v10148_v38  ;;  %13383 = vmatmul.mubr.msk.f32.vlgmr.msra.gmra.mxu0 %vm289_vm2, %v16042_v48 }
 0x2c1   : > { %v7406_v23 = vadd.f32 %v13045_v46, %v16421_v6  ;;  %v16505_v5 = vadd.f32 %v13065_v10, %v7404_v60  ;;  %13365 = vmatprep.mubr.msk.f32.mxu1 %vm289_vm2, %v10149_v55  ;;  %13385 = vmatprep.mubr.msk.f32.mxu0 %vm289_vm2, %v16047_v21  ;;  %v10152_v21 = vld [vmem:[%s13598_s4 + $0x91] sm:$0xff] }
 0x2c2   : > { %v7352_v63 = vpop.f32.mrf.mxu1  ;;  %v7552_v16 = vpop.f32.mrf.mxu0 }
 0x2c3   : > { %v7405_v32 = vadd.f32 %v7352_v63, %v16429_v13  ;;  %v16513_v19 = vadd.f32 %v7552_v16, %v7403_v29 }
 0x2c4   : > { %v13048_v48 = vpop.f32.mrf.mxu1  ;;  %v13068_v18 = vpop.f32.mrf.mxu0  ;;  %13366 = vmatmul.mubr.msk.f32.gmra.mxu1 %vm289_vm2, %v10150_v8  ;;  %13386 = vmatmul.mubr.msk.f32.gmra.mxu0 %vm289_vm2, %v16069_v9 }
 0x2c5   : > { %v7408_v6 = vadd.f32 %v13048_v48, %v16435_v50  ;;  %v16519_v15 = vadd.f32 %v13068_v18, %v7406_v23  ;;  %13368 = vmatprep.mubr.msk.f32.mxu1 %vm289_vm2, %v10151_v56  ;;  %13388 = vmatprep.mubr.msk.f32.mxu0 %vm289_vm2, %v16074_v12  ;;  %v10154_v12 = vld [vmem:[%s13598_s4 + $0xa1] sm:$0xff] }
 0x2c6   : > { %v7362_v13 = vpop.f32.mrf.mxu1  ;;  %v7562_v36 = vpop.f32.mrf.mxu0 }
 0x2c7   : > { %v7407_v27 = vadd.f32 %v7362_v13, %v16443_v24  ;;  %v16527_v53 = vadd.f32 %v7562_v36, %v7405_v32 }
 0x2c8   : > { %v13051_v9 = vpop.f32.mrf.mxu1  ;;  %v13071_v2 = vpop.f32.mrf.mxu0  ;;  %13369 = vmatmul.mubr.msk.f32.gmra.mxu1 %vm289_vm2, %v10152_v21  ;;  %13389 = vmatmul.mubr.msk.f32.gmra.mxu0 %vm289_vm2, %v16093_v57 }
 0x2c9   : > { %v7410_v50 = vadd.f32 %v13051_v9, %v16449_v42  ;;  %v16533_v62 = vadd.f32 %v13071_v2, %v7408_v6  ;;  %13371 = vmatprep.mubr.msk.f32.mxu1 %vm289_vm2, %v10153_v3  ;;  %13391 = vmatprep.mubr.msk.f32.mxu0 %vm289_vm2, %v16096_v26  ;;  %v10156_v26 = vld [vmem:[%s13598_s4 + $0xb1] sm:$0xff] }
 0x2ca   : > { %v7372_v24 = vpop.f32.mrf.mxu1  ;;  %v7572_v20 = vpop.f32.mrf.mxu0 }
 0x2cb   : > { %v7409_v33 = vadd.f32 %v7372_v24, %v16457_v58  ;;  %v16541_v54 = vadd.f32 %v7572_v20, %v7407_v27 }
 0x2cc   : > { %v13054_v57 = vpop.f32.mrf.mxu1  ;;  %v13074_v11 = vpop.f32.mrf.mxu0  ;;  %13372 = vmatmul.mubr.msk.f32.gmra.mxu1 %vm289_vm2, %v10154_v12  ;;  %13392 = vmatmul.mubr.msk.f32.gmra.mxu0 %vm289_vm2, %v16113_v1 }
 0x2cd   : > { %v7412_v42 = vadd.f32 %v13054_v57, %v16463_v52  ;;  %v7620_v22 = vadd.f32 %v13074_v11, %v7410_v50  ;;  %13374 = vmatprep.mubr.msk.f32.mxu1 %vm289_vm2, %v10155_v30  ;;  %13394 = vmatprep.mubr.msk.f32.mxu0 %vm289_vm2, %v16116_v45  ;;  %v10158_v45 = vld [vmem:[%s13598_s4 + $0xc1] sm:$0xff] }
 0x2ce   : > { %v7382_v58 = vpop.f32.mrf.mxu1  ;;  %v7582_v61 = vpop.f32.mrf.mxu0 }
 0x2cf   : > { %v7411_v31 = vadd.f32 %v7382_v58, %v16472_v17  ;;  %v7619_v39 = vadd.f32 %v7582_v61, %v7409_v33 }
 0x2d0   : > { %v13057_v0 = vpop.f32.mrf.mxu1  ;;  %v13077_v37 = vpop.f32.mrf.mxu0  ;;  %13375 = vmatmul.mubr.msk.f32.gmra.mxu1 %vm289_vm2, %v10156_v26  ;;  %13395 = vmatmul.mubr.msk.f32.gmra.mxu0 %vm289_vm2, %v16133_v40 }
 0x2d1   : > { %v7414_v1 = vadd.f32 %v13057_v0, %v16477_v47  ;;  %v7622_v52 = vadd.f32 %v13077_v37, %v7412_v42  ;;  %13377 = vmatprep.mubr.msk.f32.mxu1 %vm289_vm2, %v10157_v59  ;;  %13397 = vmatprep.mubr.msk.f32.mxu0 %vm289_vm2, %v16136_v43  ;;  %v10368_v43 = vld [vmem:[%s13598_s4 + $0xc2] sm:$0xff] }
 0x2d2   : > { %v7392_v7 = vpop.f32.mrf.mxu1  ;;  %v7592_v17 = vpop.f32.mrf.mxu0 }
 0x2d3   : > { %v7413_v35 = vadd.f32 %v7392_v7, %v16485_v44  ;;  %v7621_v28 = vadd.f32 %v7592_v17, %v7411_v31 }
 0x2d4   : > { %v13080_v34 = vpop.f32.mrf.mxu0  ;;  %v13085_v60 = vpop.f32.mrf.mxu1  ;;  %13378 = vmatmul.mubr.msk.f32.gmra.mxu1 %vm289_vm2, %v10158_v45  ;;  %13398 = vmatmul.mubr.msk.f32.gmra.mxu0 %vm289_vm2, %v16153_v14 }
 0x2d5   : > { %v7624_v40 = vadd.f32 %v13080_v34, %v7414_v1  ;;  %v7822_v47 = vadd.f32 %v13085_v60, %v16491_v49  ;;  %13400 = vmatprep.mubr.msk.f32.mxu0 %vm289_vm2, %v10367_v4 }
 0x2d6   : > { %v7602_v38 = vpop.f32.mrf.mxu0  ;;  %v7752_v41 = vpop.f32.mrf.mxu1 }
 0x2d7   : > { %v7623_v51 = vadd.f32 %v7602_v38, %v7413_v35  ;;  %v7821_v55 = vadd.f32 %v7752_v41, %v16499_v25 }
 0x2d8   : > { %v13088_v44 = vpop.f32.mrf.mxu1  ;;  %v13108_v29 = vpop.f32.mrf.mxu0  ;;  %13401 = vmatmul.mubr.msk.f32.gmra.mxu0 %vm289_vm2, %v10368_v43 }
 0x2d9   : > { %v7824_v46 = vadd.f32 %v13088_v44, %v16505_v5  ;;  %v8032_v10 = vadd.f32 %v13108_v29, %v7822_v47 }
 0x2da   : > { %v7762_v23 = vpop.f32.mrf.mxu1  ;;  %v7962_v14 = vpop.f32.mrf.mxu0 }
 0x2db   : > { %v7823_v8 = vadd.f32 %v7762_v23, %v16513_v19  ;;  %v8031_v49 = vadd.f32 %v7962_v14, %v7821_v55 }
 0x2dc   : > { %v13091_v63 = vpop.f32.mrf.mxu1  ;;  %v13111_v16 = vpop.f32.mrf.mxu0 }
 0x2dd   : > { %v7826_v56 = vadd.f32 %v13091_v63, %v16519_v15  ;;  %v8034_v32 = vadd.f32 %v13111_v16, %v7824_v46 }
 0x2de   : > { %v7772_v48 = vpop.f32.mrf.mxu1  ;;  %v7972_v18 = vpop.f32.mrf.mxu0 }
 0x2df   : > { %v7825_v25 = vadd.f32 %v7772_v48, %v16527_v53  ;;  %v8033_v6 = vadd.f32 %v7972_v18, %v7823_v8 }
 0x2e0   : > { %v13094_v21 = vpop.f32.mrf.mxu1  ;;  %v13114_v13 = vpop.f32.mrf.mxu0 }
 0x2e1   : > { %v7828_v5 = vadd.f32 %v13094_v21, %v16533_v62  ;;  %v8036_v36 = vadd.f32 %v13114_v13, %v7826_v56 }
 0x2e2   : > { %v7782_v3 = vpop.f32.mrf.mxu1  ;;  %v7982_v27 = vpop.f32.mrf.mxu0 }
 0x2e3   : > { %v7827_v19 = vadd.f32 %v7782_v3, %v16541_v54  ;;  %v8035_v9 = vadd.f32 %v7982_v27, %v7825_v25 }
 0x2e4   : > { %v13097_v2 = vpop.f32.mrf.mxu1  ;;  %v13117_v50 = vpop.f32.mrf.mxu0 }
 0x2e5   : > { %v7830_v12 = vadd.f32 %v13097_v2, %v7620_v22  ;;  %v8038_v15 = vadd.f32 %v13117_v50, %v7828_v5 }
 0x2e6   : > { %v7792_v24 = vpop.f32.mrf.mxu1  ;;  %v7992_v20 = vpop.f32.mrf.mxu0 }
 0x2e7   : > { %v7829_v30 = vadd.f32 %v7792_v24, %v7619_v39  ;;  %v8037_v33 = vadd.f32 %v7992_v20, %v7827_v19 }
 0x2e8   : > { %v13100_v53 = vpop.f32.mrf.mxu1  ;;  %v13120_v57 = vpop.f32.mrf.mxu0 }
 0x2e9   : > { %v7832_v11 = vadd.f32 %v13100_v53, %v7622_v52  ;;  %v8040_v42 = vadd.f32 %v13120_v57, %v7830_v12 }
 0x2ea   : > { %v7802_v26 = vpop.f32.mrf.mxu1  ;;  %v8002_v62 = vpop.f32.mrf.mxu0 }
 0x2eb   : > { %v7831_v58 = vadd.f32 %v7802_v26, %v7621_v28  ;;  %v8039_v61 = vadd.f32 %v8002_v62, %v7829_v30 }
 0x2ec   : > { %v13103_v59 = vpop.f32.mrf.mxu1  ;;  %v13123_v31 = vpop.f32.mrf.mxu0 }
 0x2ed   : > { %v7834_v54 = vadd.f32 %v13103_v59, %v7624_v40  ;;  %v8042_v0 = vadd.f32 %v13123_v31, %v7832_v11 }
 0x2ee   : > { %v7812_v37 = vpop.f32.mrf.mxu1  ;;  %v8012_v1 = vpop.f32.mrf.mxu0 }
 0x2ef   : > { %v7833_v22 = vadd.f32 %v7812_v37, %v7623_v51  ;;  %v8041_v45 = vadd.f32 %v8012_v1, %v7831_v58 }
 0x2f0   : > { %v13126_v7 = vpop.f32.mrf.mxu0  ;;  %v13131_v17 = vpop.f32.mrf.mxu1 }
 0x2f1   : > { %v8044_v39 = vadd.f32 %v13126_v7, %v7834_v54  ;;  %v8242_v4 = vadd.f32 %v13131_v17, %v8032_v10 }
 0x2f2   : > { %v8022_v35 = vpop.f32.mrf.mxu0  ;;  %v8172_v34 = vpop.f32.mrf.mxu1 }
 0x2f3   : > { %v8043_v52 = vadd.f32 %v8022_v35, %v7833_v22  ;;  %v8241_v60 = vadd.f32 %v8172_v34, %v8031_v49 }
 0x2f4   : > { %v13134_v47 = vpop.f32.mrf.mxu1  ;;  %v13154_v43 = vpop.f32.mrf.mxu0 }
 0x2f5   : > { %v8244_v28 = vadd.f32 %v13134_v47, %v8034_v32  ;;  %v8452_v38 = vadd.f32 %v13154_v43, %v8242_v4 }
 0x2f6   : > { %v8182_v41 = vpop.f32.mrf.mxu1  ;;  %v8382_v55 = vpop.f32.mrf.mxu0 }
 0x2f7   : > { %v8243_v40 = vadd.f32 %v8182_v41, %v8033_v6  ;;  %v8451_v44 = vadd.f32 %v8382_v55, %v8241_v60 }
 0x2f8   : > { %v13137_v29 = vpop.f32.mrf.mxu1  ;;  %v13157_v46 = vpop.f32.mrf.mxu0 }
 0x2f9   : > { %v8246_v51 = vadd.f32 %v13137_v29, %v8036_v36  ;;  %v8454_v23 = vadd.f32 %v13157_v46, %v8244_v28 }
 0x2fa   : > { %v8192_v14 = vpop.f32.mrf.mxu1  ;;  %v8392_v8 = vpop.f32.mrf.mxu0 }
 0x2fb   : > { %v8245_v63 = vadd.f32 %v8192_v14, %v8035_v9  ;;  %v8453_v10 = vadd.f32 %v8392_v8, %v8243_v40 }
 0x2fc   : > { %v13140_v16 = vpop.f32.mrf.mxu1  ;;  %v13160_v56 = vpop.f32.mrf.mxu0 }
 0x2fd   : > { %v8248_v48 = vadd.f32 %v13140_v16, %v8038_v15  ;;  %v8456_v49 = vadd.f32 %v13160_v56, %v8246_v51 }
 0x2fe   : > { %v8202_v18 = vpop.f32.mrf.mxu1  ;;  %v8402_v25 = vpop.f32.mrf.mxu0 }
 0x2ff   : > { %v8247_v32 = vadd.f32 %v8202_v18, %v8037_v33  ;;  %v8455_v21 = vadd.f32 %v8402_v25, %v8245_v63 }
 0x300   : > { %v13143_v13 = vpop.f32.mrf.mxu1  ;;  %v13163_v5 = vpop.f32.mrf.mxu0 }
 0x301   : > { %v8250_v6 = vadd.f32 %v13143_v13, %v8040_v42  ;;  %v8458_v3 = vadd.f32 %v13163_v5, %v8248_v48 }
 0x302   : > { %v8212_v27 = vpop.f32.mrf.mxu1  ;;  %v8412_v19 = vpop.f32.mrf.mxu0 }
 0x303   : > { %v8249_v36 = vadd.f32 %v8212_v27, %v8039_v61  ;;  %v8457_v2 = vadd.f32 %v8412_v19, %v8247_v32 }
 0x304   : > { %v13146_v50 = vpop.f32.mrf.mxu1  ;;  %v13166_v12 = vpop.f32.mrf.mxu0 }
 0x305   : > { %v8252_v9 = vadd.f32 %v13146_v50, %v8042_v0  ;;  %v8460_v24 = vadd.f32 %v13166_v12, %v8250_v6 }
 0x306   : > { %v8222_v20 = vpop.f32.mrf.mxu1  ;;  %v8422_v30 = vpop.f32.mrf.mxu0 }
 0x307   : > { %v8251_v15 = vadd.f32 %v8222_v20, %v8041_v45  ;;  %v8459_v53 = vadd.f32 %v8422_v30, %v8249_v36 }
 0x308   : > { %v13149_v57 = vpop.f32.mrf.mxu1  ;;  %v13169_v11 = vpop.f32.mrf.mxu0 }
 0x309   : > { %v8254_v33 = vadd.f32 %v13149_v57, %v8044_v39  ;;  %v8462_v26 = vadd.f32 %v13169_v11, %v8252_v9 }
 0x30a   : > { %v8232_v62 = vpop.f32.mrf.mxu1  ;;  %v8432_v58 = vpop.f32.mrf.mxu0 }
 0x30b   : > { %v8253_v42 = vadd.f32 %v8232_v62, %v8043_v52  ;;  %v8461_v59 = vadd.f32 %v8432_v58, %v8251_v15 }
 0x30c   : > { %v13172_v31 = vpop.f32.mrf.mxu0  ;;  %v13177_v54 = vpop.f32.mrf.mxu1 }
 0x30d   : > { %v8464_v61 = vadd.f32 %v13172_v31, %v8254_v33  ;;  %v8662_v37 = vadd.f32 %v13177_v54, %v8452_v38 }
 0x30e   : > { %v8442_v1 = vpop.f32.mrf.mxu0  ;;  %v8592_v22 = vpop.f32.mrf.mxu1 }
 0x30f   : > { %v8463_v0 = vadd.f32 %v8442_v1, %v8253_v42  ;;  %v8661_v7 = vadd.f32 %v8592_v22, %v8451_v44 }
 0x310   : > { %v13180_v17 = vpop.f32.mrf.mxu1  ;;  %v13200_v4 = vpop.f32.mrf.mxu0 }
 0x311   : > { %v8664_v45 = vadd.f32 %v13180_v17, %v8454_v23  ;;  %v8872_v35 = vadd.f32 %v13200_v4, %v8662_v37 }
 0x312   : > { %v8602_v34 = vpop.f32.mrf.mxu1  ;;  %v8802_v60 = vpop.f32.mrf.mxu0 }
 0x313   : > { %v8663_v39 = vadd.f32 %v8602_v34, %v8453_v10  ;;  %v8871_v47 = vadd.f32 %v8802_v60, %v8661_v7 }
 0x314   : > { %v13183_v43 = vpop.f32.mrf.mxu1  ;;  %v13203_v28 = vpop.f32.mrf.mxu0 }
 0x315   : > { %v8666_v52 = vadd.f32 %v13183_v43, %v8456_v49  ;;  %v8874_v41 = vadd.f32 %v13203_v28, %v8664_v45 }
 0x316   : > { %v8612_v55 = vpop.f32.mrf.mxu1  ;;  %v8812_v40 = vpop.f32.mrf.mxu0 }
 0x317   : > { %v8665_v29 = vadd.f32 %v8612_v55, %v8455_v21  ;;  %v8873_v38 = vadd.f32 %v8812_v40, %v8663_v39 }
 0x318   : > { %v13186_v46 = vpop.f32.mrf.mxu1  ;;  %v13206_v51 = vpop.f32.mrf.mxu0 }
 0x319   : > { %v8668_v14 = vadd.f32 %v13186_v46, %v8458_v3  ;;  %v8876_v44 = vadd.f32 %v13206_v51, %v8666_v52 }
 0x31a   : > { %v8622_v8 = vpop.f32.mrf.mxu1  ;;  %v8822_v63 = vpop.f32.mrf.mxu0 }
 0x31b   : > { %v8667_v23 = vadd.f32 %v8622_v8, %v8457_v2  ;;  %v8875_v16 = vadd.f32 %v8822_v63, %v8665_v29 }
 0x31c   : > { %v13189_v56 = vpop.f32.mrf.mxu1  ;;  %v13209_v48 = vpop.f32.mrf.mxu0 }
 0x31d   : > { %v8670_v10 = vadd.f32 %v13189_v56, %v8460_v24  ;;  %v8878_v18 = vadd.f32 %v13209_v48, %v8668_v14 }
 0x31e   : > { %v8632_v25 = vpop.f32.mrf.mxu1  ;;  %v8832_v32 = vpop.f32.mrf.mxu0 }
 0x31f   : > { %v8669_v49 = vadd.f32 %v8632_v25, %v8459_v53  ;;  %v8877_v13 = vadd.f32 %v8832_v32, %v8667_v23 }
 0x320   : > { %v13192_v5 = vpop.f32.mrf.mxu1  ;;  %v13212_v6 = vpop.f32.mrf.mxu0 }
 0x321   : > { %v8672_v21 = vadd.f32 %v13192_v5, %v8462_v26  ;;  %v8880_v27 = vadd.f32 %v13212_v6, %v8670_v10 }
 0x322   : > { %v8642_v19 = vpop.f32.mrf.mxu1  ;;  %v8842_v36 = vpop.f32.mrf.mxu0 }
 0x323   : > { %v8671_v3 = vadd.f32 %v8642_v19, %v8461_v59  ;;  %v8879_v50 = vadd.f32 %v8842_v36, %v8669_v49 }
 0x324   : > { %v13195_v12 = vpop.f32.mrf.mxu1  ;;  %v13215_v9 = vpop.f32.mrf.mxu0 }
 0x325   : > { %v8674_v2 = vadd.f32 %v13195_v12, %v8464_v61  ;;  %v8882_v20 = vadd.f32 %v13215_v9, %v8672_v21 }
 0x326   : > { %v8652_v30 = vpop.f32.mrf.mxu1  ;;  %v8852_v15 = vpop.f32.mrf.mxu0 }
 0x327   : > { %v8673_v24 = vadd.f32 %v8652_v30, %v8463_v0  ;;  %v8881_v57 = vadd.f32 %v8852_v15, %v8671_v3 }
 0x328   : > { %v13218_v11 = vpop.f32.mrf.mxu0  ;;  %v13223_v33 = vpop.f32.mrf.mxu1 }
 0x329   : > { %v8884_v53 = vadd.f32 %v13218_v11, %v8674_v2  ;;  %v9082_v62 = vadd.f32 %v13223_v33, %v8872_v35 }
 0x32a   : > { %v8862_v58 = vpop.f32.mrf.mxu0  ;;  %v9012_v42 = vpop.f32.mrf.mxu1 }
 0x32b   : > { %v8883_v26 = vadd.f32 %v8862_v58, %v8673_v24  ;;  %v9081_v31 = vadd.f32 %v9012_v42, %v8871_v47 }
 0x32c   : > { %v13226_v54 = vpop.f32.mrf.mxu1  ;;  %v13246_v37 = vpop.f32.mrf.mxu0 }
 0x32d   : > { %v9084_v59 = vadd.f32 %v13226_v54, %v8874_v41  ;;  %v16577_v1 = vadd.f32 %v13246_v37, %v9082_v62 }
 0x32e   : > { %v9022_v22 = vpop.f32.mrf.mxu1  ;;  %v9222_v61 = vpop.f32.mrf.mxu0 }
 0x32f   : > { %v9083_v7 = vadd.f32 %v9022_v22, %v8873_v38  ;;  %v16579_v17 = vadd.f32 %v9222_v61, %v9081_v31 }
 0x330   : > { %v13229_v0 = vpop.f32.mrf.mxu1  ;;  %v13249_v4 = vpop.f32.mrf.mxu0 }
 0x331   : > { %v9086_v45 = vadd.f32 %v13229_v0, %v8876_v44  ;;  %v16581_v34 = vadd.f32 %v13249_v4, %v9084_v59 }
 0x332   : > { %v9032_v35 = vpop.f32.mrf.mxu1  ;;  %v9232_v60 = vpop.f32.mrf.mxu0 }
 0x333   : > { %v9085_v39 = vadd.f32 %v9032_v35, %v8875_v16  ;;  %v16583_v43 = vadd.f32 %v9232_v60, %v9083_v7 }
 0x334   : > { %v13232_v47 = vpop.f32.mrf.mxu1  ;;  %v13252_v28 = vpop.f32.mrf.mxu0 }
 0x335   : > { %v9088_v52 = vadd.f32 %v13232_v47, %v8878_v18  ;;  %v16585_v41 = vadd.f32 %v13252_v28, %v9086_v45 }
 0x336   : > { %v9042_v55 = vpop.f32.mrf.mxu1  ;;  %v9242_v40 = vpop.f32.mrf.mxu0 }
 0x337   : > { %v9087_v29 = vadd.f32 %v9042_v55, %v8877_v13  ;;  %v16587_v38 = vadd.f32 %v9242_v40, %v9085_v39 }
 0x338   : > { %v13235_v46 = vpop.f32.mrf.mxu1  ;;  %v13255_v51 = vpop.f32.mrf.mxu0 }
 0x339   : > { %v9090_v14 = vadd.f32 %v13235_v46, %v8880_v27  ;;  %v16589_v44 = vadd.f32 %v13255_v51, %v9088_v52 }
 0x33a   : > { %v9052_v8 = vpop.f32.mrf.mxu1  ;;  %v9252_v63 = vpop.f32.mrf.mxu0 }
 0x33b   : > { %v9089_v23 = vadd.f32 %v9052_v8, %v8879_v50  ;;  %v16591_v16 = vadd.f32 %v9252_v63, %v9087_v29 }
 0x33c   : > { %v13238_v56 = vpop.f32.mrf.mxu1  ;;  %v13258_v48 = vpop.f32.mrf.mxu0 }
 0x33d   : > { %v9092_v10 = vadd.f32 %v13238_v56, %v8882_v20  ;;  %v16593_v18 = vadd.f32 %v13258_v48, %v9090_v14 }
 0x33e   : > { %v9062_v25 = vpop.f32.mrf.mxu1  ;;  %v9262_v32 = vpop.f32.mrf.mxu0 }
 0x33f   : > { %v9091_v49 = vadd.f32 %v9062_v25, %v8881_v57  ;;  %v16595_v13 = vadd.f32 %v9262_v32, %v9089_v23 }
 0x340   : > { %v13241_v5 = vpop.f32.mrf.mxu1  ;;  %v13261_v6 = vpop.f32.mrf.mxu0 }
 0x341   : > { %v9094_v21 = vadd.f32 %v13241_v5, %v8884_v53  ;;  %v16597_v27 = vadd.f32 %v13261_v6, %v9092_v10 }
 0x342   : > { %v9072_v19 = vpop.f32.mrf.mxu1  ;;  %v9272_v36 = vpop.f32.mrf.mxu0 }
 0x343   : > { %v9093_v3 = vadd.f32 %v9072_v19, %v8883_v26  ;;  %v16599_v50 = vadd.f32 %v9272_v36, %v9091_v49 }
 0x344   : > { %v13264_v12 = vpop.f32.mrf.mxu0  ;;  %v13269_v9 = vpop.f32.mrf.mxu1 }
 0x345   : > { %v16601_v2 = vadd.f32 %v13264_v12, %v9094_v21 }
 0x346   : > { %v9282_v20 = vpop.f32.mrf.mxu0  ;;  %v9432_v30 = vpop.f32.mrf.mxu1 }
 0x347   : > { %16941 = vst [vmem:[#allocation14_spill] sm:$0xff] %v16601_v2  ;;  %v16603_v15 = vadd.f32 %v9282_v20, %v9093_v3 }
 0x348   : > { %v13272_v24 = vpop.f32.mrf.mxu1  ;;  %v13292_v57 = vpop.f32.mrf.mxu0 }
 0x349   : > { %16942 = vst [vmem:[#allocation3_spill] sm:$0xff] %v16603_v15  ;;  %v9501_v15 = vadd.f32 %v9432_v30, %v16579_v17 }
 0x34a   : > { %v9442_v11 = vpop.f32.mrf.mxu1  ;;  %v9642_v33 = vpop.f32.mrf.mxu0 }
 0x34c   : > { %v13275_v53 = vpop.f32.mrf.mxu1  ;;  %v13295_v62 = vpop.f32.mrf.mxu0 }
 0x34e   : > { %v16605_v58 = vpop.f32.mrf.mxu1  ;;  %v9652_v42 = vpop.f32.mrf.mxu0 }
 0x350   : > { %v16607_v26 = vpop.f32.mrf.mxu1  ;;  %v16609_v31 = vpop.f32.mrf.mxu0 }
 0x352   : > { %v16611_v54 = vpop.f32.mrf.mxu1  ;;  %v16613_v37 = vpop.f32.mrf.mxu0 }
 0x354   : > { %v16615_v59 = vpop.f32.mrf.mxu1  ;;  %v16617_v22 = vpop.f32.mrf.mxu0 }
 0x356   : > { %v16619_v61 = vpop.f32.mrf.mxu1  ;;  %v16621_v7 = vpop.f32.mrf.mxu0 }
 0x358   : > { %v16623_v0 = vpop.f32.mrf.mxu1  ;;  %v16625_v4 = vpop.f32.mrf.mxu0 }
 0x35a   : > { %v16627_v45 = vpop.f32.mrf.mxu1  ;;  %v16629_v35 = vpop.f32.mrf.mxu0 }
 0x35c   : > { %v16631_v60 = vpop.f32.mrf.mxu1  ;;  %v16633_v39 = vpop.f32.mrf.mxu0 }
 0x35d   : > { %16943 = vst [vmem:[#allocation4_spill] sm:$0xff] %v16631_v60  ;;  %16944 = vst [vmem:[#allocation5_spill] sm:$0xff] %v16633_v39 }
 0x35e   : > { %v16635_v47 = vpop.f32.mrf.mxu1  ;;  %v16637_v28 = vpop.f32.mrf.mxu0 }
 0x35f   : > { %16945 = vst [vmem:[#allocation6_spill] sm:$0xff] %v16635_v47  ;;  %16946 = vst [vmem:[#allocation7_spill] sm:$0xff] %v16637_v28 }
 0x360   : > { %v16639_v52 = vpop.f32.mrf.mxu0  ;;  %v13315_v55 = vpop.f32.mrf.mxu1 }
 0x361   : > { %16947 = vst [vmem:[#allocation8_spill] sm:$0xff] %v16639_v52 }
 0x362   : > { %v16641_v40 = vpop.f32.mrf.mxu0  ;;  %v9852_v29 = vpop.f32.mrf.mxu1 }
 0x363   : > { %16948 = vst [vmem:[#allocation9_spill] sm:$0xff] %v16641_v40  ;;  %v9502_v40 = vadd.f32 %v13269_v9, %v16577_v1  ;;  %v9503_v1 = vadd.f32 %v9442_v11, %v16583_v43 }
 0x364   : > { %v13318_v46 = vpop.f32.mrf.mxu1  ;;  %v13338_v51 = vpop.f32.mrf.mxu0 }
 0x365   : > { %v9712_v28 = vadd.f32 %v13292_v57, %v9502_v40  ;;  %v9713_v57 = vadd.f32 %v9652_v42, %v9503_v1 }
 0x366   : > { %v9862_v14 = vpop.f32.mrf.mxu1  ;;  %v10062_v8 = vpop.f32.mrf.mxu0 }
 0x367   : > { %v9923_v43 = vadd.f32 %v9862_v14, %v9713_v57 }
 0x368   : > { %v13321_v63 = vpop.f32.mrf.mxu1  ;;  %v13341_v23 = vpop.f32.mrf.mxu0 }
 0x36a   : > { %v9872_v56 = vpop.f32.mrf.mxu1  ;;  %v10072_v48 = vpop.f32.mrf.mxu0 }
 0x36c   : > { %v16643_v10 = vpop.f32.mrf.mxu1  ;;  %v13344_v25 = vpop.f32.mrf.mxu0 }
 0x36e   : > { %v16645_v32 = vpop.f32.mrf.mxu1  ;;  %v16647_v49 = vpop.f32.mrf.mxu0 }
 0x370   : > { %v16649_v5 = vpop.f32.mrf.mxu1  ;;  %v16651_v6 = vpop.f32.mrf.mxu0 }
 0x372   : > { %v16653_v21 = vpop.f32.mrf.mxu1  ;;  %v16655_v19 = vpop.f32.mrf.mxu0 }
 0x373   : > { %16949 = vst [vmem:[#allocation11_spill] sm:$0xff] %v16653_v21  ;;  %v9922_v21 = vadd.f32 %v13315_v55, %v9712_v28  ;;  %v10133_v55 = vadd.f32 %v10072_v48, %v9923_v43 }
 0x374   : > { %v16657_v36 = vpop.f32.mrf.mxu1  ;;  %v16659_v3 = vpop.f32.mrf.mxu0 }
 0x375   : > { %16950 = vst [vmem:[#allocation13_spill] sm:$0xff] %v16657_v36  ;;  %16951 = vst [vmem:[#allocation15_spill] sm:$0xff] %v16659_v3  ;;  %v9504_v36 = vadd.f32 %v13272_v24, %v16581_v34  ;;  %v9711_v3 = vadd.f32 %v9642_v33, %v9501_v15  ;;  %v10132_v39 = vadd.f32 %v13338_v51, %v9922_v21 }
 0x376   : > { %v16661_v12 = vpop.f32.mrf.mxu1  ;;  %v16663_v20 = vpop.f32.mrf.mxu0  ;;  %v9505_v34 = vadd.f32 %v16605_v58, %v16587_v38  ;;  %v9507_v58 = vadd.f32 %v16611_v54, %v16591_v16 }
 0x377   : > { %16952 = vst [vmem:[#allocation16_spill] sm:$0xff] %v16661_v12  ;;  %16953 = vst [vmem:[#allocation17_spill] sm:$0xff] %v16663_v20  ;;  %v9714_v9 = vadd.f32 %v13295_v62, %v9504_v36 }
 0x378   : > { %v16666_v52 = vpop.f32.mrf.mxu1  ;;  %v16668_v47 = vpop.f32.mrf.mxu0  ;;  %v9717_v51 = vadd.f32 %v16621_v7, %v9507_v58 }
 0x379   : > { %16954 = vst [vmem:[#allocation18_spill] sm:$0xff] %v16666_v52  ;;  %16955 = vst [vmem:[#allocation19_spill] sm:$0xff] %v16668_v47  ;;  %v9921_v52 = vadd.f32 %v9852_v29, %v9711_v3  ;;  %v9506_v47 = vadd.f32 %v13275_v53, %v16585_v41  ;;  %v9924_v40 = vadd.f32 %v13318_v46, %v9714_v9 }
 0x37a   : > { %v16671_v60 = vpop.f32.mrf.mxu1  ;;  %v16673_v2 = vpop.f32.mrf.mxu0  ;;  %v9508_v41 = vadd.f32 %v16607_v26, %v16589_v44  ;;  %v9715_v53 = vadd.f32 %v16613_v37, %v9505_v34  ;;  %v9510_v46 = vadd.f32 %v16615_v59, %v16593_v18  ;;  %v9927_v7 = vadd.f32 %v16645_v32, %v9717_v51  ;;  %v16962_v34 = vld [vmem:[#allocation4_spill] sm:$0xff] }
 0x37b   : > { %16956 = vst [vmem:[#allocation20_spill] sm:$0xff] %v16671_v60  ;;  %16957 = vst [vmem:[#allocation21_spill] sm:$0xff] %v16673_v2  ;;  %v10131_v60 = vadd.f32 %v10062_v8, %v9921_v52  ;;  %v9716_v15 = vadd.f32 %v16609_v31, %v9506_v47  ;;  %v10134_v11 = vadd.f32 %v13341_v23, %v9924_v40  ;;  %v16961_v40 = vld [vmem:[#allocation14_spill] sm:$0xff] }
 0x37c   : > { %v16676_v12 = vpop.f32.mrf.mxu0  ;;  %v13361_v20 = vpop.f32.mrf.mxu1  ;;  %v9925_v44 = vadd.f32 %v9872_v56, %v9715_v53  ;;  %v9509_v23 = vadd.f32 %v16619_v61, %v16595_v13  ;;  %v9720_v56 = vadd.f32 %v16625_v4, %v9510_v46  ;;  %v10137_v36 = vadd.f32 %v16655_v19, %v9927_v7 }
 0x37d   : > { %v10342_v2 = vadd.f32 %v13361_v20, %v10132_v39  ;;  %v9926_v39 = vadd.f32 %v13321_v63, %v9716_v15  ;;  %v9511_v3 = vadd.f32 %v16627_v45, %v16599_v50  ;;  %v16958_v20 = vld [vmem:[#allocation5_spill] sm:$0xff]  ;;  %v9514_v15 = vadd.f32 %v16962_v34, %v16961_v40 }
 0x37e   : > { %v16680_v17 = vpop.f32.mrf.mxu0  ;;  %v10272_v30 = vpop.f32.mrf.mxu1  ;;  %v10135_v54 = vadd.f32 %v16647_v49, %v9925_v44  ;;  %v9512_v49 = vadd.f32 %v16623_v0, %v16597_v27  ;;  %v9719_v21 = vadd.f32 %v16629_v35, %v9509_v23  ;;  %v9930_v4 = vadd.f32 %v16649_v5, %v9720_v56  ;;  %v16959_v35 = vld [vmem:[#allocation11_spill] sm:$0xff]  ;;  %v16964_v45 = vld [vmem:[#allocation13_spill] sm:$0xff] }
 0x37f   : > { %v10341_v62 = vadd.f32 %v10272_v30, %v10131_v60  ;;  %v10136_v26 = vadd.f32 %v13344_v25, %v9926_v39  ;;  %v16960_v30 = vld [vmem:[#allocation15_spill] sm:$0xff]  ;;  %v16967_v39 = vld [vmem:[#allocation6_spill] sm:$0xff] }
 0x380   : > { %v13364_v24 = vpop.f32.mrf.mxu1  ;;  %v13384_v33 = vpop.f32.mrf.mxu0  ;;  %v9722_v1 = vadd.f32 %v16958_v20, %v9512_v49  ;;  %v9929_v9 = vadd.f32 %v16959_v35, %v9719_v21  ;;  %v10140_v57 = vadd.f32 %v16960_v30, %v9930_v4 }
 0x381   : > { %v16685_v28 = vadd.f32 %v13384_v33, %v10342_v2  ;;  %v10344_v29 = vadd.f32 %v13364_v24, %v10134_v11  ;;  %v9718_v2 = vadd.f32 %v16617_v22, %v9508_v41  ;;  %v16963_v24 = vld [vmem:[#allocation7_spill] sm:$0xff] }
 0x382   : > { %v10282_v42 = vpop.f32.mrf.mxu1  ;;  %v10482_v52 = vpop.f32.mrf.mxu0  ;;  %v9721_v33 = vadd.f32 %v16963_v24, %v9511_v3  ;;  %v9932_v11 = vadd.f32 %v16964_v45, %v9722_v1  ;;  %v16973_v56 = vld [vmem:[#allocation21_spill] sm:$0xff]  ;;  %v16974_v49 = vld [vmem:[#allocation20_spill] sm:$0xff] }
 0x383   : > { %10566 = vst.msk [vmem:[#allocation2 + $0x8] sm:$0xff] %vm289_vm2, %v16685_v28  ;;  %v16692_v38 = vadd.f32 %v10482_v52, %v10341_v62  ;;  %v10343_v37 = vadd.f32 %v10282_v42, %v10133_v55  ;;  %v9928_v16 = vadd.f32 %v16643_v10, %v9718_v2  ;;  %v16965_v62 = vld [vmem:[#allocation17_spill] sm:$0xff]  ;;  %v16966_v52 = vld [vmem:[#allocation3_spill] sm:$0xff] }
 0x384   : > { %v13367_v31 = vpop.f32.mrf.mxu1  ;;  %v13387_v60 = vpop.f32.mrf.mxu0  ;;  %v10139_v41 = vadd.f32 %v16965_v62, %v9929_v9  ;;  %v9513_v55 = vadd.f32 %v16967_v39, %v16966_v52 }
 0x385   : > { %10565 = vst.msk [vmem:[#allocation2] sm:$0xff] %vm289_vm2, %v16692_v38  ;;  %v16699_v47 = vadd.f32 %v13387_v60, %v10344_v29  ;;  %v10346_v22 = vadd.f32 %v13367_v31, %v10136_v26  ;;  %v10138_v48 = vadd.f32 %v16651_v6, %v9928_v16  ;;  %v16968_v29 = vld [vmem:[#allocation8_spill] sm:$0xff]  ;;  %v16970_v26 = vld [vmem:[#allocation19_spill] sm:$0xff] }
 0x386   : > { %v10292_v14 = vpop.f32.mrf.mxu1  ;;  %v10492_v8 = vpop.f32.mrf.mxu0  ;;  %v9724_v58 = vadd.f32 %v16968_v29, %v9514_v15  ;;  %v16969_v60 = vld [vmem:[#allocation16_spill] sm:$0xff] }
 0x387   : > { %10568 = vst.msk [vmem:[#allocation2 + $0x18] sm:$0xff] %vm289_vm2, %v16699_v47  ;;  %v16708_v63 = vadd.f32 %v10492_v8, %v10343_v37  ;;  %v10345_v10 = vadd.f32 %v10292_v14, %v10135_v54  ;;  %v9931_v44 = vadd.f32 %v16969_v60, %v9721_v33  ;;  %v10142_v37 = vadd.f32 %v16970_v26, %v9932_v11  ;;  %v16971_v14 = vld [vmem:[#allocation9_spill] sm:$0xff] }
 0x388   : > { %v13370_v18 = vpop.f32.mrf.mxu1  ;;  %v13390_v59 = vpop.f32.mrf.mxu0  ;;  %v9723_v8 = vadd.f32 %v16971_v14, %v9513_v55 }
 0x389   : > { %10567 = vst.msk [vmem:[#allocation2 + $0x10] sm:$0xff] %vm289_vm2, %v16708_v63  ;;  %v16717_v25 = vadd.f32 %v13390_v59, %v10346_v22  ;;  %v10348_v32 = vadd.f32 %v13370_v18, %v10138_v48  ;;  %v16972_v22 = vld [vmem:[#allocation18_spill] sm:$0xff]  ;;  %v10141_v18 = vadd.f32 %v16973_v56, %v9931_v44 }
 0x38a   : > { %v10302_v13 = vpop.f32.mrf.mxu1  ;;  %v10502_v61 = vpop.f32.mrf.mxu0  ;;  %v9934_v23 = vadd.f32 %v16972_v22, %v9724_v58  ;;  %v9933_v21 = vadd.f32 %v16974_v49, %v9723_v8 }
 0x38b   : > { %10570 = vst.msk [vmem:[#allocation2 + $0x28] sm:$0xff] %vm289_vm2, %v16717_v25  ;;  %v16726_v6 = vadd.f32 %v10502_v61, %v10345_v10  ;;  %v10347_v5 = vadd.f32 %v10302_v13, %v10137_v36 }
 0x38c   : > { %v13373_v27 = vpop.f32.mrf.mxu1  ;;  %v13393_v0 = vpop.f32.mrf.mxu0  ;;  %v10144_v13 = vadd.f32 %v16676_v12, %v9934_v23  ;;  %v10143_v3 = vadd.f32 %v16680_v17, %v9933_v21 }
 0x38d   : > { %10569 = vst.msk [vmem:[#allocation2 + $0x20] sm:$0xff] %vm289_vm2, %v16726_v6  ;;  %v10558_v19 = vadd.f32 %v13393_v0, %v10348_v32  ;;  %v10350_v53 = vadd.f32 %v13373_v27, %v10140_v57 }
 0x38e   : > { %v10312_v43 = vpop.f32.mrf.mxu1  ;;  %v10512_v50 = vpop.f32.mrf.mxu0 }
 0x38f   : > { %10572 = vst.msk [vmem:[#allocation2 + $0x38] sm:$0xff] %vm289_vm2, %v10558_v19  ;;  %v10557_v42 = vadd.f32 %v10512_v50, %v10347_v5  ;;  %v10349_v46 = vadd.f32 %v10312_v43, %v10139_v41 }
 0x390   : > { %v13376_v2 = vpop.f32.mrf.mxu1  ;;  %v13396_v31 = vpop.f32.mrf.mxu0 }
 0x391   : > { %10571 = vst.msk [vmem:[#allocation2 + $0x30] sm:$0xff] %vm289_vm2, %v10557_v42  ;;  %v10560_v51 = vadd.f32 %v13396_v31, %v10350_v53  ;;  %v10352_v59 = vadd.f32 %v13376_v2, %v10142_v37 }
 0x392   : > { %v10322_v16 = vpop.f32.mrf.mxu1  ;;  %v10522_v54 = vpop.f32.mrf.mxu0 }
 0x393   : > { %10574 = vst.msk [vmem:[#allocation2 + $0x48] sm:$0xff] %vm289_vm2, %v10560_v51  ;;  %v10559_v7 = vadd.f32 %v10522_v54, %v10349_v46  ;;  %v10351_v61 = vadd.f32 %v10322_v16, %v10141_v18 }
 0x394   : > { %v13379_v48 = vpop.f32.mrf.mxu1  ;;  %v13399_v10 = vpop.f32.mrf.mxu0 }
 0x395   : > { %10573 = vst.msk [vmem:[#allocation2 + $0x40] sm:$0xff] %vm289_vm2, %v10559_v7  ;;  %v10562_v4 = vadd.f32 %v13399_v10, %v10352_v59  ;;  %v10354_v20 = vadd.f32 %v13379_v48, %v10144_v13 }
 0x396   : > { %v10332_v36 = vpop.f32.mrf.mxu1  ;;  %v10532_v32 = vpop.f32.mrf.mxu0 }
 0x397   : > { %10576 = vst.msk [vmem:[#allocation2 + $0x58] sm:$0xff] %vm289_vm2, %v10562_v4  ;;  %v10561_v1 = vadd.f32 %v10532_v32, %v10351_v61  ;;  %v10353_v0 = vadd.f32 %v10332_v36, %v10143_v3 }
 0x398   : > { %v13402_v27 = vpop.f32.mrf.mxu0 }
 0x399   : > { %10575 = vst.msk [vmem:[#allocation2 + $0x50] sm:$0xff] %vm289_vm2, %v10561_v1  ;;  %v10564_v35 = vadd.f32 %v13402_v27, %v10354_v20  ;;  %10582 = sbr.rel (%p11537_p11) target bundleno = 938 (0x3aa), region = 40 }
 0x39a   : > { %v10542_v9 = vpop.f32.mrf.mxu0 }
 0x39b   : > { %10578 = vst.msk [vmem:[#allocation2 + $0x68] sm:$0xff] %vm289_vm2, %v10564_v35  ;;  %v10563_v12 = vadd.f32 %v10542_v9, %v10353_v0 }
 0x39d   : > { %10577 = vst.msk [vmem:[#allocation2 + $0x60] sm:$0xff] %vm289_vm2, %v10563_v12 }
 0x39e   : > { %v11538_v17 = vld [vmem:[%s16820_s2] ss:$0 sm:$0xff] }
 0x39f   : > { %v10590_v30 = vadd.f32 %v11538_v17, %v16692_v38  ;;  %v10591_v57 = vadd.f32 %v11538_v17, %v16685_v28  ;;  %v10592_v5 = vadd.f32 %v11538_v17, %v16708_v63  ;;  %v10593_v40 = vadd.f32 %v11538_v17, %v16699_v47 }
 0x3a0   : > { %v10594_v34 = vadd.f32 %v11538_v17, %v16726_v6  ;;  %v10595_v15 = vadd.f32 %v11538_v17, %v16717_v25  ;;  %v10596_v24 = vadd.f32 %v11538_v17, %v10557_v42  ;;  %v10597_v33 = vadd.f32 %v11538_v17, %v10558_v19 }
 0x3a1   : > { %v10604_v43 = vmax.f32 %v10590_v30, 0.0  ;;  %v10605_v50 = vmax.f32 %v10591_v57, 0.0  ;;  %v10606_v38 = vmax.f32 %v10592_v5, 0.0  ;;  %v10607_v28 = vmax.f32 %v10593_v40, 0.0 }
 0x3a2   : > { %v10608_v45 = vmax.f32 %v10594_v34, 0.0  ;;  %v10609_v63 = vmax.f32 %v10595_v15, 0.0  ;;  %v10610_v11 = vmax.f32 %v10596_v24, 0.0  ;;  %v10611_v62 = vmax.f32 %v10597_v33, 0.0 }
 0x3a3   : > { %10618 = vst.msk [vmem:[%s13609_s24] sm:$0xff] %vm289_vm2, %v10604_v43  ;;  %10619 = vst.msk [vmem:[%s13609_s24 + $0x8] sm:$0xff] %vm289_vm2, %v10605_v50  ;;  %v10598_v47 = vadd.f32 %v11538_v17, %v10559_v7  ;;  %v10599_v25 = vadd.f32 %v11538_v17, %v10560_v51  ;;  %v10600_v6 = vadd.f32 %v11538_v17, %v10561_v1 }
 0x3a4   : > { %10620 = vst.msk [vmem:[%s13609_s24 + $0x10] sm:$0xff] %vm289_vm2, %v10606_v38  ;;  %10621 = vst.msk [vmem:[%s13609_s24 + $0x18] sm:$0xff] %vm289_vm2, %v10607_v28  ;;  %v10601_v19 = vadd.f32 %v11538_v17, %v10562_v4  ;;  %v10602_v41 = vadd.f32 %v11538_v17, %v10563_v12  ;;  %v10603_v53 = vadd.f32 %v11538_v17, %v10564_v35 }
 0x3a5   : > { %10622 = vst.msk [vmem:[%s13609_s24 + $0x20] sm:$0xff] %vm289_vm2, %v10608_v45  ;;  %10623 = vst.msk [vmem:[%s13609_s24 + $0x28] sm:$0xff] %vm289_vm2, %v10609_v63  ;;  %v10612_v42 = vmax.f32 %v10598_v47, 0.0  ;;  %v10613_v52 = vmax.f32 %v10599_v25, 0.0  ;;  %v10614_v39 = vmax.f32 %v10600_v6, 0.0 }
 0x3a6   : > { %10624 = vst.msk [vmem:[%s13609_s24 + $0x30] sm:$0xff] %vm289_vm2, %v10610_v11  ;;  %10625 = vst.msk [vmem:[%s13609_s24 + $0x38] sm:$0xff] %vm289_vm2, %v10611_v62  ;;  %v10615_v55 = vmax.f32 %v10601_v19, 0.0  ;;  %v10616_v29 = vmax.f32 %v10602_v41, 0.0  ;;  %v10617_v58 = vmax.f32 %v10603_v53, 0.0 }
 0x3a7   : > { %10626 = vst.msk [vmem:[%s13609_s24 + $0x40] sm:$0xff] %vm289_vm2, %v10612_v42  ;;  %10627 = vst.msk [vmem:[%s13609_s24 + $0x48] sm:$0xff] %vm289_vm2, %v10613_v52 }
 0x3a8   : > { %10628 = vst.msk [vmem:[%s13609_s24 + $0x50] sm:$0xff] %vm289_vm2, %v10614_v39  ;;  %10629 = vst.msk [vmem:[%s13609_s24 + $0x58] sm:$0xff] %vm289_vm2, %v10615_v55 }
 0x3a9   : > { %10630 = vst.msk [vmem:[%s13609_s24 + $0x60] sm:$0xff] %vm289_vm2, %v10616_v29  ;;  %10631 = vst.msk [vmem:[%s13609_s24 + $0x68] sm:$0xff] %vm289_vm2, %v10617_v58 }
 0x3aa PF: > { %s13_s18 = sadd.s32 1, %s13521_s18   ;;  %s16975_s12 = smov %s13509_s15 }
 0x3ab   : > { %p10_p12 = scmp.ge.s32.totalorder %s13_s18, 114   ;;  %s16976_s13 = smov %s13513_s16 }
 0x3ac   : > { %s16977_s14 = smov %s13517_s17  ;;  %s16978_s15 = smov %s16982_s19 }
 0x3ad   : > { %s16979_s16 = smov %s16986_s20  ;;  %s16980_s17 = smov %s16990_s21 }
 0x3ae   :  { %12 = sbr.rel (!%p10_p12) target bundleno = 4 (0x4), region = 121 }

// kernel: inception_block.8
= control target key start
LH: loop header
LB: loop body
LE: loop exit
PB: predicated region body
PF: predicated region fallthrough
CT: control target
= control target key end

     0   :  { %s912_s12 = smov 0   ;;  %s914_s13 = smov 0   ;;  %s1108_s0 = inlined_call_operand.vmem [shape: f32[2,10,102,4], index: 0, kind: input, shape index: {}]   ;;  %s1109_s1 = inlined_call_operand.vmem [shape: f32[4,4], index: 1, kind: input, shape index: {}]   ;;  %s1110_s2 = inlined_call_operand.vmem [shape: f32[1,4], index: 2, kind: input, shape index: {}]   ;;  %s1111_s3 = inlined_call_operand.vmem [shape: f32[2,8,80,4], index: 3, kind: output, shape index: {}]  }
   0x1   :  { %s916_s14 = smov 0   ;;  %s918_s15 = smov 0  }
   0x2   :  { %s920_s16 = smov 0   ;;  %s922_s17 = smov 0  }
   0x3   :  { %s924_s18 = smov 0  }
   0x4 LB: > { %s25_s19 = sadd.s32 1, %s877_s15  ;;  %s28_s20 = sadd.s32 1, %s881_s16  ;;  %s889_s18 = sphi %s924_s18, %s13_s18   ;;  %s885_s17 = sphi %s922_s17, %s1117_s17   ;;  %s881_s16 = sphi %s920_s16, %s1116_s16   ;;  %s877_s15 = sphi %s918_s15, %s1115_s15   ;;  %s873_s14 = sphi %s916_s14, %s1114_s14   ;;  %s869_s13 = sphi %s914_s13, %s1113_s13   ;;  %s865_s12 = sphi %s912_s12, %s1112_s12  }
   0x5   : > { %p26_p0 = scmp.ge.s32.totalorder %s25_s19, 3  ;;  %p725_p1 = scmp.ge.s32.totalorder %s889_s18, 1 }
   0x6   : > { %p168_p2 = scmp.lt.s32.totalorder %s889_s18, 49  ;;  %s32_s21 = sadd.s32 1, %s885_s17 }
   0x7   : > { %s1119_s19 = smov (%p26_p0, %s25_s19), 0  ;;  %s1121_s20 = smov (!%p26_p0, %s28_s20), %s881_s16 }
   0x8   : > { %p169_p3 = pnand %p725_p1, %p168_p2  ;;  %p30_p4 = scmp.ge.s32.totalorder %s1121_s20, 8 }
   0x9   : > { %s201_s22 = sadd.s32 (!%p169_p3), %s865_s12, %s869_s13  ;;  %p202_p6 = scmp.lt.s32.totalorder (!%p169_p3), %s873_s14, 1 }
   0xa   : > { %s1123_s20 = smov (%p30_p4, %s1121_s20), 0  ;;  %s1125_s21 = smov (!%p30_p4, %s32_s21), %s885_s17 }
   0xb   : > { %p34_p5 = scmp.ge.s32.totalorder %s1125_s21, 2  ;;  %172 = sbr.rel (%p169_p3) target bundleno = 283 (0x11b), region = 32 }
   0xc   : > { %p204_p7 = scmp.lt.s32.totalorder (!%p169_p3), %s201_s22, 9  ;;  %p214_p8 = scmp.lt.s32.totalorder (!%p169_p3), %s869_s13, 7 }
   0xd   : > { %s1127_s21 = smov (%p34_p5, %s1125_s21), 0  ;;  %p728_p9 = scmp.ne.s32.totalorder (!%p169_p3), %s865_s12, 0 }
  0x10   : > { %s1129_s14 = smov (!%p202_p6, %s873_s14), 1  ;;  %s1131_s22 = smov (!%p204_p7, %s201_s22), 9 }
  0x11   : > { %s775_s23 = smul.u32 130, %s1129_s14  ;;  %s1133_s13 = smov (!%p214_p8, %s869_s13), 7 }
  0x12   : > { %s774_s24 = smul.u32 13, %s1131_s22 }
  0x13   : > { %s777_s26 = smul.u32 80, %s1129_s14 }
  0x14   : > { %s208_s25 = sadd.s32 %s775_s23, %s774_s24  ;;  %s776_s28 = smul.u32 10, %s1133_s13 }
  0x15   : > { %s726_s27 = sshll.u32 %s208_s25, 3  ;;  %224 = sbr.rel (%p728_p9) target bundleno = 32 (0x20), region = 36 }
  0x16   : > { %s960_s4 = scalar_lea.vmem %s1108_s0, %s726_s27  ;;  %s218_s5 = sadd.s32 %s777_s26, %s776_s28 }
  0x17   : > { %s727_s6 = sshll.u32 %s218_s5, 3 }
  0x18   : > { %s965_s9 = scalar_lea.vmem %s1111_s3, %s727_s6 }
  0x1a   : > { %vm225_vm0 = vcmask 31744   ;;  %v891_v0 = vmov -inf  }
  0x1b   : > { %226 = vst.msk [vmem:[#allocation2] sm:$0xff] %vm225_vm0, %v891_v0  ;;  %227 = vst.msk [vmem:[#allocation2 + $0x8] sm:$0xff] %vm225_vm0, %v891_v0 }
  0x1c   : > { %228 = vst.msk [vmem:[#allocation2 + $0x10] sm:$0xff] %vm225_vm0, %v891_v0  ;;  %229 = vst.msk [vmem:[#allocation2 + $0x18] sm:$0xff] %vm225_vm0, %v891_v0 }
  0x1d   : > { %230 = vst.msk [vmem:[#allocation2 + $0x20] sm:$0xff] %vm225_vm0, %v891_v0  ;;  %231 = vst.msk [vmem:[#allocation2 + $0x28] sm:$0xff] %vm225_vm0, %v891_v0 }
  0x1e   : > { %232 = vst.msk [vmem:[#allocation2 + $0x30] sm:$0xff] %vm225_vm0, %v891_v0  ;;  %233 = vst.msk [vmem:[#allocation2 + $0x38] sm:$0xff] %vm225_vm0, %v891_v0 }
  0x1f   : > { %234 = vst.msk [vmem:[#allocation2 + $0x40] sm:$0xff] %vm225_vm0, %v891_v0  ;;  %235 = vst.msk [vmem:[#allocation2 + $0x48] sm:$0xff] %vm225_vm0, %v891_v0 }
  0x20 PF: > { %v236_v1 = vld [vmem:[%s960_s4] sm:$0xff]  ;;  %v257_v4 = vld [vmem:[%s960_s4 + $0xa] sm:$0xff]  ;;  %v278_v8 = vld [vmem:[%s960_s4 + $0x14] sm:$0xff]  ;;  %vm408_vm1 = vcmask 31744   ;;  %p729_p10 = scmp.ne.s32.totalorder %s865_s12, 2 }
  0x21   : > { %v246_v2 = vld [vmem:[%s960_s4 + $0x1] sm:$0xff]  ;;  %v267_v5 = vld [vmem:[%s960_s4 + $0xb] sm:$0xff]  ;;  %v288_v9 = vld [vmem:[%s960_s4 + $0x15] sm:$0xff] }
  0x22   : > { %v256_v3 = vld [vmem:[%s960_s4 + $0x2] sm:$0xff]  ;;  %v277_v6 = vld [vmem:[%s960_s4 + $0xc] sm:$0xff]  ;;  %v318_v7 = vmax.f32 %v236_v1, %v246_v2  ;;  %v348_v12 = vmax.f32 %v278_v8, %v288_v9  ;;  %v298_v20 = vld [vmem:[%s960_s4 + $0x16] sm:$0xff] }
  0x23   : > { %v328_v10 = vmax.f32 %v256_v3, %v257_v4  ;;  %v338_v11 = vmax.f32 %v267_v5, %v277_v6  ;;  %v237_v13 = vld [vmem:[%s960_s4 + $0x8] sm:$0xff]  ;;  %v258_v16 = vld [vmem:[%s960_s4 + $0x12] sm:$0xff]  ;;  %v279_v18 = vld [vmem:[%s960_s4 + $0x1c] sm:$0xff] }
  0x24   : > { %v247_v14 = vld [vmem:[%s960_s4 + $0x9] sm:$0xff]  ;;  %v268_v17 = vld [vmem:[%s960_s4 + $0x13] sm:$0xff]  ;;  %v289_v22 = vld [vmem:[%s960_s4 + $0x1d] sm:$0xff]  ;;  %v329_v23 = vmax.f32 %v257_v4, %v258_v16 }
  0x25   : > { %v358_v15 = vmax.f32 %v318_v7, %v328_v10  ;;  %v319_v19 = vmax.f32 %v237_v13, %v247_v14  ;;  %v368_v21 = vmax.f32 %v338_v11, %v348_v12  ;;  %v339_v24 = vmax.f32 %v268_v17, %v278_v8  ;;  %v238_v26 = vld [vmem:[%s960_s4 + $0x10] sm:$0xff]  ;;  %v259_v28 = vld [vmem:[%s960_s4 + $0x1a] sm:$0xff]  ;;  %v280_v32 = vld [vmem:[%s960_s4 + $0x24] sm:$0xff] }
  0x26   : > { %v349_v25 = vmax.f32 %v279_v18, %v289_v22  ;;  %v248_v27 = vld [vmem:[%s960_s4 + $0x11] sm:$0xff]  ;;  %v269_v31 = vld [vmem:[%s960_s4 + $0x1b] sm:$0xff]  ;;  %v290_v33 = vld [vmem:[%s960_s4 + $0x25] sm:$0xff]  ;;  %v330_v35 = vmax.f32 %v258_v16, %v259_v28 }
  0x27   : > { %v378_v29 = vmax.f32 %v358_v15, %v368_v21  ;;  %v359_v30 = vmax.f32 %v319_v19, %v329_v23  ;;  %v320_v34 = vmax.f32 %v238_v26, %v248_v27  ;;  %v308_v36 = vld [vmem:[#allocation2] sm:$0xff]  ;;  %v340_v39 = vmax.f32 %v269_v31, %v279_v18  ;;  %v239_v41 = vld [vmem:[%s960_s4 + $0x18] sm:$0xff]  ;;  %v309_v47 = vld [vmem:[#allocation2 + $0x8] sm:$0xff] }
  0x28   : > { %v299_v37 = vld [vmem:[%s960_s4 + $0x1e] sm:$0xff]  ;;  %v369_v38 = vmax.f32 %v339_v24, %v349_v25  ;;  %v350_v40 = vmax.f32 %v280_v32, %v290_v33  ;;  %v281_v50 = vld [vmem:[%s960_s4 + $0x2c] sm:$0xff]  ;;  %v282_v1 = vld [vmem:[%s960_s4 + $0x34] sm:$0xff] }
  0x29   : > { %v388_v42 = vmax.f32 %v378_v29, %v298_v20  ;;  %v360_v43 = vmax.f32 %v320_v34, %v330_v35  ;;  %v249_v44 = vld [vmem:[%s960_s4 + $0x19] sm:$0xff]  ;;  %v260_v45 = vld [vmem:[%s960_s4 + $0x22] sm:$0xff]  ;;  %v291_v51 = vld [vmem:[%s960_s4 + $0x2d] sm:$0xff] }
  0x2a   : > { %v270_v46 = vld [vmem:[%s960_s4 + $0x23] sm:$0xff]  ;;  %v379_v48 = vmax.f32 %v359_v30, %v369_v38  ;;  %v370_v49 = vmax.f32 %v340_v39, %v350_v40  ;;  %v321_v52 = vmax.f32 %v239_v41, %v249_v44  ;;  %v331_v53 = vmax.f32 %v259_v28, %v260_v45  ;;  %v271_v0 = vld [vmem:[%s960_s4 + $0x2b] sm:$0xff]  ;;  %v292_v6 = vld [vmem:[%s960_s4 + $0x35] sm:$0xff] }
  0x2b   : > { %v398_v54 = vmax.f32 %v308_v36, %v388_v42  ;;  %v300_v55 = vld [vmem:[%s960_s4 + $0x26] sm:$0xff]  ;;  %v341_v56 = vmax.f32 %v270_v46, %v280_v32  ;;  %v351_v57 = vmax.f32 %v281_v50, %v291_v51  ;;  %v310_v3 = vld [vmem:[#allocation2 + $0x10] sm:$0xff]  ;;  %v342_v8 = vmax.f32 %v271_v0, %v281_v50  ;;  %v283_v18 = vld [vmem:[%s960_s4 + $0x3c] sm:$0xff] }
  0x2c   : > { %v240_v58 = vld [vmem:[%s960_s4 + $0x20] sm:$0xff]  ;;  %v389_v60 = vmax.f32 %v379_v48, %v299_v37  ;;  %v380_v61 = vmax.f32 %v360_v43, %v370_v49  ;;  %v361_v62 = vmax.f32 %v321_v52, %v331_v53  ;;  %v261_v63 = vld [vmem:[%s960_s4 + $0x2a] sm:$0xff]  ;;  %v352_v11 = vmax.f32 %v282_v1, %v292_v6  ;;  %v262_v14 = vld [vmem:[%s960_s4 + $0x32] sm:$0xff] }
  0x2d   : > { %v250_v59 = vld [vmem:[%s960_s4 + $0x21] sm:$0xff]  ;;  %409 = vst.msk [vmem:[#allocation2] sm:$0xff] %vm408_vm1, %v398_v54  ;;  %v301_v4 = vld [vmem:[%s960_s4 + $0x2e] sm:$0xff]  ;;  %v371_v5 = vmax.f32 %v341_v56, %v351_v57  ;;  %v332_v7 = vmax.f32 %v260_v45, %v261_v63  ;;  %v333_v21 = vmax.f32 %v261_v63, %v262_v14  ;;  %v311_v23 = vld [vmem:[#allocation2 + $0x18] sm:$0xff] }
  0x2e   : > { %v322_v2 = vmax.f32 %v240_v58, %v250_v59  ;;  %v399_v9 = vmax.f32 %v309_v47, %v389_v60  ;;  %v390_v10 = vmax.f32 %v380_v61, %v300_v55  ;;  %v241_v12 = vld [vmem:[%s960_s4 + $0x28] sm:$0xff]  ;;  %v272_v17 = vld [vmem:[%s960_s4 + $0x33] sm:$0xff]  ;;  %v293_v19 = vld [vmem:[%s960_s4 + $0x3d] sm:$0xff]  ;;  %v372_v25 = vmax.f32 %v342_v8, %v352_v11 }
  0x2f   : > { %v251_v13 = vld [vmem:[%s960_s4 + $0x29] sm:$0xff]  ;;  %v381_v15 = vmax.f32 %v361_v62, %v371_v5  ;;  %v302_v24 = vld [vmem:[%s960_s4 + $0x36] sm:$0xff]  ;;  %v343_v26 = vmax.f32 %v272_v17, %v282_v1  ;;  %v353_v27 = vmax.f32 %v283_v18, %v293_v19  ;;  %v312_v34 = vld [vmem:[#allocation2 + $0x20] sm:$0xff] }
  0x30   : > { %v362_v16 = vmax.f32 %v322_v2, %v332_v7  ;;  %v323_v20 = vmax.f32 %v241_v12, %v251_v13  ;;  %410 = vst.msk [vmem:[#allocation2 + $0x8] sm:$0xff] %vm408_vm1, %v399_v9  ;;  %v400_v22 = vmax.f32 %v310_v3, %v390_v10  ;;  %v242_v28 = vld [vmem:[%s960_s4 + $0x30] sm:$0xff]  ;;  %v263_v32 = vld [vmem:[%s960_s4 + $0x3a] sm:$0xff]  ;;  %v284_v37 = vld [vmem:[%s960_s4 + $0x44] sm:$0xff] }
  0x31   : > { %v391_v29 = vmax.f32 %v381_v15, %v301_v4  ;;  %v252_v31 = vld [vmem:[%s960_s4 + $0x31] sm:$0xff]  ;;  %v273_v33 = vld [vmem:[%s960_s4 + $0x3b] sm:$0xff]  ;;  %v373_v36 = vmax.f32 %v343_v26, %v353_v27  ;;  %v294_v38 = vld [vmem:[%s960_s4 + $0x45] sm:$0xff]  ;;  %v334_v40 = vmax.f32 %v262_v14, %v263_v32 }
  0x32   : > { %v363_v30 = vmax.f32 %v323_v20, %v333_v21  ;;  %411 = vst.msk [vmem:[#allocation2 + $0x10] sm:$0xff] %vm408_vm1, %v400_v22  ;;  %v382_v35 = vmax.f32 %v362_v16, %v372_v25  ;;  %v324_v39 = vmax.f32 %v242_v28, %v252_v31  ;;  %v303_v42 = vld [vmem:[%s960_s4 + $0x3e] sm:$0xff]  ;;  %v344_v43 = vmax.f32 %v273_v33, %v283_v18  ;;  %v285_v52 = vld [vmem:[%s960_s4 + $0x4c] sm:$0xff]  ;;  %v286_v5 = vld [vmem:[%s960_s4 + $0x54] sm:$0xff] }
  0x33   : > { %v401_v41 = vmax.f32 %v311_v23, %v391_v29  ;;  %v354_v44 = vmax.f32 %v284_v37, %v294_v38  ;;  %v243_v45 = vld [vmem:[%s960_s4 + $0x38] sm:$0xff]  ;;  %v264_v50 = vld [vmem:[%s960_s4 + $0x42] sm:$0xff]  ;;  %v295_v57 = vld [vmem:[%s960_s4 + $0x4d] sm:$0xff] }
  0x34   : > { %v253_v46 = vld [vmem:[%s960_s4 + $0x39] sm:$0xff]  ;;  %v392_v47 = vmax.f32 %v382_v35, %v302_v24  ;;  %v383_v48 = vmax.f32 %v363_v30, %v373_v36  ;;  %v364_v49 = vmax.f32 %v324_v39, %v334_v40  ;;  %v274_v51 = vld [vmem:[%s960_s4 + $0x43] sm:$0xff]  ;;  %v335_v58 = vmax.f32 %v263_v32, %v264_v50  ;;  %v275_v4 = vld [vmem:[%s960_s4 + $0x4b] sm:$0xff] }
  0x35   : > { %v325_v53 = vmax.f32 %v243_v45, %v253_v46  ;;  %412 = vst.msk [vmem:[#allocation2 + $0x18] sm:$0xff] %vm408_vm1, %v401_v41  ;;  %v313_v54 = vld [vmem:[#allocation2 + $0x28] sm:$0xff]  ;;  %v374_v56 = vmax.f32 %v344_v43, %v354_v44  ;;  %v345_v59 = vmax.f32 %v274_v51, %v284_v37  ;;  %v355_v62 = vmax.f32 %v285_v52, %v295_v57  ;;  %v244_v63 = vld [vmem:[%s960_s4 + $0x40] sm:$0xff]  ;;  %v296_v6 = vld [vmem:[%s960_s4 + $0x55] sm:$0xff] }
  0x36   : > { %v304_v55 = vld [vmem:[%s960_s4 + $0x46] sm:$0xff]  ;;  %v402_v60 = vmax.f32 %v312_v34, %v392_v47  ;;  %v393_v61 = vmax.f32 %v383_v48, %v303_v42  ;;  %v314_v10 = vld [vmem:[#allocation2 + $0x30] sm:$0xff]  ;;  %v346_v13 = vmax.f32 %v275_v4, %v285_v52  ;;  %v356_v14 = vmax.f32 %v286_v5, %v296_v6  ;;  %v287_v23 = vld [vmem:[%s960_s4 + $0x5c] sm:$0xff] }
  0x37   : > { %v254_v0 = vld [vmem:[%s960_s4 + $0x41] sm:$0xff]  ;;  %v265_v1 = vld [vmem:[%s960_s4 + $0x4a] sm:$0xff]  ;;  %v384_v2 = vmax.f32 %v364_v49, %v374_v56  ;;  %v365_v3 = vmax.f32 %v325_v53, %v335_v58  ;;  %v375_v12 = vmax.f32 %v345_v59, %v355_v62  ;;  %v266_v19 = vld [vmem:[%s960_s4 + $0x52] sm:$0xff] }
  0x38   : > { %v326_v7 = vmax.f32 %v244_v63, %v254_v0  ;;  %v336_v8 = vmax.f32 %v264_v50, %v265_v1  ;;  %413 = vst.msk [vmem:[#allocation2 + $0x20] sm:$0xff] %vm408_vm1, %v402_v60  ;;  %v403_v9 = vmax.f32 %v313_v54, %v393_v61  ;;  %v305_v11 = vld [vmem:[%s960_s4 + $0x4e] sm:$0xff]  ;;  %v376_v22 = vmax.f32 %v346_v13, %v356_v14  ;;  %v297_v24 = vld [vmem:[%s960_s4 + $0x5d] sm:$0xff] }
  0x39   : > { %v245_v15 = vld [vmem:[%s960_s4 + $0x48] sm:$0xff]  ;;  %v394_v16 = vmax.f32 %v384_v2, %v304_v55  ;;  %v276_v20 = vld [vmem:[%s960_s4 + $0x53] sm:$0xff]  ;;  %v385_v21 = vmax.f32 %v365_v3, %v375_v12  ;;  %v337_v26 = vmax.f32 %v265_v1, %v266_v19  ;;  %v357_v31 = vmax.f32 %v287_v23, %v297_v24  ;;  %v316_v35 = vld [vmem:[#allocation2 + $0x40] sm:$0xff] }
  0x3a   : > { %v366_v17 = vmax.f32 %v326_v7, %v336_v8  ;;  %v255_v18 = vld [vmem:[%s960_s4 + $0x49] sm:$0xff]  ;;  %414 = vst.msk [vmem:[#allocation2 + $0x28] sm:$0xff] %vm408_vm1, %v403_v9  ;;  %v315_v28 = vld [vmem:[#allocation2 + $0x38] sm:$0xff]  ;;  %v347_v30 = vmax.f32 %v276_v20, %v286_v5 }
  0x3b   : > { %v327_v25 = vmax.f32 %v245_v15, %v255_v18  ;;  %v404_v27 = vmax.f32 %v314_v10, %v394_v16  ;;  %v306_v29 = vld [vmem:[%s960_s4 + $0x56] sm:$0xff]  ;;  %v395_v32 = vmax.f32 %v385_v21, %v305_v11  ;;  %v307_v39 = vld [vmem:[%s960_s4 + $0x5e] sm:$0xff]  ;;  %v317_v42 = vld [vmem:[#allocation2 + $0x48] sm:$0xff] }
  0x3c   : > { %v386_v33 = vmax.f32 %v366_v17, %v376_v22  ;;  %v377_v36 = vmax.f32 %v347_v30, %v357_v31 }
  0x3d   : > { %v367_v34 = vmax.f32 %v327_v25, %v337_v26  ;;  %415 = vst.msk [vmem:[#allocation2 + $0x30] sm:$0xff] %vm408_vm1, %v404_v27  ;;  %v405_v37 = vmax.f32 %v315_v28, %v395_v32 }
  0x3e   : > { %v396_v38 = vmax.f32 %v386_v33, %v306_v29 }
  0x3f   : > { %v387_v40 = vmax.f32 %v367_v34, %v377_v36  ;;  %416 = vst.msk [vmem:[#allocation2 + $0x38] sm:$0xff] %vm408_vm1, %v405_v37 }
  0x40   : > { %v406_v41 = vmax.f32 %v316_v35, %v396_v38 }
  0x41   : > { %v397_v43 = vmax.f32 %v387_v40, %v307_v39  ;;  %422 = sbr.rel (%p729_p10) target bundleno = 283 (0x11b), region = 40 }
  0x42   : > { %417 = vst.msk [vmem:[#allocation2 + $0x40] sm:$0xff] %vm408_vm1, %v406_v41 }
  0x43   : > { %v407_v44 = vmax.f32 %v317_v42, %v397_v43 }
  0x45   : > { %418 = vst.msk [vmem:[#allocation2 + $0x48] sm:$0xff] %vm408_vm1, %v407_v44 }
  0x46   : > { %v443_v45 = vld [vmem:[%s1109_s1] sm:$0xf]  ;;  %vm481_vm2 = vcmask 1043456   ;;  %v424_v47 = vld [vmem:[#allocation2 + $0x8] sm:$0xff]  ;;  %v429_v50 = vld [vmem:[#allocation2 + $0x30] sm:$0xff] }
  0x47   : > { %v423_v46 = vld [vmem:[#allocation2] sm:$0xff]  ;;  %755 = vmatprep.subr.msk.mxu0 %vm481_vm2, %v443_v45  ;;  %772 = vmatprep.subr.msk.mxu1 %vm481_vm2, %v443_v45  ;;  %v434_v49 = vmax.f32 %v424_v47, -3e+38  ;;  %v430_v51 = vld [vmem:[#allocation2 + $0x38] sm:$0xff]  ;;  %v439_v52 = vmax.f32 %v429_v50, -3e+38 }
  0x48   : > { %v433_v48 = vmax.f32 %v423_v46, -3e+38  ;;  %756 = vmatpush3.msk.msra.mxu0 %vm481_vm2, %v443_v45  ;;  %773 = vmatpush3.msk.msra.mxu1 %vm481_vm2, %v443_v45  ;;  %v440_v53 = vmax.f32 %v430_v51, -3e+38  ;;  %v425_v54 = vld [vmem:[#allocation2 + $0x10] sm:$0xff]  ;;  %v426_v55 = vld [vmem:[#allocation2 + $0x18] sm:$0xff] }
  0x49   : > { %v435_v56 = vmax.f32 %v425_v54, -3e+38  ;;  %v431_v57 = vld [vmem:[#allocation2 + $0x40] sm:$0xff]  ;;  %766 = vmatprep.mubr.msk.f32.mxu1 %vm408_vm1, %v439_v52  ;;  %v436_v59 = vmax.f32 %v426_v55, -3e+38  ;;  %v428_v0 = vld [vmem:[#allocation2 + $0x28] sm:$0xff] }
  0x4a   : > { %757 = vmatprep.mubr.msk.f32.mxu0 %vm408_vm1, %v433_v48  ;;  %v441_v60 = vmax.f32 %v431_v57, -3e+38  ;;  %v427_v61 = vld [vmem:[#allocation2 + $0x20] sm:$0xff]  ;;  %767 = vmatmul.mubr.msk.f32.vlgmr.msra.gmra.mxu1 %vm408_vm1, %v440_v53  ;;  %v438_v1 = vmax.f32 %v428_v0, -3e+38 }
  0x4b   : > { %758 = vmatmul.mubr.msk.f32.vlgmr.msra.gmra.mxu0 %vm408_vm1, %v434_v49  ;;  %v437_v63 = vmax.f32 %v427_v61, -3e+38  ;;  %v730_v2 = vld [vmem:[%s1110_s2] ss:$0 sm:$0xff] }
  0x4c   : > { %v432_v58 = vld [vmem:[#allocation2 + $0x48] sm:$0xff]  ;;  %760 = vmatprep.mubr.msk.f32.mxu0 %vm408_vm1, %v435_v56  ;;  %769 = vmatprep.mubr.msk.f32.mxu1 %vm408_vm1, %v441_v60 }
  0x4d   : > { %v442_v62 = vmax.f32 %v432_v58, -3e+38 }
  0x4f   : > { %761 = vmatmul.mubr.msk.f32.gmra.mxu0 %vm408_vm1, %v436_v59  ;;  %770 = vmatmul.mubr.msk.f32.gmra.mxu1 %vm408_vm1, %v442_v62 }
  0x50   : > { %763 = vmatprep.mubr.msk.f32.mxu0 %vm408_vm1, %v437_v63 }
  0x53   : > { %764 = vmatmul.mubr.msk.f32.gmra.mxu0 %vm408_vm1, %v438_v1 }
 0x10a   : > { %v768_v5 = vpop.f32.mrf.mxu1 }
 0x10b   : > { %v759_v3 = vpop.f32.mrf.mxu0  ;;  %v587_v7 = vadd.f32 %v768_v5, %v730_v2 }
 0x10c   : > { %v557_v4 = vadd.f32 %v759_v3, %v730_v2  ;;  %v581_v10 = vpop.f32.mrf.mxu1 }
 0x10d   : > { %v551_v6 = vpop.f32.mrf.mxu0  ;;  %v607_v11 = vmax.f32 %v587_v7, 0.0  ;;  %v582_v13 = vadd.f32 %v730_v2, %v581_v10 }
 0x10e   : > { %v601_v8 = vmax.f32 %v557_v4, 0.0  ;;  %v552_v9 = vadd.f32 %v730_v2, %v551_v6 }
 0x10f   : > { %v762_v12 = vpop.f32.mrf.mxu0  ;;  %v771_v16 = vpop.f32.mrf.mxu1  ;;  %617 = vst.msk [vmem:[%s965_s9 + $0x38] sm:$0xff] %vm408_vm1, %v607_v11  ;;  %v606_v17 = vmax.f32 %v582_v13, 0.0 }
 0x110   : > { %611 = vst.msk [vmem:[%s965_s9 + $0x8] sm:$0xff] %vm408_vm1, %v601_v8  ;;  %v600_v14 = vmax.f32 %v552_v9, 0.0  ;;  %v567_v15 = vadd.f32 %v762_v12, %v730_v2  ;;  %v597_v19 = vadd.f32 %v771_v16, %v730_v2 }
 0x111   : > { %v561_v18 = vpop.f32.mrf.mxu0  ;;  %v591_v22 = vpop.f32.mrf.mxu1  ;;  %616 = vst.msk [vmem:[%s965_s9 + $0x30] sm:$0xff] %vm408_vm1, %v606_v17 }
 0x112   : > { %610 = vst.msk [vmem:[%s965_s9] sm:$0xff] %vm408_vm1, %v600_v14  ;;  %v603_v20 = vmax.f32 %v567_v15, 0.0  ;;  %v562_v21 = vadd.f32 %v730_v2, %v561_v18  ;;  %v609_v23 = vmax.f32 %v597_v19, 0.0  ;;  %v592_v25 = vadd.f32 %v730_v2, %v591_v22 }
 0x113   : > { %v765_v24 = vpop.f32.mrf.mxu0 }
 0x114   : > { %613 = vst.msk [vmem:[%s965_s9 + $0x18] sm:$0xff] %vm408_vm1, %v603_v20  ;;  %v602_v26 = vmax.f32 %v562_v21, 0.0  ;;  %v577_v27 = vadd.f32 %v765_v24, %v730_v2  ;;  %619 = vst.msk [vmem:[%s965_s9 + $0x48] sm:$0xff] %vm408_vm1, %v609_v23  ;;  %v608_v28 = vmax.f32 %v592_v25, 0.0 }
 0x115   : > { %v571_v29 = vpop.f32.mrf.mxu0 }
 0x116   : > { %612 = vst.msk [vmem:[%s965_s9 + $0x10] sm:$0xff] %vm408_vm1, %v602_v26  ;;  %v605_v30 = vmax.f32 %v577_v27, 0.0  ;;  %v572_v31 = vadd.f32 %v730_v2, %v571_v29  ;;  %618 = vst.msk [vmem:[%s965_s9 + $0x40] sm:$0xff] %vm408_vm1, %v608_v28 }
 0x118   : > { %615 = vst.msk [vmem:[%s965_s9 + $0x28] sm:$0xff] %vm408_vm1, %v605_v30  ;;  %v604_v32 = vmax.f32 %v572_v31, 0.0 }
 0x11a   : > { %614 = vst.msk [vmem:[%s965_s9 + $0x20] sm:$0xff] %vm408_vm1, %v604_v32 }
 0x11b PF: > { %s13_s18 = sadd.s32 1, %s889_s18   ;;  %s1112_s12 = smov %s877_s15 }
 0x11c   : > { %p10_p11 = scmp.ge.s32.totalorder %s13_s18, 50   ;;  %s1113_s13 = smov %s881_s16 }
 0x11d   : > { %s1114_s14 = smov %s885_s17  ;;  %s1115_s15 = smov %s1119_s19 }
 0x11e   : > { %s1116_s16 = smov %s1123_s20  ;;  %s1117_s17 = smov %s1127_s21 }
 0x11f   :  { %12 = sbr.rel (!%p10_p11) target bundleno = 4 (0x4), region = 70 }

</bundles_post_ra>
